<compile_context>
chip_gen: v6e
topology: v6e:2x2x1
jax: 0.10.0
libtpu: 0.0.40
codegen_flags: <defaults>
</compile_context>

<pallas_src>
import jax
import jax.numpy as jnp
from jax.experimental import pallas as pl
from jax.experimental.pallas import tpu as pltpu

# Module constants (from the PyTorch spec)
N_EMBD = 384
N_HEAD = 6
HEAD_SIZE = N_EMBD // N_HEAD   # 64
BLOCK_SIZE = 256               # max sequence length (causal mask size)
LN_EPS = 1e-5


def _layernorm(h, g, b):
    mu = jnp.mean(h, axis=-1, keepdims=True)
    var = jnp.mean((h - mu) ** 2, axis=-1, keepdims=True)
    return (h - mu) * jax.lax.rsqrt(var + LN_EPS) * g + b


def block_kernel(x_ref,
                 ln1g_ref, ln1b_ref,
                 wqkv_ref,                     # (N_HEAD, C, 3*HEAD_SIZE) bf16
                 wp_ref, bp_ref,               # (N_HEAD, HEAD_SIZE, C) bf16, (1, C) f32
                 ln2g_ref, ln2b_ref,
                 w1_ref, b1_ref, w2_ref, b2_ref,
                 o_ref):
    BB, T, C = x_ref.shape
    M = BB * T
    x = x_ref[...].reshape(M, C)                                   # (M, C) f32

    # ---- LN1 + multi-head causal self-attention -------------------------
    xn = _layernorm(x, ln1g_ref[...], ln1b_ref[...])
    xn_b = xn.astype(jnp.bfloat16)

    # Causal mask, built once and reused by every head.
    row = jax.lax.broadcasted_iota(jnp.int32, (T, T), 0)
    col = jax.lax.broadcasted_iota(jnp.int32, (T, T), 1)
    causal = (row >= col)[None]                                    # (1, T, T)

    sa = jnp.zeros((M, C), jnp.float32)
    for h in range(N_HEAD):                                        # static unroll
        # Fused QKV matmul for this head (scale already folded into Wq).
        qkv = jnp.dot(xn_b, wqkv_ref[h],
                      preferred_element_type=jnp.float32)           # (M, 192)
        qkv_b = qkv.astype(jnp.bfloat16)
        q3 = qkv_b[:, 0 * HEAD_SIZE:1 * HEAD_SIZE].reshape(BB, T, HEAD_SIZE)
        k3 = qkv_b[:, 1 * HEAD_SIZE:2 * HEAD_SIZE].reshape(BB, T, HEAD_SIZE)
        v3 = qkv_b[:, 2 * HEAD_SIZE:3 * HEAD_SIZE].reshape(BB, T, HEAD_SIZE)

        s = jnp.einsum("bqd,bkd->bqk", q3, k3,
                       preferred_element_type=jnp.float32)          # (BB, T, T)
        s = jnp.where(causal, s, -jnp.inf)
        s = s - jnp.max(s, axis=-1, keepdims=True)
        p = jnp.exp(s)
        p = p * pl.reciprocal(jnp.sum(p, axis=-1, keepdims=True), approx=True)

        pv = jnp.einsum("bqk,bkd->bqd", p.astype(jnp.bfloat16), v3,
                        preferred_element_type=jnp.float32)          # (BB, T, 64)

        # Accumulate through the matching Wproj row-slab (no lane concat).
        sa = sa + jnp.dot(pv.reshape(M, HEAD_SIZE).astype(jnp.bfloat16),
                          wp_ref[h], preferred_element_type=jnp.float32)

    x1 = x + sa + bp_ref[...]

    # ---- LN2 + feed-forward ---------------------------------------------
    xn2 = _layernorm(x1, ln2g_ref[...], ln2b_ref[...]).astype(jnp.bfloat16)
    hdn = jnp.dot(xn2, w1_ref[...], preferred_element_type=jnp.float32) + b1_ref[...]
    hdn = jnp.maximum(hdn, 0.0).astype(jnp.bfloat16)
    ff = jnp.dot(hdn, w2_ref[...], preferred_element_type=jnp.float32) + b2_ref[...]

    o_ref[...] = (x1 + ff).reshape(BB, T, C)


def _pick_batch_block(batch, seq):
    """Largest divisor of `batch` keeping BB*T <= ~256 rows per grid step."""
    best = 1
    for bb in range(1, batch + 1):
        if batch % bb == 0 and bb * seq <= max(256, seq):
            best = bb
    return best


def block_forward(x, params):
    """x: (B, T, C) float32; params: dict of f32 weights (see init_params)."""
    B, T, C = x.shape
    assert C == N_EMBD and T <= BLOCK_SIZE

    BB = _pick_batch_block(B, T)
    nb = B // BB

    bf16 = jnp.bfloat16
    scale = HEAD_SIZE ** -0.5  # exact power of two -> safe to fold pre-cast
    # Per-head weight slabs on a leading axis (cheap in-kernel slicing);
    # fuse Q (pre-scaled), K, V along the output dim -> (N_HEAD, C, 192).
    wq3 = (params["wq"] * scale).reshape(C, N_HEAD, HEAD_SIZE).transpose(1, 0, 2)
    wk3 = params["wk"].reshape(C, N_HEAD, HEAD_SIZE).transpose(1, 0, 2)
    wv3 = params["wv"].reshape(C, N_HEAD, HEAD_SIZE).transpose(1, 0, 2)
    wqkv = jnp.concatenate([wq3, wk3, wv3], axis=-1).astype(bf16)   # (H, C, 192)
    wp3 = params["w_proj"].reshape(N_HEAD, HEAD_SIZE, C).astype(bf16)
    w1 = params["w1"].astype(bf16)
    w2 = params["w2"].astype(bf16)

    def full_spec(shape):
        zeros = (0,) * len(shape)
        return pl.BlockSpec(shape, lambda b, z=zeros: z)

    in_specs = [
        pl.BlockSpec((BB, T, C), lambda b: (b, 0, 0)),              # x
        full_spec((1, C)), full_spec((1, C)),                        # ln1 g, b
        full_spec((N_HEAD, C, 3 * HEAD_SIZE)),                       # fused Wqkv
        full_spec((N_HEAD, HEAD_SIZE, C)), full_spec((1, C)),        # Wproj, bproj
        full_spec((1, C)), full_spec((1, C)),                        # ln2 g, b
        full_spec((C, 4 * C)), full_spec((1, 4 * C)),                # W1, b1
        full_spec((4 * C, C)), full_spec((1, C)),                    # W2, b2
    ]
    out_spec = pl.BlockSpec((BB, T, C), lambda b: (b, 0, 0))

    return pl.pallas_call(
        block_kernel,
        out_shape=jax.ShapeDtypeStruct((B, T, C), jnp.float32),
        grid=(nb,),
        in_specs=in_specs,
        out_specs=out_spec,
        compiler_params=pltpu.CompilerParams(
            dimension_semantics=("parallel",),
            vmem_limit_bytes=48 * 1024 * 1024,   # safe on v7x (64 MiB physical)
        ),
    )(
        x,
        params["ln1_g"], params["ln1_b"],
        wqkv,
        wp3, params["b_proj"],
        params["ln2_g"], params["ln2_b"],
        w1, params["b1"], w2, params["b2"],
    )


def init_params(key):
    C = N_EMBD
    ks = jax.random.split(key, 8)
    scale = 0.02
    return {
        # LayerNorm affine params (PyTorch default: gamma=1, beta=0)
        "ln1_g": jnp.ones((1, C), jnp.float32),
        "ln1_b": jnp.zeros((1, C), jnp.float32),
        "ln2_g": jnp.ones((1, C), jnp.float32),
        "ln2_b": jnp.zeros((1, C), jnp.float32),
        # per-head key/query/value Linears (bias=False), concatenated over heads
        "wq": scale * jax.random.normal(ks[0], (C, C), jnp.float32),
        "wk": scale * jax.random.normal(ks[1], (C, C), jnp.float32),
        "wv": scale * jax.random.normal(ks[2], (C, C), jnp.float32),
        # output projection Linear(C, C)
        "w_proj": scale * jax.random.normal(ks[3], (C, C), jnp.float32),
        "b_proj": scale * jax.random.normal(ks[4], (1, C), jnp.float32),
        # FeedForward: Linear(C, 4C) -> ReLU -> Linear(4C, C)
        "w1": scale * jax.random.normal(ks[5], (C, 4 * C), jnp.float32),
        "b1": jnp.zeros((1, 4 * C), jnp.float32),
        "w2": scale * jax.random.normal(ks[6], (4 * C, C), jnp.float32),
        "b2": jnp.zeros((1, C), jnp.float32),
    }


def reference_forward(x, p):
    """Pure-JAX reference of the same math (dropout = identity), using the same
    bf16-input / f32-accumulation matmul rounding as the kernel."""
    bf = lambda a: a.astype(jnp.bfloat16)

    def ln(h, g, b):
        mu = jnp.mean(h, axis=-1, keepdims=True)
        var = jnp.mean((h - mu) ** 2, axis=-1, keepdims=True)
        return (h - mu) * jax.lax.rsqrt(var + LN_EPS) * g + b

    def mm(a, w):
        return jnp.dot(bf(a), bf(w), preferred_element_type=jnp.float32)

    B, T, C = x.shape
    xn = ln(x, p["ln1_g"], p["ln1_b"])
    q = mm(xn, p["wq"] * (HEAD_SIZE ** -0.5))
    k = mm(xn, p["wk"])
    v = mm(xn, p["wv"])
    qh = q.reshape(B, T, N_HEAD, HEAD_SIZE)
    kh = k.reshape(B, T, N_HEAD, HEAD_SIZE)
    vh = v.reshape(B, T, N_HEAD, HEAD_SIZE)
    s = jnp.einsum("bthd,bshd->bhts", bf(qh), bf(kh),
                   preferred_element_type=jnp.float32)
    mask = jnp.tril(jnp.ones((T, T), bool))
    s = jnp.where(mask[None, None], s, -jnp.inf)
    w = jax.nn.softmax(s, axis=-1)
    att = jnp.einsum("bhts,bshd->bthd", bf(w), bf(vh),
                     preferred_element_type=jnp.float32).reshape(B, T, C)
    x1 = x + mm(att, p["w_proj"]) + p["b_proj"]
    xn2 = ln(x1, p["ln2_g"], p["ln2_b"])
    h1 = jnp.maximum(mm(xn2, p["w1"]) + p["b1"], 0.0)
    ff = mm(h1, p["w2"]) + p["b2"]
    return x1 + ff


if __name__ == "__main__":
    key = jax.random.PRNGKey(0)
    k_x, k_p = jax.random.split(key)

    B, T, C = 2, 16, N_EMBD          # small batch/seq, module-defined n_embd
    x = jax.random.normal(k_x, (B, T, C), jnp.float32)
    params = init_params(k_p)

    out = block_forward(x, params)
    out = jax.block_until_ready(out)

    ref = reference_forward(x, params)
    assert out.shape == (B, T, C)
    assert jnp.allclose(out, ref, atol=2e-2, rtol=2e-2), (
        float(jnp.max(jnp.abs(out - ref))))

    print("KERNEL_OK")
</pallas_src>

<mosaic_0001>
module attributes {stable_mosaic.version = 11 : i64} {
  func.func @block_kernel(%arg0: i32, %arg1: memref<2x16x384xf32, #tpu.memory_space<vmem>>, %arg2: memref<1x384xf32, #tpu.memory_space<vmem>>, %arg3: memref<1x384xf32, #tpu.memory_space<vmem>>, %arg4: memref<6x384x192xbf16, #tpu.memory_space<vmem>>, %arg5: memref<6x64x384xbf16, #tpu.memory_space<vmem>>, %arg6: memref<1x384xf32, #tpu.memory_space<vmem>>, %arg7: memref<1x384xf32, #tpu.memory_space<vmem>>, %arg8: memref<1x384xf32, #tpu.memory_space<vmem>>, %arg9: memref<384x1536xbf16, #tpu.memory_space<vmem>>, %arg10: memref<1x1536xf32, #tpu.memory_space<vmem>>, %arg11: memref<1536x384xbf16, #tpu.memory_space<vmem>>, %arg12: memref<1x384xf32, #tpu.memory_space<vmem>>, %arg13: memref<2x16x384xf32, #tpu.memory_space<vmem>>) attributes {dimension_semantics = [#tpu.dimension_semantics<parallel>], iteration_bounds = array<i64: 1>, scalar_prefetch = 0 : i64, scratch_operands = 0 : i64, tpu.core_type = #tpu.core_type<tc>, window_params = [{transform_indices = @transform_0, window_bounds = array<i64: 2, 16, 384>}, {pipeline_mode = #tpu.pipeline_mode<synchronous>, transform_indices = @transform_1, window_bounds = array<i64: 1, 384>}, {pipeline_mode = #tpu.pipeline_mode<synchronous>, transform_indices = @transform_2, window_bounds = array<i64: 1, 384>}, {pipeline_mode = #tpu.pipeline_mode<synchronous>, transform_indices = @transform_3, window_bounds = array<i64: 6, 384, 192>}, {pipeline_mode = #tpu.pipeline_mode<synchronous>, transform_indices = @transform_4, window_bounds = array<i64: 6, 64, 384>}, {pipeline_mode = #tpu.pipeline_mode<synchronous>, transform_indices = @transform_5, window_bounds = array<i64: 1, 384>}, {pipeline_mode = #tpu.pipeline_mode<synchronous>, transform_indices = @transform_6, window_bounds = array<i64: 1, 384>}, {pipeline_mode = #tpu.pipeline_mode<synchronous>, transform_indices = @transform_7, window_bounds = array<i64: 1, 384>}, {pipeline_mode = #tpu.pipeline_mode<synchronous>, transform_indices = @transform_8, window_bounds = array<i64: 384, 1536>}, {pipeline_mode = #tpu.pipeline_mode<synchronous>, transform_indices = @transform_9, window_bounds = array<i64: 1, 1536>}, {pipeline_mode = #tpu.pipeline_mode<synchronous>, transform_indices = @transform_10, window_bounds = array<i64: 1536, 384>}, {pipeline_mode = #tpu.pipeline_mode<synchronous>, transform_indices = @transform_11, window_bounds = array<i64: 1, 384>}, {transform_indices = @transform_12, window_bounds = array<i64: 2, 16, 384>}]} {
    %c0 = arith.constant 0 : index
    %c0_0 = arith.constant 0 : index
    %c0_1 = arith.constant 0 : index
    %0 = vector.load %arg1[%c0, %c0_0, %c0_1] : memref<2x16x384xf32, #tpu.memory_space<vmem>>, vector<2x16x384xf32>
    %1 = vector.shape_cast %0 : vector<2x16x384xf32> to vector<32x384xf32>
    %c0_2 = arith.constant 0 : index
    %c0_3 = arith.constant 0 : index
    %2 = vector.load %arg2[%c0_2, %c0_3] : memref<1x384xf32, #tpu.memory_space<vmem>>, vector<1x384xf32>
    %c0_4 = arith.constant 0 : index
    %c0_5 = arith.constant 0 : index
    %3 = vector.load %arg3[%c0_4, %c0_5] : memref<1x384xf32, #tpu.memory_space<vmem>>, vector<1x384xf32>
    %cst = arith.constant dense<0.000000e+00> : vector<32xf32>
    %4 = vector.multi_reduction <add>, %1, %cst [1] : vector<32x384xf32> to vector<32xf32>
    %5 = vector.shape_cast %4 : vector<32xf32> to vector<32x1xf32>
    %cst_6 = arith.constant 3.840000e+02 : f32
    %6 = vector.broadcast %cst_6 : f32 to vector<32x1xf32>
    %7 = arith.divf %5, %6 : vector<32x1xf32>
    %8 = vector.broadcast %7 : vector<32x1xf32> to vector<32x384xf32>
    %9 = arith.subf %1, %8 : vector<32x384xf32>
    %10 = arith.mulf %9, %9 : vector<32x384xf32>
    %cst_7 = arith.constant dense<0.000000e+00> : vector<32xf32>
    %11 = vector.multi_reduction <add>, %10, %cst_7 [1] : vector<32x384xf32> to vector<32xf32>
    %12 = vector.shape_cast %11 : vector<32xf32> to vector<32x1xf32>
    %cst_8 = arith.constant 3.840000e+02 : f32
    %13 = vector.broadcast %cst_8 : f32 to vector<32x1xf32>
    %14 = arith.divf %12, %13 : vector<32x1xf32>
    %15 = vector.broadcast %7 : vector<32x1xf32> to vector<32x384xf32>
    %16 = arith.subf %1, %15 : vector<32x384xf32>
    %cst_9 = arith.constant 9.99999974E-6 : f32
    %17 = vector.broadcast %cst_9 : f32 to vector<32x1xf32>
    %18 = arith.addf %14, %17 : vector<32x1xf32>
    %19 = math.rsqrt %18 : vector<32x1xf32>
    %20 = vector.broadcast %19 : vector<32x1xf32> to vector<32x384xf32>
    %21 = arith.mulf %16, %20 : vector<32x384xf32>
    %22 = vector.broadcast %2 : vector<1x384xf32> to vector<32x384xf32>
    %23 = arith.mulf %21, %22 : vector<32x384xf32>
    %24 = vector.broadcast %3 : vector<1x384xf32> to vector<32x384xf32>
    %25 = arith.addf %23, %24 : vector<32x384xf32>
    %26 = arith.truncf %25 : vector<32x384xf32> to vector<32x384xbf16>
    %27 = tpu.iota {dimensions = array<i32: 0>} : vector<16x16xi32>
    %28 = tpu.iota {dimensions = array<i32: 1>} : vector<16x16xi32>
    %29 = arith.cmpi sge, %27, %28 : vector<16x16xi32>
    %30 = vector.shape_cast %29 : vector<16x16xi1> to vector<1x16x16xi1>
    %cst_10 = arith.constant 0.000000e+00 : f32
    %31 = vector.broadcast %cst_10 : f32 to vector<32x384xf32>
    %c0_11 = arith.constant 0 : index
    %c0_12 = arith.constant 0 : index
    %c0_13 = arith.constant 0 : index
    %32 = vector.load %arg4[%c0_11, %c0_12, %c0_13] : memref<6x384x192xbf16, #tpu.memory_space<vmem>>, vector<1x384x192xbf16>
    %33 = vector.shape_cast %32 : vector<1x384x192xbf16> to vector<384x192xbf16>
    %cst_14 = arith.constant dense<0.000000e+00> : vector<32x192xf32>
    %34 = tpu.matmul %26, %33, %cst_14 {dimension_numbers = #tpu.dot_dimension_numbers<[1], [0], [0], [1], [0, 0, 1, 1], [], []>} : vector<32x384xbf16>, vector<384x192xbf16>, vector<32x192xf32> -> vector<32x192xf32>
    %35 = arith.truncf %34 : vector<32x192xf32> to vector<32x192xbf16>
    %36 = vector.extract_strided_slice %35 {offsets = [0, 0], sizes = [32, 64], strides = [1, 1]} : vector<32x192xbf16> to vector<32x64xbf16>
    %37 = vector.shape_cast %36 : vector<32x64xbf16> to vector<2x16x64xbf16>
    %38 = vector.extract_strided_slice %35 {offsets = [0, 64], sizes = [32, 64], strides = [1, 1]} : vector<32x192xbf16> to vector<32x64xbf16>
    %39 = vector.shape_cast %38 : vector<32x64xbf16> to vector<2x16x64xbf16>
    %40 = vector.extract_strided_slice %35 {offsets = [0, 128], sizes = [32, 64], strides = [1, 1]} : vector<32x192xbf16> to vector<32x64xbf16>
    %41 = vector.shape_cast %40 : vector<32x64xbf16> to vector<2x16x64xbf16>
    "tpu.trace_start"() <{level = 10 : i32, message = "bqd,bkd->bqk"}> : () -> ()
    %cst_15 = arith.constant dense<0.000000e+00> : vector<2x16x16xf32>
    %42 = tpu.matmul %37, %39, %cst_15 {dimension_numbers = #tpu.dot_dimension_numbers<[2], [2], [1], [1], [0, 0, 0, 1, 1, 1], [0], [0]>} : vector<2x16x64xbf16>, vector<2x16x64xbf16>, vector<2x16x16xf32> -> vector<2x16x16xf32>
    %cst_16 = arith.constant 0xFF800000 : f32
    "tpu.trace_stop"() : () -> ()
    %43 = vector.shape_cast %30 : vector<1x16x16xi1> to vector<1x16x16xi1>
    %44 = vector.broadcast %43 : vector<1x16x16xi1> to vector<2x16x16xi1>
    %45 = vector.broadcast %cst_16 : f32 to vector<2x16x16xf32>
    %46 = arith.select %44, %42, %45 : vector<2x16x16xi1>, vector<2x16x16xf32>
    %cst_17 = arith.constant dense<0xFF800000> : vector<2x16xf32>
    %47 = vector.multi_reduction <maximumf>, %46, %cst_17 [2] : vector<2x16x16xf32> to vector<2x16xf32>
    %48 = vector.shape_cast %47 : vector<2x16xf32> to vector<2x16x1xf32>
    %49 = vector.broadcast %48 : vector<2x16x1xf32> to vector<2x16x16xf32>
    %50 = arith.subf %46, %49 : vector<2x16x16xf32>
    %51 = math.exp %50 : vector<2x16x16xf32>
    %cst_18 = arith.constant dense<0.000000e+00> : vector<2x16xf32>
    %52 = vector.multi_reduction <add>, %51, %cst_18 [2] : vector<2x16x16xf32> to vector<2x16xf32>
    %53 = vector.shape_cast %52 : vector<2x16xf32> to vector<2x16x1xf32>
    %54 = tpu.reciprocal %53 {approx = true} : vector<2x16x1xf32> -> vector<2x16x1xf32>
    %55 = vector.broadcast %54 : vector<2x16x1xf32> to vector<2x16x16xf32>
    %56 = arith.mulf %51, %55 : vector<2x16x16xf32>
    %57 = arith.truncf %56 : vector<2x16x16xf32> to vector<2x16x16xbf16>
    "tpu.trace_start"() <{level = 10 : i32, message = "bqk,bkd->bqd"}> : () -> ()
    %cst_19 = arith.constant dense<0.000000e+00> : vector<2x16x64xf32>
    %58 = tpu.matmul %57, %41, %cst_19 {dimension_numbers = #tpu.dot_dimension_numbers<[2], [1], [1], [2], [0, 0, 0, 1, 1, 2], [0], [0]>} : vector<2x16x16xbf16>, vector<2x16x64xbf16>, vector<2x16x64xf32> -> vector<2x16x64xf32>
    "tpu.trace_stop"() : () -> ()
    %59 = vector.shape_cast %58 : vector<2x16x64xf32> to vector<32x64xf32>
    %60 = arith.truncf %59 : vector<32x64xf32> to vector<32x64xbf16>
    %c0_20 = arith.constant 0 : index
    %c0_21 = arith.constant 0 : index
    %c0_22 = arith.constant 0 : index
    %61 = vector.load %arg5[%c0_20, %c0_21, %c0_22] : memref<6x64x384xbf16, #tpu.memory_space<vmem>>, vector<1x64x384xbf16>
    %62 = vector.shape_cast %61 : vector<1x64x384xbf16> to vector<64x384xbf16>
    %cst_23 = arith.constant dense<0.000000e+00> : vector<32x384xf32>
    %63 = tpu.matmul %60, %62, %cst_23 {dimension_numbers = #tpu.dot_dimension_numbers<[1], [0], [0], [1], [0, 0, 1, 1], [], []>} : vector<32x64xbf16>, vector<64x384xbf16>, vector<32x384xf32> -> vector<32x384xf32>
    %64 = arith.addf %31, %63 : vector<32x384xf32>
    %c1 = arith.constant 1 : index
    %c0_24 = arith.constant 0 : index
    %c0_25 = arith.constant 0 : index
    %65 = vector.load %arg4[%c1, %c0_24, %c0_25] : memref<6x384x192xbf16, #tpu.memory_space<vmem>>, vector<1x384x192xbf16>
    %66 = vector.shape_cast %65 : vector<1x384x192xbf16> to vector<384x192xbf16>
    %cst_26 = arith.constant dense<0.000000e+00> : vector<32x192xf32>
    %67 = tpu.matmul %26, %66, %cst_26 {dimension_numbers = #tpu.dot_dimension_numbers<[1], [0], [0], [1], [0, 0, 1, 1], [], []>} : vector<32x384xbf16>, vector<384x192xbf16>, vector<32x192xf32> -> vector<32x192xf32>
    %68 = arith.truncf %67 : vector<32x192xf32> to vector<32x192xbf16>
    %69 = vector.extract_strided_slice %68 {offsets = [0, 0], sizes = [32, 64], strides = [1, 1]} : vector<32x192xbf16> to vector<32x64xbf16>
    %70 = vector.shape_cast %69 : vector<32x64xbf16> to vector<2x16x64xbf16>
    %71 = vector.extract_strided_slice %68 {offsets = [0, 64], sizes = [32, 64], strides = [1, 1]} : vector<32x192xbf16> to vector<32x64xbf16>
    %72 = vector.shape_cast %71 : vector<32x64xbf16> to vector<2x16x64xbf16>
    %73 = vector.extract_strided_slice %68 {offsets = [0, 128], sizes = [32, 64], strides = [1, 1]} : vector<32x192xbf16> to vector<32x64xbf16>
    %74 = vector.shape_cast %73 : vector<32x64xbf16> to vector<2x16x64xbf16>
    "tpu.trace_start"() <{level = 10 : i32, message = "bqd,bkd->bqk"}> : () -> ()
    %cst_27 = arith.constant dense<0.000000e+00> : vector<2x16x16xf32>
    %75 = tpu.matmul %70, %72, %cst_27 {dimension_numbers = #tpu.dot_dimension_numbers<[2], [2], [1], [1], [0, 0, 0, 1, 1, 1], [0], [0]>} : vector<2x16x64xbf16>, vector<2x16x64xbf16>, vector<2x16x16xf32> -> vector<2x16x16xf32>
    %cst_28 = arith.constant 0xFF800000 : f32
    "tpu.trace_stop"() : () -> ()
    %76 = vector.shape_cast %30 : vector<1x16x16xi1> to vector<1x16x16xi1>
    %77 = vector.broadcast %76 : vector<1x16x16xi1> to vector<2x16x16xi1>
    %78 = vector.broadcast %cst_28 : f32 to vector<2x16x16xf32>
    %79 = arith.select %77, %75, %78 : vector<2x16x16xi1>, vector<2x16x16xf32>
    %cst_29 = arith.constant dense<0xFF800000> : vector<2x16xf32>
    %80 = vector.multi_reduction <maximumf>, %79, %cst_29 [2] : vector<2x16x16xf32> to vector<2x16xf32>
    %81 = vector.shape_cast %80 : vector<2x16xf32> to vector<2x16x1xf32>
    %82 = vector.broadcast %81 : vector<2x16x1xf32> to vector<2x16x16xf32>
    %83 = arith.subf %79, %82 : vector<2x16x16xf32>
    %84 = math.exp %83 : vector<2x16x16xf32>
    %cst_30 = arith.constant dense<0.000000e+00> : vector<2x16xf32>
    %85 = vector.multi_reduction <add>, %84, %cst_30 [2] : vector<2x16x16xf32> to vector<2x16xf32>
    %86 = vector.shape_cast %85 : vector<2x16xf32> to vector<2x16x1xf32>
    %87 = tpu.reciprocal %86 {approx = true} : vector<2x16x1xf32> -> vector<2x16x1xf32>
    %88 = vector.broadcast %87 : vector<2x16x1xf32> to vector<2x16x16xf32>
    %89 = arith.mulf %84, %88 : vector<2x16x16xf32>
    %90 = arith.truncf %89 : vector<2x16x16xf32> to vector<2x16x16xbf16>
    "tpu.trace_start"() <{level = 10 : i32, message = "bqk,bkd->bqd"}> : () -> ()
    %cst_31 = arith.constant dense<0.000000e+00> : vector<2x16x64xf32>
    %91 = tpu.matmul %90, %74, %cst_31 {dimension_numbers = #tpu.dot_dimension_numbers<[2], [1], [1], [2], [0, 0, 0, 1, 1, 2], [0], [0]>} : vector<2x16x16xbf16>, vector<2x16x64xbf16>, vector<2x16x64xf32> -> vector<2x16x64xf32>
    "tpu.trace_stop"() : () -> ()
    %92 = vector.shape_cast %91 : vector<2x16x64xf32> to vector<32x64xf32>
    %93 = arith.truncf %92 : vector<32x64xf32> to vector<32x64xbf16>
    %c1_32 = arith.constant 1 : index
    %c0_33 = arith.constant 0 : index
    %c0_34 = arith.constant 0 : index
    %94 = vector.load %arg5[%c1_32, %c0_33, %c0_34] : memref<6x64x384xbf16, #tpu.memory_space<vmem>>, vector<1x64x384xbf16>
    %95 = vector.shape_cast %94 : vector<1x64x384xbf16> to vector<64x384xbf16>
    %cst_35 = arith.constant dense<0.000000e+00> : vector<32x384xf32>
    %96 = tpu.matmul %93, %95, %cst_35 {dimension_numbers = #tpu.dot_dimension_numbers<[1], [0], [0], [1], [0, 0, 1, 1], [], []>} : vector<32x64xbf16>, vector<64x384xbf16>, vector<32x384xf32> -> vector<32x384xf32>
    %97 = arith.addf %64, %96 : vector<32x384xf32>
    %c2 = arith.constant 2 : index
    %c0_36 = arith.constant 0 : index
    %c0_37 = arith.constant 0 : index
    %98 = vector.load %arg4[%c2, %c0_36, %c0_37] : memref<6x384x192xbf16, #tpu.memory_space<vmem>>, vector<1x384x192xbf16>
    %99 = vector.shape_cast %98 : vector<1x384x192xbf16> to vector<384x192xbf16>
    %cst_38 = arith.constant dense<0.000000e+00> : vector<32x192xf32>
    %100 = tpu.matmul %26, %99, %cst_38 {dimension_numbers = #tpu.dot_dimension_numbers<[1], [0], [0], [1], [0, 0, 1, 1], [], []>} : vector<32x384xbf16>, vector<384x192xbf16>, vector<32x192xf32> -> vector<32x192xf32>
    %101 = arith.truncf %100 : vector<32x192xf32> to vector<32x192xbf16>
    %102 = vector.extract_strided_slice %101 {offsets = [0, 0], sizes = [32, 64], strides = [1, 1]} : vector<32x192xbf16> to vector<32x64xbf16>
    %103 = vector.shape_cast %102 : vector<32x64xbf16> to vector<2x16x64xbf16>
    %104 = vector.extract_strided_slice %101 {offsets = [0, 64], sizes = [32, 64], strides = [1, 1]} : vector<32x192xbf16> to vector<32x64xbf16>
    %105 = vector.shape_cast %104 : vector<32x64xbf16> to vector<2x16x64xbf16>
    %106 = vector.extract_strided_slice %101 {offsets = [0, 128], sizes = [32, 64], strides = [1, 1]} : vector<32x192xbf16> to vector<32x64xbf16>
    %107 = vector.shape_cast %106 : vector<32x64xbf16> to vector<2x16x64xbf16>
    "tpu.trace_start"() <{level = 10 : i32, message = "bqd,bkd->bqk"}> : () -> ()
    %cst_39 = arith.constant dense<0.000000e+00> : vector<2x16x16xf32>
    %108 = tpu.matmul %103, %105, %cst_39 {dimension_numbers = #tpu.dot_dimension_numbers<[2], [2], [1], [1], [0, 0, 0, 1, 1, 1], [0], [0]>} : vector<2x16x64xbf16>, vector<2x16x64xbf16>, vector<2x16x16xf32> -> vector<2x16x16xf32>
    %cst_40 = arith.constant 0xFF800000 : f32
    "tpu.trace_stop"() : () -> ()
    %109 = vector.shape_cast %30 : vector<1x16x16xi1> to vector<1x16x16xi1>
    %110 = vector.broadcast %109 : vector<1x16x16xi1> to vector<2x16x16xi1>
    %111 = vector.broadcast %cst_40 : f32 to vector<2x16x16xf32>
    %112 = arith.select %110, %108, %111 : vector<2x16x16xi1>, vector<2x16x16xf32>
    %cst_41 = arith.constant dense<0xFF800000> : vector<2x16xf32>
    %113 = vector.multi_reduction <maximumf>, %112, %cst_41 [2] : vector<2x16x16xf32> to vector<2x16xf32>
    %114 = vector.shape_cast %113 : vector<2x16xf32> to vector<2x16x1xf32>
    %115 = vector.broadcast %114 : vector<2x16x1xf32> to vector<2x16x16xf32>
    %116 = arith.subf %112, %115 : vector<2x16x16xf32>
    %117 = math.exp %116 : vector<2x16x16xf32>
    %cst_42 = arith.constant dense<0.000000e+00> : vector<2x16xf32>
    %118 = vector.multi_reduction <add>, %117, %cst_42 [2] : vector<2x16x16xf32> to vector<2x16xf32>
    %119 = vector.shape_cast %118 : vector<2x16xf32> to vector<2x16x1xf32>
    %120 = tpu.reciprocal %119 {approx = true} : vector<2x16x1xf32> -> vector<2x16x1xf32>
    %121 = vector.broadcast %120 : vector<2x16x1xf32> to vector<2x16x16xf32>
    %122 = arith.mulf %117, %121 : vector<2x16x16xf32>
    %123 = arith.truncf %122 : vector<2x16x16xf32> to vector<2x16x16xbf16>
    "tpu.trace_start"() <{level = 10 : i32, message = "bqk,bkd->bqd"}> : () -> ()
    %cst_43 = arith.constant dense<0.000000e+00> : vector<2x16x64xf32>
    %124 = tpu.matmul %123, %107, %cst_43 {dimension_numbers = #tpu.dot_dimension_numbers<[2], [1], [1], [2], [0, 0, 0, 1, 1, 2], [0], [0]>} : vector<2x16x16xbf16>, vector<2x16x64xbf16>, vector<2x16x64xf32> -> vector<2x16x64xf32>
    "tpu.trace_stop"() : () -> ()
    %125 = vector.shape_cast %124 : vector<2x16x64xf32> to vector<32x64xf32>
    %126 = arith.truncf %125 : vector<32x64xf32> to vector<32x64xbf16>
    %c2_44 = arith.constant 2 : index
    %c0_45 = arith.constant 0 : index
    %c0_46 = arith.constant 0 : index
    %127 = vector.load %arg5[%c2_44, %c0_45, %c0_46] : memref<6x64x384xbf16, #tpu.memory_space<vmem>>, vector<1x64x384xbf16>
    %128 = vector.shape_cast %127 : vector<1x64x384xbf16> to vector<64x384xbf16>
    %cst_47 = arith.constant dense<0.000000e+00> : vector<32x384xf32>
    %129 = tpu.matmul %126, %128, %cst_47 {dimension_numbers = #tpu.dot_dimension_numbers<[1], [0], [0], [1], [0, 0, 1, 1], [], []>} : vector<32x64xbf16>, vector<64x384xbf16>, vector<32x384xf32> -> vector<32x384xf32>
    %130 = arith.addf %97, %129 : vector<32x384xf32>
    %c3 = arith.constant 3 : index
    %c0_48 = arith.constant 0 : index
    %c0_49 = arith.constant 0 : index
    %131 = vector.load %arg4[%c3, %c0_48, %c0_49] : memref<6x384x192xbf16, #tpu.memory_space<vmem>>, vector<1x384x192xbf16>
    %132 = vector.shape_cast %131 : vector<1x384x192xbf16> to vector<384x192xbf16>
    %cst_50 = arith.constant dense<0.000000e+00> : vector<32x192xf32>
    %133 = tpu.matmul %26, %132, %cst_50 {dimension_numbers = #tpu.dot_dimension_numbers<[1], [0], [0], [1], [0, 0, 1, 1], [], []>} : vector<32x384xbf16>, vector<384x192xbf16>, vector<32x192xf32> -> vector<32x192xf32>
    %134 = arith.truncf %133 : vector<32x192xf32> to vector<32x192xbf16>
    %135 = vector.extract_strided_slice %134 {offsets = [0, 0], sizes = [32, 64], strides = [1, 1]} : vector<32x192xbf16> to vector<32x64xbf16>
    %136 = vector.shape_cast %135 : vector<32x64xbf16> to vector<2x16x64xbf16>
    %137 = vector.extract_strided_slice %134 {offsets = [0, 64], sizes = [32, 64], strides = [1, 1]} : vector<32x192xbf16> to vector<32x64xbf16>
    %138 = vector.shape_cast %137 : vector<32x64xbf16> to vector<2x16x64xbf16>
    %139 = vector.extract_strided_slice %134 {offsets = [0, 128], sizes = [32, 64], strides = [1, 1]} : vector<32x192xbf16> to vector<32x64xbf16>
    %140 = vector.shape_cast %139 : vector<32x64xbf16> to vector<2x16x64xbf16>
    "tpu.trace_start"() <{level = 10 : i32, message = "bqd,bkd->bqk"}> : () -> ()
    %cst_51 = arith.constant dense<0.000000e+00> : vector<2x16x16xf32>
    %141 = tpu.matmul %136, %138, %cst_51 {dimension_numbers = #tpu.dot_dimension_numbers<[2], [2], [1], [1], [0, 0, 0, 1, 1, 1], [0], [0]>} : vector<2x16x64xbf16>, vector<2x16x64xbf16>, vector<2x16x16xf32> -> vector<2x16x16xf32>
    %cst_52 = arith.constant 0xFF800000 : f32
    "tpu.trace_stop"() : () -> ()
    %142 = vector.shape_cast %30 : vector<1x16x16xi1> to vector<1x16x16xi1>
    %143 = vector.broadcast %142 : vector<1x16x16xi1> to vector<2x16x16xi1>
    %144 = vector.broadcast %cst_52 : f32 to vector<2x16x16xf32>
    %145 = arith.select %143, %141, %144 : vector<2x16x16xi1>, vector<2x16x16xf32>
    %cst_53 = arith.constant dense<0xFF800000> : vector<2x16xf32>
    %146 = vector.multi_reduction <maximumf>, %145, %cst_53 [2] : vector<2x16x16xf32> to vector<2x16xf32>
    %147 = vector.shape_cast %146 : vector<2x16xf32> to vector<2x16x1xf32>
    %148 = vector.broadcast %147 : vector<2x16x1xf32> to vector<2x16x16xf32>
    %149 = arith.subf %145, %148 : vector<2x16x16xf32>
    %150 = math.exp %149 : vector<2x16x16xf32>
    %cst_54 = arith.constant dense<0.000000e+00> : vector<2x16xf32>
    %151 = vector.multi_reduction <add>, %150, %cst_54 [2] : vector<2x16x16xf32> to vector<2x16xf32>
    %152 = vector.shape_cast %151 : vector<2x16xf32> to vector<2x16x1xf32>
    %153 = tpu.reciprocal %152 {approx = true} : vector<2x16x1xf32> -> vector<2x16x1xf32>
    %154 = vector.broadcast %153 : vector<2x16x1xf32> to vector<2x16x16xf32>
    %155 = arith.mulf %150, %154 : vector<2x16x16xf32>
    %156 = arith.truncf %155 : vector<2x16x16xf32> to vector<2x16x16xbf16>
    "tpu.trace_start"() <{level = 10 : i32, message = "bqk,bkd->bqd"}> : () -> ()
    %cst_55 = arith.constant dense<0.000000e+00> : vector<2x16x64xf32>
    %157 = tpu.matmul %156, %140, %cst_55 {dimension_numbers = #tpu.dot_dimension_numbers<[2], [1], [1], [2], [0, 0, 0, 1, 1, 2], [0], [0]>} : vector<2x16x16xbf16>, vector<2x16x64xbf16>, vector<2x16x64xf32> -> vector<2x16x64xf32>
    "tpu.trace_stop"() : () -> ()
    %158 = vector.shape_cast %157 : vector<2x16x64xf32> to vector<32x64xf32>
    %159 = arith.truncf %158 : vector<32x64xf32> to vector<32x64xbf16>
    %c3_56 = arith.constant 3 : index
    %c0_57 = arith.constant 0 : index
    %c0_58 = arith.constant 0 : index
    %160 = vector.load %arg5[%c3_56, %c0_57, %c0_58] : memref<6x64x384xbf16, #tpu.memory_space<vmem>>, vector<1x64x384xbf16>
    %161 = vector.shape_cast %160 : vector<1x64x384xbf16> to vector<64x384xbf16>
    %cst_59 = arith.constant dense<0.000000e+00> : vector<32x384xf32>
    %162 = tpu.matmul %159, %161, %cst_59 {dimension_numbers = #tpu.dot_dimension_numbers<[1], [0], [0], [1], [0, 0, 1, 1], [], []>} : vector<32x64xbf16>, vector<64x384xbf16>, vector<32x384xf32> -> vector<32x384xf32>
    %163 = arith.addf %130, %162 : vector<32x384xf32>
    %c4 = arith.constant 4 : index
    %c0_60 = arith.constant 0 : index
    %c0_61 = arith.constant 0 : index
    %164 = vector.load %arg4[%c4, %c0_60, %c0_61] : memref<6x384x192xbf16, #tpu.memory_space<vmem>>, vector<1x384x192xbf16>
    %165 = vector.shape_cast %164 : vector<1x384x192xbf16> to vector<384x192xbf16>
    %cst_62 = arith.constant dense<0.000000e+00> : vector<32x192xf32>
    %166 = tpu.matmul %26, %165, %cst_62 {dimension_numbers = #tpu.dot_dimension_numbers<[1], [0], [0], [1], [0, 0, 1, 1], [], []>} : vector<32x384xbf16>, vector<384x192xbf16>, vector<32x192xf32> -> vector<32x192xf32>
    %167 = arith.truncf %166 : vector<32x192xf32> to vector<32x192xbf16>
    %168 = vector.extract_strided_slice %167 {offsets = [0, 0], sizes = [32, 64], strides = [1, 1]} : vector<32x192xbf16> to vector<32x64xbf16>
    %169 = vector.shape_cast %168 : vector<32x64xbf16> to vector<2x16x64xbf16>
    %170 = vector.extract_strided_slice %167 {offsets = [0, 64], sizes = [32, 64], strides = [1, 1]} : vector<32x192xbf16> to vector<32x64xbf16>
    %171 = vector.shape_cast %170 : vector<32x64xbf16> to vector<2x16x64xbf16>
    %172 = vector.extract_strided_slice %167 {offsets = [0, 128], sizes = [32, 64], strides = [1, 1]} : vector<32x192xbf16> to vector<32x64xbf16>
    %173 = vector.shape_cast %172 : vector<32x64xbf16> to vector<2x16x64xbf16>
    "tpu.trace_start"() <{level = 10 : i32, message = "bqd,bkd->bqk"}> : () -> ()
    %cst_63 = arith.constant dense<0.000000e+00> : vector<2x16x16xf32>
    %174 = tpu.matmul %169, %171, %cst_63 {dimension_numbers = #tpu.dot_dimension_numbers<[2], [2], [1], [1], [0, 0, 0, 1, 1, 1], [0], [0]>} : vector<2x16x64xbf16>, vector<2x16x64xbf16>, vector<2x16x16xf32> -> vector<2x16x16xf32>
    %cst_64 = arith.constant 0xFF800000 : f32
    "tpu.trace_stop"() : () -> ()
    %175 = vector.shape_cast %30 : vector<1x16x16xi1> to vector<1x16x16xi1>
    %176 = vector.broadcast %175 : vector<1x16x16xi1> to vector<2x16x16xi1>
    %177 = vector.broadcast %cst_64 : f32 to vector<2x16x16xf32>
    %178 = arith.select %176, %174, %177 : vector<2x16x16xi1>, vector<2x16x16xf32>
    %cst_65 = arith.constant dense<0xFF800000> : vector<2x16xf32>
    %179 = vector.multi_reduction <maximumf>, %178, %cst_65 [2] : vector<2x16x16xf32> to vector<2x16xf32>
    %180 = vector.shape_cast %179 : vector<2x16xf32> to vector<2x16x1xf32>
    %181 = vector.broadcast %180 : vector<2x16x1xf32> to vector<2x16x16xf32>
    %182 = arith.subf %178, %181 : vector<2x16x16xf32>
    %183 = math.exp %182 : vector<2x16x16xf32>
    %cst_66 = arith.constant dense<0.000000e+00> : vector<2x16xf32>
    %184 = vector.multi_reduction <add>, %183, %cst_66 [2] : vector<2x16x16xf32> to vector<2x16xf32>
    %185 = vector.shape_cast %184 : vector<2x16xf32> to vector<2x16x1xf32>
    %186 = tpu.reciprocal %185 {approx = true} : vector<2x16x1xf32> -> vector<2x16x1xf32>
    %187 = vector.broadcast %186 : vector<2x16x1xf32> to vector<2x16x16xf32>
    %188 = arith.mulf %183, %187 : vector<2x16x16xf32>
    %189 = arith.truncf %188 : vector<2x16x16xf32> to vector<2x16x16xbf16>
    "tpu.trace_start"() <{level = 10 : i32, message = "bqk,bkd->bqd"}> : () -> ()
    %cst_67 = arith.constant dense<0.000000e+00> : vector<2x16x64xf32>
    %190 = tpu.matmul %189, %173, %cst_67 {dimension_numbers = #tpu.dot_dimension_numbers<[2], [1], [1], [2], [0, 0, 0, 1, 1, 2], [0], [0]>} : vector<2x16x16xbf16>, vector<2x16x64xbf16>, vector<2x16x64xf32> -> vector<2x16x64xf32>
    "tpu.trace_stop"() : () -> ()
    %191 = vector.shape_cast %190 : vector<2x16x64xf32> to vector<32x64xf32>
    %192 = arith.truncf %191 : vector<32x64xf32> to vector<32x64xbf16>
    %c4_68 = arith.constant 4 : index
    %c0_69 = arith.constant 0 : index
    %c0_70 = arith.constant 0 : index
    %193 = vector.load %arg5[%c4_68, %c0_69, %c0_70] : memref<6x64x384xbf16, #tpu.memory_space<vmem>>, vector<1x64x384xbf16>
    %194 = vector.shape_cast %193 : vector<1x64x384xbf16> to vector<64x384xbf16>
    %cst_71 = arith.constant dense<0.000000e+00> : vector<32x384xf32>
    %195 = tpu.matmul %192, %194, %cst_71 {dimension_numbers = #tpu.dot_dimension_numbers<[1], [0], [0], [1], [0, 0, 1, 1], [], []>} : vector<32x64xbf16>, vector<64x384xbf16>, vector<32x384xf32> -> vector<32x384xf32>
    %196 = arith.addf %163, %195 : vector<32x384xf32>
    %c5 = arith.constant 5 : index
    %c0_72 = arith.constant 0 : index
    %c0_73 = arith.constant 0 : index
    %197 = vector.load %arg4[%c5, %c0_72, %c0_73] : memref<6x384x192xbf16, #tpu.memory_space<vmem>>, vector<1x384x192xbf16>
    %198 = vector.shape_cast %197 : vector<1x384x192xbf16> to vector<384x192xbf16>
    %cst_74 = arith.constant dense<0.000000e+00> : vector<32x192xf32>
    %199 = tpu.matmul %26, %198, %cst_74 {dimension_numbers = #tpu.dot_dimension_numbers<[1], [0], [0], [1], [0, 0, 1, 1], [], []>} : vector<32x384xbf16>, vector<384x192xbf16>, vector<32x192xf32> -> vector<32x192xf32>
    %200 = arith.truncf %199 : vector<32x192xf32> to vector<32x192xbf16>
    %201 = vector.extract_strided_slice %200 {offsets = [0, 0], sizes = [32, 64], strides = [1, 1]} : vector<32x192xbf16> to vector<32x64xbf16>
    %202 = vector.shape_cast %201 : vector<32x64xbf16> to vector<2x16x64xbf16>
    %203 = vector.extract_strided_slice %200 {offsets = [0, 64], sizes = [32, 64], strides = [1, 1]} : vector<32x192xbf16> to vector<32x64xbf16>
    %204 = vector.shape_cast %203 : vector<32x64xbf16> to vector<2x16x64xbf16>
    %205 = vector.extract_strided_slice %200 {offsets = [0, 128], sizes = [32, 64], strides = [1, 1]} : vector<32x192xbf16> to vector<32x64xbf16>
    %206 = vector.shape_cast %205 : vector<32x64xbf16> to vector<2x16x64xbf16>
    "tpu.trace_start"() <{level = 10 : i32, message = "bqd,bkd->bqk"}> : () -> ()
    %cst_75 = arith.constant dense<0.000000e+00> : vector<2x16x16xf32>
    %207 = tpu.matmul %202, %204, %cst_75 {dimension_numbers = #tpu.dot_dimension_numbers<[2], [2], [1], [1], [0, 0, 0, 1, 1, 1], [0], [0]>} : vector<2x16x64xbf16>, vector<2x16x64xbf16>, vector<2x16x16xf32> -> vector<2x16x16xf32>
    %cst_76 = arith.constant 0xFF800000 : f32
    "tpu.trace_stop"() : () -> ()
    %208 = vector.shape_cast %30 : vector<1x16x16xi1> to vector<1x16x16xi1>
    %209 = vector.broadcast %208 : vector<1x16x16xi1> to vector<2x16x16xi1>
    %210 = vector.broadcast %cst_76 : f32 to vector<2x16x16xf32>
    %211 = arith.select %209, %207, %210 : vector<2x16x16xi1>, vector<2x16x16xf32>
    %cst_77 = arith.constant dense<0xFF800000> : vector<2x16xf32>
    %212 = vector.multi_reduction <maximumf>, %211, %cst_77 [2] : vector<2x16x16xf32> to vector<2x16xf32>
    %213 = vector.shape_cast %212 : vector<2x16xf32> to vector<2x16x1xf32>
    %214 = vector.broadcast %213 : vector<2x16x1xf32> to vector<2x16x16xf32>
    %215 = arith.subf %211, %214 : vector<2x16x16xf32>
    %216 = math.exp %215 : vector<2x16x16xf32>
    %cst_78 = arith.constant dense<0.000000e+00> : vector<2x16xf32>
    %217 = vector.multi_reduction <add>, %216, %cst_78 [2] : vector<2x16x16xf32> to vector<2x16xf32>
    %218 = vector.shape_cast %217 : vector<2x16xf32> to vector<2x16x1xf32>
    %219 = tpu.reciprocal %218 {approx = true} : vector<2x16x1xf32> -> vector<2x16x1xf32>
    %220 = vector.broadcast %219 : vector<2x16x1xf32> to vector<2x16x16xf32>
    %221 = arith.mulf %216, %220 : vector<2x16x16xf32>
    %222 = arith.truncf %221 : vector<2x16x16xf32> to vector<2x16x16xbf16>
    "tpu.trace_start"() <{level = 10 : i32, message = "bqk,bkd->bqd"}> : () -> ()
    %cst_79 = arith.constant dense<0.000000e+00> : vector<2x16x64xf32>
    %223 = tpu.matmul %222, %206, %cst_79 {dimension_numbers = #tpu.dot_dimension_numbers<[2], [1], [1], [2], [0, 0, 0, 1, 1, 2], [0], [0]>} : vector<2x16x16xbf16>, vector<2x16x64xbf16>, vector<2x16x64xf32> -> vector<2x16x64xf32>
    "tpu.trace_stop"() : () -> ()
    %224 = vector.shape_cast %223 : vector<2x16x64xf32> to vector<32x64xf32>
    %225 = arith.truncf %224 : vector<32x64xf32> to vector<32x64xbf16>
    %c5_80 = arith.constant 5 : index
    %c0_81 = arith.constant 0 : index
    %c0_82 = arith.constant 0 : index
    %226 = vector.load %arg5[%c5_80, %c0_81, %c0_82] : memref<6x64x384xbf16, #tpu.memory_space<vmem>>, vector<1x64x384xbf16>
    %227 = vector.shape_cast %226 : vector<1x64x384xbf16> to vector<64x384xbf16>
    %cst_83 = arith.constant dense<0.000000e+00> : vector<32x384xf32>
    %228 = tpu.matmul %225, %227, %cst_83 {dimension_numbers = #tpu.dot_dimension_numbers<[1], [0], [0], [1], [0, 0, 1, 1], [], []>} : vector<32x64xbf16>, vector<64x384xbf16>, vector<32x384xf32> -> vector<32x384xf32>
    %229 = arith.addf %196, %228 : vector<32x384xf32>
    %230 = arith.addf %1, %229 : vector<32x384xf32>
    %c0_84 = arith.constant 0 : index
    %c0_85 = arith.constant 0 : index
    %231 = vector.load %arg6[%c0_84, %c0_85] : memref<1x384xf32, #tpu.memory_space<vmem>>, vector<1x384xf32>
    %232 = vector.broadcast %231 : vector<1x384xf32> to vector<32x384xf32>
    %233 = arith.addf %230, %232 : vector<32x384xf32>
    %c0_86 = arith.constant 0 : index
    %c0_87 = arith.constant 0 : index
    %234 = vector.load %arg7[%c0_86, %c0_87] : memref<1x384xf32, #tpu.memory_space<vmem>>, vector<1x384xf32>
    %c0_88 = arith.constant 0 : index
    %c0_89 = arith.constant 0 : index
    %235 = vector.load %arg8[%c0_88, %c0_89] : memref<1x384xf32, #tpu.memory_space<vmem>>, vector<1x384xf32>
    %cst_90 = arith.constant dense<0.000000e+00> : vector<32xf32>
    %236 = vector.multi_reduction <add>, %233, %cst_90 [1] : vector<32x384xf32> to vector<32xf32>
    %237 = vector.shape_cast %236 : vector<32xf32> to vector<32x1xf32>
    %cst_91 = arith.constant 3.840000e+02 : f32
    %238 = vector.broadcast %cst_91 : f32 to vector<32x1xf32>
    %239 = arith.divf %237, %238 : vector<32x1xf32>
    %240 = vector.broadcast %239 : vector<32x1xf32> to vector<32x384xf32>
    %241 = arith.subf %233, %240 : vector<32x384xf32>
    %242 = arith.mulf %241, %241 : vector<32x384xf32>
    %cst_92 = arith.constant dense<0.000000e+00> : vector<32xf32>
    %243 = vector.multi_reduction <add>, %242, %cst_92 [1] : vector<32x384xf32> to vector<32xf32>
    %244 = vector.shape_cast %243 : vector<32xf32> to vector<32x1xf32>
    %cst_93 = arith.constant 3.840000e+02 : f32
    %245 = vector.broadcast %cst_93 : f32 to vector<32x1xf32>
    %246 = arith.divf %244, %245 : vector<32x1xf32>
    %247 = vector.broadcast %239 : vector<32x1xf32> to vector<32x384xf32>
    %248 = arith.subf %233, %247 : vector<32x384xf32>
    %cst_94 = arith.constant 9.99999974E-6 : f32
    %249 = vector.broadcast %cst_94 : f32 to vector<32x1xf32>
    %250 = arith.addf %246, %249 : vector<32x1xf32>
    %251 = math.rsqrt %250 : vector<32x1xf32>
    %252 = vector.broadcast %251 : vector<32x1xf32> to vector<32x384xf32>
    %253 = arith.mulf %248, %252 : vector<32x384xf32>
    %254 = vector.broadcast %234 : vector<1x384xf32> to vector<32x384xf32>
    %255 = arith.mulf %253, %254 : vector<32x384xf32>
    %256 = vector.broadcast %235 : vector<1x384xf32> to vector<32x384xf32>
    %257 = arith.addf %255, %256 : vector<32x384xf32>
    %258 = arith.truncf %257 : vector<32x384xf32> to vector<32x384xbf16>
    %c0_95 = arith.constant 0 : index
    %c0_96 = arith.constant 0 : index
    %259 = vector.load %arg9[%c0_95, %c0_96] : memref<384x1536xbf16, #tpu.memory_space<vmem>>, vector<384x1536xbf16>
    %cst_97 = arith.constant dense<0.000000e+00> : vector<32x1536xf32>
    %260 = tpu.matmul %258, %259, %cst_97 {dimension_numbers = #tpu.dot_dimension_numbers<[1], [0], [0], [1], [0, 0, 1, 1], [], []>} : vector<32x384xbf16>, vector<384x1536xbf16>, vector<32x1536xf32> -> vector<32x1536xf32>
    %c0_98 = arith.constant 0 : index
    %c0_99 = arith.constant 0 : index
    %261 = vector.load %arg10[%c0_98, %c0_99] : memref<1x1536xf32, #tpu.memory_space<vmem>>, vector<1x1536xf32>
    %262 = vector.broadcast %261 : vector<1x1536xf32> to vector<32x1536xf32>
    %263 = arith.addf %260, %262 : vector<32x1536xf32>
    %cst_100 = arith.constant 0.000000e+00 : f32
    %264 = vector.broadcast %cst_100 : f32 to vector<32x1536xf32>
    %265 = arith.maximumf %263, %264 : vector<32x1536xf32>
    %266 = arith.truncf %265 : vector<32x1536xf32> to vector<32x1536xbf16>
    %c0_101 = arith.constant 0 : index
    %c0_102 = arith.constant 0 : index
    %267 = vector.load %arg11[%c0_101, %c0_102] : memref<1536x384xbf16, #tpu.memory_space<vmem>>, vector<1536x384xbf16>
    %cst_103 = arith.constant dense<0.000000e+00> : vector<32x384xf32>
    %268 = tpu.matmul %266, %267, %cst_103 {dimension_numbers = #tpu.dot_dimension_numbers<[1], [0], [0], [1], [0, 0, 1, 1], [], []>} : vector<32x1536xbf16>, vector<1536x384xbf16>, vector<32x384xf32> -> vector<32x384xf32>
    %c0_104 = arith.constant 0 : index
    %c0_105 = arith.constant 0 : index
    %269 = vector.load %arg12[%c0_104, %c0_105] : memref<1x384xf32, #tpu.memory_space<vmem>>, vector<1x384xf32>
    %270 = vector.broadcast %269 : vector<1x384xf32> to vector<32x384xf32>
    %271 = arith.addf %268, %270 : vector<32x384xf32>
    %272 = arith.addf %233, %271 : vector<32x384xf32>
    %273 = vector.shape_cast %272 : vector<32x384xf32> to vector<2x16x384xf32>
    %c0_106 = arith.constant 0 : index
    %c0_107 = arith.constant 0 : index
    %c0_108 = arith.constant 0 : index
    %274 = vector.load %arg13[%c0_106, %c0_107, %c0_108] : memref<2x16x384xf32, #tpu.memory_space<vmem>>, vector<2x16x384xf32>
    tpu.vector_store %arg13[%c0_106, %c0_107, %c0_108], %273 {strides = array<i32>} : memref<2x16x384xf32, #tpu.memory_space<vmem>>, vector<2x16x384xf32>,
    return
  }
  func.func @transform_0(%arg0: i32) -> (i32, i32, i32) {
    %c0_i32 = arith.constant 0 : i32
    %c0_i32_0 = arith.constant 0 : i32
    %c0_i32_1 = arith.constant 0 : i32
    return %arg0, %c0_i32, %c0_i32_0 : i32, i32, i32
  }
  func.func @transform_1(%arg0: i32) -> (i32, i32) {
    %c0_i32 = arith.constant 0 : i32
    %c0_i32_0 = arith.constant 0 : i32
    %c0_i32_1 = arith.constant 0 : i32
    return %c0_i32, %c0_i32_0 : i32, i32
  }
  func.func @transform_2(%arg0: i32) -> (i32, i32) {
    %c0_i32 = arith.constant 0 : i32
    %c0_i32_0 = arith.constant 0 : i32
    %c0_i32_1 = arith.constant 0 : i32
    return %c0_i32, %c0_i32_0 : i32, i32
  }
  func.func @transform_3(%arg0: i32) -> (i32, i32, i32) {
    %c0_i32 = arith.constant 0 : i32
    %c0_i32_0 = arith.constant 0 : i32
    %c0_i32_1 = arith.constant 0 : i32
    %c0_i32_2 = arith.constant 0 : i32
    return %c0_i32, %c0_i32_0, %c0_i32_1 : i32, i32, i32
  }
  func.func @transform_4(%arg0: i32) -> (i32, i32, i32) {
    %c0_i32 = arith.constant 0 : i32
    %c0_i32_0 = arith.constant 0 : i32
    %c0_i32_1 = arith.constant 0 : i32
    %c0_i32_2 = arith.constant 0 : i32
    return %c0_i32, %c0_i32_0, %c0_i32_1 : i32, i32, i32
  }
  func.func @transform_5(%arg0: i32) -> (i32, i32) {
    %c0_i32 = arith.constant 0 : i32
    %c0_i32_0 = arith.constant 0 : i32
    %c0_i32_1 = arith.constant 0 : i32
    return %c0_i32, %c0_i32_0 : i32, i32
  }
  func.func @transform_6(%arg0: i32) -> (i32, i32) {
    %c0_i32 = arith.constant 0 : i32
    %c0_i32_0 = arith.constant 0 : i32
    %c0_i32_1 = arith.constant 0 : i32
    return %c0_i32, %c0_i32_0 : i32, i32
  }
  func.func @transform_7(%arg0: i32) -> (i32, i32) {
    %c0_i32 = arith.constant 0 : i32
    %c0_i32_0 = arith.constant 0 : i32
    %c0_i32_1 = arith.constant 0 : i32
    return %c0_i32, %c0_i32_0 : i32, i32
  }
  func.func @transform_8(%arg0: i32) -> (i32, i32) {
    %c0_i32 = arith.constant 0 : i32
    %c0_i32_0 = arith.constant 0 : i32
    %c0_i32_1 = arith.constant 0 : i32
    return %c0_i32, %c0_i32_0 : i32, i32
  }
  func.func @transform_9(%arg0: i32) -> (i32, i32) {
    %c0_i32 = arith.constant 0 : i32
    %c0_i32_0 = arith.constant 0 : i32
    %c0_i32_1 = arith.constant 0 : i32
    return %c0_i32, %c0_i32_0 : i32, i32
  }
  func.func @transform_10(%arg0: i32) -> (i32, i32) {
    %c0_i32 = arith.constant 0 : i32
    %c0_i32_0 = arith.constant 0 : i32
    %c0_i32_1 = arith.constant 0 : i32
    return %c0_i32, %c0_i32_0 : i32, i32
  }
  func.func @transform_11(%arg0: i32) -> (i32, i32) {
    %c0_i32 = arith.constant 0 : i32
    %c0_i32_0 = arith.constant 0 : i32
    %c0_i32_1 = arith.constant 0 : i32
    return %c0_i32, %c0_i32_0 : i32, i32
  }
  func.func @transform_12(%arg0: i32) -> (i32, i32, i32) {
    %c0_i32 = arith.constant 0 : i32
    %c0_i32_0 = arith.constant 0 : i32
    %c0_i32_1 = arith.constant 0 : i32
    return %arg0, %c0_i32, %c0_i32_0 : i32, i32, i32
  }
}

</mosaic_0001>

<bundles_post_ra>
// kernel: tpu_custom_call.1
= control target key start
LH: loop header
LB: loop body
LE: loop exit
PB: predicated region body
PF: predicated region fallthrough
CT: control target
= control target key end

     0   :  { %17 = vsyncpa [#allocation3], 0  ;;  %s17044_s0 = inlined_call_operand.vmem [shape: f32[2,16,384], index: 0, kind: input, shape index: {}]   ;;  %s17045_s1 = inlined_call_operand.vmem [shape: f32[1,384], index: 1, kind: input, shape index: {}]   ;;  %s17046_s2 = inlined_call_operand.vmem [shape: f32[1,384], index: 2, kind: input, shape index: {}]   ;;  %s17047_s3 = inlined_call_operand.vmem [shape: bf16[6,384,192], index: 3, kind: input, shape index: {}]   ;;  %s17048_s4 = inlined_call_operand.vmem [shape: bf16[6,64,384], index: 4, kind: input, shape index: {}]   ;;  %s17049_s5 = inlined_call_operand.vmem [shape: f32[1,384], index: 5, kind: input, shape index: {}]   ;;  %s17050_s6 = inlined_call_operand.vmem [shape: f32[1,384], index: 6, kind: input, shape index: {}]   ;;  %s17051_s7 = inlined_call_operand.vmem [shape: f32[1,384], index: 7, kind: input, shape index: {}]   ;;  %s17052_s8 = inlined_call_operand.vmem [shape: bf16[384,1536], index: 8, kind: input, shape index: {}]   ;;  %s17053_s9 = inlined_call_operand.vmem [shape: f32[1,1536], index: 9, kind: input, shape index: {}]   ;;  %s17054_s10 = inlined_call_operand.hbm [shape: bf16[1536,384], index: 10, kind: input, shape index: {}]   ;;  %s17055_s11 = inlined_call_operand.vmem [shape: f32[1,384], index: 11, kind: input, shape index: {}]   ;;  %s17056_s12 = inlined_call_operand.hbm [shape: f32[2,16,384], index: 12, kind: output, shape index: {}]  }
   0x1   :  { %18 = vsyncpa [#allocation4], 0  ;;  %s13818_s21 = smov [#allocation2]  }
   0x2   :  { %s44_s22 = sshll.u32 %s13818_s21, 4  ;;  %s45_s22 = int_to_ptr.vmem [resolvable:$true] %s44_s22 }
   0x3   :  { %s13782_s23 = scalar_lea.vmem %s45_s22, 36864  ;;  %p13787_p1 = scmp.lt.s32.totalorder %s45_s22, %s45_s22 }
   0x4   :  { %p13783_p0 = scmp.ne.s32.totalorder %s45_s22, %s13782_s23  ;;  %p13788_p2 = scmp.lt.s32.totalorder %s13782_s23, %s13782_s23 }
   0x6   :  { %p13789_p3 = por %p13788_p2, %p13787_p1 }
   0x8   :  { %p13790_p4 = pnand %p13789_p3, %p13783_p0 }
   0xa   :  { %13793 = shalt.err (!%p13790_p4)
}
   0xb   :  { %s13819_s24 = smov 192   ;;  %s13820_s25 = smov 12  }
   0xc   :  { %50 = dma.hbm_to_vmem [thread:$0]  %s17054_s10, 36864, %s45_s22, [#allocation3], %s13819_s24, %s13819_s24, %s13820_s25  }
   0xd   :  { %13814 = dma.done.wait [#allocation3], 36864  }
   0xe   :  { %13815 = vsyncadd [#allocation3], 4294930432  ;;  %v13899_v0 = vld [vmem:[%s17044_s0] sm:$0xff]  ;;  %v13904_v1 = vld [vmem:[%s17044_s0 + $0x8] sm:$0xff]  ;;  %vm13823_vm0 = vmmov 0   ;;  %s13824_s20 = smov 64  }
   0xf   :  { %v13909_v2 = vld [vmem:[%s17044_s0 + $0x10] sm:$0xff]  ;;  %v71_v3 = vadd.f32 %v13904_v1, %v13899_v0  ;;  %v13921_v5 = vld [vmem:[%s17044_s0 + $0x38] sm:$0xff]  ;;  %v13926_v6 = vld [vmem:[%s17044_s0 + $0x40] sm:$0xff]  ;;  %vm626_vm1 = vcmask 523264   ;;  %vm732_vm3 = vcmask 130048  }
  0x10   :  { %v13916_v4 = vld [vmem:[%s17044_s0 + $0x30] sm:$0xff]  ;;  %v13933_v8 = vld [vmem:[%s17044_s0 + $0x18] sm:$0xff]  ;;  %v13938_v9 = vld [vmem:[%s17044_s0 + $0x20] sm:$0xff] }
  0x11   :  { %v79_v7 = vadd.f32 %v13921_v5, %v13916_v4  ;;  %v13943_v10 = vld [vmem:[%s17044_s0 + $0x28] sm:$0xff]  ;;  %v72_v11 = vadd.f32 %v71_v3, %v13909_v2  ;;  %v75_v12 = vadd.f32 %v13938_v9, %v13933_v8  ;;  %v13956_v14 = vld [vmem:[%s17044_s0 + $0x50] sm:$0xff]  ;;  %v13961_v15 = vld [vmem:[%s17044_s0 + $0x58] sm:$0xff] }
  0x12   :  { %v13951_v13 = vld [vmem:[%s17044_s0 + $0x48] sm:$0xff]  ;;  %v12306_v20 = vld [vmem:[%s17047_s3 + $0x74] ss:$8 sps:$4 sm:$0xff]   ;;  %v12308_v21 = vld [vmem:[%s17047_s3 + $0x70] ss:$8 sps:$4 sm:$0xff]  }
  0x13   :  { %v80_v16 = vadd.f32 %v79_v7, %v13926_v6  ;;  %v83_v17 = vadd.f32 %v13956_v14, %v13951_v13  ;;  %73 = vadd.xlane.f32.xlu0 %v72_v11  ;;  %v76_v18 = vadd.f32 %v75_v12, %v13943_v10  ;;  %v12309_v22 = vld [vmem:[%s17047_s3 + $0x64] ss:$8 sps:$4 sm:$0xff]   ;;  %513 = vmatprep.subr.bf16.mxu0 %v12306_v20  ;;  %v12311_v23 = vld [vmem:[%s17047_s3 + $0x60] ss:$8 sps:$4 sm:$0xff]   ;;  %v12312_v24 = vld [vmem:[%s17047_s3 + $0x54] ss:$8 sps:$4 sm:$0xff]  }
  0x14   :  { %514 = vmatpush1.bf16.msra.mxu0 %v12308_v21  ;;  %v12314_v25 = vld [vmem:[%s17047_s3 + $0x50] ss:$8 sps:$4 sm:$0xff]   ;;  %v12332_v26 = vld [vmem:[%s17047_s3 + $0x174] ss:$8 sps:$4 sm:$0xff]   ;;  %v12315_v27 = vld [vmem:[%s17047_s3 + $0x44] ss:$8 sps:$4 sm:$0xff]  }
  0x15   :  { %81 = vadd.xlane.f32.xlu1 %v80_v16  ;;  %v84_v19 = vadd.f32 %v83_v17, %v13961_v15  ;;  %515 = vmatprep.subr.bf16.mxu0 %v12309_v22  ;;  %v12335_v28 = vld [vmem:[%s17047_s3 + $0x170] ss:$8 sps:$4 sm:$0xff]   ;;  %v12317_v29 = vld [vmem:[%s17047_s3 + $0x40] ss:$8 sps:$4 sm:$0xff]   ;;  %v12318_v30 = vld [vmem:[%s17047_s3 + $0x34] ss:$8 sps:$4 sm:$0xff]  }
  0x16   :  { %566 = vmatprep.subr.bf16.mxu1 %v12332_v26  ;;  %v12320_v31 = vld [vmem:[%s17047_s3 + $0x30] ss:$8 sps:$4 sm:$0xff]   ;;  %v12321_v32 = vld [vmem:[%s17047_s3 + $0x24] ss:$8 sps:$4 sm:$0xff]   ;;  %v12323_v33 = vld [vmem:[%s17047_s3 + $0x20] ss:$8 sps:$4 sm:$0xff]  }
  0x17   :  { %77 = vadd.xlane.f32.xlu0 %v76_v18  ;;  %567 = vmatpush1.bf16.msra.mxu1 %v12335_v28  ;;  %v12324_v34 = vld [vmem:[%s17047_s3 + $0x14] ss:$8 sps:$4 sm:$0xff]   ;;  %v12326_v35 = vld [vmem:[%s17047_s3 + $0x10] ss:$8 sps:$4 sm:$0xff]   ;;  %v12327_v36 = vld [vmem:[%s17047_s3 + $0x4] ss:$8 sps:$4 sm:$0xff]  }
  0x18   :  { %516 = vmatpush1.bf16.msra.mxu0 %v12311_v23  ;;  %v12329_v37 = vld [vmem:[%s17047_s3] ss:$8 sps:$4 sm:$0xff]   ;;  %v12330_v38 = vld [vmem:[%s17047_s3 + $0xf4] ss:$8 sps:$4 sm:$0xff]   ;;  %v12334_v39 = vld [vmem:[%s17047_s3 + $0xf0] ss:$8 sps:$4 sm:$0xff]  }
  0x19   :  { %85 = vadd.xlane.f32.xlu1 %v84_v19  ;;  %517 = vmatprep.subr.bf16.mxu0 %v12312_v24  ;;  %v12336_v16 = vld [vmem:[%s17047_s3 + $0xe4] ss:$8 sps:$4 sm:$0xff]   ;;  %v12340_v18 = vld [vmem:[%s17047_s3 + $0xe0] ss:$8 sps:$4 sm:$0xff]   ;;  %v12342_v20 = vld [vmem:[%s17047_s3 + $0xd4] ss:$8 sps:$4 sm:$0xff]  }
  0x1a   :  { %v12338_v17 = vld [vmem:[%s17047_s3 + $0x164] ss:$8 sps:$4 sm:$0xff]   ;;  %v12341_v19 = vld [vmem:[%s17047_s3 + $0x160] ss:$8 sps:$4 sm:$0xff]   ;;  %v12344_v21 = vld [vmem:[%s17047_s3 + $0x154] ss:$8 sps:$4 sm:$0xff]  }
  0x1b   :  { %568 = vmatprep.subr.bf16.mxu1 %v12338_v17  ;;  %v12346_v22 = vld [vmem:[%s17047_s3 + $0xd0] ss:$8 sps:$4 sm:$0xff]   ;;  %v12348_v24 = vld [vmem:[%s17047_s3 + $0xc4] ss:$8 sps:$4 sm:$0xff]   ;;  %v12352_v26 = vld [vmem:[%s17047_s3 + $0xc0] ss:$8 sps:$4 sm:$0xff]  }
  0x1c   :  { %518 = vmatpush1.bf16.msra.mxu0 %v12314_v25  ;;  %569 = vmatpush1.bf16.msra.mxu1 %v12341_v19  ;;  %v12347_v23 = vld [vmem:[%s17047_s3 + $0x150] ss:$8 sps:$4 sm:$0xff]   ;;  %v12350_v25 = vld [vmem:[%s17047_s3 + $0x144] ss:$8 sps:$4 sm:$0xff]   ;;  %v12354_v28 = vld [vmem:[%s17047_s3 + $0xb4] ss:$8 sps:$4 sm:$0xff]  }
  0x1d   :  { %519 = vmatprep.subr.bf16.mxu0 %v12315_v27  ;;  %570 = vmatprep.subr.bf16.mxu1 %v12344_v21  ;;  %v12353_v27 = vld [vmem:[%s17047_s3 + $0x140] ss:$8 sps:$4 sm:$0xff]  }
  0x20   :  { %520 = vmatpush1.bf16.msra.mxu0 %v12317_v29  ;;  %571 = vmatpush1.bf16.msra.mxu1 %v12347_v23  ;;  %v12356_v29 = vld [vmem:[%s17047_s3 + $0x134] ss:$8 sps:$4 sm:$0xff]  }
  0x21   :  { %521 = vmatprep.subr.bf16.mxu0 %v12318_v30  ;;  %572 = vmatprep.subr.bf16.mxu1 %v12350_v25  ;;  %v12358_v30 = vld [vmem:[%s17047_s3 + $0xb0] ss:$8 sps:$4 sm:$0xff]  }
  0x24   :  { %522 = vmatpush1.bf16.msra.mxu0 %v12320_v31  ;;  %573 = vmatpush1.bf16.msra.mxu1 %v12353_v27  ;;  %v12359_v31 = vld [vmem:[%s17047_s3 + $0x130] ss:$8 sps:$4 sm:$0xff]  }
  0x25   :  { %523 = vmatprep.subr.bf16.mxu0 %v12321_v32  ;;  %v12360_v32 = vld [vmem:[%s17047_s3 + $0xa4] ss:$8 sps:$4 sm:$0xff]   ;;  %574 = vmatprep.subr.bf16.mxu1 %v12356_v29 }
  0x28   :  { %524 = vmatpush1.bf16.msra.mxu0 %v12323_v33  ;;  %v12362_v33 = vld [vmem:[%s17047_s3 + $0x124] ss:$8 sps:$4 sm:$0xff]   ;;  %575 = vmatpush1.bf16.msra.mxu1 %v12359_v31 }
  0x29   :  { %525 = vmatprep.subr.bf16.mxu0 %v12324_v34  ;;  %v12364_v34 = vld [vmem:[%s17047_s3 + $0xa0] ss:$8 sps:$4 sm:$0xff]   ;;  %576 = vmatprep.subr.bf16.mxu1 %v12362_v33 }
  0x2c   :  { %526 = vmatpush1.bf16.msra.mxu0 %v12326_v35  ;;  %v12365_v35 = vld [vmem:[%s17047_s3 + $0x120] ss:$8 sps:$4 sm:$0xff]  }
  0x2d   :  { %527 = vmatprep.subr.bf16.mxu0 %v12327_v36  ;;  %v12366_v36 = vld [vmem:[%s17047_s3 + $0x94] ss:$8 sps:$4 sm:$0xff]   ;;  %577 = vmatpush1.bf16.msra.mxu1 %v12365_v35 }
  0x30   :  { %528 = vmatpush1.bf16.msra.mxu0 %v12329_v37  ;;  %v12368_v37 = vld [vmem:[%s17047_s3 + $0x114] ss:$8 sps:$4 sm:$0xff]  }
  0x31   :  { %529 = vmatprep.subr.bf16.mxu0 %v12330_v38  ;;  %v12370_v38 = vld [vmem:[%s17047_s3 + $0x90] ss:$8 sps:$4 sm:$0xff]   ;;  %578 = vmatprep.subr.bf16.mxu1 %v12368_v37 }
  0x34   :  { %530 = vmatpush2.bf16.msra.mxu0 %v12334_v39  ;;  %v12371_v39 = vld [vmem:[%s17047_s3 + $0x110] ss:$8 sps:$4 sm:$0xff]  }
  0x35   :  { %531 = vmatprep.subr.bf16.mxu0 %v12336_v16  ;;  %579 = vmatpush1.bf16.msra.mxu1 %v12371_v39 }
  0x38   :  { %532 = vmatpush2.bf16.msra.mxu0 %v12340_v18 }
  0x39   :  { %533 = vmatprep.subr.bf16.mxu0 %v12342_v20 }
  0x3c   :  { %534 = vmatpush2.bf16.msra.mxu0 %v12346_v22 }
  0x3d   :  { %535 = vmatprep.subr.bf16.mxu0 %v12348_v24 }
  0x40   :  { %536 = vmatpush2.bf16.msra.mxu0 %v12352_v26 }
  0x41   :  { %537 = vmatprep.subr.bf16.mxu0 %v12354_v28 }
  0x44   :  { %538 = vmatpush2.bf16.msra.mxu0 %v12358_v30 }
  0x45   :  { %539 = vmatprep.subr.bf16.mxu0 %v12360_v32 }
  0x48   :  { %540 = vmatpush2.bf16.msra.mxu0 %v12364_v34 }
  0x49   :  { %541 = vmatprep.subr.bf16.mxu0 %v12366_v36 }
  0x4c   :  { %542 = vmatpush2.bf16.msra.mxu0 %v12370_v38 }
  0x9c   :  { %v74_v40 = vpop.xlane.xlu0 %73 }
  0x9d   :  { %v88_v41 = vmul.f32 0.0026041667, %v74_v40  ;;  %v13821_v40 = vmov 0  }
  0x9e   :  { %v82_v42 = vpop.xlane.xlu1 %81  ;;  %598 = vmatprep.mubr.bf16.mxu1 %v13821_v40 }
  0x9f   :  { %v90_v43 = vmul.f32 0.0026041667, %v82_v42  ;;  %v14029_v44 = vsub.f32 %v13899_v0, %v88_v41  ;;  %v14032_v45 = vsub.f32 %v13904_v1, %v88_v41  ;;  %v14035_v46 = vsub.f32 %v13909_v2, %v88_v41  ;;  %v12372_v41 = vld [vmem:[%s17047_s3 + $0x84] ss:$8 sps:$4 sm:$0xff]  }
  0xa0   :  { %v78_v50 = vpop.xlane.xlu0 %77  ;;  %v12374_v42 = vld [vmem:[%s17047_s3 + $0x104] ss:$8 sps:$4 sm:$0xff]   ;;  %543 = vmatprep.subr.bf16.mxu0 %v12372_v41 }
  0xa1   :  { %v14038_v47 = vsub.f32 %v13916_v4, %v90_v43  ;;  %v14041_v48 = vsub.f32 %v13921_v5, %v90_v43  ;;  %v14044_v49 = vsub.f32 %v13926_v6, %v90_v43  ;;  %v89_v51 = vmul.f32 0.0026041667, %v78_v50  ;;  %v12376_v43 = vld [vmem:[%s17047_s3 + $0x80] ss:$8 sps:$4 sm:$0xff]   ;;  %580 = vmatprep.subr.bf16.mxu1 %v12374_v42  ;;  %v12383_v41 = vld [vmem:[%s17047_s3 + $0x1e4] ss:$8 sps:$4 sm:$0xff]  }
  0xa2   :  { %v86_v52 = vpop.xlane.xlu1 %85  ;;  %v104_v53 = vmul.f32 %v14029_v44, %v14029_v44  ;;  %v105_v54 = vmul.f32 %v14032_v45, %v14032_v45  ;;  %v106_v55 = vmul.f32 %v14035_v46, %v14035_v46  ;;  %v12377_v50 = vld [vmem:[%s17047_s3 + $0x100] ss:$8 sps:$4 sm:$0xff]   ;;  %544 = vmatpush2.bf16.msra.mxu0 %v12376_v43 }
  0xa3   :  { %v91_v56 = vmul.f32 0.0026041667, %v86_v52  ;;  %v110_v57 = vmul.f32 %v14038_v47, %v14038_v47  ;;  %v111_v58 = vmul.f32 %v14041_v48, %v14041_v48  ;;  %v112_v59 = vmul.f32 %v14044_v49, %v14044_v49  ;;  %581 = vmatpush1.bf16.msra.mxu1 %v12377_v50 }
  0xa4   :  { %v14059_v60 = vsub.f32 %v13933_v8, %v89_v51  ;;  %v14062_v61 = vsub.f32 %v13938_v9, %v89_v51  ;;  %v14065_v62 = vsub.f32 %v13943_v10, %v89_v51  ;;  %v116_v63 = vadd.f32 %v105_v54, %v104_v53  ;;  %v12380_v51 = vld [vmem:[%s17047_s3 + $0x1f4] ss:$8 sps:$4 sm:$0xff]  }
  0xa5   :  { %v14068_v0 = vsub.f32 %v13951_v13, %v91_v56  ;;  %v14071_v1 = vsub.f32 %v13956_v14, %v91_v56  ;;  %v14074_v2 = vsub.f32 %v13961_v15, %v91_v56  ;;  %v124_v3 = vadd.f32 %v111_v58, %v110_v57  ;;  %1174 = vmatprep.subr.bf16.mxu0 %v12380_v51 }
  0xa6   :  { %v117_v4 = vadd.f32 %v116_v63, %v106_v55  ;;  %v107_v5 = vmul.f32 %v14059_v60, %v14059_v60  ;;  %v108_v6 = vmul.f32 %v14062_v61, %v14062_v61  ;;  %v109_v10 = vmul.f32 %v14065_v62, %v14065_v62 }
  0xa7   :  { %v113_v7 = vmul.f32 %v14068_v0, %v14068_v0  ;;  %v114_v8 = vmul.f32 %v14071_v1, %v14071_v1  ;;  %v125_v9 = vadd.f32 %v124_v3, %v112_v59  ;;  %v115_v12 = vmul.f32 %v14074_v2, %v14074_v2 }
  0xa8   :  { %118 = vadd.xlane.f32.xlu0 %v117_v4  ;;  %v120_v11 = vadd.f32 %v108_v6, %v107_v5  ;;  %v157_v59 = vlaneseq }
  0xa9   :  { %v128_v13 = vadd.f32 %v114_v8, %v113_v7  ;;  %v69_v8 = vld [vmem:[%s17045_s1] sm:$0x7] }
  0xaa   :  { %v121_v14 = vadd.f32 %v120_v11, %v109_v10  ;;  %v14177_v6 = vshrl.u32 %v157_v59, 7  ;;  %v70_v11 = vld [vmem:[%s17046_s2] sm:$0x7] }
  0xab   :  { %v129_v15 = vadd.f32 %v128_v13, %v115_v12 }
  0xac   :  { %126 = vadd.xlane.f32.xlu0 %v125_v9  ;;  %122 = vadd.xlane.f32.xlu1 %v121_v14  ;;  %v14183_v9 = vsub.s32 1, %v14177_v6  ;;  %v14186_v10 = vsub.s32 2, %v14177_v6  ;;  %v14192_v12 = vsub.s32 0, %v14177_v6 }
  0xae   :  { %17064 = vst [vmem:[#allocation8_spill] sm:$0xff] %v14186_v10  ;;  %v164_v13 = vrot.slane %v69_v8, %v14183_v9  ;;  %v160_v19 = vrot.slane %v69_v8, %v14192_v12  ;;  %v192_v21 = vrot.slane %v70_v11, %v14183_v9  ;;  %v196_v24 = vrot.slane %v70_v11, %v14186_v10 }
  0xb0   :  { %130 = vadd.xlane.f32.xlu1 %v129_v15  ;;  %v168_v15 = vrot.slane %v69_v8, %v14186_v10 }
 0x131   :  { %v119_v52 = vpop.xlane.xlu0 %118 }
 0x132   :  { %v132_v53 = vmul.f32 0.0026041667, %v119_v52 }
 0x134   :  { %v136_v54 = vadd.f32 1e-05, %v132_v53 }
 0x135   :  { %v123_v55 = vpop.xlane.xlu1 %122  ;;  %v127_v56 = vpop.xlane.xlu0 %126 }
 0x136   :  { %13650 = vrsqrt.f32 %v136_v54  ;;  %v133_v57 = vmul.f32 0.0026041667, %v123_v55  ;;  %v134_v58 = vmul.f32 0.0026041667, %v127_v56  ;;  %v12386_v55 = vld [vmem:[%s17047_s3 + $0x1d4] ss:$8 sps:$4 sm:$0xff]  }
 0x138   :  { %v137_v63 = vadd.f32 1e-05, %v133_v57  ;;  %v138_v3 = vadd.f32 1e-05, %v134_v58 }
 0x139   :  { %v131_v4 = vpop.xlane.xlu1 %130 }
 0x13a   :  { %13652 = vrsqrt.f32 %v137_v63  ;;  %v135_v5 = vmul.f32 0.0026041667, %v131_v4  ;;  %v12384_v4 = vld [vmem:[%s17047_s3 + $0x1d0] ss:$8 sps:$4 sm:$0xff]  }
 0x13b   :  { %13654 = vrsqrt.f32 %v138_v3 }
 0x13c   :  { %v139_v7 = vadd.f32 1e-05, %v135_v5 }
 0x13e   :  { %13656 = vrsqrt.f32 %v139_v7  ;;  %v12389_v7 = vld [vmem:[%s17047_s3 + $0x1c4] ss:$8 sps:$4 sm:$0xff]  }
 0x143   :  { %v13651_v14 = vpop.eup %13650 }
 0x144   :  { %v145_v16 = vmul.f32 %v13651_v14, %v14032_v45  ;;  %v146_v17 = vmul.f32 %v13651_v14, %v14035_v46  ;;  %v144_v18 = vmul.f32 %v13651_v14, %v14029_v44  ;;  %v188_v46 = vrot.slane %v70_v11, %v14192_v12  ;;  %v12392_v14 = vld [vmem:[%s17047_s3 + $0x1b4] ss:$8 sps:$4 sm:$0xff]  }
 0x146   :  { %v173_v20 = vmul.f32 %v164_v13, %v145_v16  ;;  %v174_v23 = vmul.f32 %v168_v15, %v146_v17  ;;  %v172_v28 = vmul.f32 %v160_v19, %v144_v18  ;;  %v12395_v16 = vld [vmem:[%s17047_s3 + $0x1a4] ss:$8 sps:$4 sm:$0xff]   ;;  %v12393_v17 = vld [vmem:[%s17047_s3 + $0x1a0] ss:$8 sps:$4 sm:$0xff]   ;;  %v12398_v18 = vld [vmem:[%s17047_s3 + $0x194] ss:$8 sps:$4 sm:$0xff]  }
 0x147   :  { %v13653_v22 = vpop.eup %13652 }
 0x148   :  { %v13655_v25 = vpop.eup %13654  ;;  %v148_v26 = vmul.f32 %v13653_v22, %v14062_v61  ;;  %v149_v27 = vmul.f32 %v13653_v22, %v14065_v62  ;;  %v147_v45 = vmul.f32 %v13653_v22, %v14059_v60  ;;  %v201_v30 = vadd.f32 %v192_v21, %v173_v20  ;;  %v12378_v60 = vld [vmem:[%s17047_s3 + $0x1f0] ss:$8 sps:$4 sm:$0xff]   ;;  %v12401_v20 = vld [vmem:[%s17047_s3 + $0x184] ss:$8 sps:$4 sm:$0xff]   ;;  %v12404_v22 = vld [vmem:[%s17047_s3 + $0x274] ss:$8 sps:$4 sm:$0xff]  }
 0x149   :  { %v151_v44 = vmul.f32 %v13655_v25, %v14041_v48  ;;  %v202_v33 = vadd.f32 %v196_v24, %v174_v23  ;;  %v152_v36 = vmul.f32 %v13655_v25, %v14044_v49  ;;  %v200_v48 = vadd.f32 %v188_v46, %v172_v28  ;;  %v12402_v23 = vld [vmem:[%s17047_s3 + $0x270] ss:$8 sps:$4 sm:$0xff]   ;;  %v12411_v28 = vld [vmem:[%s17047_s3 + $0x240] ss:$8 sps:$4 sm:$0xff]  }
 0x14a   :  { %v176_v29 = vmul.f32 %v164_v13, %v148_v26  ;;  %v177_v31 = vmul.f32 %v168_v15, %v149_v27  ;;  %v175_v34 = vmul.f32 %v160_v19, %v147_v45  ;;  %v150_v42 = vmul.f32 %v13655_v25, %v14038_v47  ;;  %v12381_v47 = vld [vmem:[%s17047_s3 + $0x1e0] ss:$8 sps:$4 sm:$0xff]   ;;  %v12410_v26 = vld [vmem:[%s17047_s3 + $0x254] ss:$8 sps:$4 sm:$0xff]   ;;  %v12408_v27 = vld [vmem:[%s17047_s3 + $0x250] ss:$8 sps:$4 sm:$0xff]  }
 0x14b   :  { %v13657_v32 = vpop.eup %13656  ;;  %v179_v35 = vmul.f32 %v164_v13, %v151_v44  ;;  %v12405_v25 = vld [vmem:[%s17047_s3 + $0x260] ss:$8 sps:$4 sm:$0xff]   ;;  %v12413_v45 = vld [vmem:[%s17047_s3 + $0x244] ss:$8 sps:$4 sm:$0xff]   ;;  %v12414_v44 = vld [vmem:[%s17047_s3 + $0x230] ss:$8 sps:$4 sm:$0xff]  }
 0x14c   :  { %v204_v37 = vadd.f32 %v192_v21, %v176_v29  ;;  %v205_v61 = vadd.f32 %v196_v24, %v177_v31  ;;  %v154_v62 = vmul.f32 %v13657_v32, %v14071_v1  ;;  %v155_v38 = vmul.f32 %v13657_v32, %v14074_v2  ;;  %v12419_v29 = vld [vmem:[%s17047_s3 + $0x224] ss:$8 sps:$4 sm:$0xff]   ;;  %v12422_v31 = vld [vmem:[%s17047_s3 + $0x214] ss:$8 sps:$4 sm:$0xff]  }
 0x14d   :  { %v203_v39 = vadd.f32 %v188_v46, %v175_v34  ;;  %v153_v49 = vmul.f32 %v13657_v32, %v14068_v0  ;;  %v207_v2 = vadd.f32 %v192_v21, %v179_v35  ;;  %v180_v0 = vmul.f32 %v168_v15, %v152_v36  ;;  %v12420_v32 = vld [vmem:[%s17047_s3 + $0x210] ss:$8 sps:$4 sm:$0xff]   ;;  %v12423_v34 = vld [vmem:[%s17047_s3 + $0x200] ss:$8 sps:$4 sm:$0xff]  }
 0x14e   :  { %v14218_v43 = vpack.c.bf16 %v204_v37, %v201_v30  ;;  %v14220_v50 = vpack.c.bf16 %v205_v61, %v202_v33  ;;  %v182_v51 = vmul.f32 %v164_v13, %v154_v62  ;;  %v183_v52 = vmul.f32 %v168_v15, %v155_v38  ;;  %v12387_v13 = vld [vmem:[%s17047_s3 + $0x1c0] ss:$8 sps:$4 sm:$0xff]   ;;  %v12390_v15 = vld [vmem:[%s17047_s3 + $0x1b0] ss:$8 sps:$4 sm:$0xff]   ;;  %v12425_v33 = vld [vmem:[%s17047_s3 + $0x204] ss:$8 sps:$4 sm:$0xff]  }
 0x14f   :  { %v14222_v53 = vpack.c.bf16 %v203_v39, %v200_v48  ;;  %v181_v1 = vmul.f32 %v160_v19, %v153_v49  ;;  %v178_v56 = vmul.f32 %v160_v19, %v150_v42  ;;  %v208_v3 = vadd.f32 %v196_v24, %v180_v0  ;;  %v12396_v19 = vld [vmem:[%s17047_s3 + $0x190] ss:$8 sps:$4 sm:$0xff]   ;;  %v12417_v30 = vld [vmem:[%s17047_s3 + $0x220] ss:$8 sps:$4 sm:$0xff]  }
 0x150   :  { %545 = vmatprep.mubr.bf16.mxu0 %v14218_v43  ;;  %599 = vmatmul.mubr.bf16.vlgmr.msra.gmra.mxu1 %v14220_v50  ;;  %v210_v54 = vadd.f32 %v192_v21, %v182_v51  ;;  %v211_v58 = vadd.f32 %v196_v24, %v183_v52  ;;  %v12399_v21 = vld [vmem:[%s17047_s3 + $0x180] ss:$8 sps:$4 sm:$0xff]   ;;  %v12407_v24 = vld [vmem:[%s17047_s3 + $0x264] ss:$8 sps:$4 sm:$0xff]   ;;  %v13822_v35 = vmov 0.0  }
 0x151   :  { %546 = vmatmul.mubr.bf16.vlgmr.msra.gmra.mxu0 %v14222_v53  ;;  %608 = vmatprep.mubr.bf16.mxu1 %v13821_v40  ;;  %v209_v63 = vadd.f32 %v188_v46, %v181_v1  ;;  %v206_v5 = vadd.f32 %v188_v46, %v178_v56  ;;  %v12416_v46 = vld [vmem:[%s17047_s3 + $0x234] ss:$8 sps:$4 sm:$0xff]  }
 0x152   :  { %1175 = vmatpush1.bf16.msra.mxu0 %v12378_v60  ;;  %v14234_v57 = vpack.c.bf16 %v210_v54, %v207_v2  ;;  %v14243_v8 = vpack.c.bf16 %v211_v58, %v208_v3  ;;  %12080 = vmatprep.subr.bf16.mxu1 %v13822_v35 }
 0x153   :  { %1176 = vmatprep.subr.bf16.mxu0 %v12383_v41  ;;  %v14245_v11 = vpack.c.bf16 %v209_v63, %v206_v5 }
 0x154   :  { %555 = vmatprep.mubr.bf16.mxu0 %v14234_v57 }
 0x156   :  { %1177 = vmatpush1.bf16.msra.mxu0 %v12381_v47 }
 0x157   :  { %1178 = vmatprep.subr.bf16.mxu0 %v12386_v55 }
 0x158   :  { %609 = vmatmul.mubr.bf16.gmra.mxu1 %v14243_v8 }
 0x159   :  { %556 = vmatmul.mubr.bf16.gmra.mxu0 %v14245_v11  ;;  %12082 = vmatprep.mubr.msk.bf16.mxu1 %vm13823_vm0, %v13822_v35 }
 0x15a   :  { %1179 = vmatpush1.bf16.msra.mxu0 %v12384_v4  ;;  %1206 = vmatprep.mubr.bf16.mxu0 %v14218_v43 }
 0x15b   :  { %1180 = vmatprep.subr.bf16.mxu0 %v12389_v7 }
 0x15e   :  { %1181 = vmatpush1.bf16.msra.mxu0 %v12387_v13 }
 0x15f   :  { %1182 = vmatprep.subr.bf16.mxu0 %v12392_v14 }
 0x162   :  { %1183 = vmatpush1.bf16.msra.mxu0 %v12390_v15  ;;  %v222_v15 = vand.u32 127, %v157_v59 }
 0x163   :  { %1184 = vmatprep.subr.bf16.mxu0 %v12395_v16 }
 0x164   :  { %vm14353_vm2 = vcmp.ge.s32.totalorder %v14177_v6, %v222_v15 }
 0x166   :  { %1185 = vmatpush1.bf16.msra.mxu0 %v12393_v17 }
 0x167   :  { %1186 = vmatprep.subr.bf16.mxu0 %v12398_v18  ;;  %v220_v18 = vadd.s32 8, %v14177_v6 }
 0x169   :  { %vm14361_vm4 = vcmp.ge.s32.totalorder %v220_v18, %v222_v15  ;;  %v12428_v18 = vld [vmem:[%s17047_s3 + $0x2f4] ss:$8 sps:$4 sm:$0xff]  }
 0x16a   :  { %1187 = vmatpush1.bf16.msra.mxu0 %v12396_v19 }
 0x16b   :  { %1188 = vmatprep.subr.bf16.mxu0 %v12401_v20 }
 0x16e   :  { %1189 = vmatpush1.bf16.msra.mxu0 %v12399_v21 }
 0x16f   :  { %1190 = vmatprep.subr.bf16.mxu0 %v12404_v22 }
 0x172   :  { %1191 = vmatpush2.bf16.msra.mxu0 %v12402_v23 }
 0x173   :  { %1192 = vmatprep.subr.bf16.mxu0 %v12407_v24 }
 0x176   :  { %1193 = vmatpush2.bf16.msra.mxu0 %v12405_v25 }
 0x177   :  { %1194 = vmatprep.subr.bf16.mxu0 %v12410_v26 }
 0x17a   :  { %1195 = vmatpush2.bf16.msra.mxu0 %v12408_v27 }
 0x17b   :  { %1196 = vmatprep.subr.bf16.mxu0 %v12413_v45 }
 0x17e   :  { %1197 = vmatpush2.bf16.msra.mxu0 %v12411_v28 }
 0x17f   :  { %1198 = vmatprep.subr.bf16.mxu0 %v12416_v46 }
 0x182   :  { %1199 = vmatpush2.bf16.msra.mxu0 %v12414_v44 }
 0x183   :  { %1200 = vmatprep.subr.bf16.mxu0 %v12419_v29 }
 0x186   :  { %1201 = vmatpush2.bf16.msra.mxu0 %v12417_v30 }
 0x187   :  { %1202 = vmatprep.subr.bf16.mxu0 %v12422_v31 }
 0x18a   :  { %1203 = vmatpush2.bf16.msra.mxu0 %v12420_v32 }
 0x18b   :  { %1204 = vmatprep.subr.bf16.mxu0 %v12425_v33 }
 0x18e   :  { %1205 = vmatpush2.bf16.msra.mxu0 %v12423_v34 }
 0x18f   :  { %12122 = vmatprep.subr.bf16.mxu0 %v13822_v35 }
 0x191   :  { %1207 = vmatmul.mubr.bf16.vlgmr.msra.gmra.mxu0 %v14222_v53 }
 0x192   :  { %1216 = vmatprep.mubr.bf16.mxu0 %v14234_v57 }
 0x199   :  { %1217 = vmatmul.mubr.bf16.gmra.mxu0 %v14245_v11 }
 0x19a   :  { %12124 = vmatprep.mubr.msk.bf16.mxu0 %vm13823_vm0, %v13822_v35 }
 0x210   :  { %v600_v36 = vpop.f32.mrf.mxu1 }
 0x211   :  { %v547_v37 = vpop.f32.mrf.mxu0 }
 0x212   :  { %v602_v61 = vpop.f32.mrf.mxu1  ;;  %v601_v39 = vadd.f32 %v600_v36, %v547_v37 }
 0x213   :  { %v549_v60 = vpop.f32.mrf.mxu0 }
 0x214   :  { %v603_v62 = vadd.f32 %v602_v61, %v549_v60  ;;  %v604_v38 = vpop.f32.mrf.mxu1 }
 0x215   :  { %v551_v48 = vpop.f32.mrf.mxu0 }
 0x216   :  { %v605_v41 = vadd.f32 %v604_v38, %v551_v48  ;;  %v606_v42 = vpop.f32.mrf.mxu1 }
 0x217   :  { %v553_v49 = vpop.f32.mrf.mxu0 }
 0x218   :  { %v619_v51 = vpack.c.bf16 %v605_v41, %v601_v39  ;;  %v610_v52 = vpop.f32.mrf.mxu1  ;;  %v607_v13 = vadd.f32 %v606_v42, %v553_v49 }
 0x219   :  { %v557_v1 = vpop.f32.mrf.mxu0 }
 0x21a   :  { %624 = vrot.lane.b32.xlu0 %v619_v51, %s13824_s20  ;;  %v612_v2 = vpop.f32.mrf.mxu1  ;;  %v611_v56 = vadd.f32 %v610_v52, %v557_v1  ;;  %v620_v14 = vpack.c.bf16 %v607_v13, %v603_v62 }
 0x21b   :  { %v559_v54 = vpop.f32.mrf.mxu0 }
 0x21c   :  { %v14335_v47 = vadd.f32 %v612_v2, %v559_v54  ;;  %v614_v0 = vpop.f32.mrf.mxu1 }
 0x21d   :  { %v561_v55 = vpop.f32.mrf.mxu0 }
 0x21e   :  { %v615_v58 = vadd.f32 %v614_v0, %v561_v55  ;;  %v14350_v16 = vpop.f32.mrf.mxu1 }
 0x220   :  { %v621_v63 = vpack.c.bf16 %v615_v58, %v611_v56 }
 0x222   :  { %675 = vrot.lane.b32.xlu1 %v621_v63, %s13824_s20 }
 0x28c   :  { %v625_v3 = vpop.permute.xlu0 %624 }
 0x28d   :  { %v631_v4 = vsel %vm626_vm1, %v625_v3, 0  ;;  %v563_v3 = vpop.f32.mrf.mxu0 }
 0x28e   :  { %12081 = vmatpush3.bf16.xpose.msra.mxu1 %v631_v4 }
 0x28f   :  { %12086 = vmatprep.subr.bf16.mxu1 %v13822_v35 }
 0x294   :  { %v676_v5 = vpop.permute.xlu1 %675 }
 0x295   :  { %v681_v7 = vsel %vm626_vm1, %v676_v5, 0  ;;  %12083 = vmatmul.mubr.msk.bf16.vlgmr.msra.gmra.mxu1 %vm626_vm1, %v619_v51 }
 0x296   :  { %12087 = vmatpush3.bf16.xpose.msra.mxu1 %v681_v7  ;;  %12088 = vmatprep.mubr.msk.bf16.mxu1 %vm13823_vm0, %v13822_v35  ;;  %v617_v7 = vadd.f32 %v14350_v16, %v563_v3 }
 0x297   :  { %12092 = vmatprep.subr.bf16.mxu1 %v13822_v35 }
 0x29d   :  { %12089 = vmatmul.mubr.msk.bf16.vlgmr.msra.gmra.mxu1 %vm626_vm1, %v621_v63 }
 0x29e   :  { %12093 = vmatpush3.bf16.msra.mxu1 %v620_v14  ;;  %12094 = vmatprep.mubr.msk.bf16.mxu1 %vm13823_vm0, %v13822_v35 }
 0x29f   :  { %12098 = vmatprep.subr.bf16.mxu1 %v13822_v35 }
 0x355   :  { %v667_v19 = vpop.f32.mrf.mxu1 }
 0x356   :  { %v728_v20 = vsel %vm14353_vm2, %v667_v19, -inf  ;;  %v622_v19 = vpack.c.bf16 %v617_v7, %v14335_v47  ;;  %v12431_v47 = vld [vmem:[%s17047_s3 + $0x2e4] ss:$8 sps:$4 sm:$0xff]  }
 0x357   :  { %v12084_v21 = vpop.f32.mrf.mxu1  ;;  %v733_v22 = vsel %vm732_vm3, %v728_v20, -inf }
 0x358   :  { %734 = vmax.xlane.f32.xlu1 %v733_v22 }
 0x359   :  { %v670_v59 = vpop.f32.mrf.mxu1 }
 0x35a   :  { %v729_v24 = vsel %vm14361_vm4, %v670_v59, -inf  ;;  %v12426_v59 = vld [vmem:[%s17047_s3 + $0x2f0] ss:$8 sps:$4 sm:$0xff]  }
 0x35b   :  { %v12085_v25 = vpop.f32.mrf.mxu1  ;;  %v736_v26 = vsel %vm732_vm3, %v729_v24, -inf }
 0x35c   :  { %737 = vmax.xlane.f32.xlu0 %v736_v26  ;;  %v12429_v25 = vld [vmem:[%s17047_s3 + $0x2e0] ss:$8 sps:$4 sm:$0xff]   ;;  %v12434_v26 = vld [vmem:[%s17047_s3 + $0x2d4] ss:$8 sps:$4 sm:$0xff]  }
 0x35d   :  { %v717_v27 = vpop.f32.mrf.mxu1 }
 0x35e   :  { %v730_v45 = vsel %vm14353_vm2, %v717_v27, -inf  ;;  %v12432_v27 = vld [vmem:[%s17047_s3 + $0x2d0] ss:$8 sps:$4 sm:$0xff]  }
 0x35f   :  { %v12090_v28 = vpop.f32.mrf.mxu1  ;;  %v739_v46 = vsel %vm732_vm3, %v730_v45, -inf }
 0x360   :  { %740 = vmax.xlane.f32.xlu0 %v739_v46  ;;  %v12435_v28 = vld [vmem:[%s17047_s3 + $0x2c0] ss:$8 sps:$4 sm:$0xff]   ;;  %v12440_v46 = vld [vmem:[%s17047_s3 + $0x2b4] ss:$8 sps:$4 sm:$0xff]  }
 0x361   :  { %v720_v44 = vpop.f32.mrf.mxu1 }
 0x362   :  { %v731_v29 = vsel %vm14361_vm4, %v720_v44, -inf  ;;  %v12438_v44 = vld [vmem:[%s17047_s3 + $0x2b0] ss:$8 sps:$4 sm:$0xff]  }
 0x363   :  { %v12091_v30 = vpop.f32.mrf.mxu1  ;;  %v742_v31 = vsel %vm732_vm3, %v731_v29, -inf }
 0x364   :  { %743 = vmax.xlane.f32.xlu1 %v742_v31  ;;  %v12441_v30 = vld [vmem:[%s17047_s3 + $0x2a0] ss:$8 sps:$4 sm:$0xff]   ;;  %v12446_v31 = vld [vmem:[%s17047_s3 + $0x294] ss:$8 sps:$4 sm:$0xff]  }
 0x3e1   :  { %v735_v32 = vpop.xlane.xlu1 %734 }
 0x3e2   :  { %v745_v33 = vsub.f32 %v728_v20, %v735_v32  ;;  %v12444_v32 = vld [vmem:[%s17047_s3 + $0x290] ss:$8 sps:$4 sm:$0xff]  }
 0x3e4   :  { %v749_v34 = vmul.f32 1.442695, %v745_v33  ;;  %v12449_v33 = vld [vmem:[%s17047_s3 + $0x284] ss:$8 sps:$4 sm:$0xff]  }
 0x3e5   :  { %v738_v36 = vpop.xlane.xlu0 %737 }
 0x3e6   :  { %13658 = vpow2.f32 %v749_v34  ;;  %v746_v37 = vsub.f32 %v729_v24, %v738_v36  ;;  %v12447_v34 = vld [vmem:[%s17047_s3 + $0x280] ss:$8 sps:$4 sm:$0xff]  }
 0x3e8   :  { %v751_v61 = vmul.f32 1.442695, %v746_v37 }
 0x3e9   :  { %v741_v60 = vpop.xlane.xlu0 %740 }
 0x3ea   :  { %13660 = vpow2.f32 %v751_v61  ;;  %v747_v62 = vsub.f32 %v730_v45, %v741_v60  ;;  %v12437_v45 = vld [vmem:[%s17047_s3 + $0x2c4] ss:$8 sps:$4 sm:$0xff]  }
 0x3ec   :  { %v753_v38 = vmul.f32 1.442695, %v747_v62 }
 0x3ed   :  { %v744_v48 = vpop.xlane.xlu1 %743 }
 0x3ee   :  { %13662 = vpow2.f32 %v753_v38  ;;  %v748_v39 = vsub.f32 %v731_v29, %v744_v48  ;;  %v12443_v29 = vld [vmem:[%s17047_s3 + $0x2a4] ss:$8 sps:$4 sm:$0xff]  }
 0x3f0   :  { %v755_v41 = vmul.f32 1.442695, %v748_v39 }
 0x3f2   :  { %13664 = vpow2.f32 %v755_v41 }
 0x3f3   :  { %v13659_v42 = vpop.eup %13658 }
 0x3f4   :  { %v757_v49 = vsel %vm732_vm3, %v13659_v42, 0.0 }
 0x3f5   :  { %758 = vadd.xlane.f32.xlu0 %v757_v49  ;;  %v1208_v49 = vpop.f32.mrf.mxu0 }
 0x3f7   :  { %v13661_v51 = vpop.eup %13660 }
 0x3f8   :  { %v760_v52 = vsel %vm732_vm3, %v13661_v51, 0.0 }
 0x3f9   :  { %761 = vadd.xlane.f32.xlu1 %v760_v52 }
 0x3fb   :  { %v13663_v1 = vpop.eup %13662 }
 0x3fc   :  { %v763_v2 = vsel %vm732_vm3, %v13663_v1, 0.0 }
 0x3fd   :  { %764 = vadd.xlane.f32.xlu0 %v763_v2 }
 0x3ff   :  { %v13665_v54 = vpop.eup %13664 }
 0x400   :  { %v766_v0 = vsel %vm732_vm3, %v13665_v54, 0.0 }
 0x401   :  { %767 = vadd.xlane.f32.xlu1 %v766_v0 }
 0x47e   :  { %v759_v55 = vpop.xlane.xlu0 %758 }
 0x47f   :  { %13666 = vrcp.f32 %v759_v55 }
 0x482   :  { %v762_v56 = vpop.xlane.xlu1 %761 }
 0x483   :  { %13668 = vrcp.f32 %v762_v56 }
 0x486   :  { %v765_v58 = vpop.xlane.xlu0 %764 }
 0x487   :  { %13670 = vrcp.f32 %v765_v58 }
 0x48a   :  { %v768_v63 = vpop.xlane.xlu1 %767 }
 0x48b   :  { %13672 = vrcp.f32 %v768_v63 }
 0x48c   :  { %v13667_v4 = vpop.eup %13666 }
 0x48d   :  { %v773_v13 = vmul.f32 %v13667_v4, %v13659_v42 }
 0x490   :  { %v13669_v5 = vpop.eup %13668 }
 0x491   :  { %v774_v14 = vmul.f32 %v13669_v5, %v13661_v51  ;;  %v1210_v51 = vpop.f32.mrf.mxu0 }
 0x493   :  { %v777_v15 = vpack.c.bf16 %v774_v14, %v773_v13  ;;  %v1212_v52 = vpop.f32.mrf.mxu0 }
 0x494   :  { %v13671_v20 = vpop.eup %13670 }
 0x495   :  { %12095 = vmatmul.mubr.msk.bf16.vlgmr.msra.gmra.mxu1 %vm732_vm3, %v777_v15  ;;  %v775_v22 = vmul.f32 %v13671_v20, %v13663_v1  ;;  %v1214_v1 = vpop.f32.mrf.mxu0 }
 0x496   :  { %12099 = vmatpush3.bf16.msra.mxu1 %v622_v19  ;;  %12100 = vmatprep.mubr.msk.bf16.mxu1 %vm13823_vm0, %v13822_v35 }
 0x497   :  { %1227 = vmatprep.subr.bf16.mxu1 %v12428_v18 }
 0x498   :  { %v13673_v21 = vpop.eup %13672 }
 0x499   :  { %v776_v16 = vmul.f32 %v13673_v21, %v13665_v54  ;;  %v1218_v54 = vpop.f32.mrf.mxu0 }
 0x49b   :  { %v778_v24 = vpack.c.bf16 %v776_v16, %v775_v22  ;;  %v1220_v63 = vpop.f32.mrf.mxu0 }
 0x49d   :  { %12101 = vmatmul.mubr.msk.bf16.vlgmr.msra.gmra.mxu1 %vm732_vm3, %v778_v24  ;;  %v1222_v7 = vpop.f32.mrf.mxu0 }
 0x49e   :  { %1228 = vmatpush1.bf16.msra.mxu1 %v12426_v59  ;;  %1259 = vmatprep.mubr.bf16.mxu1 %v13821_v40 }
 0x49f   :  { %1229 = vmatprep.subr.bf16.mxu1 %v12431_v47  ;;  %v1224_v19 = vpop.f32.mrf.mxu0 }
 0x4a2   :  { %1230 = vmatpush1.bf16.msra.mxu1 %v12429_v25 }
 0x4a3   :  { %1231 = vmatprep.subr.bf16.mxu1 %v12434_v26 }
 0x4a6   :  { %1232 = vmatpush1.bf16.msra.mxu1 %v12432_v27 }
 0x4a7   :  { %1233 = vmatprep.subr.bf16.mxu1 %v12437_v45 }
 0x4aa   :  { %1234 = vmatpush1.bf16.msra.mxu1 %v12435_v28 }
 0x4ab   :  { %1235 = vmatprep.subr.bf16.mxu1 %v12440_v46 }
 0x4ae   :  { %1236 = vmatpush1.bf16.msra.mxu1 %v12438_v44 }
 0x4af   :  { %1237 = vmatprep.subr.bf16.mxu1 %v12443_v29 }
 0x4b2   :  { %1238 = vmatpush1.bf16.msra.mxu1 %v12441_v30 }
 0x4b3   :  { %1239 = vmatprep.subr.bf16.mxu1 %v12446_v31 }
 0x4b6   :  { %1240 = vmatpush1.bf16.msra.mxu1 %v12444_v32 }
 0x4b7   :  { %1241 = vmatprep.subr.bf16.mxu1 %v12449_v33 }
 0x4ba   :  { %1242 = vmatpush1.bf16.msra.mxu1 %v12447_v34 }
 0x4bb   :  { %12104 = vmatprep.subr.bf16.mxu1 %v13822_v35 }
 0x4bd   :  { %1260 = vmatmul.mubr.bf16.vlgmr.msra.gmra.mxu1 %v14220_v50 }
 0x4be   :  { %1269 = vmatprep.mubr.bf16.mxu1 %v13821_v40 }
 0x4c5   :  { %1270 = vmatmul.mubr.bf16.gmra.mxu1 %v14243_v8 }
 0x4c6   :  { %12106 = vmatprep.mubr.msk.bf16.mxu1 %vm13823_vm0, %v13822_v35 }
 0x555   :  { %v816_v36 = vpop.f32.mrf.mxu1 }
 0x557   :  { %v12096_v37 = vpop.f32.mrf.mxu1 }
 0x559   :  { %v819_v61 = vpop.f32.mrf.mxu1 }
 0x55a   :  { %v14439_v60 = vpack.c.bf16 %v819_v61, %v816_v36 }
 0x55b   :  { %v12097_v62 = vpop.f32.mrf.mxu1 }
 0x55d   :  { %v860_v38 = vpop.f32.mrf.mxu1 }
 0x55f   :  { %v12102_v48 = vpop.f32.mrf.mxu1 }
 0x561   :  { %v863_v39 = vpop.f32.mrf.mxu1 }
 0x562   :  { %v14441_v41 = vpack.c.bf16 %v863_v39, %v860_v38 }
 0x563   :  { %v12103_v42 = vpop.f32.mrf.mxu1 }
 0x57d   :  { %v1261_v2 = vpop.f32.mrf.mxu1 }
 0x57e   :  { %v1262_v56 = vadd.f32 %v1261_v2, %v1208_v49 }
 0x57f   :  { %v1263_v0 = vpop.f32.mrf.mxu1 }
 0x580   :  { %v1264_v45 = vadd.f32 %v1263_v0, %v1210_v51 }
 0x581   :  { %v1265_v55 = vpop.f32.mrf.mxu1 }
 0x582   :  { %v1266_v58 = vadd.f32 %v1265_v55, %v1212_v52 }
 0x583   :  { %v1267_v3 = vpop.f32.mrf.mxu1 }
 0x584   :  { %v1280_v4 = vpack.c.bf16 %v1266_v58, %v1262_v56  ;;  %v1268_v27 = vadd.f32 %v1267_v3, %v1214_v1 }
 0x585   :  { %v1271_v5 = vpop.f32.mrf.mxu1 }
 0x586   :  { %1285 = vrot.lane.b32.xlu0 %v1280_v4, %s13824_s20  ;;  %v1272_v15 = vadd.f32 %v1271_v5, %v1218_v54  ;;  %v1281_v28 = vpack.c.bf16 %v1268_v27, %v1264_v45  ;;  %v12450_v45 = vld [vmem:[%s17048_s4 + $0xa8] ss:$12 sps:$4 sm:$0xff]  }
 0x587   :  { %v1273_v13 = vpop.f32.mrf.mxu1 }
 0x588   :  { %v1274_v21 = vadd.f32 %v1273_v13, %v1220_v63 }
 0x589   :  { %v1275_v14 = vpop.f32.mrf.mxu1 }
 0x58a   :  { %v1276_v18 = vadd.f32 %v1275_v14, %v1222_v7 }
 0x58b   :  { %v1277_v20 = vpop.f32.mrf.mxu1 }
 0x58c   :  { %v1282_v22 = vpack.c.bf16 %v1276_v18, %v1272_v15  ;;  %v1278_v16 = vadd.f32 %v1277_v20, %v1224_v19  ;;  %v12452_v20 = vld [vmem:[%s17048_s4 + $0xac] ss:$12 sps:$4 sm:$0xff]  }
 0x58e   :  { %v1283_v59 = vpack.c.bf16 %v1278_v16, %v1274_v21  ;;  %1335 = vrot.lane.b32.xlu1 %v1282_v22, %s13824_s20  ;;  %v12459_v21 = vld [vmem:[%s17048_s4 + $0xb0] ss:$12 sps:$4 sm:$0xff]  }
 0x590   :  { %12123 = vmatpush3.bf16.msra.mxu0 %v1283_v59 }
 0x591   :  { %12128 = vmatprep.subr.bf16.mxu0 %v12459_v21 }
 0x5f8   :  { %v1286_v24 = vpop.permute.xlu0 %1285 }
 0x5f9   :  { %v1291_v47 = vsel %vm626_vm1, %v1286_v24, 0 }
 0x5fa   :  { %12105 = vmatpush3.bf16.xpose.msra.mxu1 %v1291_v47 }
 0x5fb   :  { %12110 = vmatprep.subr.bf16.mxu1 %v13822_v35 }
 0x600   :  { %v1336_v25 = vpop.permute.xlu1 %1335 }
 0x601   :  { %v1341_v26 = vsel %vm626_vm1, %v1336_v25, 0  ;;  %12107 = vmatmul.mubr.msk.bf16.vlgmr.msra.gmra.mxu1 %vm626_vm1, %v1280_v4 }
 0x602   :  { %12111 = vmatpush3.bf16.xpose.msra.mxu1 %v1341_v26  ;;  %12112 = vmatprep.mubr.msk.bf16.mxu1 %vm13823_vm0, %v13822_v35 }
 0x603   :  { %12116 = vmatprep.subr.bf16.mxu1 %v13822_v35 }
 0x609   :  { %12113 = vmatmul.mubr.msk.bf16.vlgmr.msra.gmra.mxu1 %vm626_vm1, %v1282_v22 }
 0x60a   :  { %12117 = vmatpush3.bf16.msra.mxu1 %v1281_v28  ;;  %12118 = vmatprep.mubr.msk.bf16.mxu1 %vm13823_vm0, %v13822_v35 }
 0x60b   :  { %1619 = vmatprep.subr.bf16.mxu1 %v12452_v20  ;;  %v12481_v20 = vld [vmem:[%s17047_s3 + $0x370] ss:$8 sps:$4 sm:$0xff]  }
 0x6c1   :  { %v1327_v46 = vpop.f32.mrf.mxu1 }
 0x6c2   :  { %v1384_v44 = vsel %vm14353_vm2, %v1327_v46, -inf  ;;  %v12455_v46 = vld [vmem:[%s17048_s4 + $0x94] ss:$12 sps:$4 sm:$0xff]  }
 0x6c3   :  { %v12108_v29 = vpop.f32.mrf.mxu1  ;;  %v1388_v30 = vsel %vm732_vm3, %v1384_v44, -inf }
 0x6c4   :  { %1389 = vmax.xlane.f32.xlu1 %v1388_v30  ;;  %v12453_v29 = vld [vmem:[%s17048_s4 + $0x90] ss:$12 sps:$4 sm:$0xff]  }
 0x6c5   :  { %v1330_v31 = vpop.f32.mrf.mxu1  ;;  %v12458_v30 = vld [vmem:[%s17048_s4 + $0x7c] ss:$12 sps:$4 sm:$0xff]  }
 0x6c6   :  { %v1385_v32 = vsel %vm14361_vm4, %v1330_v31, -inf }
 0x6c7   :  { %v12109_v33 = vpop.f32.mrf.mxu1  ;;  %v1391_v34 = vsel %vm732_vm3, %v1385_v32, -inf }
 0x6c8   :  { %1392 = vmax.xlane.f32.xlu0 %v1391_v34  ;;  %v12456_v34 = vld [vmem:[%s17048_s4 + $0x78] ss:$12 sps:$4 sm:$0xff]  }
 0x6c9   :  { %v1377_v36 = vpop.f32.mrf.mxu1 }
 0x6ca   :  { %v1386_v37 = vsel %vm14353_vm2, %v1377_v36, -inf }
 0x6cb   :  { %v12114_v61 = vpop.f32.mrf.mxu1  ;;  %v1394_v62 = vsel %vm732_vm3, %v1386_v37, -inf }
 0x6cc   :  { %1395 = vmax.xlane.f32.xlu0 %v1394_v62  ;;  %v12462_v61 = vld [vmem:[%s17048_s4 + $0x64] ss:$12 sps:$4 sm:$0xff]  }
 0x6cd   :  { %v1380_v38 = vpop.f32.mrf.mxu1  ;;  %v12463_v62 = vld [vmem:[%s17048_s4 + $0x98] ss:$12 sps:$4 sm:$0xff]  }
 0x6ce   :  { %v1387_v48 = vsel %vm14361_vm4, %v1380_v38, -inf  ;;  %v12464_v38 = vld [vmem:[%s17048_s4 + $0x80] ss:$12 sps:$4 sm:$0xff]  }
 0x6cf   :  { %v12115_v39 = vpop.f32.mrf.mxu1  ;;  %v1397_v42 = vsel %vm732_vm3, %v1387_v48, -inf }
 0x6d0   :  { %1398 = vmax.xlane.f32.xlu1 %v1397_v42  ;;  %v12468_v39 = vld [vmem:[%s17048_s4 + $0x68] ss:$12 sps:$4 sm:$0xff]   ;;  %v12475_v42 = vld [vmem:[%s17048_s4 + $0x50] ss:$12 sps:$4 sm:$0xff]  }
 0x74d   :  { %v1390_v49 = vpop.xlane.xlu1 %1389 }
 0x74e   :  { %v1400_v51 = vsub.f32 %v1384_v44, %v1390_v49 }
 0x750   :  { %v1404_v52 = vmul.f32 1.442695, %v1400_v51 }
 0x751   :  { %v1393_v1 = vpop.xlane.xlu0 %1392 }
 0x752   :  { %13674 = vpow2.f32 %v1404_v52  ;;  %v1401_v2 = vsub.f32 %v1385_v32, %v1393_v1  ;;  %v12465_v1 = vld [vmem:[%s17048_s4 + $0x48] ss:$12 sps:$4 sm:$0xff]  }
 0x754   :  { %v1406_v54 = vmul.f32 1.442695, %v1401_v2 }
 0x755   :  { %v1396_v0 = vpop.xlane.xlu0 %1395 }
 0x756   :  { %13676 = vpow2.f32 %v1406_v54  ;;  %v1402_v55 = vsub.f32 %v1386_v37, %v1396_v0  ;;  %v12460_v37 = vld [vmem:[%s17048_s4 + $0x60] ss:$12 sps:$4 sm:$0xff]  }
 0x757   :  { %v12471_v54 = vld [vmem:[%s17048_s4 + $0x34] ss:$12 sps:$4 sm:$0xff]  }
 0x758   :  { %v1408_v56 = vmul.f32 1.442695, %v1402_v55 }
 0x759   :  { %v1399_v58 = vpop.xlane.xlu1 %1398 }
 0x75a   :  { %13678 = vpow2.f32 %v1408_v56  ;;  %v1403_v63 = vsub.f32 %v1387_v48, %v1399_v58  ;;  %v12467_v48 = vld [vmem:[%s17048_s4 + $0x4c] ss:$12 sps:$4 sm:$0xff]   ;;  %v12469_v56 = vld [vmem:[%s17048_s4 + $0x30] ss:$12 sps:$4 sm:$0xff]  }
 0x75b   :  { %v12474_v58 = vld [vmem:[%s17048_s4 + $0x1c] ss:$12 sps:$4 sm:$0xff]  }
 0x75c   :  { %v1410_v3 = vmul.f32 1.442695, %v1403_v63 }
 0x75e   :  { %13680 = vpow2.f32 %v1410_v3 }
 0x75f   :  { %v13675_v4 = vpop.eup %13674 }
 0x760   :  { %v1412_v5 = vsel %vm732_vm3, %v13675_v4, 0.0 }
 0x761   :  { %1413 = vadd.xlane.f32.xlu0 %v1412_v5 }
 0x763   :  { %v13677_v7 = vpop.eup %13676 }
 0x764   :  { %v1415_v13 = vsel %vm732_vm3, %v13677_v7, 0.0 }
 0x765   :  { %1416 = vadd.xlane.f32.xlu1 %v1415_v13 }
 0x767   :  { %v13679_v14 = vpop.eup %13678 }
 0x768   :  { %v1418_v15 = vsel %vm732_vm3, %v13679_v14, 0.0 }
 0x769   :  { %1419 = vadd.xlane.f32.xlu0 %v1418_v15  ;;  %v12476_v15 = vld [vmem:[%s17048_s4] ss:$12 sps:$4 sm:$0xff]  }
 0x76b   :  { %v13681_v18 = vpop.eup %13680 }
 0x76c   :  { %v1421_v19 = vsel %vm732_vm3, %v13681_v18, 0.0 }
 0x76d   :  { %1422 = vadd.xlane.f32.xlu1 %v1421_v19  ;;  %v12483_v19 = vld [vmem:[%s17047_s3 + $0x374] ss:$8 sps:$4 sm:$0xff]  }
 0x7ea   :  { %v1414_v22 = vpop.xlane.xlu0 %1413 }
 0x7eb   :  { %13682 = vrcp.f32 %v1414_v22  ;;  %v12487_v22 = vld [vmem:[%s17047_s3 + $0x364] ss:$8 sps:$4 sm:$0xff]  }
 0x7ee   :  { %v1417_v16 = vpop.xlane.xlu1 %1416 }
 0x7ef   :  { %13684 = vrcp.f32 %v1417_v16  ;;  %v12485_v16 = vld [vmem:[%s17047_s3 + $0x360] ss:$8 sps:$4 sm:$0xff]  }
 0x7f2   :  { %v1420_v59 = vpop.xlane.xlu0 %1419 }
 0x7f3   :  { %13686 = vrcp.f32 %v1420_v59  ;;  %v12490_v59 = vld [vmem:[%s17047_s3 + $0x354] ss:$8 sps:$4 sm:$0xff]  }
 0x7f6   :  { %v1423_v24 = vpop.xlane.xlu1 %1422 }
 0x7f7   :  { %13688 = vrcp.f32 %v1423_v24  ;;  %v12493_v24 = vld [vmem:[%s17047_s3 + $0x474] ss:$8 sps:$4 sm:$0xff]  }
 0x7f8   :  { %v13683_v47 = vpop.eup %13682 }
 0x7f9   :  { %v1428_v26 = vmul.f32 %v13683_v47, %v13675_v4  ;;  %v12472_v4 = vld [vmem:[%s17048_s4 + $0x18] ss:$12 sps:$4 sm:$0xff]  }
 0x7fa   :  { %v12491_v47 = vld [vmem:[%s17047_s3 + $0x470] ss:$8 sps:$4 sm:$0xff]  }
 0x7fc   :  { %v13685_v25 = vpop.eup %13684 }
 0x7fd   :  { %v1429_v27 = vmul.f32 %v13685_v25, %v13677_v7  ;;  %v12478_v7 = vld [vmem:[%s17048_s4 + $0x4] ss:$12 sps:$4 sm:$0xff]  }
 0x7fe   :  { %v12496_v25 = vld [vmem:[%s17047_s3 + $0x344] ss:$8 sps:$4 sm:$0xff]  }
 0x7ff   :  { %v1432_v28 = vpack.c.bf16 %v1429_v27, %v1428_v26  ;;  %v12499_v26 = vld [vmem:[%s17047_s3 + $0x464] ss:$8 sps:$4 sm:$0xff]   ;;  %v12494_v27 = vld [vmem:[%s17047_s3 + $0x340] ss:$8 sps:$4 sm:$0xff]  }
 0x800   :  { %v13687_v44 = vpop.eup %13686 }
 0x801   :  { %12119 = vmatmul.mubr.msk.bf16.vlgmr.msra.gmra.mxu1 %vm732_vm3, %v1432_v28  ;;  %v1430_v32 = vmul.f32 %v13687_v44, %v13679_v14  ;;  %v12479_v14 = vld [vmem:[%s17048_s4 + $0x38] ss:$12 sps:$4 sm:$0xff]   ;;  %v12502_v28 = vld [vmem:[%s17047_s3 + $0x334] ss:$8 sps:$4 sm:$0xff]  }
 0x802   :  { %1620 = vmatpush1.bf16.msra.mxu1 %v12450_v45  ;;  %1643 = vmatprep.mubr.bf16.mxu1 %v13821_v40  ;;  %v12497_v45 = vld [vmem:[%s17047_s3 + $0x460] ss:$8 sps:$4 sm:$0xff]   ;;  %v12503_v44 = vld [vmem:[%s17047_s3 + $0x450] ss:$8 sps:$4 sm:$0xff]  }
 0x803   :  { %1621 = vmatprep.subr.bf16.mxu1 %v12455_v46  ;;  %v12500_v46 = vld [vmem:[%s17047_s3 + $0x330] ss:$8 sps:$4 sm:$0xff]  }
 0x804   :  { %v13689_v31 = vpop.eup %13688 }
 0x805   :  { %v1431_v33 = vmul.f32 %v13689_v31, %v13681_v18  ;;  %v12480_v18 = vld [vmem:[%s17048_s4 + $0x20] ss:$12 sps:$4 sm:$0xff]  }
 0x806   :  { %1622 = vmatpush1.bf16.msra.mxu1 %v12453_v29  ;;  %v12508_v29 = vld [vmem:[%s17047_s3 + $0x324] ss:$8 sps:$4 sm:$0xff]   ;;  %v12506_v31 = vld [vmem:[%s17047_s3 + $0x320] ss:$8 sps:$4 sm:$0xff]  }
 0x807   :  { %v1433_v36 = vpack.c.bf16 %v1431_v33, %v1430_v32  ;;  %1623 = vmatprep.subr.bf16.mxu1 %v12458_v30  ;;  %v12511_v30 = vld [vmem:[%s17047_s3 + $0x444] ss:$8 sps:$4 sm:$0xff]   ;;  %v12509_v32 = vld [vmem:[%s17047_s3 + $0x440] ss:$8 sps:$4 sm:$0xff]   ;;  %v12514_v33 = vld [vmem:[%s17047_s3 + $0x314] ss:$8 sps:$4 sm:$0xff]  }
 0x809   :  { %12125 = vmatmul.mubr.msk.bf16.vlgmr.msra.gmra.mxu0 %vm732_vm3, %v1433_v36  ;;  %v12512_v36 = vld [vmem:[%s17047_s3 + $0x310] ss:$8 sps:$4 sm:$0xff]  }
 0x80a   :  { %1624 = vmatpush1.bf16.msra.mxu1 %v12456_v34  ;;  %12129 = vmatpush3.bf16.msra.mxu0 %v12459_v21  ;;  %v12484_v21 = vld [vmem:[%s17048_s4 + $0x8] ss:$12 sps:$4 sm:$0xff]  }
 0x80b   :  { %1625 = vmatprep.subr.bf16.mxu1 %v12462_v61  ;;  %12130 = vmatprep.subr.bf16.mxu0 %v12463_v62  ;;  %v12517_v34 = vld [vmem:[%s17047_s3 + $0x434] ss:$8 sps:$4 sm:$0xff]   ;;  %v12520_v61 = vld [vmem:[%s17047_s3 + $0x304] ss:$8 sps:$4 sm:$0xff]  }
 0x80e   :  { %1626 = vmatpush1.bf16.msra.mxu1 %v12460_v37  ;;  %12131 = vmatpush3.bf16.msra.mxu0 %v12463_v62  ;;  %v12515_v37 = vld [vmem:[%s17047_s3 + $0x430] ss:$8 sps:$4 sm:$0xff]   ;;  %v12523_v62 = vld [vmem:[%s17047_s3 + $0x424] ss:$8 sps:$4 sm:$0xff]  }
 0x80f   :  { %12132 = vmatprep.subr.bf16.mxu0 %v12464_v38  ;;  %1791 = vmatprep.subr.bf16.mxu1 %v12467_v48  ;;  %v12521_v48 = vld [vmem:[%s17047_s3 + $0x420] ss:$8 sps:$4 sm:$0xff]  }
 0x812   :  { %12133 = vmatpush3.bf16.msra.mxu0 %v12464_v38  ;;  %v12518_v38 = vld [vmem:[%s17047_s3 + $0x300] ss:$8 sps:$4 sm:$0xff]  }
 0x813   :  { %12134 = vmatprep.subr.bf16.mxu0 %v12468_v39 }
 0x816   :  { %12135 = vmatpush3.bf16.msra.mxu0 %v12468_v39  ;;  %v12526_v39 = vld [vmem:[%s17047_s3 + $0x3f4] ss:$8 sps:$4 sm:$0xff]  }
 0x817   :  { %12140 = vmatprep.subr.bf16.mxu0 %v12475_v42 }
 0x8c1   :  { %v1471_v49 = vpop.f32.mrf.mxu1 }
 0x8c3   :  { %v12120_v51 = vpop.f32.mrf.mxu1 }
 0x8c4   :  { %v12527_v51 = vld [vmem:[%s17047_s3 + $0x410] ss:$8 sps:$4 sm:$0xff]  }
 0x8c5   :  { %v1474_v52 = vpop.f32.mrf.mxu1 }
 0x8c6   :  { %v1522_v2 = vpack.c.bf16 %v1474_v52, %v1471_v49  ;;  %v12524_v49 = vld [vmem:[%s17047_s3 + $0x3f0] ss:$8 sps:$4 sm:$0xff]   ;;  %v12532_v52 = vld [vmem:[%s17047_s3 + $0x3e4] ss:$8 sps:$4 sm:$0xff]  }
 0x8c7   :  { %v12121_v0 = vpop.f32.mrf.mxu1 }
 0x8c8   :  { %10704 = vmatmul.mubr.msk.bf16.vlgmr.msra.gmra.mxu1 %vm626_vm1, %v1522_v2  ;;  %12136 = vmatprep.mubr.msk.bf16.mxu0 %vm626_vm1, %v1522_v2  ;;  %v12530_v2 = vld [vmem:[%s17047_s3 + $0x3e0] ss:$8 sps:$4 sm:$0xff]   ;;  %v12538_v0 = vld [vmem:[%s17047_s3 + $0x3d4] ss:$8 sps:$4 sm:$0xff]  }
 0x8c9   :  { %1792 = vmatpush1.bf16.msra.mxu1 %v12465_v1  ;;  %v1515_v55 = vpop.f32.mrf.mxu0  ;;  %1653 = vmatprep.mubr.bf16.mxu1 %v13821_v40  ;;  %v12535_v1 = vld [vmem:[%s17047_s3 + $0x404] ss:$8 sps:$4 sm:$0xff]  }
 0x8ca   :  { %1793 = vmatprep.subr.bf16.mxu1 %v12471_v54  ;;  %v12533_v54 = vld [vmem:[%s17047_s3 + $0x400] ss:$8 sps:$4 sm:$0xff]  }
 0x8cb   :  { %v12126_v63 = vpop.f32.mrf.mxu0 }
 0x8cc   :  { %v12544_v63 = vld [vmem:[%s17047_s3 + $0x3b4] ss:$8 sps:$4 sm:$0xff]  }
 0x8cd   :  { %1794 = vmatpush1.bf16.msra.mxu1 %v12469_v56  ;;  %v1518_v3 = vpop.f32.mrf.mxu0  ;;  %v12541_v56 = vld [vmem:[%s17047_s3 + $0x3c4] ss:$8 sps:$4 sm:$0xff]  }
 0x8ce   :  { %v1523_v5 = vpack.c.bf16 %v1518_v3, %v1515_v55  ;;  %1795 = vmatprep.subr.bf16.mxu1 %v12474_v58  ;;  %v12536_v55 = vld [vmem:[%s17047_s3 + $0x3d0] ss:$8 sps:$4 sm:$0xff]   ;;  %v12539_v58 = vld [vmem:[%s17047_s3 + $0x3c0] ss:$8 sps:$4 sm:$0xff]  }
 0x8cf   :  { %v12127_v13 = vpop.f32.mrf.mxu0  ;;  %v12542_v3 = vld [vmem:[%s17047_s3 + $0x3b0] ss:$8 sps:$4 sm:$0xff]  }
 0x8d0   :  { %10705 = vmatmul.mubr.msk.bf16.gmra.mxu1 %vm626_vm1, %v1523_v5  ;;  %12137 = vmatmul.mubr.msk.bf16.vlgmr.msra.gmra.mxu0 %vm626_vm1, %v1523_v5  ;;  %v12545_v5 = vld [vmem:[%s17047_s3 + $0x3a0] ss:$8 sps:$4 sm:$0xff]   ;;  %v12548_v13 = vld [vmem:[%s17047_s3 + $0x390] ss:$8 sps:$4 sm:$0xff]  }
 0x8d1   :  { %1796 = vmatpush1.bf16.msra.mxu1 %v12472_v4  ;;  %12141 = vmatpush3.bf16.msra.mxu0 %v12475_v42  ;;  %v12529_v42 = vld [vmem:[%s17047_s3 + $0x414] ss:$8 sps:$4 sm:$0xff]   ;;  %v12547_v4 = vld [vmem:[%s17047_s3 + $0x3a4] ss:$8 sps:$4 sm:$0xff]  }
 0x8d2   :  { %12148 = vmatprep.mubr.msk.bf16.mxu0 %vm626_vm1, %v14439_v60  ;;  %1797 = vmatprep.subr.bf16.mxu1 %v12478_v7  ;;  %v12550_v7 = vld [vmem:[%s17047_s3 + $0x394] ss:$8 sps:$4 sm:$0xff]  }
 0x8d3   :  { %12142 = vmatprep.subr.bf16.mxu0 %v12479_v14  ;;  %1815 = vmatprep.mubr.bf16.mxu1 %v13821_v40 }
 0x8d5   :  { %1798 = vmatpush1.bf16.msra.mxu1 %v12476_v15  ;;  %12143 = vmatpush3.bf16.msra.mxu0 %v12479_v14  ;;  %v12553_v14 = vld [vmem:[%s17047_s3 + $0x384] ss:$8 sps:$4 sm:$0xff]   ;;  %v12551_v15 = vld [vmem:[%s17047_s3 + $0x380] ss:$8 sps:$4 sm:$0xff]  }
 0x8d6   :  { %12144 = vmatprep.subr.bf16.mxu0 %v12480_v18  ;;  %2174 = vmatprep.subr.bf16.mxu1 %v12483_v19 }
 0x8d8   :  { %10720 = vmatmul.mubr.msk.bf16.vlgmr.msra.gmra.mxu1 %vm626_vm1, %v14439_v60  ;;  %v12488_v60 = vld [vmem:[%s17047_s3 + $0x350] ss:$8 sps:$4 sm:$0xff]  }
 0x8d9   :  { %12145 = vmatpush3.bf16.msra.mxu0 %v12480_v18  ;;  %2175 = vmatpush1.bf16.msra.mxu1 %v12481_v20 }
 0x8da   :  { %12146 = vmatprep.subr.bf16.mxu0 %v12484_v21  ;;  %2176 = vmatprep.subr.bf16.mxu1 %v12487_v22 }
 0x8db   :  { %1825 = vmatprep.mubr.bf16.mxu1 %v13821_v40 }
 0x8dd   :  { %12147 = vmatpush3.bf16.msra.mxu0 %v12484_v21  ;;  %2177 = vmatpush1.bf16.msra.mxu1 %v12485_v16 }
 0x8de   :  { %2178 = vmatprep.subr.bf16.mxu1 %v12490_v59  ;;  %2227 = vmatprep.subr.bf16.mxu0 %v12493_v24 }
 0x8e0   :  { %12149 = vmatmul.mubr.msk.bf16.vlgmr.msra.gmra.mxu0 %vm626_vm1, %v14441_v41  ;;  %10721 = vmatmul.mubr.msk.bf16.gmra.mxu1 %vm626_vm1, %v14441_v41  ;;  %v12505_v41 = vld [vmem:[%s17047_s3 + $0x454] ss:$8 sps:$4 sm:$0xff]  }
 0x8e1   :  { %2179 = vmatpush1.bf16.msra.mxu1 %v12488_v60  ;;  %2228 = vmatpush1.bf16.msra.mxu0 %v12491_v47 }
 0x8e2   :  { %2206 = vmatprep.mubr.bf16.mxu1 %v14218_v43  ;;  %2180 = vmatprep.subr.bf16.mxu1 %v12496_v25 }
 0x8e3   :  { %2229 = vmatprep.subr.bf16.mxu0 %v12499_v26  ;;  %2259 = vmatprep.mubr.bf16.mxu0 %v13821_v40 }
 0x8e5   :  { %2181 = vmatpush1.bf16.msra.mxu1 %v12494_v27  ;;  %2230 = vmatpush1.bf16.msra.mxu0 %v12497_v45 }
 0x8e6   :  { %2182 = vmatprep.subr.bf16.mxu1 %v12502_v28  ;;  %2231 = vmatprep.subr.bf16.mxu0 %v12505_v41 }
 0x8e9   :  { %2183 = vmatpush1.bf16.msra.mxu1 %v12500_v46  ;;  %2232 = vmatpush1.bf16.msra.mxu0 %v12503_v44 }
 0x8ea   :  { %2184 = vmatprep.subr.bf16.mxu1 %v12508_v29  ;;  %2233 = vmatprep.subr.bf16.mxu0 %v12511_v30 }
 0x8ed   :  { %2185 = vmatpush1.bf16.msra.mxu1 %v12506_v31  ;;  %2234 = vmatpush1.bf16.msra.mxu0 %v12509_v32 }
 0x8ee   :  { %2186 = vmatprep.subr.bf16.mxu1 %v12514_v33  ;;  %2235 = vmatprep.subr.bf16.mxu0 %v12517_v34 }
 0x8f1   :  { %2187 = vmatpush1.bf16.msra.mxu1 %v12512_v36  ;;  %2236 = vmatpush1.bf16.msra.mxu0 %v12515_v37 }
 0x8f2   :  { %2188 = vmatprep.subr.bf16.mxu1 %v12520_v61  ;;  %2237 = vmatprep.subr.bf16.mxu0 %v12523_v62 }
 0x8f5   :  { %2189 = vmatpush1.bf16.msra.mxu1 %v12518_v38  ;;  %2238 = vmatpush1.bf16.msra.mxu0 %v12521_v48 }
 0x8f6   :  { %2190 = vmatprep.subr.bf16.mxu1 %v12526_v39  ;;  %2239 = vmatprep.subr.bf16.mxu0 %v12529_v42 }
 0x8f9   :  { %2191 = vmatpush2.bf16.msra.mxu1 %v12524_v49  ;;  %2240 = vmatpush1.bf16.msra.mxu0 %v12527_v51 }
 0x8fa   :  { %2192 = vmatprep.subr.bf16.mxu1 %v12532_v52  ;;  %2241 = vmatprep.subr.bf16.mxu0 %v12535_v1 }
 0x8fd   :  { %2193 = vmatpush2.bf16.msra.mxu1 %v12530_v2  ;;  %2242 = vmatpush1.bf16.msra.mxu0 %v12533_v54 }
 0x8fe   :  { %2194 = vmatprep.subr.bf16.mxu1 %v12538_v0  ;;  %12152 = vmatprep.subr.bf16.mxu0 %v13822_v35 }
 0x900   :  { %2260 = vmatmul.mubr.bf16.vlgmr.msra.gmra.mxu0 %v14220_v50 }
 0x901   :  { %2195 = vmatpush2.bf16.msra.mxu1 %v12536_v55  ;;  %2269 = vmatprep.mubr.bf16.mxu0 %v13821_v40 }
 0x902   :  { %2196 = vmatprep.subr.bf16.mxu1 %v12541_v56 }
 0x905   :  { %2197 = vmatpush2.bf16.msra.mxu1 %v12539_v58 }
 0x906   :  { %2198 = vmatprep.subr.bf16.mxu1 %v12544_v63 }
 0x908   :  { %2270 = vmatmul.mubr.bf16.gmra.mxu0 %v14243_v8 }
 0x909   :  { %2199 = vmatpush2.bf16.msra.mxu1 %v12542_v3  ;;  %12154 = vmatprep.mubr.msk.bf16.mxu0 %vm13823_vm0, %v13822_v35 }
 0x90a   :  { %2200 = vmatprep.subr.bf16.mxu1 %v12547_v4 }
 0x90d   :  { %2201 = vmatpush2.bf16.msra.mxu1 %v12545_v5 }
 0x90e   :  { %2202 = vmatprep.subr.bf16.mxu1 %v12550_v7 }
 0x911   :  { %2203 = vmatpush2.bf16.msra.mxu1 %v12548_v13 }
 0x912   :  { %2204 = vmatprep.subr.bf16.mxu1 %v12553_v14 }
 0x915   :  { %2205 = vmatpush2.bf16.msra.mxu1 %v12551_v15 }
 0x918   :  { %2207 = vmatmul.mubr.bf16.vlgmr.msra.gmra.mxu1 %v14222_v53 }
 0x919   :  { %2216 = vmatprep.mubr.bf16.mxu1 %v14234_v57 }
 0x920   :  { %2217 = vmatmul.mubr.bf16.gmra.mxu1 %v14245_v11 }
 0x921   :  { %2643 = vmatprep.mubr.bf16.mxu1 %v13821_v40 }
 0x988   :  { %v1645_v18 = vpop.f32.mrf.mxu1 }
 0x98a   :  { %v1647_v19 = vpop.f32.mrf.mxu1 }
 0x98c   :  { %v1649_v20 = vpop.f32.mrf.mxu1 }
 0x98e   :  { %v14717_v21 = vpop.f32.mrf.mxu1 }
 0x990   :  { %v1655_v22 = vpop.f32.mrf.mxu1  ;;  %v12138_v16 = vpop.f32.mrf.mxu0 }
 0x992   :  { %v1657_v59 = vpop.f32.mrf.mxu1  ;;  %v1698_v60 = vpop.f32.mrf.mxu0 }
 0x994   :  { %v1659_v24 = vpop.f32.mrf.mxu1  ;;  %v12139_v27 = vpop.f32.mrf.mxu0 }
 0x996   :  { %v14719_v47 = vpop.f32.mrf.mxu1  ;;  %v14727_v44 = vpop.f32.mrf.mxu0 }
 0x998   :  { %v1817_v25 = vpop.f32.mrf.mxu1 }
 0x999   :  { %v14721_v26 = vadd.f32 %v1817_v25, %v1645_v18 }
 0x99a   :  { %v1819_v45 = vpop.f32.mrf.mxu1 }
 0x99b   :  { %v14723_v28 = vadd.f32 %v1819_v45, %v1647_v19 }
 0x99c   :  { %v1821_v41 = vpop.f32.mrf.mxu1 }
 0x99d   :  { %v14725_v46 = vadd.f32 %v1821_v41, %v1649_v20 }
 0x99e   :  { %v14729_v29 = vpop.f32.mrf.mxu1 }
 0x9a0   :  { %v12150_v30 = vpop.f32.mrf.mxu0  ;;  %v1827_v31 = vpop.f32.mrf.mxu1 }
 0x9a1   :  { %v14731_v32 = vadd.f32 %v12150_v30, %v12138_v16  ;;  %v14733_v33 = vadd.f32 %v1827_v31, %v1655_v22 }
 0x9a2   :  { %v1870_v34 = vpop.f32.mrf.mxu0  ;;  %v1829_v36 = vpop.f32.mrf.mxu1 }
 0x9a3   :  { %v14735_v37 = vadd.f32 %v1870_v34, %v1698_v60  ;;  %v14737_v61 = vadd.f32 %v1829_v36, %v1657_v59 }
 0x9a4   :  { %v12151_v62 = vpop.f32.mrf.mxu0  ;;  %v1831_v38 = vpop.f32.mrf.mxu1 }
 0x9a5   :  { %v14739_v48 = vadd.f32 %v12151_v62, %v12139_v27  ;;  %v14741_v39 = vadd.f32 %v1831_v38, %v1659_v24 }
 0x9a6   :  { %v14743_v42 = vpop.f32.mrf.mxu0  ;;  %v14745_v1 = vpop.f32.mrf.mxu1 }
 0x9c0   :  { %v2261_v49 = vpop.f32.mrf.mxu0 }
 0x9c2   :  { %v2263_v51 = vpop.f32.mrf.mxu0 }
 0x9c4   :  { %v2265_v52 = vpop.f32.mrf.mxu0 }
 0x9c6   :  { %v2267_v2 = vpop.f32.mrf.mxu0 }
 0x9c8   :  { %v2271_v56 = vpop.f32.mrf.mxu0 }
 0x9ca   :  { %v2273_v7 = vpop.f32.mrf.mxu0 }
 0x9cc   :  { %v2275_v18 = vpop.f32.mrf.mxu0 }
 0x9ce   :  { %v14762_v41 = vpop.f32.mrf.mxu0 }
 0x9d8   :  { %v2208_v54 = vpop.f32.mrf.mxu1 }
 0x9d9   :  { %v2262_v63 = vadd.f32 %v2261_v49, %v2208_v54 }
 0x9da   :  { %v2210_v0 = vpop.f32.mrf.mxu1 }
 0x9db   :  { %v2264_v55 = vadd.f32 %v2263_v51, %v2210_v0 }
 0x9dc   :  { %v2212_v58 = vpop.f32.mrf.mxu1 }
 0x9dd   :  { %v2266_v3 = vadd.f32 %v2265_v52, %v2212_v58 }
 0x9de   :  { %v2214_v4 = vpop.f32.mrf.mxu1 }
 0x9df   :  { %v2280_v5 = vpack.c.bf16 %v2266_v3, %v2262_v63  ;;  %v2268_v27 = vadd.f32 %v2267_v2, %v2214_v4 }
 0x9e0   :  { %v2218_v13 = vpop.f32.mrf.mxu1 }
 0x9e1   :  { %2285 = vrot.lane.b32.xlu0 %v2280_v5, %s13824_s20  ;;  %v2272_v20 = vadd.f32 %v2271_v56, %v2218_v13  ;;  %v2281_v45 = vpack.c.bf16 %v2268_v27, %v2264_v55 }
 0x9e2   :  { %v2220_v14 = vpop.f32.mrf.mxu1 }
 0x9e3   :  { %v14748_v15 = vadd.f32 %v2273_v7, %v2220_v14 }
 0x9e4   :  { %v2222_v19 = vpop.f32.mrf.mxu1 }
 0x9e5   :  { %v2276_v22 = vadd.f32 %v2275_v18, %v2222_v19 }
 0x9e7   :  { %v2282_v16 = vpack.c.bf16 %v2276_v22, %v2272_v20 }
 0x9e9   :  { %2335 = vrot.lane.b32.xlu1 %v2282_v16, %s13824_s20 }
 0xa53   :  { %v2286_v59 = vpop.permute.xlu0 %2285 }
 0xa54   :  { %v2291_v24 = vsel %vm626_vm1, %v2286_v59, 0 }
 0xa55   :  { %12153 = vmatpush3.bf16.xpose.msra.mxu0 %v2291_v24 }
 0xa56   :  { %12158 = vmatprep.subr.bf16.mxu0 %v13822_v35 }
 0xa5b   :  { %v2336_v60 = vpop.permute.xlu1 %2335 }
 0xa5c   :  { %v2341_v25 = vsel %vm626_vm1, %v2336_v60, 0  ;;  %12155 = vmatmul.mubr.msk.bf16.vlgmr.msra.gmra.mxu0 %vm626_vm1, %v2280_v5 }
 0xa5d   :  { %12159 = vmatpush3.bf16.xpose.msra.mxu0 %v2341_v25  ;;  %12160 = vmatprep.mubr.msk.bf16.mxu0 %vm13823_vm0, %v13822_v35 }
 0xa5e   :  { %12164 = vmatprep.subr.bf16.mxu0 %v13822_v35 }
 0xa64   :  { %12161 = vmatmul.mubr.msk.bf16.vlgmr.msra.gmra.mxu0 %vm626_vm1, %v2282_v16 }
 0xa65   :  { %12165 = vmatpush3.bf16.msra.mxu0 %v2281_v45  ;;  %12166 = vmatprep.mubr.msk.bf16.mxu0 %vm13823_vm0, %v13822_v35 }
 0xa66   :  { %12170 = vmatprep.subr.bf16.mxu0 %v13822_v35 }
 0xb1c   :  { %v2327_v30 = vpop.f32.mrf.mxu0 }
 0xb1d   :  { %v2384_v31 = vsel %vm14353_vm2, %v2327_v30, -inf }
 0xb1e   :  { %v12156_v34 = vpop.f32.mrf.mxu0  ;;  %v2388_v36 = vsel %vm732_vm3, %v2384_v31, -inf }
 0xb1f   :  { %2389 = vmax.xlane.f32.xlu1 %v2388_v36  ;;  %v12554_v36 = vld [vmem:[%s17048_s4 + $0x108] ss:$12 sps:$4 sm:$0xff]  }
 0xb20   :  { %v2330_v62 = vpop.f32.mrf.mxu0 }
 0xb21   :  { %v2385_v38 = vsel %vm14361_vm4, %v2330_v62, -inf  ;;  %v12556_v62 = vld [vmem:[%s17048_s4 + $0x10c] ss:$12 sps:$4 sm:$0xff]  }
 0xb22   :  { %v12157_v49 = vpop.f32.mrf.mxu0  ;;  %v2391_v51 = vsel %vm732_vm3, %v2385_v38, -inf  ;;  %2619 = vmatprep.subr.bf16.mxu1 %v12556_v62  ;;  %v12575_v62 = vld [vmem:[%s17047_s3 + $0x4e4] ss:$8 sps:$4 sm:$0xff]  }
 0xb23   :  { %2392 = vmax.xlane.f32.xlu0 %v2391_v51  ;;  %2620 = vmatpush1.bf16.msra.mxu1 %v12554_v36  ;;  %v12557_v49 = vld [vmem:[%s17048_s4 + $0xf0] ss:$12 sps:$4 sm:$0xff]  }
 0xb24   :  { %v2377_v52 = vpop.f32.mrf.mxu0  ;;  %v12562_v51 = vld [vmem:[%s17048_s4 + $0xdc] ss:$12 sps:$4 sm:$0xff]  }
 0xb25   :  { %v2386_v2 = vsel %vm14353_vm2, %v2377_v52, -inf  ;;  %v12560_v52 = vld [vmem:[%s17048_s4 + $0xd8] ss:$12 sps:$4 sm:$0xff]  }
 0xb26   :  { %v12162_v54 = vpop.f32.mrf.mxu0  ;;  %v2394_v0 = vsel %vm732_vm3, %v2386_v2, -inf }
 0xb27   :  { %2395 = vmax.xlane.f32.xlu0 %v2394_v0 }
 0xb28   :  { %v2380_v55 = vpop.f32.mrf.mxu0 }
 0xb29   :  { %v2387_v56 = vsel %vm14361_vm4, %v2380_v55, -inf }
 0xb2a   :  { %v12163_v58 = vpop.f32.mrf.mxu0  ;;  %v2397_v63 = vsel %vm732_vm3, %v2387_v56, -inf }
 0xb2b   :  { %2398 = vmax.xlane.f32.xlu1 %v2397_v63 }
 0xba8   :  { %v2390_v3 = vpop.xlane.xlu1 %2389 }
 0xba9   :  { %v2400_v4 = vsub.f32 %v2384_v31, %v2390_v3 }
 0xbab   :  { %v2404_v5 = vmul.f32 1.442695, %v2400_v4 }
 0xbac   :  { %v2393_v7 = vpop.xlane.xlu0 %2392 }
 0xbad   :  { %13690 = vpow2.f32 %v2404_v5  ;;  %v2401_v13 = vsub.f32 %v2385_v38, %v2393_v7  ;;  %v12559_v38 = vld [vmem:[%s17048_s4 + $0xf4] ss:$12 sps:$4 sm:$0xff]  }
 0xbae   :  { %2621 = vmatprep.subr.bf16.mxu1 %v12559_v38 }
 0xbaf   :  { %v2406_v14 = vmul.f32 1.442695, %v2401_v13  ;;  %2622 = vmatpush1.bf16.msra.mxu1 %v12557_v49  ;;  %v12563_v13 = vld [vmem:[%s17048_s4 + $0x110] ss:$12 sps:$4 sm:$0xff]  }
 0xbb0   :  { %v2396_v18 = vpop.xlane.xlu0 %2395  ;;  %2623 = vmatprep.subr.bf16.mxu1 %v12562_v51  ;;  %v12573_v51 = vld [vmem:[%s17047_s3 + $0x4e0] ss:$8 sps:$4 sm:$0xff]  }
 0xbb1   :  { %13692 = vpow2.f32 %v2406_v14  ;;  %v2402_v19 = vsub.f32 %v2386_v2, %v2396_v18 }
 0xbb3   :  { %v2408_v20 = vmul.f32 1.442695, %v2402_v19  ;;  %2624 = vmatpush1.bf16.msra.mxu1 %v12560_v52  ;;  %v12578_v52 = vld [vmem:[%s17047_s3 + $0x4d4] ss:$8 sps:$4 sm:$0xff]  }
 0xbb4   :  { %v2399_v22 = vpop.xlane.xlu1 %2398 }
 0xbb5   :  { %13694 = vpow2.f32 %v2408_v20  ;;  %v2403_v16 = vsub.f32 %v2387_v56, %v2399_v22  ;;  %v2224_v56 = vpop.f32.mrf.mxu1 }
 0xbb6   :  { %v2278_v3 = vadd.f32 %v14762_v41, %v2224_v56 }
 0xbb7   :  { %v2410_v59 = vmul.f32 1.442695, %v2403_v16  ;;  %v12564_v16 = vld [vmem:[%s17048_s4 + $0xc0] ss:$12 sps:$4 sm:$0xff]  }
 0xbb8   :  { %v2283_v14 = vpack.c.bf16 %v2278_v3, %v14748_v15  ;;  %v12566_v15 = vld [vmem:[%s17048_s4 + $0xc4] ss:$12 sps:$4 sm:$0xff]  }
 0xbb9   :  { %13696 = vpow2.f32 %v2410_v59  ;;  %v12567_v59 = vld [vmem:[%s17048_s4 + $0xf8] ss:$12 sps:$4 sm:$0xff]   ;;  %2625 = vmatprep.subr.bf16.mxu1 %v12566_v15  ;;  %v12605_v15 = vld [vmem:[%s17047_s3 + $0x5b4] ss:$8 sps:$4 sm:$0xff]  }
 0xbba   :  { %v13691_v24 = vpop.eup %13690  ;;  %2626 = vmatpush1.bf16.msra.mxu1 %v12564_v16  ;;  %v12587_v3 = vld [vmem:[%s17047_s3 + $0x5e4] ss:$8 sps:$4 sm:$0xff]   ;;  %v12602_v16 = vld [vmem:[%s17047_s3 + $0x494] ss:$8 sps:$4 sm:$0xff]  }
 0xbbb   :  { %v2412_v60 = vsel %vm732_vm3, %v13691_v24, 0.0 }
 0xbbc   :  { %2413 = vadd.xlane.f32.xlu0 %v2412_v60  ;;  %v12571_v60 = vld [vmem:[%s17047_s3 + $0x4f4] ss:$8 sps:$4 sm:$0xff]  }
 0xbbd   :  { %3014 = vmatprep.subr.bf16.mxu1 %v12571_v60  ;;  %v12608_v60 = vld [vmem:[%s17047_s3 + $0x484] ss:$8 sps:$4 sm:$0xff]  }
 0xbbe   :  { %v13693_v25 = vpop.eup %13692 }
 0xbbf   :  { %v2415_v27 = vsel %vm732_vm3, %v13693_v25, 0.0 }
 0xbc0   :  { %2416 = vadd.xlane.f32.xlu1 %v2415_v27  ;;  %v12581_v27 = vld [vmem:[%s17047_s3 + $0x5f4] ss:$8 sps:$4 sm:$0xff]  }
 0xbc2   :  { %v13695_v45 = vpop.eup %13694 }
 0xbc3   :  { %v2418_v30 = vsel %vm732_vm3, %v13695_v45, 0.0 }
 0xbc4   :  { %2419 = vadd.xlane.f32.xlu0 %v2418_v30 }
 0xbc6   :  { %v13697_v31 = vpop.eup %13696 }
 0xbc7   :  { %v2421_v34 = vsel %vm732_vm3, %v13697_v31, 0.0 }
 0xbc8   :  { %2422 = vadd.xlane.f32.xlu1 %v2421_v34  ;;  %v12569_v34 = vld [vmem:[%s17047_s3 + $0x4f0] ss:$8 sps:$4 sm:$0xff]  }
 0xc45   :  { %v2414_v2 = vpop.xlane.xlu0 %2413 }
 0xc46   :  { %13698 = vrcp.f32 %v2414_v2 }
 0xc49   :  { %v2417_v54 = vpop.xlane.xlu1 %2416 }
 0xc4a   :  { %13700 = vrcp.f32 %v2417_v54 }
 0xc4d   :  { %v2420_v0 = vpop.xlane.xlu0 %2419 }
 0xc4e   :  { %13702 = vrcp.f32 %v2420_v0  ;;  %v12576_v0 = vld [vmem:[%s17047_s3 + $0x4d0] ss:$8 sps:$4 sm:$0xff]  }
 0xc51   :  { %v2423_v55 = vpop.xlane.xlu1 %2422 }
 0xc52   :  { %13704 = vrcp.f32 %v2423_v55  ;;  %v12579_v55 = vld [vmem:[%s17047_s3 + $0x5f0] ss:$8 sps:$4 sm:$0xff]  }
 0xc53   :  { %v13699_v58 = vpop.eup %13698 }
 0xc54   :  { %v2428_v4 = vmul.f32 %v13699_v58, %v13691_v24  ;;  %v12568_v24 = vld [vmem:[%s17048_s4 + $0xe0] ss:$12 sps:$4 sm:$0xff]  }
 0xc55   :  { %v12584_v58 = vld [vmem:[%s17047_s3 + $0x4c4] ss:$8 sps:$4 sm:$0xff]  }
 0xc57   :  { %v13701_v63 = vpop.eup %13700 }
 0xc58   :  { %v2429_v5 = vmul.f32 %v13701_v63, %v13693_v25  ;;  %v12572_v25 = vld [vmem:[%s17048_s4 + $0xc8] ss:$12 sps:$4 sm:$0xff]  }
 0xc5a   :  { %v2432_v7 = vpack.c.bf16 %v2429_v5, %v2428_v4  ;;  %v12582_v4 = vld [vmem:[%s17047_s3 + $0x4c0] ss:$8 sps:$4 sm:$0xff]  }
 0xc5b   :  { %v13703_v18 = vpop.eup %13702  ;;  %v12585_v5 = vld [vmem:[%s17047_s3 + $0x5e0] ss:$8 sps:$4 sm:$0xff]  }
 0xc5c   :  { %12167 = vmatmul.mubr.msk.bf16.vlgmr.msra.gmra.mxu0 %vm732_vm3, %v2432_v7  ;;  %v2430_v20 = vmul.f32 %v13703_v18, %v13695_v45  ;;  %v12590_v7 = vld [vmem:[%s17047_s3 + $0x4b4] ss:$8 sps:$4 sm:$0xff]   ;;  %v12591_v18 = vld [vmem:[%s17047_s3 + $0x5d0] ss:$8 sps:$4 sm:$0xff]  }
 0xc5d   :  { %12171 = vmatpush3.bf16.msra.mxu0 %v2283_v14  ;;  %12172 = vmatprep.mubr.msk.bf16.mxu0 %vm13823_vm0, %v13822_v35  ;;  %v12588_v14 = vld [vmem:[%s17047_s3 + $0x4b0] ss:$8 sps:$4 sm:$0xff]  }
 0xc5e   :  { %12176 = vmatprep.subr.bf16.mxu0 %v12563_v13 }
 0xc5f   :  { %v13705_v19 = vpop.eup %13704 }
 0xc60   :  { %v2431_v41 = vmul.f32 %v13705_v19, %v13697_v31  ;;  %v12596_v19 = vld [vmem:[%s17047_s3 + $0x4a4] ss:$8 sps:$4 sm:$0xff]  }
 0xc62   :  { %v2433_v22 = vpack.c.bf16 %v2431_v41, %v2430_v20  ;;  %v12599_v20 = vld [vmem:[%s17047_s3 + $0x5c4] ss:$8 sps:$4 sm:$0xff]   ;;  %v12594_v41 = vld [vmem:[%s17047_s3 + $0x4a0] ss:$8 sps:$4 sm:$0xff]  }
 0xc64   :  { %12173 = vmatmul.mubr.msk.bf16.vlgmr.msra.gmra.mxu0 %vm732_vm3, %v2433_v22  ;;  %v12597_v22 = vld [vmem:[%s17047_s3 + $0x5c0] ss:$8 sps:$4 sm:$0xff]  }
 0xc65   :  { %12177 = vmatpush3.bf16.msra.mxu0 %v12563_v13  ;;  %v12593_v13 = vld [vmem:[%s17047_s3 + $0x5d4] ss:$8 sps:$4 sm:$0xff]  }
 0xc66   :  { %12178 = vmatprep.subr.bf16.mxu0 %v12567_v59 }
 0xc69   :  { %12179 = vmatpush3.bf16.msra.mxu0 %v12567_v59  ;;  %v12600_v59 = vld [vmem:[%s17047_s3 + $0x490] ss:$8 sps:$4 sm:$0xff]  }
 0xc6a   :  { %12180 = vmatprep.subr.bf16.mxu0 %v12568_v24 }
 0xc6d   :  { %12181 = vmatpush3.bf16.msra.mxu0 %v12568_v24  ;;  %v12603_v24 = vld [vmem:[%s17047_s3 + $0x5b0] ss:$8 sps:$4 sm:$0xff]  }
 0xc6e   :  { %12182 = vmatprep.subr.bf16.mxu0 %v12572_v25 }
 0xc71   :  { %12183 = vmatpush3.bf16.msra.mxu0 %v12572_v25  ;;  %v12611_v25 = vld [vmem:[%s17047_s3 + $0x5a4] ss:$8 sps:$4 sm:$0xff]  }
 0xc72   :  { %3067 = vmatprep.subr.bf16.mxu0 %v12581_v27  ;;  %v12606_v27 = vld [vmem:[%s17047_s3 + $0x480] ss:$8 sps:$4 sm:$0xff]  }
 0xd1c   :  { %v2471_v45 = vpop.f32.mrf.mxu0 }
 0xd1e   :  { %v12168_v30 = vpop.f32.mrf.mxu0 }
 0xd1f   :  { %v12614_v30 = vld [vmem:[%s17047_s3 + $0x574] ss:$8 sps:$4 sm:$0xff]  }
 0xd20   :  { %v2474_v31 = vpop.f32.mrf.mxu0 }
 0xd21   :  { %v2522_v36 = vpack.c.bf16 %v2474_v31, %v2471_v45  ;;  %v12609_v45 = vld [vmem:[%s17047_s3 + $0x5a0] ss:$8 sps:$4 sm:$0xff]   ;;  %v12617_v31 = vld [vmem:[%s17047_s3 + $0x594] ss:$8 sps:$4 sm:$0xff]  }
 0xd22   :  { %v12169_v38 = vpop.f32.mrf.mxu0 }
 0xd23   :  { %10852 = vmatmul.mubr.msk.bf16.vlgmr.msra.gmra.mxu1 %vm626_vm1, %v2522_v36  ;;  %12184 = vmatprep.mubr.msk.bf16.mxu0 %vm626_vm1, %v2522_v36  ;;  %v12615_v36 = vld [vmem:[%s17047_s3 + $0x590] ss:$8 sps:$4 sm:$0xff]   ;;  %v12623_v38 = vld [vmem:[%s17047_s3 + $0x584] ss:$8 sps:$4 sm:$0xff]  }
 0xd24   :  { %3015 = vmatpush1.bf16.msra.mxu1 %v12569_v34  ;;  %v2515_v49 = vpop.f32.mrf.mxu0  ;;  %2653 = vmatprep.mubr.bf16.mxu1 %v13821_v40  ;;  %v12612_v34 = vld [vmem:[%s17047_s3 + $0x570] ss:$8 sps:$4 sm:$0xff]  }
 0xd25   :  { %3016 = vmatprep.subr.bf16.mxu1 %v12575_v62  ;;  %v12620_v62 = vld [vmem:[%s17047_s3 + $0x564] ss:$8 sps:$4 sm:$0xff]  }
 0xd26   :  { %v12174_v2 = vpop.f32.mrf.mxu0 }
 0xd27   :  { %v12624_v2 = vld [vmem:[%s17047_s3 + $0x550] ss:$8 sps:$4 sm:$0xff]  }
 0xd28   :  { %3017 = vmatpush1.bf16.msra.mxu1 %v12573_v51  ;;  %v2518_v54 = vpop.f32.mrf.mxu0  ;;  %v12621_v51 = vld [vmem:[%s17047_s3 + $0x580] ss:$8 sps:$4 sm:$0xff]  }
 0xd29   :  { %v2523_v56 = vpack.c.bf16 %v2518_v54, %v2515_v49  ;;  %3018 = vmatprep.subr.bf16.mxu1 %v12578_v52  ;;  %v12618_v49 = vld [vmem:[%s17047_s3 + $0x560] ss:$8 sps:$4 sm:$0xff]   ;;  %v12626_v52 = vld [vmem:[%s17047_s3 + $0x554] ss:$8 sps:$4 sm:$0xff]   ;;  %v12629_v54 = vld [vmem:[%s17047_s3 + $0x544] ss:$8 sps:$4 sm:$0xff]  }
 0xd2a   :  { %v12175_v63 = vpop.f32.mrf.mxu0 }
 0xd2b   :  { %10853 = vmatmul.mubr.msk.bf16.gmra.mxu1 %vm626_vm1, %v2523_v56  ;;  %12185 = vmatmul.mubr.msk.bf16.vlgmr.msra.gmra.mxu0 %vm626_vm1, %v2523_v56  ;;  %v12630_v56 = vld [vmem:[%s17047_s3 + $0x530] ss:$8 sps:$4 sm:$0xff]   ;;  %v12633_v63 = vld [vmem:[%s17047_s3 + $0x520] ss:$8 sps:$4 sm:$0xff]  }
 0xd2c   :  { %3019 = vmatpush1.bf16.msra.mxu1 %v12576_v0  ;;  %3068 = vmatpush1.bf16.msra.mxu0 %v12579_v55  ;;  %v12627_v0 = vld [vmem:[%s17047_s3 + $0x540] ss:$8 sps:$4 sm:$0xff]   ;;  %v12632_v55 = vld [vmem:[%s17047_s3 + $0x534] ss:$8 sps:$4 sm:$0xff]  }
 0xd2d   :  { %3046 = vmatprep.mubr.bf16.mxu1 %v14218_v43  ;;  %3020 = vmatprep.subr.bf16.mxu1 %v12584_v58  ;;  %v12635_v58 = vld [vmem:[%s17047_s3 + $0x524] ss:$8 sps:$4 sm:$0xff]  }
 0xd2e   :  { %3069 = vmatprep.subr.bf16.mxu0 %v12587_v3  ;;  %3099 = vmatprep.mubr.bf16.mxu0 %v13821_v40  ;;  %v12638_v3 = vld [vmem:[%s17047_s3 + $0x514] ss:$8 sps:$4 sm:$0xff]  }
 0xd30   :  { %3021 = vmatpush1.bf16.msra.mxu1 %v12582_v4  ;;  %3070 = vmatpush1.bf16.msra.mxu0 %v12585_v5  ;;  %v12636_v4 = vld [vmem:[%s17047_s3 + $0x510] ss:$8 sps:$4 sm:$0xff]   ;;  %v12641_v5 = vld [vmem:[%s17047_s3 + $0x504] ss:$8 sps:$4 sm:$0xff]  }
 0xd31   :  { %3022 = vmatprep.subr.bf16.mxu1 %v12590_v7  ;;  %3071 = vmatprep.subr.bf16.mxu0 %v12593_v13  ;;  %v12639_v7 = vld [vmem:[%s17047_s3 + $0x500] ss:$8 sps:$4 sm:$0xff]  }
 0xd34   :  { %3023 = vmatpush1.bf16.msra.mxu1 %v12588_v14  ;;  %3072 = vmatpush1.bf16.msra.mxu0 %v12591_v18 }
 0xd35   :  { %3024 = vmatprep.subr.bf16.mxu1 %v12596_v19  ;;  %3073 = vmatprep.subr.bf16.mxu0 %v12599_v20 }
 0xd38   :  { %3025 = vmatpush1.bf16.msra.mxu1 %v12594_v41  ;;  %3074 = vmatpush1.bf16.msra.mxu0 %v12597_v22 }
 0xd39   :  { %3026 = vmatprep.subr.bf16.mxu1 %v12602_v16  ;;  %3075 = vmatprep.subr.bf16.mxu0 %v12605_v15 }
 0xd3c   :  { %3027 = vmatpush1.bf16.msra.mxu1 %v12600_v59  ;;  %3076 = vmatpush1.bf16.msra.mxu0 %v12603_v24 }
 0xd3d   :  { %3028 = vmatprep.subr.bf16.mxu1 %v12608_v60  ;;  %3077 = vmatprep.subr.bf16.mxu0 %v12611_v25 }
 0xd40   :  { %3029 = vmatpush1.bf16.msra.mxu1 %v12606_v27  ;;  %3078 = vmatpush1.bf16.msra.mxu0 %v12609_v45 }
 0xd41   :  { %3030 = vmatprep.subr.bf16.mxu1 %v12614_v30  ;;  %3079 = vmatprep.subr.bf16.mxu0 %v12617_v31 }
 0xd44   :  { %3031 = vmatpush2.bf16.msra.mxu1 %v12612_v34  ;;  %3080 = vmatpush1.bf16.msra.mxu0 %v12615_v36 }
 0xd45   :  { %3032 = vmatprep.subr.bf16.mxu1 %v12620_v62  ;;  %3081 = vmatprep.subr.bf16.mxu0 %v12623_v38 }
 0xd48   :  { %3033 = vmatpush2.bf16.msra.mxu1 %v12618_v49  ;;  %3082 = vmatpush1.bf16.msra.mxu0 %v12621_v51 }
 0xd49   :  { %3034 = vmatprep.subr.bf16.mxu1 %v12626_v52  ;;  %12188 = vmatprep.subr.bf16.mxu0 %v13822_v35 }
 0xd4b   :  { %3100 = vmatmul.mubr.bf16.vlgmr.msra.gmra.mxu0 %v14220_v50 }
 0xd4c   :  { %3035 = vmatpush2.bf16.msra.mxu1 %v12624_v2  ;;  %3109 = vmatprep.mubr.bf16.mxu0 %v13821_v40 }
 0xd4d   :  { %3036 = vmatprep.subr.bf16.mxu1 %v12629_v54 }
 0xd50   :  { %3037 = vmatpush2.bf16.msra.mxu1 %v12627_v0 }
 0xd51   :  { %3038 = vmatprep.subr.bf16.mxu1 %v12632_v55 }
 0xd53   :  { %3110 = vmatmul.mubr.bf16.gmra.mxu0 %v14243_v8 }
 0xd54   :  { %3039 = vmatpush2.bf16.msra.mxu1 %v12630_v56  ;;  %12190 = vmatprep.mubr.msk.bf16.mxu0 %vm13823_vm0, %v13822_v35 }
 0xd55   :  { %3040 = vmatprep.subr.bf16.mxu1 %v12635_v58 }
 0xd58   :  { %3041 = vmatpush2.bf16.msra.mxu1 %v12633_v63 }
 0xd59   :  { %3042 = vmatprep.subr.bf16.mxu1 %v12638_v3 }
 0xd5c   :  { %3043 = vmatpush2.bf16.msra.mxu1 %v12636_v4 }
 0xd5d   :  { %3044 = vmatprep.subr.bf16.mxu1 %v12641_v5 }
 0xd60   :  { %3045 = vmatpush2.bf16.msra.mxu1 %v12639_v7 }
 0xd61   :  { %12206 = vmatprep.subr.bf16.mxu1 %v13822_v35 }
 0xd63   :  { %3047 = vmatmul.mubr.bf16.vlgmr.msra.gmra.mxu1 %v14222_v53 }
 0xd64   :  { %3056 = vmatprep.mubr.bf16.mxu1 %v14234_v57 }
 0xd6b   :  { %3057 = vmatmul.mubr.bf16.gmra.mxu1 %v14245_v11 }
 0xd6c   :  { %12208 = vmatprep.mubr.msk.bf16.mxu1 %vm13823_vm0, %v13822_v35 }
 0xde3   :  { %v2645_v13 = vpop.f32.mrf.mxu1 }
 0xde4   :  { %v14986_v14 = vadd.f32 %v2645_v13, %v14721_v26 }
 0xde5   :  { %v2647_v18 = vpop.f32.mrf.mxu1 }
 0xde6   :  { %v14989_v19 = vadd.f32 %v2647_v18, %v14723_v28 }
 0xde7   :  { %v2649_v20 = vpop.f32.mrf.mxu1 }
 0xde8   :  { %v14992_v41 = vadd.f32 %v2649_v20, %v14725_v46 }
 0xde9   :  { %v14994_v22 = vpop.f32.mrf.mxu1 }
 0xdeb   :  { %v2655_v16 = vpop.f32.mrf.mxu1  ;;  %v12186_v15 = vpop.f32.mrf.mxu0 }
 0xdec   :  { %v14997_v59 = vadd.f32 %v2655_v16, %v14733_v33  ;;  %v15000_v24 = vadd.f32 %v12186_v15, %v14731_v32 }
 0xded   :  { %v2657_v26 = vpop.f32.mrf.mxu1  ;;  %v2698_v60 = vpop.f32.mrf.mxu0 }
 0xdee   :  { %v15003_v25 = vadd.f32 %v2657_v26, %v14737_v61  ;;  %v15006_v28 = vadd.f32 %v2698_v60, %v14735_v37 }
 0xdef   :  { %v2659_v46 = vpop.f32.mrf.mxu1  ;;  %v12187_v27 = vpop.f32.mrf.mxu0 }
 0xdf0   :  { %v15009_v45 = vadd.f32 %v2659_v46, %v14741_v39  ;;  %v15012_v30 = vadd.f32 %v12187_v27, %v14739_v48 }
 0xdf1   :  { %v15014_v33 = vpop.f32.mrf.mxu0  ;;  %v15016_v36 = vpop.f32.mrf.mxu1 }
 0xe0b   :  { %v3101_v32 = vpop.f32.mrf.mxu0 }
 0xe0d   :  { %v3103_v31 = vpop.f32.mrf.mxu0 }
 0xe0f   :  { %v3105_v34 = vpop.f32.mrf.mxu0 }
 0xe11   :  { %v3107_v61 = vpop.f32.mrf.mxu0 }
 0xe13   :  { %v3111_v38 = vpop.f32.mrf.mxu0 }
 0xe15   :  { %v3113_v39 = vpop.f32.mrf.mxu0 }
 0xe17   :  { %v3115_v55 = vpop.f32.mrf.mxu0 }
 0xe19   :  { %v3117_v4 = vpop.f32.mrf.mxu0 }
 0xe23   :  { %v3048_v62 = vpop.f32.mrf.mxu1 }
 0xe24   :  { %v3102_v52 = vadd.f32 %v3101_v32, %v3048_v62 }
 0xe25   :  { %v3050_v37 = vpop.f32.mrf.mxu1 }
 0xe26   :  { %v3104_v49 = vadd.f32 %v3103_v31, %v3050_v37 }
 0xe27   :  { %v3052_v51 = vpop.f32.mrf.mxu1 }
 0xe28   :  { %v3106_v2 = vadd.f32 %v3105_v34, %v3052_v51 }
 0xe29   :  { %v3054_v54 = vpop.f32.mrf.mxu1 }
 0xe2a   :  { %v3120_v0 = vpack.c.bf16 %v3106_v2, %v3102_v52  ;;  %v3108_v46 = vadd.f32 %v3107_v61, %v3054_v54 }
 0xe2b   :  { %v3058_v48 = vpop.f32.mrf.mxu1 }
 0xe2c   :  { %3125 = vrot.lane.b32.xlu0 %v3120_v0, %s13824_s20  ;;  %v3112_v63 = vadd.f32 %v3111_v38, %v3058_v48  ;;  %v3121_v27 = vpack.c.bf16 %v3108_v46, %v3104_v49 }
 0xe2d   :  { %v3060_v56 = vpop.f32.mrf.mxu1 }
 0xe2e   :  { %v3114_v7 = vadd.f32 %v3113_v39, %v3060_v56 }
 0xe2f   :  { %v3062_v58 = vpop.f32.mrf.mxu1 }
 0xe30   :  { %v3116_v3 = vadd.f32 %v3115_v55, %v3062_v58 }
 0xe31   :  { %v3064_v5 = vpop.f32.mrf.mxu1 }
 0xe32   :  { %v3122_v13 = vpack.c.bf16 %v3116_v3, %v3112_v63  ;;  %v3118_v18 = vadd.f32 %v3117_v4, %v3064_v5 }
 0xe34   :  { %v3123_v20 = vpack.c.bf16 %v3118_v18, %v3114_v7  ;;  %3175 = vrot.lane.b32.xlu1 %v3122_v13, %s13824_s20 }
 0xe36   :  { %12207 = vmatpush3.bf16.msra.mxu1 %v3123_v20 }
 0xe9e   :  { %v3126_v16 = vpop.permute.xlu0 %3125 }
 0xe9f   :  { %v3131_v15 = vsel %vm626_vm1, %v3126_v16, 0 }
 0xea0   :  { %12189 = vmatpush3.bf16.xpose.msra.mxu0 %v3131_v15 }
 0xea1   :  { %12194 = vmatprep.subr.bf16.mxu0 %v13822_v35 }
 0xea6   :  { %v3176_v26 = vpop.permute.xlu1 %3175 }
 0xea7   :  { %v3181_v60 = vsel %vm626_vm1, %v3176_v26, 0  ;;  %12191 = vmatmul.mubr.msk.bf16.vlgmr.msra.gmra.mxu0 %vm626_vm1, %v3120_v0 }
 0xea8   :  { %12195 = vmatpush3.bf16.xpose.msra.mxu0 %v3181_v60  ;;  %12196 = vmatprep.mubr.msk.bf16.mxu0 %vm13823_vm0, %v13822_v35 }
 0xea9   :  { %12200 = vmatprep.subr.bf16.mxu0 %v13822_v35 }
 0xeaf   :  { %12197 = vmatmul.mubr.msk.bf16.vlgmr.msra.gmra.mxu0 %vm626_vm1, %v3122_v13 }
 0xeb0   :  { %12201 = vmatpush3.bf16.msra.mxu0 %v3121_v27  ;;  %12202 = vmatprep.mubr.msk.bf16.mxu0 %vm13823_vm0, %v13822_v35 }
 0xf67   :  { %v3167_v32 = vpop.f32.mrf.mxu0 }
 0xf68   :  { %v3224_v31 = vsel %vm14353_vm2, %v3167_v32, -inf }
 0xf69   :  { %v12192_v34 = vpop.f32.mrf.mxu0  ;;  %v3228_v62 = vsel %vm732_vm3, %v3224_v31, -inf }
 0xf6a   :  { %3229 = vmax.xlane.f32.xlu1 %v3228_v62 }
 0xf6b   :  { %v3170_v38 = vpop.f32.mrf.mxu0 }
 0xf6c   :  { %v3225_v37 = vsel %vm14361_vm4, %v3170_v38, -inf  ;;  %v12644_v38 = vld [vmem:[%s17048_s4 + $0x16c] ss:$12 sps:$4 sm:$0xff]  }
 0xf6d   :  { %v12193_v61 = vpop.f32.mrf.mxu0  ;;  %v3231_v49 = vsel %vm732_vm3, %v3225_v37, -inf  ;;  %3459 = vmatprep.subr.bf16.mxu0 %v12644_v38 }
 0xf6e   :  { %3232 = vmax.xlane.f32.xlu0 %v3231_v49 }
 0xf6f   :  { %v3217_v51 = vpop.f32.mrf.mxu0 }
 0xf70   :  { %v3226_v52 = vsel %vm14353_vm2, %v3217_v51, -inf }
 0xf71   :  { %v12198_v2 = vpop.f32.mrf.mxu0  ;;  %v3234_v39 = vsel %vm732_vm3, %v3226_v52, -inf }
 0xf72   :  { %3235 = vmax.xlane.f32.xlu0 %v3234_v39 }
 0xf73   :  { %v3220_v54 = vpop.f32.mrf.mxu0 }
 0xf74   :  { %v3227_v0 = vsel %vm14361_vm4, %v3220_v54, -inf }
 0xf75   :  { %v12199_v48 = vpop.f32.mrf.mxu0  ;;  %v3237_v55 = vsel %vm732_vm3, %v3227_v0, -inf }
 0xf76   :  { %3238 = vmax.xlane.f32.xlu1 %v3237_v55  ;;  %v12642_v48 = vld [vmem:[%s17048_s4 + $0x168] ss:$12 sps:$4 sm:$0xff]  }
 0xff3   :  { %v3230_v56 = vpop.xlane.xlu1 %3229 }
 0xff4   :  { %v3240_v58 = vsub.f32 %v3224_v31, %v3230_v56  ;;  %v12647_v56 = vld [vmem:[%s17048_s4 + $0x154] ss:$12 sps:$4 sm:$0xff]  }
 0xff6   :  { %v3244_v63 = vmul.f32 1.442695, %v3240_v58 }
 0xff7   :  { %v3233_v3 = vpop.xlane.xlu0 %3232 }
 0xff8   :  { %13706 = vpow2.f32 %v3244_v63  ;;  %v3241_v4 = vsub.f32 %v3225_v37, %v3233_v3  ;;  %v12651_v37 = vld [vmem:[%s17048_s4 + $0x170] ss:$12 sps:$4 sm:$0xff]  }
 0xff9   :  { %12212 = vmatprep.subr.bf16.mxu1 %v12651_v37  ;;  %v12645_v63 = vld [vmem:[%s17048_s4 + $0x150] ss:$12 sps:$4 sm:$0xff]  }
 0xffa   :  { %v3246_v5 = vmul.f32 1.442695, %v3241_v4  ;;  %v12650_v3 = vld [vmem:[%s17048_s4 + $0x13c] ss:$12 sps:$4 sm:$0xff]  }
 0xffb   :  { %v3236_v7 = vpop.xlane.xlu0 %3235 }
 0xffc   :  { %13708 = vpow2.f32 %v3246_v5  ;;  %v3242_v13 = vsub.f32 %v3226_v52, %v3236_v7 }
 0xffe   :  { %v3248_v18 = vmul.f32 1.442695, %v3242_v13  ;;  %v12648_v13 = vld [vmem:[%s17048_s4 + $0x138] ss:$12 sps:$4 sm:$0xff]  }
 0xfff   :  { %v3239_v20 = vpop.xlane.xlu1 %3238 }
0x1000   :  { %13710 = vpow2.f32 %v3248_v18  ;;  %v3243_v16 = vsub.f32 %v3227_v0, %v3239_v20  ;;  %v12652_v20 = vld [vmem:[%s17048_s4 + $0x120] ss:$12 sps:$4 sm:$0xff]  }
0x1002   :  { %v3250_v15 = vmul.f32 1.442695, %v3243_v16  ;;  %v12654_v16 = vld [vmem:[%s17048_s4 + $0x124] ss:$12 sps:$4 sm:$0xff]  }
0x1004   :  { %13712 = vpow2.f32 %v3250_v15  ;;  %v12655_v15 = vld [vmem:[%s17048_s4 + $0x158] ss:$12 sps:$4 sm:$0xff]  }
0x1005   :  { %v13707_v26 = vpop.eup %13706 }
0x1006   :  { %v3252_v60 = vsel %vm732_vm3, %v13707_v26, 0.0 }
0x1007   :  { %3253 = vadd.xlane.f32.xlu0 %v3252_v60  ;;  %v12659_v60 = vld [vmem:[%s17047_s3 + $0x674] ss:$8 sps:$4 sm:$0xff]  }
0x1009   :  { %v13709_v46 = vpop.eup %13708 }
0x100a   :  { %v3255_v27 = vsel %vm732_vm3, %v13709_v46, 0.0 }
0x100b   :  { %3256 = vadd.xlane.f32.xlu1 %v3255_v27  ;;  %v12669_v27 = vld [vmem:[%s17047_s3 + $0x774] ss:$8 sps:$4 sm:$0xff]  }
0x100d   :  { %v13711_v32 = vpop.eup %13710 }
0x100e   :  { %v3258_v31 = vsel %vm732_vm3, %v13711_v32, 0.0 }
0x100f   :  { %3259 = vadd.xlane.f32.xlu0 %v3258_v31 }
0x1011   :  { %v13713_v34 = vpop.eup %13712 }
0x1012   :  { %v3261_v62 = vsel %vm732_vm3, %v13713_v34, 0.0 }
0x1013   :  { %3262 = vadd.xlane.f32.xlu1 %v3261_v62  ;;  %v12657_v62 = vld [vmem:[%s17047_s3 + $0x670] ss:$8 sps:$4 sm:$0xff]  }
0x1090   :  { %v3254_v61 = vpop.xlane.xlu0 %3253 }
0x1091   :  { %13714 = vrcp.f32 %v3254_v61 }
0x1094   :  { %v3257_v49 = vpop.xlane.xlu1 %3256 }
0x1095   :  { %13716 = vrcp.f32 %v3257_v49 }
0x1098   :  { %v3260_v51 = vpop.xlane.xlu0 %3259 }
0x1099   :  { %13718 = vrcp.f32 %v3260_v51  ;;  %v12661_v51 = vld [vmem:[%s17047_s3 + $0x660] ss:$8 sps:$4 sm:$0xff]  }
0x109c   :  { %v3263_v52 = vpop.xlane.xlu1 %3262 }
0x109d   :  { %13720 = vrcp.f32 %v3263_v52  ;;  %v12666_v52 = vld [vmem:[%s17047_s3 + $0x654] ss:$8 sps:$4 sm:$0xff]  }
0x109e   :  { %v13715_v2 = vpop.eup %13714 }
0x109f   :  { %v3268_v54 = vmul.f32 %v13715_v2, %v13707_v26  ;;  %v12656_v26 = vld [vmem:[%s17048_s4 + $0x140] ss:$12 sps:$4 sm:$0xff]  }
0x10a2   :  { %v13717_v39 = vpop.eup %13716 }
0x10a3   :  { %v3269_v0 = vmul.f32 %v13717_v39, %v13709_v46  ;;  %v12660_v46 = vld [vmem:[%s17048_s4 + $0x128] ss:$12 sps:$4 sm:$0xff]  }
0x10a5   :  { %v3272_v55 = vpack.c.bf16 %v3269_v0, %v3268_v54  ;;  %v12664_v54 = vld [vmem:[%s17047_s3 + $0x650] ss:$8 sps:$4 sm:$0xff]  }
0x10a6   :  { %v13719_v58 = vpop.eup %13718  ;;  %v12667_v0 = vld [vmem:[%s17047_s3 + $0x770] ss:$8 sps:$4 sm:$0xff]  }
0x10a7   :  { %12203 = vmatmul.mubr.msk.bf16.vlgmr.msra.gmra.mxu0 %vm732_vm3, %v3272_v55  ;;  %v3270_v5 = vmul.f32 %v13719_v58, %v13711_v32  ;;  %v12672_v55 = vld [vmem:[%s17047_s3 + $0x644] ss:$8 sps:$4 sm:$0xff]  }
0x10a8   :  { %3460 = vmatpush1.bf16.msra.mxu0 %v12642_v48  ;;  %3483 = vmatprep.mubr.bf16.mxu0 %v13821_v40  ;;  %v12675_v58 = vld [vmem:[%s17047_s3 + $0x764] ss:$8 sps:$4 sm:$0xff]  }
0x10a9   :  { %3461 = vmatprep.subr.bf16.mxu0 %v12647_v56 }
0x10aa   :  { %v13721_v4 = vpop.eup %13720 }
0x10ab   :  { %v3271_v7 = vmul.f32 %v13721_v4, %v13713_v34  ;;  %v12678_v4 = vld [vmem:[%s17047_s3 + $0x634] ss:$8 sps:$4 sm:$0xff]  }
0x10ac   :  { %3462 = vmatpush1.bf16.msra.mxu0 %v12645_v63  ;;  %v12670_v63 = vld [vmem:[%s17047_s3 + $0x640] ss:$8 sps:$4 sm:$0xff]  }
0x10ad   :  { %v3273_v18 = vpack.c.bf16 %v3271_v7, %v3270_v5  ;;  %3463 = vmatprep.subr.bf16.mxu0 %v12650_v3  ;;  %v12673_v3 = vld [vmem:[%s17047_s3 + $0x760] ss:$8 sps:$4 sm:$0xff]   ;;  %v12681_v5 = vld [vmem:[%s17047_s3 + $0x754] ss:$8 sps:$4 sm:$0xff]   ;;  %v12676_v7 = vld [vmem:[%s17047_s3 + $0x630] ss:$8 sps:$4 sm:$0xff]  }
0x10af   :  { %12209 = vmatmul.mubr.msk.bf16.vlgmr.msra.gmra.mxu1 %vm732_vm3, %v3273_v18  ;;  %v12684_v18 = vld [vmem:[%s17047_s3 + $0x624] ss:$8 sps:$4 sm:$0xff]  }
0x10b0   :  { %3464 = vmatpush1.bf16.msra.mxu0 %v12648_v13  ;;  %12213 = vmatpush3.bf16.msra.mxu1 %v12651_v37  ;;  %v12663_v37 = vld [vmem:[%s17047_s3 + $0x664] ss:$8 sps:$4 sm:$0xff]   ;;  %v12679_v13 = vld [vmem:[%s17047_s3 + $0x750] ss:$8 sps:$4 sm:$0xff]  }
0x10b1   :  { %3465 = vmatprep.subr.bf16.mxu0 %v12654_v16  ;;  %12214 = vmatprep.subr.bf16.mxu1 %v12655_v15  ;;  %v12682_v16 = vld [vmem:[%s17047_s3 + $0x620] ss:$8 sps:$4 sm:$0xff]  }
0x10b4   :  { %3466 = vmatpush1.bf16.msra.mxu0 %v12652_v20  ;;  %12215 = vmatpush3.bf16.msra.mxu1 %v12655_v15  ;;  %v12687_v20 = vld [vmem:[%s17047_s3 + $0x744] ss:$8 sps:$4 sm:$0xff]   ;;  %v12685_v15 = vld [vmem:[%s17047_s3 + $0x740] ss:$8 sps:$4 sm:$0xff]  }
0x10b5   :  { %12216 = vmatprep.subr.bf16.mxu1 %v12656_v26  ;;  %3854 = vmatprep.subr.bf16.mxu0 %v12659_v60  ;;  %v12693_v60 = vld [vmem:[%s17047_s3 + $0x734] ss:$8 sps:$4 sm:$0xff]  }
0x10b8   :  { %12217 = vmatpush3.bf16.msra.mxu1 %v12656_v26  ;;  %v12690_v26 = vld [vmem:[%s17047_s3 + $0x614] ss:$8 sps:$4 sm:$0xff]  }
0x10b9   :  { %12218 = vmatprep.subr.bf16.mxu1 %v12660_v46 }
0x10bc   :  { %12219 = vmatpush3.bf16.msra.mxu1 %v12660_v46  ;;  %v12688_v46 = vld [vmem:[%s17047_s3 + $0x610] ss:$8 sps:$4 sm:$0xff]  }
0x10bd   :  { %3907 = vmatprep.subr.bf16.mxu1 %v12669_v27  ;;  %v12691_v27 = vld [vmem:[%s17047_s3 + $0x730] ss:$8 sps:$4 sm:$0xff]  }
0x1167   :  { %v3311_v32 = vpop.f32.mrf.mxu0 }
0x1169   :  { %v12204_v31 = vpop.f32.mrf.mxu0 }
0x116a   :  { %v12699_v31 = vld [vmem:[%s17047_s3 + $0x724] ss:$8 sps:$4 sm:$0xff]  }
0x116b   :  { %v3314_v34 = vpop.f32.mrf.mxu0 }
0x116c   :  { %v3362_v38 = vpack.c.bf16 %v3314_v34, %v3311_v32  ;;  %v12696_v32 = vld [vmem:[%s17047_s3 + $0x604] ss:$8 sps:$4 sm:$0xff]   ;;  %v12694_v34 = vld [vmem:[%s17047_s3 + $0x600] ss:$8 sps:$4 sm:$0xff]  }
0x116d   :  { %v12205_v61 = vpop.f32.mrf.mxu0 }
0x116e   :  { %10984 = vmatmul.mubr.msk.bf16.vlgmr.msra.gmra.mxu0 %vm626_vm1, %v3362_v38  ;;  %12220 = vmatprep.mubr.msk.bf16.mxu1 %vm626_vm1, %v3362_v38  ;;  %v12702_v38 = vld [vmem:[%s17047_s3 + $0x6f4] ss:$8 sps:$4 sm:$0xff]   ;;  %v12700_v61 = vld [vmem:[%s17047_s3 + $0x6f0] ss:$8 sps:$4 sm:$0xff]  }
0x116f   :  { %3855 = vmatpush1.bf16.msra.mxu0 %v12657_v62  ;;  %v3355_v49 = vpop.f32.mrf.mxu1  ;;  %3493 = vmatprep.mubr.bf16.mxu0 %v13821_v40  ;;  %v12697_v62 = vld [vmem:[%s17047_s3 + $0x720] ss:$8 sps:$4 sm:$0xff]  }
0x1170   :  { %3856 = vmatprep.subr.bf16.mxu0 %v12663_v37  ;;  %v12705_v37 = vld [vmem:[%s17047_s3 + $0x714] ss:$8 sps:$4 sm:$0xff]  }
0x1171   :  { %v12210_v2 = vpop.f32.mrf.mxu1 }
0x1172   :  { %v12706_v2 = vld [vmem:[%s17047_s3 + $0x6e0] ss:$8 sps:$4 sm:$0xff]  }
0x1173   :  { %3857 = vmatpush1.bf16.msra.mxu0 %v12661_v51  ;;  %v3358_v39 = vpop.f32.mrf.mxu1  ;;  %v12708_v51 = vld [vmem:[%s17047_s3 + $0x6e4] ss:$8 sps:$4 sm:$0xff]  }
0x1174   :  { %v3363_v48 = vpack.c.bf16 %v3358_v39, %v3355_v49  ;;  %3858 = vmatprep.subr.bf16.mxu0 %v12666_v52  ;;  %v12703_v49 = vld [vmem:[%s17047_s3 + $0x710] ss:$8 sps:$4 sm:$0xff]   ;;  %v12711_v52 = vld [vmem:[%s17047_s3 + $0x704] ss:$8 sps:$4 sm:$0xff]   ;;  %v12709_v39 = vld [vmem:[%s17047_s3 + $0x700] ss:$8 sps:$4 sm:$0xff]  }
0x1175   :  { %v12211_v56 = vpop.f32.mrf.mxu1 }
0x1176   :  { %10985 = vmatmul.mubr.msk.bf16.gmra.mxu0 %vm626_vm1, %v3363_v48  ;;  %12221 = vmatmul.mubr.msk.bf16.vlgmr.msra.gmra.mxu1 %vm626_vm1, %v3363_v48  ;;  %v12717_v48 = vld [vmem:[%s17047_s3 + $0x6c4] ss:$8 sps:$4 sm:$0xff]   ;;  %v12720_v56 = vld [vmem:[%s17047_s3 + $0x6b4] ss:$8 sps:$4 sm:$0xff]  }
0x1177   :  { %3859 = vmatpush1.bf16.msra.mxu0 %v12664_v54  ;;  %3908 = vmatpush1.bf16.msra.mxu1 %v12667_v0  ;;  %v12714_v54 = vld [vmem:[%s17047_s3 + $0x6d4] ss:$8 sps:$4 sm:$0xff]   ;;  %v12712_v0 = vld [vmem:[%s17047_s3 + $0x6d0] ss:$8 sps:$4 sm:$0xff]  }
0x1178   :  { %3886 = vmatprep.mubr.bf16.mxu0 %v14218_v43  ;;  %3860 = vmatprep.subr.bf16.mxu0 %v12672_v55  ;;  %v12715_v55 = vld [vmem:[%s17047_s3 + $0x6c0] ss:$8 sps:$4 sm:$0xff]  }
0x1179   :  { %3909 = vmatprep.subr.bf16.mxu1 %v12675_v58  ;;  %3939 = vmatprep.mubr.bf16.mxu1 %v13821_v40  ;;  %v12718_v58 = vld [vmem:[%s17047_s3 + $0x6b0] ss:$8 sps:$4 sm:$0xff]  }
0x117b   :  { %3861 = vmatpush1.bf16.msra.mxu0 %v12670_v63  ;;  %3910 = vmatpush1.bf16.msra.mxu1 %v12673_v3  ;;  %v12723_v63 = vld [vmem:[%s17047_s3 + $0x6a4] ss:$8 sps:$4 sm:$0xff]   ;;  %v12721_v3 = vld [vmem:[%s17047_s3 + $0x6a0] ss:$8 sps:$4 sm:$0xff]  }
0x117c   :  { %3862 = vmatprep.subr.bf16.mxu0 %v12678_v4  ;;  %3911 = vmatprep.subr.bf16.mxu1 %v12681_v5  ;;  %v12726_v4 = vld [vmem:[%s17047_s3 + $0x694] ss:$8 sps:$4 sm:$0xff]   ;;  %v12724_v5 = vld [vmem:[%s17047_s3 + $0x690] ss:$8 sps:$4 sm:$0xff]  }
0x117f   :  { %3863 = vmatpush1.bf16.msra.mxu0 %v12676_v7  ;;  %3912 = vmatpush1.bf16.msra.mxu1 %v12679_v13  ;;  %v12729_v7 = vld [vmem:[%s17047_s3 + $0x684] ss:$8 sps:$4 sm:$0xff]   ;;  %v12727_v13 = vld [vmem:[%s17047_s3 + $0x680] ss:$8 sps:$4 sm:$0xff]  }
0x1180   :  { %3864 = vmatprep.subr.bf16.mxu0 %v12684_v18  ;;  %3913 = vmatprep.subr.bf16.mxu1 %v12687_v20 }
0x1183   :  { %3865 = vmatpush1.bf16.msra.mxu0 %v12682_v16  ;;  %3914 = vmatpush1.bf16.msra.mxu1 %v12685_v15 }
0x1184   :  { %3866 = vmatprep.subr.bf16.mxu0 %v12690_v26  ;;  %3915 = vmatprep.subr.bf16.mxu1 %v12693_v60 }
0x1187   :  { %3867 = vmatpush1.bf16.msra.mxu0 %v12688_v46  ;;  %3916 = vmatpush1.bf16.msra.mxu1 %v12691_v27 }
0x1188   :  { %3868 = vmatprep.subr.bf16.mxu0 %v12696_v32  ;;  %3917 = vmatprep.subr.bf16.mxu1 %v12699_v31 }
0x118b   :  { %3869 = vmatpush1.bf16.msra.mxu0 %v12694_v34  ;;  %3918 = vmatpush1.bf16.msra.mxu1 %v12697_v62 }
0x118c   :  { %3870 = vmatprep.subr.bf16.mxu0 %v12702_v38  ;;  %3919 = vmatprep.subr.bf16.mxu1 %v12705_v37 }
0x118f   :  { %3871 = vmatpush2.bf16.msra.mxu0 %v12700_v61  ;;  %3920 = vmatpush1.bf16.msra.mxu1 %v12703_v49 }
0x1190   :  { %3872 = vmatprep.subr.bf16.mxu0 %v12708_v51  ;;  %3921 = vmatprep.subr.bf16.mxu1 %v12711_v52 }
0x1193   :  { %3873 = vmatpush2.bf16.msra.mxu0 %v12706_v2  ;;  %3922 = vmatpush1.bf16.msra.mxu1 %v12709_v39 }
0x1194   :  { %3874 = vmatprep.subr.bf16.mxu0 %v12714_v54  ;;  %12224 = vmatprep.subr.bf16.mxu1 %v13822_v35 }
0x1196   :  { %3940 = vmatmul.mubr.bf16.vlgmr.msra.gmra.mxu1 %v14220_v50 }
0x1197   :  { %3875 = vmatpush2.bf16.msra.mxu0 %v12712_v0  ;;  %3949 = vmatprep.mubr.bf16.mxu1 %v13821_v40 }
0x1198   :  { %3876 = vmatprep.subr.bf16.mxu0 %v12717_v48 }
0x119b   :  { %3877 = vmatpush2.bf16.msra.mxu0 %v12715_v55 }
0x119c   :  { %3878 = vmatprep.subr.bf16.mxu0 %v12720_v56 }
0x119e   :  { %3950 = vmatmul.mubr.bf16.gmra.mxu1 %v14243_v8 }
0x119f   :  { %3879 = vmatpush2.bf16.msra.mxu0 %v12718_v58  ;;  %12226 = vmatprep.mubr.msk.bf16.mxu1 %vm13823_vm0, %v13822_v35 }
0x11a0   :  { %3880 = vmatprep.subr.bf16.mxu0 %v12723_v63 }
0x11a3   :  { %3881 = vmatpush2.bf16.msra.mxu0 %v12721_v3 }
0x11a4   :  { %3882 = vmatprep.subr.bf16.mxu0 %v12726_v4 }
0x11a7   :  { %3883 = vmatpush2.bf16.msra.mxu0 %v12724_v5 }
0x11a8   :  { %3884 = vmatprep.subr.bf16.mxu0 %v12729_v7 }
0x11ab   :  { %3885 = vmatpush2.bf16.msra.mxu0 %v12727_v13 }
0x11ae   :  { %3887 = vmatmul.mubr.bf16.vlgmr.msra.gmra.mxu0 %v14222_v53 }
0x11af   :  { %3896 = vmatprep.mubr.bf16.mxu0 %v14234_v57 }
0x11b6   :  { %3897 = vmatmul.mubr.bf16.gmra.mxu0 %v14245_v11 }
0x11b7   :  { %4323 = vmatprep.mubr.bf16.mxu0 %v13821_v40 }
0x122e   :  { %v3485_v18 = vpop.f32.mrf.mxu0 }
0x122f   :  { %v15247_v20 = vadd.f32 %v3485_v18, %v14986_v14 }
0x1230   :  { %v3487_v16 = vpop.f32.mrf.mxu0 }
0x1231   :  { %v15250_v15 = vadd.f32 %v3487_v16, %v14989_v19 }
0x1232   :  { %v3489_v26 = vpop.f32.mrf.mxu0 }
0x1233   :  { %v15253_v60 = vadd.f32 %v3489_v26, %v14992_v41 }
0x1234   :  { %v15255_v46 = vpop.f32.mrf.mxu0 }
0x1236   :  { %v3495_v27 = vpop.f32.mrf.mxu0  ;;  %v12222_v32 = vpop.f32.mrf.mxu1 }
0x1237   :  { %v15258_v31 = vadd.f32 %v3495_v27, %v14997_v59  ;;  %v15261_v34 = vadd.f32 %v12222_v32, %v15000_v24 }
0x1238   :  { %v3497_v14 = vpop.f32.mrf.mxu0  ;;  %v3538_v62 = vpop.f32.mrf.mxu1 }
0x1239   :  { %v15264_v38 = vadd.f32 %v3497_v14, %v15003_v25  ;;  %v15267_v19 = vadd.f32 %v3538_v62, %v15006_v28 }
0x123a   :  { %v3499_v41 = vpop.f32.mrf.mxu0  ;;  %v12223_v37 = vpop.f32.mrf.mxu1 }
0x123b   :  { %v15270_v61 = vadd.f32 %v3499_v41, %v15009_v45  ;;  %v15273_v49 = vadd.f32 %v12223_v37, %v15012_v30 }
0x123c   :  { %v15275_v59 = vpop.f32.mrf.mxu1  ;;  %v15277_v2 = vpop.f32.mrf.mxu0 }
0x1256   :  { %v3941_v24 = vpop.f32.mrf.mxu1 }
0x1258   :  { %v3943_v51 = vpop.f32.mrf.mxu1 }
0x125a   :  { %v3945_v52 = vpop.f32.mrf.mxu1 }
0x125c   :  { %v3947_v25 = vpop.f32.mrf.mxu1 }
0x125e   :  { %v3951_v0 = vpop.f32.mrf.mxu1 }
0x1260   :  { %v3953_v63 = vpop.f32.mrf.mxu1 }
0x1262   :  { %v3955_v5 = vpop.f32.mrf.mxu1 }
0x1264   :  { %v15294_v37 = vpop.f32.mrf.mxu1 }
0x126e   :  { %v3888_v39 = vpop.f32.mrf.mxu0 }
0x126f   :  { %v3942_v55 = vadd.f32 %v3941_v24, %v3888_v39 }
0x1270   :  { %v3890_v54 = vpop.f32.mrf.mxu0 }
0x1271   :  { %v3944_v28 = vadd.f32 %v3943_v51, %v3890_v54 }
0x1272   :  { %v3892_v48 = vpop.f32.mrf.mxu0 }
0x1273   :  { %v3946_v56 = vadd.f32 %v3945_v52, %v3892_v48 }
0x1274   :  { %v3894_v45 = vpop.f32.mrf.mxu0 }
0x1275   :  { %v3960_v58 = vpack.c.bf16 %v3946_v56, %v3942_v55  ;;  %v3948_v62 = vadd.f32 %v3947_v25, %v3894_v45 }
0x1276   :  { %v3898_v30 = vpop.f32.mrf.mxu0 }
0x1277   :  { %3965 = vrot.lane.b32.xlu0 %v3960_v58, %s13824_s20  ;;  %v3952_v13 = vadd.f32 %v3951_v0, %v3898_v30  ;;  %v3961_v41 = vpack.c.bf16 %v3948_v62, %v3944_v28 }
0x1278   :  { %v3900_v3 = vpop.f32.mrf.mxu0 }
0x1279   :  { %v15280_v4 = vadd.f32 %v3953_v63, %v3900_v3 }
0x127a   :  { %v3902_v7 = vpop.f32.mrf.mxu0 }
0x127b   :  { %v3956_v18 = vadd.f32 %v3955_v5, %v3902_v7 }
0x127d   :  { %v3962_v16 = vpack.c.bf16 %v3956_v18, %v3952_v13 }
0x127f   :  { %4015 = vrot.lane.b32.xlu1 %v3962_v16, %s13824_s20 }
0x12e9   :  { %v3966_v26 = vpop.permute.xlu0 %3965 }
0x12ea   :  { %v3971_v27 = vsel %vm626_vm1, %v3966_v26, 0 }
0x12eb   :  { %12225 = vmatpush3.bf16.xpose.msra.mxu1 %v3971_v27 }
0x12ec   :  { %12230 = vmatprep.subr.bf16.mxu1 %v13822_v35 }
0x12f1   :  { %v4016_v32 = vpop.permute.xlu1 %4015 }
0x12f2   :  { %v4021_v14 = vsel %vm626_vm1, %v4016_v32, 0  ;;  %12227 = vmatmul.mubr.msk.bf16.vlgmr.msra.gmra.mxu1 %vm626_vm1, %v3960_v58 }
0x12f3   :  { %12231 = vmatpush3.bf16.xpose.msra.mxu1 %v4021_v14  ;;  %12232 = vmatprep.mubr.msk.bf16.mxu1 %vm13823_vm0, %v13822_v35 }
0x12f4   :  { %12236 = vmatprep.subr.bf16.mxu1 %v13822_v35 }
0x12fa   :  { %12233 = vmatmul.mubr.msk.bf16.vlgmr.msra.gmra.mxu1 %vm626_vm1, %v3962_v16 }
0x12fb   :  { %12237 = vmatpush3.bf16.msra.mxu1 %v3961_v41  ;;  %12238 = vmatprep.mubr.msk.bf16.mxu1 %vm13823_vm0, %v13822_v35 }
0x12fc   :  { %12242 = vmatprep.subr.bf16.mxu1 %v13822_v35 }
0x13b2   :  { %v4007_v24 = vpop.f32.mrf.mxu1 }
0x13b3   :  { %v4064_v51 = vsel %vm14353_vm2, %v4007_v24, -inf }
0x13b4   :  { %v12228_v52 = vpop.f32.mrf.mxu1  ;;  %v4068_v39 = vsel %vm732_vm3, %v4064_v51, -inf }
0x13b5   :  { %4069 = vmax.xlane.f32.xlu1 %v4068_v39 }
0x13b6   :  { %v4010_v25 = vpop.f32.mrf.mxu1 }
0x13b7   :  { %v4065_v54 = vsel %vm14361_vm4, %v4010_v25, -inf }
0x13b8   :  { %v12229_v28 = vpop.f32.mrf.mxu1  ;;  %v4071_v0 = vsel %vm732_vm3, %v4065_v54, -inf }
0x13b9   :  { %4072 = vmax.xlane.f32.xlu0 %v4071_v0 }
0x13ba   :  { %v4057_v48 = vpop.f32.mrf.mxu1 }
0x13bb   :  { %v4066_v55 = vsel %vm14353_vm2, %v4057_v48, -inf }
0x13bc   :  { %v12234_v56 = vpop.f32.mrf.mxu1  ;;  %v4074_v45 = vsel %vm732_vm3, %v4066_v55, -inf }
0x13bd   :  { %4075 = vmax.xlane.f32.xlu0 %v4074_v45  ;;  %v12732_v56 = vld [vmem:[%s17048_s4 + $0x1cc] ss:$12 sps:$4 sm:$0xff]   ;;  %v12735_v45 = vld [vmem:[%s17048_s4 + $0x1b4] ss:$12 sps:$4 sm:$0xff]  }
0x13be   :  { %v4060_v58 = vpop.f32.mrf.mxu1  ;;  %4299 = vmatprep.subr.bf16.mxu0 %v12732_v56  ;;  %v12757_v56 = vld [vmem:[%s17047_s3 + $0x8f4] ss:$8 sps:$4 sm:$0xff]  }
0x13bf   :  { %v4067_v63 = vsel %vm14361_vm4, %v4060_v58, -inf  ;;  %v12733_v58 = vld [vmem:[%s17048_s4 + $0x1b0] ss:$12 sps:$4 sm:$0xff]  }
0x13c0   :  { %v12235_v30 = vpop.f32.mrf.mxu1  ;;  %v4077_v3 = vsel %vm732_vm3, %v4067_v63, -inf }
0x13c1   :  { %4078 = vmax.xlane.f32.xlu1 %v4077_v3  ;;  %v12736_v30 = vld [vmem:[%s17048_s4 + $0x198] ss:$12 sps:$4 sm:$0xff]  }
0x143e   :  { %v4070_v5 = vpop.xlane.xlu1 %4069 }
0x143f   :  { %v4080_v7 = vsub.f32 %v4064_v51, %v4070_v5 }
0x1441   :  { %v4084_v13 = vmul.f32 1.442695, %v4080_v7 }
0x1442   :  { %v4073_v18 = vpop.xlane.xlu0 %4072 }
0x1443   :  { %13722 = vpow2.f32 %v4084_v13  ;;  %v4081_v16 = vsub.f32 %v4065_v54, %v4073_v18  ;;  %v3904_v18 = vpop.f32.mrf.mxu0 }
0x1445   :  { %v4086_v26 = vmul.f32 1.442695, %v4081_v16 }
0x1446   :  { %v4076_v27 = vpop.xlane.xlu0 %4075 }
0x1447   :  { %13724 = vpow2.f32 %v4086_v26  ;;  %v4082_v32 = vsub.f32 %v4066_v55, %v4076_v27  ;;  %v12730_v55 = vld [vmem:[%s17048_s4 + $0x1c8] ss:$12 sps:$4 sm:$0xff]   ;;  %v3958_v27 = vadd.f32 %v15294_v37, %v3904_v18 }
0x1448   :  { %4300 = vmatpush1.bf16.msra.mxu0 %v12730_v55  ;;  %v12748_v55 = vld [vmem:[%s17048_s4 + $0x188] ss:$12 sps:$4 sm:$0xff]  }
0x1449   :  { %v4088_v14 = vmul.f32 1.442695, %v4082_v32  ;;  %4301 = vmatprep.subr.bf16.mxu0 %v12735_v45  ;;  %v12749_v18 = vld [vmem:[%s17047_s3 + $0x7e0] ss:$8 sps:$4 sm:$0xff]  }
0x144a   :  { %v4079_v62 = vpop.xlane.xlu1 %4078 }
0x144b   :  { %13726 = vpow2.f32 %v4088_v14  ;;  %v4083_v41 = vsub.f32 %v4067_v63, %v4079_v62  ;;  %v12738_v63 = vld [vmem:[%s17048_s4 + $0x19c] ss:$12 sps:$4 sm:$0xff]  }
0x144c   :  { %4302 = vmatpush1.bf16.msra.mxu0 %v12733_v58 }
0x144d   :  { %v4090_v24 = vmul.f32 1.442695, %v4083_v41  ;;  %4303 = vmatprep.subr.bf16.mxu0 %v12738_v63  ;;  %v12739_v41 = vld [vmem:[%s17048_s4 + $0x1d0] ss:$12 sps:$4 sm:$0xff]  }
0x144f   :  { %13728 = vpow2.f32 %v4090_v24  ;;  %v3963_v24 = vpack.c.bf16 %v3958_v27, %v15280_v4  ;;  %v12743_v4 = vld [vmem:[%s17048_s4 + $0x1b8] ss:$12 sps:$4 sm:$0xff]  }
0x1450   :  { %v13723_v52 = vpop.eup %13722  ;;  %4304 = vmatpush1.bf16.msra.mxu0 %v12736_v30  ;;  %v12745_v30 = vld [vmem:[%s17047_s3 + $0x7f0] ss:$8 sps:$4 sm:$0xff]  }
0x1451   :  { %v4092_v39 = vsel %vm732_vm3, %v13723_v52, 0.0 }
0x1452   :  { %4093 = vadd.xlane.f32.xlu0 %v4092_v39 }
0x1454   :  { %v13725_v25 = vpop.eup %13724 }
0x1455   :  { %v4095_v51 = vsel %vm732_vm3, %v13725_v25, 0.0 }
0x1456   :  { %4096 = vadd.xlane.f32.xlu1 %v4095_v51 }
0x1458   :  { %v13727_v28 = vpop.eup %13726 }
0x1459   :  { %v4098_v54 = vsel %vm732_vm3, %v13727_v28, 0.0 }
0x145a   :  { %4099 = vadd.xlane.f32.xlu0 %v4098_v54 }
0x145c   :  { %v13729_v0 = vpop.eup %13728 }
0x145d   :  { %v4101_v48 = vsel %vm732_vm3, %v13729_v0, 0.0 }
0x145e   :  { %4102 = vadd.xlane.f32.xlu1 %v4101_v48  ;;  %v12740_v48 = vld [vmem:[%s17048_s4 + $0x180] ss:$12 sps:$4 sm:$0xff]  }
0x14db   :  { %v4094_v3 = vpop.xlane.xlu0 %4093 }
0x14dc   :  { %13730 = vrcp.f32 %v4094_v3 }
0x14df   :  { %v4097_v5 = vpop.xlane.xlu1 %4096 }
0x14e0   :  { %13732 = vrcp.f32 %v4097_v5  ;;  %v12751_v5 = vld [vmem:[%s17047_s3 + $0x7e4] ss:$8 sps:$4 sm:$0xff]  }
0x14e3   :  { %v4100_v7 = vpop.xlane.xlu0 %4099 }
0x14e4   :  { %13734 = vrcp.f32 %v4100_v7 }
0x14e7   :  { %v4103_v13 = vpop.xlane.xlu1 %4102 }
0x14e8   :  { %13736 = vrcp.f32 %v4103_v13 }
0x14e9   :  { %v13731_v16 = vpop.eup %13730 }
0x14ea   :  { %v4108_v32 = vmul.f32 %v13731_v16, %v13723_v52  ;;  %v12754_v16 = vld [vmem:[%s17047_s3 + $0x7d4] ss:$8 sps:$4 sm:$0xff]  }
0x14ed   :  { %v13733_v26 = vpop.eup %13732 }
0x14ee   :  { %v4109_v14 = vmul.f32 %v13733_v26, %v13725_v25  ;;  %v12742_v25 = vld [vmem:[%s17048_s4 + $0x184] ss:$12 sps:$4 sm:$0xff]  }
0x14ef   :  { %4305 = vmatprep.subr.bf16.mxu0 %v12742_v25  ;;  %v12764_v25 = vld [vmem:[%s17047_s3 + $0x7b0] ss:$8 sps:$4 sm:$0xff]  }
0x14f0   :  { %v4112_v62 = vpack.c.bf16 %v4109_v14, %v4108_v32  ;;  %4306 = vmatpush1.bf16.msra.mxu0 %v12740_v48  ;;  %v12752_v32 = vld [vmem:[%s17047_s3 + $0x7d0] ss:$8 sps:$4 sm:$0xff]   ;;  %v12775_v48 = vld [vmem:[%s17047_s3 + $0x8c4] ss:$8 sps:$4 sm:$0xff]  }
0x14f1   :  { %v13735_v39 = vpop.eup %13734  ;;  %v12755_v14 = vld [vmem:[%s17047_s3 + $0x8f0] ss:$8 sps:$4 sm:$0xff]  }
0x14f2   :  { %12239 = vmatmul.mubr.msk.bf16.vlgmr.msra.gmra.mxu1 %vm732_vm3, %v4112_v62  ;;  %v4110_v54 = vmul.f32 %v13735_v39, %v13727_v28  ;;  %v12744_v28 = vld [vmem:[%s17048_s4 + $0x1a0] ss:$12 sps:$4 sm:$0xff]  }
0x14f3   :  { %12243 = vmatpush3.bf16.msra.mxu1 %v3963_v24  ;;  %12244 = vmatprep.mubr.msk.bf16.mxu1 %vm13823_vm0, %v13822_v35  ;;  %v12763_v39 = vld [vmem:[%s17047_s3 + $0x8e4] ss:$8 sps:$4 sm:$0xff]  }
0x14f4   :  { %12248 = vmatprep.subr.bf16.mxu1 %v12739_v41 }
0x14f5   :  { %v13737_v51 = vpop.eup %13736 }
0x14f6   :  { %v4111_v37 = vmul.f32 %v13737_v51, %v13729_v0  ;;  %v12747_v0 = vld [vmem:[%s17047_s3 + $0x7f4] ss:$8 sps:$4 sm:$0xff]   ;;  %v12758_v51 = vld [vmem:[%s17047_s3 + $0x7c0] ss:$8 sps:$4 sm:$0xff]  }
0x14f7   :  { %4694 = vmatprep.subr.bf16.mxu0 %v12747_v0  ;;  %v12773_v0 = vld [vmem:[%s17047_s3 + $0x8c0] ss:$8 sps:$4 sm:$0xff]  }
0x14f8   :  { %v4113_v52 = vpack.c.bf16 %v4111_v37, %v4110_v54  ;;  %v12761_v54 = vld [vmem:[%s17047_s3 + $0x8e0] ss:$8 sps:$4 sm:$0xff]   ;;  %v12766_v37 = vld [vmem:[%s17047_s3 + $0x7b4] ss:$8 sps:$4 sm:$0xff]  }
0x14fa   :  { %12245 = vmatmul.mubr.msk.bf16.vlgmr.msra.gmra.mxu1 %vm732_vm3, %v4113_v52  ;;  %v12769_v52 = vld [vmem:[%s17047_s3 + $0x8d4] ss:$8 sps:$4 sm:$0xff]  }
0x14fb   :  { %12249 = vmatpush3.bf16.msra.mxu1 %v12739_v41  ;;  %v12760_v41 = vld [vmem:[%s17047_s3 + $0x7c4] ss:$8 sps:$4 sm:$0xff]  }
0x14fc   :  { %12250 = vmatprep.subr.bf16.mxu1 %v12743_v4 }
0x14ff   :  { %12251 = vmatpush3.bf16.msra.mxu1 %v12743_v4  ;;  %v12772_v4 = vld [vmem:[%s17047_s3 + $0x7a4] ss:$8 sps:$4 sm:$0xff]  }
0x1500   :  { %12252 = vmatprep.subr.bf16.mxu1 %v12744_v28 }
0x1503   :  { %12253 = vmatpush3.bf16.msra.mxu1 %v12744_v28  ;;  %v12770_v28 = vld [vmem:[%s17047_s3 + $0x7a0] ss:$8 sps:$4 sm:$0xff]  }
0x1504   :  { %12254 = vmatprep.subr.bf16.mxu1 %v12748_v55 }
0x1507   :  { %12255 = vmatpush3.bf16.msra.mxu1 %v12748_v55  ;;  %v12778_v55 = vld [vmem:[%s17047_s3 + $0x794] ss:$8 sps:$4 sm:$0xff]  }
0x1508   :  { %4747 = vmatprep.subr.bf16.mxu1 %v12757_v56  ;;  %v12781_v56 = vld [vmem:[%s17047_s3 + $0x8b4] ss:$8 sps:$4 sm:$0xff]  }
0x15b2   :  { %v4151_v45 = vpop.f32.mrf.mxu1 }
0x15b4   :  { %v12240_v58 = vpop.f32.mrf.mxu1 }
0x15b5   :  { %v12779_v58 = vld [vmem:[%s17047_s3 + $0x8b0] ss:$8 sps:$4 sm:$0xff]  }
0x15b6   :  { %v4154_v63 = vpop.f32.mrf.mxu1 }
0x15b7   :  { %v4202_v3 = vpack.c.bf16 %v4154_v63, %v4151_v45  ;;  %v12776_v45 = vld [vmem:[%s17047_s3 + $0x790] ss:$8 sps:$4 sm:$0xff]   ;;  %v12784_v63 = vld [vmem:[%s17047_s3 + $0x784] ss:$8 sps:$4 sm:$0xff]  }
0x15b8   :  { %v12241_v7 = vpop.f32.mrf.mxu1 }
0x15b9   :  { %11116 = vmatmul.mubr.msk.bf16.vlgmr.msra.gmra.mxu0 %vm626_vm1, %v4202_v3  ;;  %12256 = vmatprep.mubr.msk.bf16.mxu1 %vm626_vm1, %v4202_v3  ;;  %v12782_v3 = vld [vmem:[%s17047_s3 + $0x780] ss:$8 sps:$4 sm:$0xff]   ;;  %v12790_v7 = vld [vmem:[%s17047_s3 + $0x874] ss:$8 sps:$4 sm:$0xff]  }
0x15ba   :  { %4695 = vmatpush1.bf16.msra.mxu0 %v12745_v30  ;;  %v4195_v13 = vpop.f32.mrf.mxu1  ;;  %4333 = vmatprep.mubr.bf16.mxu0 %v13821_v40  ;;  %v12787_v30 = vld [vmem:[%s17047_s3 + $0x8a4] ss:$8 sps:$4 sm:$0xff]  }
0x15bb   :  { %4696 = vmatprep.subr.bf16.mxu0 %v12751_v5  ;;  %v12785_v5 = vld [vmem:[%s17047_s3 + $0x8a0] ss:$8 sps:$4 sm:$0xff]  }
0x15bc   :  { %v12246_v26 = vpop.f32.mrf.mxu1 }
0x15bd   :  { %v12796_v26 = vld [vmem:[%s17047_s3 + $0x864] ss:$8 sps:$4 sm:$0xff]  }
0x15be   :  { %4697 = vmatpush1.bf16.msra.mxu0 %v12749_v18  ;;  %v4198_v27 = vpop.f32.mrf.mxu1  ;;  %v12788_v18 = vld [vmem:[%s17047_s3 + $0x870] ss:$8 sps:$4 sm:$0xff]  }
0x15bf   :  { %v4203_v62 = vpack.c.bf16 %v4198_v27, %v4195_v13  ;;  %4698 = vmatprep.subr.bf16.mxu0 %v12754_v16  ;;  %v12793_v13 = vld [vmem:[%s17047_s3 + $0x894] ss:$8 sps:$4 sm:$0xff]   ;;  %v12791_v16 = vld [vmem:[%s17047_s3 + $0x890] ss:$8 sps:$4 sm:$0xff]   ;;  %v12799_v27 = vld [vmem:[%s17047_s3 + $0x884] ss:$8 sps:$4 sm:$0xff]  }
0x15c0   :  { %v12247_v24 = vpop.f32.mrf.mxu1 }
0x15c1   :  { %11117 = vmatmul.mubr.msk.bf16.gmra.mxu0 %vm626_vm1, %v4203_v62  ;;  %12257 = vmatmul.mubr.msk.bf16.vlgmr.msra.gmra.mxu1 %vm626_vm1, %v4203_v62  ;;  %v12802_v62 = vld [vmem:[%s17047_s3 + $0x854] ss:$8 sps:$4 sm:$0xff]   ;;  %v12805_v24 = vld [vmem:[%s17047_s3 + $0x844] ss:$8 sps:$4 sm:$0xff]  }
0x15c2   :  { %4699 = vmatpush1.bf16.msra.mxu0 %v12752_v32  ;;  %4748 = vmatpush1.bf16.msra.mxu1 %v12755_v14  ;;  %v12794_v32 = vld [vmem:[%s17047_s3 + $0x860] ss:$8 sps:$4 sm:$0xff]  }
0x15c3   :  { %4726 = vmatprep.mubr.bf16.mxu0 %v14218_v43  ;;  %4700 = vmatprep.subr.bf16.mxu0 %v12760_v41  ;;  %v12767_v43 = vld [vmem:[%s17047_s3 + $0x8d0] ss:$8 sps:$4 sm:$0xff]   ;;  %v12797_v14 = vld [vmem:[%s17047_s3 + $0x880] ss:$8 sps:$4 sm:$0xff]  }
0x15c4   :  { %4749 = vmatprep.subr.bf16.mxu1 %v12763_v39  ;;  %4779 = vmatprep.mubr.bf16.mxu1 %v13821_v40  ;;  %v12800_v41 = vld [vmem:[%s17047_s3 + $0x850] ss:$8 sps:$4 sm:$0xff]   ;;  %v12803_v39 = vld [vmem:[%s17047_s3 + $0x840] ss:$8 sps:$4 sm:$0xff]  }
0x15c6   :  { %4701 = vmatpush1.bf16.msra.mxu0 %v12758_v51  ;;  %4750 = vmatpush1.bf16.msra.mxu1 %v12761_v54  ;;  %v12808_v51 = vld [vmem:[%s17047_s3 + $0x834] ss:$8 sps:$4 sm:$0xff]   ;;  %v12806_v54 = vld [vmem:[%s17047_s3 + $0x830] ss:$8 sps:$4 sm:$0xff]  }
0x15c7   :  { %4702 = vmatprep.subr.bf16.mxu0 %v12766_v37  ;;  %4751 = vmatprep.subr.bf16.mxu1 %v12769_v52  ;;  %v12809_v37 = vld [vmem:[%s17047_s3 + $0x820] ss:$8 sps:$4 sm:$0xff]   ;;  %v12814_v52 = vld [vmem:[%s17047_s3 + $0x814] ss:$8 sps:$4 sm:$0xff]  }
0x15ca   :  { %4703 = vmatpush1.bf16.msra.mxu0 %v12764_v25  ;;  %4752 = vmatpush1.bf16.msra.mxu1 %v12767_v43  ;;  %v12812_v25 = vld [vmem:[%s17047_s3 + $0x810] ss:$8 sps:$4 sm:$0xff]   ;;  %v12815_v43 = vld [vmem:[%s17047_s3 + $0x800] ss:$8 sps:$4 sm:$0xff]  }
0x15cb   :  { %4704 = vmatprep.subr.bf16.mxu0 %v12772_v4  ;;  %4753 = vmatprep.subr.bf16.mxu1 %v12775_v48 }
0x15ce   :  { %4705 = vmatpush1.bf16.msra.mxu0 %v12770_v28  ;;  %4754 = vmatpush1.bf16.msra.mxu1 %v12773_v0 }
0x15cf   :  { %4706 = vmatprep.subr.bf16.mxu0 %v12778_v55  ;;  %4755 = vmatprep.subr.bf16.mxu1 %v12781_v56 }
0x15d2   :  { %4707 = vmatpush1.bf16.msra.mxu0 %v12776_v45  ;;  %4756 = vmatpush1.bf16.msra.mxu1 %v12779_v58 }
0x15d3   :  { %4708 = vmatprep.subr.bf16.mxu0 %v12784_v63  ;;  %4757 = vmatprep.subr.bf16.mxu1 %v12787_v30 }
0x15d6   :  { %4709 = vmatpush1.bf16.msra.mxu0 %v12782_v3  ;;  %4758 = vmatpush1.bf16.msra.mxu1 %v12785_v5 }
0x15d7   :  { %4710 = vmatprep.subr.bf16.mxu0 %v12790_v7  ;;  %4759 = vmatprep.subr.bf16.mxu1 %v12793_v13 }
0x15da   :  { %4711 = vmatpush2.bf16.msra.mxu0 %v12788_v18  ;;  %4760 = vmatpush1.bf16.msra.mxu1 %v12791_v16 }
0x15db   :  { %4712 = vmatprep.subr.bf16.mxu0 %v12796_v26  ;;  %4761 = vmatprep.subr.bf16.mxu1 %v12799_v27 }
0x15de   :  { %4713 = vmatpush2.bf16.msra.mxu0 %v12794_v32  ;;  %4762 = vmatpush1.bf16.msra.mxu1 %v12797_v14 }
0x15df   :  { %4714 = vmatprep.subr.bf16.mxu0 %v12802_v62  ;;  %12260 = vmatprep.subr.bf16.mxu1 %v13822_v35 }
0x15e1   :  { %4780 = vmatmul.mubr.bf16.vlgmr.msra.gmra.mxu1 %v14220_v50  ;;  %v12811_v50 = vld [vmem:[%s17047_s3 + $0x824] ss:$8 sps:$4 sm:$0xff]  }
0x15e2   :  { %4715 = vmatpush2.bf16.msra.mxu0 %v12800_v41  ;;  %4789 = vmatprep.mubr.bf16.mxu1 %v13821_v40 }
0x15e3   :  { %4716 = vmatprep.subr.bf16.mxu0 %v12805_v24 }
0x15e6   :  { %4717 = vmatpush2.bf16.msra.mxu0 %v12803_v39 }
0x15e7   :  { %4718 = vmatprep.subr.bf16.mxu0 %v12808_v51 }
0x15e9   :  { %4790 = vmatmul.mubr.bf16.gmra.mxu1 %v14243_v8  ;;  %v12817_v8 = vld [vmem:[%s17047_s3 + $0x804] ss:$8 sps:$4 sm:$0xff]  }
0x15ea   :  { %4719 = vmatpush2.bf16.msra.mxu0 %v12806_v54  ;;  %12262 = vmatprep.mubr.msk.bf16.mxu1 %vm13823_vm0, %v13822_v35 }
0x15eb   :  { %4720 = vmatprep.subr.bf16.mxu0 %v12811_v50 }
0x15ee   :  { %4721 = vmatpush2.bf16.msra.mxu0 %v12809_v37 }
0x15ef   :  { %4722 = vmatprep.subr.bf16.mxu0 %v12814_v52 }
0x15f2   :  { %4723 = vmatpush2.bf16.msra.mxu0 %v12812_v25 }
0x15f3   :  { %4724 = vmatprep.subr.bf16.mxu0 %v12817_v8 }
0x15f6   :  { %4725 = vmatpush2.bf16.msra.mxu0 %v12815_v43 }
0x15f7   :  { %12278 = vmatprep.subr.bf16.mxu0 %v13822_v35 }
0x15f9   :  { %4727 = vmatmul.mubr.bf16.vlgmr.msra.gmra.mxu0 %v14222_v53 }
0x15fa   :  { %4736 = vmatprep.mubr.bf16.mxu0 %v14234_v57 }
0x1601   :  { %4737 = vmatmul.mubr.bf16.gmra.mxu0 %v14245_v11 }
0x1602   :  { %12280 = vmatprep.mubr.msk.bf16.mxu0 %vm13823_vm0, %v13822_v35 }
0x1679   :  { %v4325_v4 = vpop.f32.mrf.mxu0 }
0x167a   :  { %v15518_v48 = vadd.f32 %v4325_v4, %v15247_v20 }
0x167b   :  { %v4327_v28 = vpop.f32.mrf.mxu0 }
0x167c   :  { %v15521_v0 = vadd.f32 %v4327_v28, %v15250_v15 }
0x167d   :  { %v4329_v55 = vpop.f32.mrf.mxu0 }
0x167e   :  { %v15524_v56 = vadd.f32 %v4329_v55, %v15253_v60 }
0x167f   :  { %v15526_v53 = vpop.f32.mrf.mxu0 }
0x1681   :  { %v4335_v57 = vpop.f32.mrf.mxu0  ;;  %v12258_v45 = vpop.f32.mrf.mxu1 }
0x1682   :  { %v15529_v11 = vadd.f32 %v4335_v57, %v15258_v31  ;;  %v15532_v58 = vadd.f32 %v12258_v45, %v15261_v34 }
0x1683   :  { %v4337_v20 = vpop.f32.mrf.mxu0  ;;  %v4378_v63 = vpop.f32.mrf.mxu1 }
0x1684   :  { %v15535_v30 = vadd.f32 %v4337_v20, %v15264_v38  ;;  %v15538_v15 = vadd.f32 %v4378_v63, %v15267_v19 }
0x1685   :  { %v4339_v60 = vpop.f32.mrf.mxu0  ;;  %v12259_v3 = vpop.f32.mrf.mxu1 }
0x1686   :  { %v15541_v5 = vadd.f32 %v4339_v60, %v15270_v61  ;;  %v15544_v7 = vadd.f32 %v12259_v3, %v15273_v49 }
0x1687   :  { %v15546_v31 = vpop.f32.mrf.mxu1  ;;  %v15548_v16 = vpop.f32.mrf.mxu0 }
0x16a1   :  { %v4781_v34 = vpop.f32.mrf.mxu1 }
0x16a3   :  { %v4783_v13 = vpop.f32.mrf.mxu1 }
0x16a5   :  { %v4785_v18 = vpop.f32.mrf.mxu1 }
0x16a7   :  { %v4787_v38 = vpop.f32.mrf.mxu1 }
0x16a9   :  { %v4791_v27 = vpop.f32.mrf.mxu1 }
0x16ab   :  { %v4793_v61 = vpop.f32.mrf.mxu1 }
0x16ad   :  { %v4795_v50 = vpop.f32.mrf.mxu1 }
0x16af   :  { %v4797_v43 = vpop.f32.mrf.mxu1 }
0x16b9   :  { %v4728_v26 = vpop.f32.mrf.mxu0 }
0x16ba   :  { %v4782_v62 = vadd.f32 %v4781_v34, %v4728_v26 }
0x16bb   :  { %v4730_v19 = vpop.f32.mrf.mxu0 }
0x16bc   :  { %v4784_v32 = vadd.f32 %v4783_v13, %v4730_v19 }
0x16bd   :  { %v4732_v14 = vpop.f32.mrf.mxu0 }
0x16be   :  { %v4786_v41 = vadd.f32 %v4785_v18, %v4732_v14 }
0x16bf   :  { %v4734_v24 = vpop.f32.mrf.mxu0 }
0x16c0   :  { %v4800_v39 = vpack.c.bf16 %v4786_v41, %v4782_v62  ;;  %v4788_v49 = vadd.f32 %v4787_v38, %v4734_v24 }
0x16c1   :  { %v4738_v51 = vpop.f32.mrf.mxu0 }
0x16c2   :  { %v4801_v54 = vpack.c.bf16 %v4788_v49, %v4784_v32  ;;  %4805 = vrot.lane.b32.xlu0 %v4800_v39, %s13824_s20  ;;  %v4792_v25 = vadd.f32 %v4791_v27, %v4738_v51 }
0x16c3   :  { %v4740_v37 = vpop.f32.mrf.mxu0 }
0x16c4   :  { %v4794_v28 = vadd.f32 %v4793_v61, %v4740_v37 }
0x16c5   :  { %v4742_v52 = vpop.f32.mrf.mxu0 }
0x16c6   :  { %v4796_v8 = vadd.f32 %v4795_v50, %v4742_v52 }
0x16c7   :  { %v4744_v4 = vpop.f32.mrf.mxu0 }
0x16c8   :  { %v4802_v55 = vpack.c.bf16 %v4796_v8, %v4792_v25  ;;  %v4798_v57 = vadd.f32 %v4797_v43, %v4744_v4 }
0x16ca   :  { %v4803_v45 = vpack.c.bf16 %v4798_v57, %v4794_v28  ;;  %4855 = vrot.lane.b32.xlu1 %v4802_v55, %s13824_s20 }
0x16cc   :  { %12279 = vmatpush3.bf16.msra.mxu0 %v4803_v45 }
0x1734   :  { %v4806_v20 = vpop.permute.xlu0 %4805 }
0x1735   :  { %v4811_v63 = vsel %vm626_vm1, %v4806_v20, 0 }
0x1736   :  { %12261 = vmatpush3.bf16.xpose.msra.mxu1 %v4811_v63 }
0x1737   :  { %12266 = vmatprep.subr.bf16.mxu1 %v13822_v35 }
0x173c   :  { %v4856_v60 = vpop.permute.xlu1 %4855 }
0x173d   :  { %v4861_v3 = vsel %vm626_vm1, %v4856_v60, 0  ;;  %12263 = vmatmul.mubr.msk.bf16.vlgmr.msra.gmra.mxu1 %vm626_vm1, %v4800_v39 }
0x173e   :  { %12267 = vmatpush3.bf16.xpose.msra.mxu1 %v4861_v3  ;;  %12268 = vmatprep.mubr.msk.bf16.mxu1 %vm13823_vm0, %v13822_v35 }
0x173f   :  { %12272 = vmatprep.subr.bf16.mxu1 %v13822_v35 }
0x1745   :  { %12269 = vmatmul.mubr.msk.bf16.vlgmr.msra.gmra.mxu1 %vm626_vm1, %v4802_v55 }
0x1746   :  { %12273 = vmatpush3.bf16.msra.mxu1 %v4801_v54  ;;  %12274 = vmatprep.mubr.msk.bf16.mxu1 %vm13823_vm0, %v13822_v35 }
0x17fd   :  { %v4847_v34 = vpop.f32.mrf.mxu1 }
0x17fe   :  { %v4904_v13 = vsel %vm14353_vm2, %v4847_v34, -inf }
0x17ff   :  { %v12264_v18 = vpop.f32.mrf.mxu1  ;;  %v4908_v38 = vsel %vm732_vm3, %v4904_v13, -inf }
0x1800   :  { %4909 = vmax.xlane.f32.xlu1 %v4908_v38  ;;  %v12827_v18 = vld [vmem:[%s17048_s4 + $0x230] ss:$12 sps:$4 sm:$0xff]  }
0x1801   :  { %v4850_v26 = vpop.f32.mrf.mxu1  ;;  %12284 = vmatprep.subr.bf16.mxu0 %v12827_v18 }
0x1802   :  { %v4905_v27 = vsel %vm14361_vm4, %v4850_v26, -inf }
0x1803   :  { %v12265_v19 = vpop.f32.mrf.mxu1  ;;  %v4911_v32 = vsel %vm732_vm3, %v4905_v27, -inf }
0x1804   :  { %4912 = vmax.xlane.f32.xlu0 %v4911_v32 }
0x1805   :  { %v4897_v14 = vpop.f32.mrf.mxu1 }
0x1806   :  { %v4906_v35 = vsel %vm14353_vm2, %v4897_v14, -inf }
0x1807   :  { %v12270_v62 = vpop.f32.mrf.mxu1  ;;  %v4914_v41 = vsel %vm732_vm3, %v4906_v35, -inf }
0x1808   :  { %4915 = vmax.xlane.f32.xlu0 %v4914_v41  ;;  %v12818_v41 = vld [vmem:[%s17048_s4 + $0x228] ss:$12 sps:$4 sm:$0xff]  }
0x1809   :  { %v4900_v61 = vpop.f32.mrf.mxu1 }
0x180a   :  { %v4907_v24 = vsel %vm14361_vm4, %v4900_v61, -inf }
0x180b   :  { %v12271_v39 = vpop.f32.mrf.mxu1  ;;  %v4917_v49 = vsel %vm732_vm3, %v4907_v24, -inf }
0x180c   :  { %4918 = vmax.xlane.f32.xlu1 %v4917_v49  ;;  %v12821_v49 = vld [vmem:[%s17048_s4 + $0x210] ss:$12 sps:$4 sm:$0xff]  }
0x1889   :  { %v4910_v51 = vpop.xlane.xlu1 %4909 }
0x188a   :  { %v4920_v54 = vsub.f32 %v4904_v13, %v4910_v51  ;;  %v12820_v13 = vld [vmem:[%s17048_s4 + $0x22c] ss:$12 sps:$4 sm:$0xff]   ;;  %v12826_v51 = vld [vmem:[%s17048_s4 + $0x1fc] ss:$12 sps:$4 sm:$0xff]  }
0x188b   :  { %5139 = vmatprep.subr.bf16.mxu1 %v12820_v13 }
0x188c   :  { %v4924_v50 = vmul.f32 1.442695, %v4920_v54 }
0x188d   :  { %v4913_v37 = vpop.xlane.xlu0 %4912 }
0x188e   :  { %13738 = vpow2.f32 %v4924_v50  ;;  %v4921_v52 = vsub.f32 %v4905_v27, %v4913_v37 }
0x1890   :  { %v4926_v17 = vmul.f32 1.442695, %v4921_v52  ;;  %v12824_v52 = vld [vmem:[%s17048_s4 + $0x1f8] ss:$12 sps:$4 sm:$0xff]  }
0x1891   :  { %v4916_v25 = vpop.xlane.xlu0 %4915 }
0x1892   :  { %13740 = vpow2.f32 %v4926_v17  ;;  %v4922_v8 = vsub.f32 %v4906_v35, %v4916_v25  ;;  %v12830_v25 = vld [vmem:[%s17048_s4 + $0x1e4] ss:$12 sps:$4 sm:$0xff]  }
0x1894   :  { %v4928_v43 = vmul.f32 1.442695, %v4922_v8  ;;  %v12831_v8 = vld [vmem:[%s17048_s4 + $0x218] ss:$12 sps:$4 sm:$0xff]  }
0x1895   :  { %v4919_v4 = vpop.xlane.xlu1 %4918 }
0x1896   :  { %13742 = vpow2.f32 %v4928_v43  ;;  %v4923_v28 = vsub.f32 %v4907_v24, %v4919_v4  ;;  %v12823_v24 = vld [vmem:[%s17048_s4 + $0x214] ss:$12 sps:$4 sm:$0xff]  }
0x1897   :  { %v12828_v43 = vld [vmem:[%s17048_s4 + $0x1e0] ss:$12 sps:$4 sm:$0xff]  }
0x1898   :  { %v4930_v23 = vmul.f32 1.442695, %v4923_v28  ;;  %v12832_v4 = vld [vmem:[%s17048_s4 + $0x200] ss:$12 sps:$4 sm:$0xff]   ;;  %v12833_v28 = vld [vmem:[%s17048_s4 + $0x1e8] ss:$12 sps:$4 sm:$0xff]  }
0x189a   :  { %13744 = vpow2.f32 %v4930_v23 }
0x189b   :  { %v13739_v55 = vpop.eup %13738 }
0x189c   :  { %v4932_v57 = vsel %vm732_vm3, %v13739_v55, 0.0 }
0x189d   :  { %4933 = vadd.xlane.f32.xlu0 %v4932_v57 }
0x189f   :  { %v13741_v45 = vpop.eup %13740 }
0x18a0   :  { %v4935_v20 = vsel %vm732_vm3, %v13741_v45, 0.0 }
0x18a1   :  { %4936 = vadd.xlane.f32.xlu1 %v4935_v20 }
0x18a3   :  { %v13743_v63 = vpop.eup %13742 }
0x18a4   :  { %v4938_v60 = vsel %vm732_vm3, %v13743_v63, 0.0 }
0x18a5   :  { %4939 = vadd.xlane.f32.xlu0 %v4938_v60 }
0x18a7   :  { %v13745_v3 = vpop.eup %13744 }
0x18a8   :  { %v4941_v34 = vsel %vm732_vm3, %v13745_v3, 0.0 }
0x18a9   :  { %4942 = vadd.xlane.f32.xlu1 %v4941_v34 }
0x1926   :  { %v4934_v38 = vpop.xlane.xlu0 %4933 }
0x1927   :  { %13746 = vrcp.f32 %v4934_v38 }
0x192a   :  { %v4937_v26 = vpop.xlane.xlu1 %4936 }
0x192b   :  { %13748 = vrcp.f32 %v4937_v26 }
0x192e   :  { %v4940_v27 = vpop.xlane.xlu0 %4939 }
0x192f   :  { %13750 = vrcp.f32 %v4940_v27 }
0x1932   :  { %v4943_v19 = vpop.xlane.xlu1 %4942 }
0x1933   :  { %13752 = vrcp.f32 %v4943_v19 }
0x1934   :  { %v13747_v32 = vpop.eup %13746 }
0x1935   :  { %v4948_v35 = vmul.f32 %v13747_v32, %v13739_v55  ;;  %v1834_v32 = vadd.f32 %v14745_v1, %v14719_v47 }
0x1938   :  { %v13749_v14 = vpop.eup %13748 }
0x1939   :  { %v4949_v62 = vmul.f32 %v13749_v14, %v13741_v45 }
0x193b   :  { %v4952_v61 = vpack.c.bf16 %v4949_v62, %v4948_v35  ;;  %v1874_v62 = vadd.f32 %v14743_v42, %v14727_v44  ;;  %v13762_v44 = vld [vmem:[%s17044_s0 + $0x8] sm:$0xff] }
0x193c   :  { %v13751_v39 = vpop.eup %13750 }
0x193d   :  { %12275 = vmatmul.mubr.msk.bf16.vlgmr.msra.gmra.mxu1 %vm732_vm3, %v4952_v61  ;;  %v4950_v50 = vmul.f32 %v13751_v39, %v13743_v63  ;;  %v2718_v47 = vadd.f32 %v15014_v33, %v1874_v62 }
0x193e   :  { %5140 = vmatpush1.bf16.msra.mxu1 %v12818_v41  ;;  %5163 = vmatprep.mubr.bf16.mxu1 %v13821_v40 }
0x193f   :  { %5141 = vmatprep.subr.bf16.mxu1 %v12823_v24  ;;  %v3558_v24 = vadd.f32 %v15275_v59, %v2718_v47  ;;  %v13773_v47 = vld [vmem:[%s17044_s0 + $0x58] sm:$0xff] }
0x1940   :  { %v13753_v54 = vpop.eup %13752 }
0x1941   :  { %v4951_v37 = vmul.f32 %v13753_v54, %v13745_v3  ;;  %v13765_v54 = vld [vmem:[%s17044_s0 + $0x20] sm:$0xff] }
0x1942   :  { %5142 = vmatpush1.bf16.msra.mxu1 %v12821_v49  ;;  %v13764_v49 = vld [vmem:[%s17044_s0 + $0x18] sm:$0xff] }
0x1943   :  { %v4953_v17 = vpack.c.bf16 %v4951_v37, %v4950_v50  ;;  %5143 = vmatprep.subr.bf16.mxu1 %v12826_v51 }
0x1945   :  { %12281 = vmatmul.mubr.msk.bf16.vlgmr.msra.gmra.mxu0 %vm732_vm3, %v4953_v17  ;;  %v4398_v17 = vadd.f32 %v15546_v31, %v3558_v24 }
0x1946   :  { %5144 = vmatpush1.bf16.msra.mxu1 %v12824_v52  ;;  %12285 = vmatpush3.bf16.msra.mxu0 %v12827_v18  ;;  %v1824_v18 = vadd.f32 %v14729_v29, %v14717_v21  ;;  %v2723_v21 = vadd.f32 %v15016_v36, %v1834_v32  ;;  %v5257_v29 = vld [vmem:[%s17049_s5] sm:$0x7] }
0x1947   :  { %5145 = vmatprep.subr.bf16.mxu1 %v12830_v25  ;;  %12286 = vmatprep.subr.bf16.mxu0 %v12831_v8  ;;  %v5262_v33 = vrot.slane %v5257_v29, %v14192_v12 }
0x1948   :  { %v2717_v26 = vadd.f32 %v14994_v22, %v1824_v18  ;;  %v13769_v18 = vld [vmem:[%s17044_s0 + $0x48] sm:$0xff] }
0x194a   :  { %5146 = vmatpush1.bf16.msra.mxu1 %v12828_v43  ;;  %12287 = vmatpush3.bf16.msra.mxu0 %v12831_v8  ;;  %v3557_v19 = vadd.f32 %v15255_v46, %v2717_v26 }
0x194b   :  { %12288 = vmatprep.subr.bf16.mxu0 %v12832_v4 }
0x194c   :  { %v4397_v41 = vadd.f32 %v15526_v53, %v3557_v19  ;;  %v13770_v19 = vld [vmem:[%s17044_s0 + $0x40] sm:$0xff] }
0x194e   :  { %12289 = vmatpush3.bf16.msra.mxu0 %v12832_v4 }
0x194f   :  { %12290 = vmatprep.subr.bf16.mxu0 %v12833_v28 }
0x1952   :  { %12291 = vmatpush3.bf16.msra.mxu0 %v12833_v28 }
0x19fd   :  { %v4991_v23 = vpop.f32.mrf.mxu1 }
0x19ff   :  { %v12276_v55 = vpop.f32.mrf.mxu1 }
0x1a01   :  { %v4994_v57 = vpop.f32.mrf.mxu1 }
0x1a02   :  { %v5042_v45 = vpack.c.bf16 %v4994_v57, %v4991_v23 }
0x1a03   :  { %v12277_v20 = vpop.f32.mrf.mxu1 }
0x1a04   :  { %11248 = vmatmul.mubr.msk.bf16.vlgmr.msra.gmra.mxu1 %vm626_vm1, %v5042_v45  ;;  %12292 = vmatprep.mubr.msk.bf16.mxu0 %vm626_vm1, %v5042_v45 }
0x1a05   :  { %v5035_v63 = vpop.f32.mrf.mxu0  ;;  %5173 = vmatprep.mubr.bf16.mxu1 %v13821_v40 }
0x1a07   :  { %v12282_v60 = vpop.f32.mrf.mxu0 }
0x1a09   :  { %v5038_v3 = vpop.f32.mrf.mxu0 }
0x1a0a   :  { %v5043_v34 = vpack.c.bf16 %v5038_v3, %v5035_v63 }
0x1a0b   :  { %v12283_v13 = vpop.f32.mrf.mxu0 }
0x1a0c   :  { %11249 = vmatmul.mubr.msk.bf16.gmra.mxu1 %vm626_vm1, %v5043_v34  ;;  %12293 = vmatmul.mubr.msk.bf16.vlgmr.msra.gmra.mxu0 %vm626_vm1, %v5043_v34 }
0x1a0d   :  { %7311 = vmatprep.mubr.bf16.mxu0 %v13821_v40 }
0x1ac4   :  { %v5165_v38 = vpop.f32.mrf.mxu1 }
0x1ac5   :  { %v5233_v61 = vadd.f32 %v5165_v38, %v15518_v48  ;;  %v5266_v48 = vrot.slane %v5257_v29, %v14183_v9 }
0x1ac6   :  { %v5167_v27 = vpop.f32.mrf.mxu1 }
0x1ac7   :  { %v5234_v14 = vadd.f32 %v5167_v27, %v15521_v0  ;;  %v3563_v0 = vadd.f32 %v15277_v2, %v2723_v21 }
0x1ac8   :  { %v5169_v35 = vpop.f32.mrf.mxu1 }
0x1ac9   :  { %v5236_v22 = vadd.f32 %v5169_v35, %v15524_v56  ;;  %v5246_v42 = vadd.f32 %v13762_v44, %v5234_v14  ;;  %v13763_v56 = vld [vmem:[%s17044_s0] sm:$0xff]  ;;  %v4403_v52 = vadd.f32 %v15548_v16, %v3563_v0  ;;  %v5270_v16 = vrot.slane %v5257_v29, %v14186_v10  ;;  %v13771_v35 = vld [vmem:[%s17044_s0 + $0x50] sm:$0xff] }
0x1aca   :  { %v5171_v46 = vpop.f32.mrf.mxu1  ;;  %v5245_v39 = vadd.f32 %v13763_v56, %v5233_v61 }
0x1acb   :  { %v5237_v1 = vadd.f32 %v5171_v46, %v4397_v41  ;;  %v5248_v51 = vadd.f32 %v13764_v49, %v5236_v22  ;;  %v15660_v8 = vadd.f32 %v5266_v48, %v5246_v42  ;;  %v13772_v41 = vld [vmem:[%s17044_s0 + $0x28] sm:$0xff]  ;;  %v12837_v49 = vld [vmem:[%s17052_s8 + $0x240] ss:$48 sps:$4 sm:$0xff]  }
0x1acc   :  { %v5175_v36 = vpop.f32.mrf.mxu1  ;;  %v12294_v53 = vpop.f32.mrf.mxu0  ;;  %v15667_v57 = vadd.f32 %v5262_v33, %v5245_v39 }
0x1acd   :  { %v5239_v2 = vadd.f32 %v5175_v36, %v15529_v11  ;;  %v5249_v50 = vadd.f32 %v13765_v54, %v5237_v1  ;;  %v13766_v11 = vld [vmem:[%s17044_s0 + $0x30] sm:$0xff]  ;;  %v5241_v4 = vadd.f32 %v12294_v53, %v15532_v58  ;;  %v15674_v20 = vadd.f32 %v5262_v33, %v5248_v51 }
0x1ace   :  { %v5177_v59 = vpop.f32.mrf.mxu1  ;;  %v5218_v37 = vpop.f32.mrf.mxu0  ;;  %v13768_v58 = vld [vmem:[%s17044_s0 + $0x10] sm:$0xff] }
0x1acf   :  { %v5240_v25 = vadd.f32 %v5177_v59, %v15535_v30  ;;  %v5251_v43 = vadd.f32 %v13766_v11, %v5239_v2  ;;  %v5235_v28 = vadd.f32 %v5218_v37, %v15538_v15  ;;  %v13767_v30 = vld [vmem:[%s17044_s0 + $0x38] sm:$0xff]  ;;  %v15676_v63 = vadd.f32 %v5266_v48, %v5249_v50  ;;  %v12839_v2 = vld [vmem:[%s17052_s8 + $0x244] ss:$48 sps:$4 sm:$0xff]   ;;  %v12858_v54 = vld [vmem:[%s17052_s8 + $0x8a0] ss:$48 sps:$4 sm:$0xff]  }
0x1ad0   :  { %v5179_v23 = vpop.f32.mrf.mxu1  ;;  %v12295_v55 = vpop.f32.mrf.mxu0  ;;  %v5253_v32 = vadd.f32 %v13770_v19, %v5241_v4  ;;  %v12842_v51 = vld [vmem:[%s17052_s8 + $0x1e4] ss:$48 sps:$4 sm:$0xff]   ;;  %v12840_v59 = vld [vmem:[%s17052_s8 + $0x1e0] ss:$48 sps:$4 sm:$0xff]  }
0x1ad1   :  { %v5252_v31 = vadd.f32 %v13767_v30, %v5240_v25  ;;  %v5242_v45 = vadd.f32 %v5179_v23, %v15541_v5  ;;  %v5247_v15 = vadd.f32 %v13768_v58, %v5235_v28  ;;  %v5244_v60 = vadd.f32 %v12295_v55, %v15544_v7  ;;  %v12860_v50 = vld [vmem:[%s17052_s8 + $0x8a4] ss:$48 sps:$4 sm:$0xff]   ;;  %v12846_v25 = vld [vmem:[%s17052_s8 + $0x120] ss:$48 sps:$4 sm:$0xff]  }
0x1ad2   :  { %v5181_v3 = vpop.f32.mrf.mxu1  ;;  %v5221_v34 = vpop.f32.mrf.mxu0  ;;  %v15687_v27 = vadd.f32 %v5262_v33, %v5251_v43  ;;  %v5288_v7 = vadd.f32 %v15660_v8, %v15667_v57  ;;  %v5292_v29 = vadd.f32 %v15676_v63, %v15674_v20  ;;  %v15716_v42 = vadd.f32 %v5270_v16, %v5253_v32  ;;  %7279 = vmatprep.subr.bf16.mxu0 %v12860_v50  ;;  %v12845_v37 = vld [vmem:[%s17052_s8 + $0x184] ss:$48 sps:$4 sm:$0xff]   ;;  %v12849_v43 = vld [vmem:[%s17052_s8 + $0xc0] ss:$48 sps:$4 sm:$0xff]  }
0x1ad3   :  { %v15682_v13 = vadd.f32 %v5266_v48, %v5252_v31  ;;  %v5254_v5 = vadd.f32 %v13769_v18, %v5242_v45  ;;  %v5243_v38 = vadd.f32 %v5181_v3, %v4403_v52  ;;  %v5238_v26 = vadd.f32 %v5221_v34, %v4398_v17  ;;  %7280 = vmatpush1.bf16.msra.mxu0 %v12858_v54  ;;  %v12843_v52 = vld [vmem:[%s17052_s8 + $0x180] ss:$48 sps:$4 sm:$0xff]   ;;  %v12848_v17 = vld [vmem:[%s17052_s8 + $0x124] ss:$48 sps:$4 sm:$0xff]  }
0x1ad4   :  { %v15692_v14 = vadd.f32 %v5270_v16, %v5247_v15  ;;  %v5256_v1 = vadd.f32 %v13773_v47, %v5244_v60  ;;  %17071 = vst [vmem:[#allocation11_spill] sm:$0xff] %v15716_v42  ;;  %v12851_v11 = vld [vmem:[%s17052_s8 + $0xc4] ss:$48 sps:$4 sm:$0xff]   ;;  %v12852_v28 = vld [vmem:[%s17052_s8 + $0x60] ss:$48 sps:$4 sm:$0xff]  }
0x1ad5   :  { %v5255_v62 = vadd.f32 %v13771_v35, %v5243_v38  ;;  %v5250_v61 = vadd.f32 %v13772_v41, %v5238_v26  ;;  %v5296_v22 = vadd.f32 %v15682_v13, %v15687_v27  ;;  %v15707_v46 = vadd.f32 %v5262_v33, %v5254_v5  ;;  %v12836_v33 = vld [vmem:[%s17052_s8 + $0x2a4] ss:$48 sps:$4 sm:$0xff]   ;;  %v12855_v55 = vld [vmem:[%s17052_s8] ss:$48 sps:$4 sm:$0xff]  }
0x1ad6   :  { %17069 = vst [vmem:[#allocation9_spill] sm:$0xff] %v15692_v14  ;;  %v5289_v21 = vadd.f32 %v5288_v7, %v15692_v14  ;;  %v15722_v56 = vadd.f32 %v5270_v16, %v5256_v1  ;;  %7226 = vmatprep.subr.bf16.mxu1 %v12836_v33  ;;  %v12854_v4 = vld [vmem:[%s17052_s8 + $0x64] ss:$48 sps:$4 sm:$0xff]   ;;  %v12861_v30 = vld [vmem:[%s17052_s8 + $0x5a0] ss:$48 sps:$4 sm:$0xff]  }
0x1ad7   :  { %v15712_v0 = vadd.f32 %v5266_v48, %v5255_v62  ;;  %v15714_v44 = vadd.f32 %v5270_v16, %v5250_v61  ;;  %v5297_v24 = vadd.f32 %v5296_v22, %v15716_v42  ;;  %v12834_v48 = vld [vmem:[%s17052_s8 + $0x2a0] ss:$48 sps:$4 sm:$0xff]   ;;  %v12857_v23 = vld [vmem:[%s17052_s8 + $0x4] ss:$48 sps:$4 sm:$0xff]  }
0x1ad8   :  { %5290 = vadd.xlane.f32.xlu0 %v5289_v21  ;;  %17072 = vst [vmem:[#allocation12_spill] sm:$0xff] %v15722_v56  ;;  %7227 = vmatpush1.bf16.msra.mxu1 %v12834_v48  ;;  %v12863_v16 = vld [vmem:[%s17052_s8 + $0x5a4] ss:$48 sps:$4 sm:$0xff]  }
0x1ad9   :  { %17070 = vst [vmem:[#allocation10_spill] sm:$0xff] %v15714_v44  ;;  %v5293_v36 = vadd.f32 %v5292_v29, %v15714_v44  ;;  %v5300_v53 = vadd.f32 %v15712_v0, %v15707_v46  ;;  %7228 = vmatprep.subr.bf16.mxu1 %v12839_v2 }
0x1adb   :  { %5294 = vadd.xlane.f32.xlu1 %v5293_v36  ;;  %v5301_v39 = vadd.f32 %v5300_v53, %v15722_v56 }
0x1adc   :  { %5298 = vadd.xlane.f32.xlu0 %v5297_v24  ;;  %7229 = vmatpush1.bf16.msra.mxu1 %v12837_v49 }
0x1add   :  { %7230 = vmatprep.subr.bf16.mxu1 %v12842_v51 }
0x1adf   :  { %5302 = vadd.xlane.f32.xlu1 %v5301_v39 }
0x1ae0   :  { %7231 = vmatpush1.bf16.msra.mxu1 %v12840_v59 }
0x1ae1   :  { %7232 = vmatprep.subr.bf16.mxu1 %v12845_v37 }
0x1ae4   :  { %7233 = vmatpush1.bf16.msra.mxu1 %v12843_v52 }
0x1ae5   :  { %7234 = vmatprep.subr.bf16.mxu1 %v12848_v17 }
0x1ae8   :  { %7235 = vmatpush1.bf16.msra.mxu1 %v12846_v25 }
0x1ae9   :  { %7236 = vmatprep.subr.bf16.mxu1 %v12851_v11 }
0x1aec   :  { %7237 = vmatpush1.bf16.msra.mxu1 %v12849_v43  ;;  %v12866_v43 = vld [vmem:[%s17052_s8 + $0x844] ss:$48 sps:$4 sm:$0xff]  }
0x1aed   :  { %7238 = vmatprep.subr.bf16.mxu1 %v12854_v4  ;;  %v12864_v4 = vld [vmem:[%s17052_s8 + $0x840] ss:$48 sps:$4 sm:$0xff]   ;;  %7281 = vmatprep.subr.bf16.mxu0 %v12866_v43 }
0x1aee   :  { %7282 = vmatpush1.bf16.msra.mxu0 %v12864_v4 }
0x1af0   :  { %7239 = vmatpush1.bf16.msra.mxu1 %v12852_v28  ;;  %v12869_v28 = vld [vmem:[%s17052_s8 + $0x544] ss:$48 sps:$4 sm:$0xff]  }
0x1af1   :  { %7240 = vmatprep.subr.bf16.mxu1 %v12857_v23  ;;  %v12867_v23 = vld [vmem:[%s17052_s8 + $0x540] ss:$48 sps:$4 sm:$0xff]  }
0x1af4   :  { %7241 = vmatpush1.bf16.msra.mxu1 %v12855_v55  ;;  %v12872_v55 = vld [vmem:[%s17052_s8 + $0x7e4] ss:$48 sps:$4 sm:$0xff]  }
0x1af5   :  { %7242 = vmatprep.subr.bf16.mxu1 %v12863_v16  ;;  %v12870_v16 = vld [vmem:[%s17052_s8 + $0x7e0] ss:$48 sps:$4 sm:$0xff]   ;;  %7283 = vmatprep.subr.bf16.mxu0 %v12872_v55 }
0x1af6   :  { %7284 = vmatpush1.bf16.msra.mxu0 %v12870_v16 }
0x1af8   :  { %7243 = vmatpush2.bf16.msra.mxu1 %v12861_v30  ;;  %v12875_v30 = vld [vmem:[%s17052_s8 + $0x4e4] ss:$48 sps:$4 sm:$0xff]  }
0x1af9   :  { %7244 = vmatprep.subr.bf16.mxu1 %v12869_v28 }
0x1afc   :  { %7245 = vmatpush2.bf16.msra.mxu1 %v12867_v23 }
0x1afd   :  { %7246 = vmatprep.subr.bf16.mxu1 %v12875_v30 }
0x1b61   :  { %v5291_v31 = vpop.xlane.xlu0 %5290 }
0x1b62   :  { %v5304_v45 = vmul.f32 0.0026041667, %v5291_v31  ;;  %v12873_v31 = vld [vmem:[%s17052_s8 + $0x4e0] ss:$48 sps:$4 sm:$0xff]  }
0x1b63   :  { %7247 = vmatpush2.bf16.msra.mxu1 %v12873_v31  ;;  %v5286_v31 = vld [vmem:[%s17050_s6] sm:$0x7] }
0x1b64   :  { %v15786_v58 = vsub.f32 %v15667_v57, %v5304_v45  ;;  %v15789_v15 = vsub.f32 %v15660_v8, %v5304_v45  ;;  %v15792_v60 = vsub.f32 %v15692_v14, %v5304_v45  ;;  %v5295_v3 = vpop.xlane.xlu1 %5294  ;;  %v12878_v45 = vld [vmem:[%s17052_s8 + $0x784] ss:$48 sps:$4 sm:$0xff]  }
0x1b65   :  { %v5305_v34 = vmul.f32 0.0026041667, %v5295_v3  ;;  %v5299_v18 = vpop.xlane.xlu0 %5298  ;;  %v12876_v3 = vld [vmem:[%s17052_s8 + $0x780] ss:$48 sps:$4 sm:$0xff]   ;;  %7285 = vmatprep.subr.bf16.mxu0 %v12878_v45 }
0x1b66   :  { %v5306_v5 = vmul.f32 0.0026041667, %v5299_v18  ;;  %v5320_v38 = vmul.f32 %v15786_v58, %v15786_v58  ;;  %v5321_v26 = vmul.f32 %v15789_v15, %v15789_v15  ;;  %v5322_v35 = vmul.f32 %v15792_v60, %v15792_v60  ;;  %v12879_v18 = vld [vmem:[%s17052_s8 + $0x480] ss:$48 sps:$4 sm:$0xff]   ;;  %7286 = vmatpush1.bf16.msra.mxu0 %v12876_v3 }
0x1b67   :  { %v15799_v19 = vsub.f32 %v15674_v20, %v5305_v34  ;;  %v15802_v32 = vsub.f32 %v15676_v63, %v5305_v34  ;;  %v15805_v7 = vsub.f32 %v15714_v44, %v5305_v34  ;;  %v12881_v34 = vld [vmem:[%s17052_s8 + $0x484] ss:$48 sps:$4 sm:$0xff]   ;;  %v5287_v45 = vld [vmem:[%s17051_s7] sm:$0x7]  ;;  %v5380_v3 = vrot.slane %v5286_v31, %v14183_v9 }
0x1b68   :  { %v15810_v62 = vsub.f32 %v15687_v27, %v5306_v5  ;;  %v15813_v41 = vsub.f32 %v15682_v13, %v5306_v5  ;;  %v15816_v61 = vsub.f32 %v15716_v42, %v5306_v5  ;;  %v5303_v21 = vpop.xlane.xlu1 %5302  ;;  %v5332_v29 = vadd.f32 %v5321_v26, %v5320_v38  ;;  %7248 = vmatprep.subr.bf16.mxu1 %v12881_v34  ;;  %v12882_v5 = vld [vmem:[%s17052_s8 + $0x720] ss:$48 sps:$4 sm:$0xff]   ;;  %v12884_v38 = vld [vmem:[%s17052_s8 + $0x724] ss:$48 sps:$4 sm:$0xff]  }
0x1b69   :  { %v5307_v22 = vmul.f32 0.0026041667, %v5303_v21  ;;  %v5323_v47 = vmul.f32 %v15799_v19, %v15799_v19  ;;  %v5324_v1 = vmul.f32 %v15802_v32, %v15802_v32  ;;  %v5325_v53 = vmul.f32 %v15805_v7, %v15805_v7  ;;  %7249 = vmatpush2.bf16.msra.mxu1 %v12879_v18  ;;  %v12885_v26 = vld [vmem:[%s17052_s8 + $0x420] ss:$48 sps:$4 sm:$0xff]   ;;  %v12890_v21 = vld [vmem:[%s17052_s8 + $0x6c4] ss:$48 sps:$4 sm:$0xff]   ;;  %7287 = vmatprep.subr.bf16.mxu0 %v12884_v38 }
0x1b6a   :  { %v5333_v36 = vadd.f32 %v5332_v29, %v5322_v35  ;;  %v5326_v24 = vmul.f32 %v15810_v62, %v15810_v62  ;;  %v5327_v39 = vmul.f32 %v15813_v41, %v15813_v41  ;;  %v5328_v51 = vmul.f32 %v15816_v61, %v15816_v61  ;;  %v12887_v35 = vld [vmem:[%s17052_s8 + $0x424] ss:$48 sps:$4 sm:$0xff]   ;;  %7288 = vmatpush1.bf16.msra.mxu0 %v12882_v5 }
0x1b6b   :  { %v15829_v48 = vsub.f32 %v15707_v46, %v5307_v22  ;;  %v15832_v33 = vsub.f32 %v15712_v0, %v5307_v22  ;;  %v15835_v2 = vsub.f32 %v15722_v56, %v5307_v22  ;;  %v5336_v49 = vadd.f32 %v5324_v1, %v5323_v47  ;;  %v12893_v29 = vld [vmem:[%s17052_s8 + $0x3c4] ss:$48 sps:$4 sm:$0xff]   ;;  %7250 = vmatprep.subr.bf16.mxu1 %v12887_v35  ;;  %v12888_v22 = vld [vmem:[%s17052_s8 + $0x6c0] ss:$48 sps:$4 sm:$0xff]  }
0x1b6c   :  { %5334 = vadd.xlane.f32.xlu0 %v5333_v36  ;;  %v5340_v54 = vadd.f32 %v5327_v39, %v5326_v24  ;;  %7289 = vmatprep.subr.bf16.mxu0 %v12890_v21  ;;  %v12891_v47 = vld [vmem:[%s17052_s8 + $0x3c0] ss:$48 sps:$4 sm:$0xff]   ;;  %v12896_v1 = vld [vmem:[%s17052_s8 + $0x664] ss:$48 sps:$4 sm:$0xff]   ;;  %v5384_v34 = vrot.slane %v5286_v31, %v14186_v10  ;;  %v5376_v18 = vrot.slane %v5286_v31, %v14192_v12 }
0x1b6d   :  { %v5337_v50 = vadd.f32 %v5336_v49, %v5325_v53  ;;  %v5329_v59 = vmul.f32 %v15829_v48, %v15829_v48  ;;  %v5330_v37 = vmul.f32 %v15832_v33, %v15832_v33  ;;  %v5331_v17 = vmul.f32 %v15835_v2, %v15835_v2  ;;  %7251 = vmatpush2.bf16.msra.mxu1 %v12885_v26  ;;  %v12899_v36 = vld [vmem:[%s17052_s8 + $0x364] ss:$48 sps:$4 sm:$0xff]   ;;  %v12894_v53 = vld [vmem:[%s17052_s8 + $0x660] ss:$48 sps:$4 sm:$0xff]  }
0x1b6e   :  { %v5341_v52 = vadd.f32 %v5340_v54, %v5328_v51  ;;  %7252 = vmatprep.subr.bf16.mxu1 %v12893_v29  ;;  %7290 = vmatpush1.bf16.msra.mxu0 %v12888_v22  ;;  %v12897_v24 = vld [vmem:[%s17052_s8 + $0x360] ss:$48 sps:$4 sm:$0xff]   ;;  %v12902_v39 = vld [vmem:[%s17052_s8 + $0x604] ss:$48 sps:$4 sm:$0xff]   ;;  %v5408_v21 = vrot.slane %v5287_v45, %v14183_v9  ;;  %v5412_v29 = vrot.slane %v5287_v45, %v14186_v10 }
0x1b6f   :  { %5338 = vadd.xlane.f32.xlu1 %v5337_v50  ;;  %v5344_v25 = vadd.f32 %v5330_v37, %v5329_v59  ;;  %7291 = vmatprep.subr.bf16.mxu0 %v12896_v1  ;;  %v12905_v49 = vld [vmem:[%s17052_s8 + $0x304] ss:$48 sps:$4 sm:$0xff]   ;;  %v12900_v51 = vld [vmem:[%s17052_s8 + $0x600] ss:$48 sps:$4 sm:$0xff]   ;;  %v12908_v50 = vld [vmem:[%s17052_s8 + $0x2ac] ss:$48 sps:$4 sm:$0xff]  }
0x1b70   :  { %5342 = vadd.xlane.f32.xlu0 %v5341_v52  ;;  %v12903_v54 = vld [vmem:[%s17052_s8 + $0x300] ss:$48 sps:$4 sm:$0xff]   ;;  %v12911_v59 = vld [vmem:[%s17052_s8 + $0x8ac] ss:$48 sps:$4 sm:$0xff]  }
0x1b71   :  { %v5345_v11 = vadd.f32 %v5344_v25, %v5331_v17  ;;  %7253 = vmatpush2.bf16.msra.mxu1 %v12891_v47 }
0x1b72   :  { %7254 = vmatprep.subr.bf16.mxu1 %v12899_v36  ;;  %7292 = vmatpush1.bf16.msra.mxu0 %v12894_v53  ;;  %v5404_v53 = vrot.slane %v5287_v45, %v14192_v12 }
0x1b73   :  { %5346 = vadd.xlane.f32.xlu1 %v5345_v11  ;;  %7293 = vmatprep.subr.bf16.mxu0 %v12902_v39 }
0x1b75   :  { %7255 = vmatpush2.bf16.msra.mxu1 %v12897_v24 }
0x1b76   :  { %7256 = vmatprep.subr.bf16.mxu1 %v12905_v49  ;;  %7294 = vmatpush1.bf16.msra.mxu0 %v12900_v51 }
0x1b77   :  { %7332 = vmatprep.subr.bf16.mxu0 %v12908_v50 }
0x1b79   :  { %7257 = vmatpush2.bf16.msra.mxu1 %v12903_v54 }
0x1b7a   :  { %7385 = vmatprep.subr.bf16.mxu1 %v12911_v59 }
0x1bf5   :  { %v5335_v37 = vpop.xlane.xlu0 %5334 }
0x1bf6   :  { %v5348_v52 = vmul.f32 0.0026041667, %v5335_v37 }
0x1bf8   :  { %v5352_v17 = vadd.f32 1e-05, %v5348_v52  ;;  %v5339_v25 = vpop.xlane.xlu1 %5338 }
0x1bf9   :  { %v5349_v11 = vmul.f32 0.0026041667, %v5339_v25  ;;  %v5343_v43 = vpop.xlane.xlu0 %5342 }
0x1bfa   :  { %13754 = vrsqrt.f32 %v5352_v17  ;;  %v5350_v4 = vmul.f32 0.0026041667, %v5343_v43 }
0x1bfb   :  { %v5353_v28 = vadd.f32 1e-05, %v5349_v11 }
0x1bfc   :  { %v5354_v23 = vadd.f32 1e-05, %v5350_v4  ;;  %v5347_v55 = vpop.xlane.xlu1 %5346 }
0x1bfd   :  { %13756 = vrsqrt.f32 %v5353_v28  ;;  %v5351_v16 = vmul.f32 0.0026041667, %v5347_v55 }
0x1bfe   :  { %13758 = vrsqrt.f32 %v5354_v23 }
0x1bff   :  { %v5355_v30 = vadd.f32 1e-05, %v5351_v16 }
0x1c01   :  { %13760 = vrsqrt.f32 %v5355_v30 }
0x1c07   :  { %v13755_v5 = vpop.eup %13754 }
0x1c08   :  { %v5361_v38 = vmul.f32 %v13755_v5, %v15789_v15  ;;  %v5362_v26 = vmul.f32 %v13755_v5, %v15792_v60  ;;  %v5360_v35 = vmul.f32 %v13755_v5, %v15786_v58 }
0x1c0a   :  { %v13757_v22 = vpop.eup %13756  ;;  %v5389_v47 = vmul.f32 %v5380_v3, %v5361_v38  ;;  %v5390_v1 = vmul.f32 %v5384_v34, %v5362_v26  ;;  %v5388_v36 = vmul.f32 %v5376_v18, %v5360_v35  ;;  %v12915_v35 = vld [vmem:[%s17052_s8 + $0x848] ss:$48 sps:$4 sm:$0xff]  }
0x1c0b   :  { %v13759_v24 = vpop.eup %13758  ;;  %v5364_v39 = vmul.f32 %v13757_v22, %v15802_v32  ;;  %v5365_v49 = vmul.f32 %v13757_v22, %v15805_v7  ;;  %v5363_v15 = vmul.f32 %v13757_v22, %v15799_v19  ;;  %v12906_v19 = vld [vmem:[%s17052_s8 + $0x2a8] ss:$48 sps:$4 sm:$0xff]  }
0x1c0c   :  { %v5367_v60 = vmul.f32 %v13759_v24, %v15813_v41  ;;  %v5417_v51 = vadd.f32 %v5408_v21, %v5389_v47  ;;  %v5418_v37 = vadd.f32 %v5412_v29, %v5390_v1  ;;  %v5416_v52 = vadd.f32 %v5404_v53, %v5388_v36  ;;  %v12918_v1 = vld [vmem:[%s17052_s8 + $0x1e8] ss:$48 sps:$4 sm:$0xff]  }
0x1c0d   :  { %v5392_v58 = vmul.f32 %v5380_v3, %v5364_v39  ;;  %v5393_v54 = vmul.f32 %v5384_v34, %v5365_v49  ;;  %v5391_v50 = vmul.f32 %v5376_v18, %v5363_v15  ;;  %v5368_v25 = vmul.f32 %v13759_v24, %v15816_v61  ;;  %v12909_v61 = vld [vmem:[%s17052_s8 + $0x8a8] ss:$48 sps:$4 sm:$0xff]   ;;  %v12929_v15 = vld [vmem:[%s17052_s8 + $0x78c] ss:$48 sps:$4 sm:$0xff]  }
0x1c0e   :  { %v13761_v59 = vpop.eup %13760  ;;  %v5395_v17 = vmul.f32 %v5380_v3, %v5367_v60  ;;  %v5366_v41 = vmul.f32 %v13759_v24, %v15810_v62  ;;  %v12917_v62 = vld [vmem:[%s17052_s8 + $0x84c] ss:$48 sps:$4 sm:$0xff]   ;;  %v12921_v39 = vld [vmem:[%s17052_s8 + $0x7e8] ss:$48 sps:$4 sm:$0xff]  }
0x1c0f   :  { %v5420_v11 = vadd.f32 %v5408_v21, %v5392_v58  ;;  %v5421_v43 = vadd.f32 %v5412_v29, %v5393_v54  ;;  %v5419_v4 = vadd.f32 %v5404_v53, %v5391_v50  ;;  %v5370_v32 = vmul.f32 %v13761_v59, %v15832_v33  ;;  %v12914_v33 = vld [vmem:[%s17052_s8 + $0x24c] ss:$48 sps:$4 sm:$0xff]   ;;  %v12927_v60 = vld [vmem:[%s17052_s8 + $0x788] ss:$48 sps:$4 sm:$0xff]  }
0x1c10   :  { %v5371_v7 = vmul.f32 %v13761_v59, %v15835_v2  ;;  %v5369_v28 = vmul.f32 %v13761_v59, %v15829_v48  ;;  %v5423_v31 = vadd.f32 %v5408_v21, %v5395_v17  ;;  %v5396_v5 = vmul.f32 %v5384_v34, %v5368_v25  ;;  %v12932_v58 = vld [vmem:[%s17052_s8 + $0x12c] ss:$48 sps:$4 sm:$0xff]   ;;  %v12930_v54 = vld [vmem:[%s17052_s8 + $0x128] ss:$48 sps:$4 sm:$0xff]  }
0x1c11   :  { %v15962_v23 = vpack.c.bf16 %v5420_v11, %v5417_v51  ;;  %v15964_v55 = vpack.c.bf16 %v5421_v43, %v5418_v37  ;;  %v15969_v16 = vpack.c.bf16 %v5419_v4, %v5416_v52  ;;  %v5398_v30 = vmul.f32 %v5380_v3, %v5370_v32  ;;  %v12912_v3 = vld [vmem:[%s17052_s8 + $0x248] ss:$48 sps:$4 sm:$0xff]   ;;  %v12935_v51 = vld [vmem:[%s17052_s8 + $0x72c] ss:$48 sps:$4 sm:$0xff]  }
0x1c12   :  { %v5399_v48 = vmul.f32 %v5384_v34, %v5371_v7  ;;  %v5397_v2 = vmul.f32 %v5376_v18, %v5369_v28  ;;  %v5394_v38 = vmul.f32 %v5376_v18, %v5366_v41  ;;  %v12920_v34 = vld [vmem:[%s17052_s8 + $0x1ec] ss:$48 sps:$4 sm:$0xff]   ;;  %v5424_v47 = vadd.f32 %v5412_v29, %v5396_v5  ;;  %v12933_v50 = vld [vmem:[%s17052_s8 + $0x728] ss:$48 sps:$4 sm:$0xff]   ;;  %v12971_v5 = vld [vmem:[%s17052_s8 + $0x1f4] ss:$48 sps:$4 sm:$0xff]  }
0x1c13   :  { %7258 = vmatprep.mubr.bf16.mxu1 %v15962_v23  ;;  %7312 = vmatmul.mubr.bf16.vlgmr.msra.gmra.mxu0 %v15964_v55  ;;  %v5426_v45 = vadd.f32 %v5408_v21, %v5398_v30  ;;  %v12923_v18 = vld [vmem:[%s17052_s8 + $0x7ec] ss:$48 sps:$4 sm:$0xff]   ;;  %v12936_v52 = vld [vmem:[%s17052_s8 + $0xc8] ss:$48 sps:$4 sm:$0xff]   ;;  %v12957_v30 = vld [vmem:[%s17052_s8 + $0x2b0] ss:$48 sps:$4 sm:$0xff]  }
0x1c14   :  { %7333 = vmatpush1.bf16.msra.mxu0 %v12906_v19  ;;  %7259 = vmatmul.mubr.bf16.vlgmr.msra.gmra.mxu1 %v15969_v16  ;;  %v5427_v21 = vadd.f32 %v5412_v29, %v5399_v48  ;;  %v5425_v22 = vadd.f32 %v5404_v53, %v5397_v2  ;;  %v5422_v36 = vadd.f32 %v5404_v53, %v5394_v38  ;;  %v12926_v29 = vld [vmem:[%s17052_s8 + $0x18c] ss:$48 sps:$4 sm:$0xff]   ;;  %v12924_v53 = vld [vmem:[%s17052_s8 + $0x188] ss:$48 sps:$4 sm:$0xff]   ;;  %v12965_v48 = vld [vmem:[%s17052_s8 + $0x254] ss:$48 sps:$4 sm:$0xff]  }
0x1c15   :  { %7386 = vmatpush1.bf16.msra.mxu1 %v12909_v61  ;;  %7334 = vmatprep.subr.bf16.mxu0 %v12914_v33  ;;  %v15983_v26 = vpack.c.bf16 %v5426_v45, %v5423_v31  ;;  %v12938_v59 = vld [vmem:[%s17052_s8 + $0xcc] ss:$48 sps:$4 sm:$0xff]   ;;  %v12939_v17 = vld [vmem:[%s17052_s8 + $0x6c8] ss:$48 sps:$4 sm:$0xff]   ;;  %v12959_v61 = vld [vmem:[%s17052_s8 + $0x2b4] ss:$48 sps:$4 sm:$0xff]  }
0x1c16   :  { %7387 = vmatprep.subr.bf16.mxu1 %v12917_v62  ;;  %7321 = vmatprep.mubr.bf16.mxu0 %v13821_v40  ;;  %v15999_v24 = vpack.c.bf16 %v5427_v21, %v5424_v47  ;;  %v16004_v49 = vpack.c.bf16 %v5425_v22, %v5422_v36  ;;  %v12941_v37 = vld [vmem:[%s17052_s8 + $0x6cc] ss:$48 sps:$4 sm:$0xff]   ;;  %v12942_v43 = vld [vmem:[%s17052_s8 + $0x68] ss:$48 sps:$4 sm:$0xff]   ;;  %v12963_v31 = vld [vmem:[%s17052_s8 + $0x250] ss:$48 sps:$4 sm:$0xff]  }
0x1c17   :  { %7268 = vmatprep.mubr.bf16.mxu1 %v15983_v26  ;;  %v12944_v25 = vld [vmem:[%s17052_s8 + $0x6c] ss:$48 sps:$4 sm:$0xff]   ;;  %v12945_v4 = vld [vmem:[%s17052_s8 + $0x668] ss:$48 sps:$4 sm:$0xff]   ;;  %v12969_v38 = vld [vmem:[%s17052_s8 + $0x1f0] ss:$48 sps:$4 sm:$0xff]  }
0x1c18   :  { %7335 = vmatpush1.bf16.msra.mxu0 %v12912_v3  ;;  %v12947_v11 = vld [vmem:[%s17052_s8 + $0x66c] ss:$48 sps:$4 sm:$0xff]   ;;  %v12948_v7 = vld [vmem:[%s17052_s8 + $0x8] ss:$48 sps:$4 sm:$0xff]   ;;  %v12983_v47 = vld [vmem:[%s17052_s8 + $0x134] ss:$48 sps:$4 sm:$0xff]  }
0x1c19   :  { %7388 = vmatpush1.bf16.msra.mxu1 %v12915_v35  ;;  %7336 = vmatprep.subr.bf16.mxu0 %v12920_v34  ;;  %v12950_v32 = vld [vmem:[%s17052_s8 + $0xc] ss:$48 sps:$4 sm:$0xff]   ;;  %v12951_v41 = vld [vmem:[%s17052_s8 + $0x608] ss:$48 sps:$4 sm:$0xff]   ;;  %v12977_v34 = vld [vmem:[%s17052_s8 + $0x194] ss:$48 sps:$4 sm:$0xff]  }
0x1c1a   :  { %7389 = vmatprep.subr.bf16.mxu1 %v12923_v18  ;;  %v12953_v19 = vld [vmem:[%s17052_s8 + $0x60c] ss:$48 sps:$4 sm:$0xff]   ;;  %v12954_v33 = vld [vmem:[%s17052_s8 + $0x5a8] ss:$48 sps:$4 sm:$0xff]   ;;  %v12975_v18 = vld [vmem:[%s17052_s8 + $0x190] ss:$48 sps:$4 sm:$0xff]  }
0x1c1b   :  { %7322 = vmatmul.mubr.bf16.gmra.mxu0 %v15999_v24  ;;  %v12956_v28 = vld [vmem:[%s17052_s8 + $0x5ac] ss:$48 sps:$4 sm:$0xff]   ;;  %v12960_v2 = vld [vmem:[%s17052_s8 + $0x548] ss:$48 sps:$4 sm:$0xff]   ;;  %v12981_v36 = vld [vmem:[%s17052_s8 + $0x130] ss:$48 sps:$4 sm:$0xff]  }
0x1c1c   :  { %7337 = vmatpush1.bf16.msra.mxu0 %v12918_v1  ;;  %7269 = vmatmul.mubr.bf16.gmra.mxu1 %v16004_v49  ;;  %v12962_v62 = vld [vmem:[%s17052_s8 + $0x54c] ss:$48 sps:$4 sm:$0xff]   ;;  %v12966_v3 = vld [vmem:[%s17052_s8 + $0x4e8] ss:$48 sps:$4 sm:$0xff]  }
0x1c1d   :  { %7364 = vmatprep.mubr.bf16.mxu0 %v15962_v23  ;;  %7390 = vmatpush1.bf16.msra.mxu1 %v12921_v39  ;;  %v12968_v45 = vld [vmem:[%s17052_s8 + $0x4ec] ss:$48 sps:$4 sm:$0xff]   ;;  %v12972_v21 = vld [vmem:[%s17052_s8 + $0x488] ss:$48 sps:$4 sm:$0xff]  }
0x1c1e   :  { %7338 = vmatprep.subr.bf16.mxu0 %v12926_v29  ;;  %7391 = vmatprep.subr.bf16.mxu1 %v12929_v15  ;;  %v12974_v35 = vld [vmem:[%s17052_s8 + $0x48c] ss:$48 sps:$4 sm:$0xff]   ;;  %v12978_v1 = vld [vmem:[%s17052_s8 + $0x428] ss:$48 sps:$4 sm:$0xff]   ;;  %v12989_v29 = vld [vmem:[%s17052_s8 + $0xd4] ss:$48 sps:$4 sm:$0xff]  }
0x1c1f   :  { %7417 = vmatprep.mubr.bf16.mxu1 %v13821_v40  ;;  %v12980_v22 = vld [vmem:[%s17052_s8 + $0x42c] ss:$48 sps:$4 sm:$0xff]   ;;  %v12984_v15 = vld [vmem:[%s17052_s8 + $0x3c8] ss:$48 sps:$4 sm:$0xff]  }
0x1c20   :  { %7339 = vmatpush1.bf16.msra.mxu0 %v12924_v53  ;;  %v12986_v39 = vld [vmem:[%s17052_s8 + $0x3cc] ss:$48 sps:$4 sm:$0xff]   ;;  %v12987_v53 = vld [vmem:[%s17052_s8 + $0xd0] ss:$48 sps:$4 sm:$0xff]  }
0x1c21   :  { %7392 = vmatpush1.bf16.msra.mxu1 %v12927_v60  ;;  %7340 = vmatprep.subr.bf16.mxu0 %v12932_v58  ;;  %v12992_v60 = vld [vmem:[%s17052_s8 + $0x36c] ss:$48 sps:$4 sm:$0xff]   ;;  %v12995_v58 = vld [vmem:[%s17052_s8 + $0x74] ss:$48 sps:$4 sm:$0xff]  }
0x1c22   :  { %7393 = vmatprep.subr.bf16.mxu1 %v12935_v51  ;;  %v12990_v51 = vld [vmem:[%s17052_s8 + $0x368] ss:$48 sps:$4 sm:$0xff]  }
0x1c24   :  { %7341 = vmatpush1.bf16.msra.mxu0 %v12930_v54  ;;  %v12993_v54 = vld [vmem:[%s17052_s8 + $0x70] ss:$48 sps:$4 sm:$0xff]  }
0x1c25   :  { %7394 = vmatpush1.bf16.msra.mxu1 %v12933_v50  ;;  %7342 = vmatprep.subr.bf16.mxu0 %v12938_v59  ;;  %v12998_v50 = vld [vmem:[%s17052_s8 + $0x30c] ss:$48 sps:$4 sm:$0xff]   ;;  %v13001_v59 = vld [vmem:[%s17052_s8 + $0x14] ss:$48 sps:$4 sm:$0xff]  }
0x1c26   :  { %7395 = vmatprep.subr.bf16.mxu1 %v12941_v37  ;;  %v12996_v37 = vld [vmem:[%s17052_s8 + $0x308] ss:$48 sps:$4 sm:$0xff]  }
0x1c28   :  { %7343 = vmatpush1.bf16.msra.mxu0 %v12936_v52  ;;  %v12999_v52 = vld [vmem:[%s17052_s8 + $0x10] ss:$48 sps:$4 sm:$0xff]  }
0x1c29   :  { %7396 = vmatpush1.bf16.msra.mxu1 %v12939_v17  ;;  %7344 = vmatprep.subr.bf16.mxu0 %v12944_v25  ;;  %v13004_v17 = vld [vmem:[%s17052_s8 + $0x8b4] ss:$48 sps:$4 sm:$0xff]  }
0x1c2a   :  { %7397 = vmatprep.subr.bf16.mxu1 %v12947_v11  ;;  %v13007_v25 = vld [vmem:[%s17052_s8 + $0x5b4] ss:$48 sps:$4 sm:$0xff]   ;;  %v13002_v11 = vld [vmem:[%s17052_s8 + $0x8b0] ss:$48 sps:$4 sm:$0xff]  }
0x1c2c   :  { %7345 = vmatpush1.bf16.msra.mxu0 %v12942_v43  ;;  %v13005_v43 = vld [vmem:[%s17052_s8 + $0x5b0] ss:$48 sps:$4 sm:$0xff]  }
0x1c2d   :  { %7398 = vmatpush1.bf16.msra.mxu1 %v12945_v4  ;;  %7346 = vmatprep.subr.bf16.mxu0 %v12950_v32  ;;  %v13010_v4 = vld [vmem:[%s17052_s8 + $0x854] ss:$48 sps:$4 sm:$0xff]  }
0x1c2e   :  { %7399 = vmatprep.subr.bf16.mxu1 %v12953_v19  ;;  %v13013_v32 = vld [vmem:[%s17052_s8 + $0x554] ss:$48 sps:$4 sm:$0xff]   ;;  %v13008_v19 = vld [vmem:[%s17052_s8 + $0x850] ss:$48 sps:$4 sm:$0xff]  }
0x1c30   :  { %7347 = vmatpush1.bf16.msra.mxu0 %v12948_v7  ;;  %v13011_v7 = vld [vmem:[%s17052_s8 + $0x550] ss:$48 sps:$4 sm:$0xff]  }
0x1c31   :  { %7400 = vmatpush1.bf16.msra.mxu1 %v12951_v41  ;;  %7348 = vmatprep.subr.bf16.mxu0 %v12956_v28  ;;  %v13016_v41 = vld [vmem:[%s17052_s8 + $0x7f4] ss:$48 sps:$4 sm:$0xff]  }
0x1c32   :  { %7438 = vmatprep.subr.bf16.mxu1 %v12959_v61  ;;  %v13019_v28 = vld [vmem:[%s17052_s8 + $0x4f4] ss:$48 sps:$4 sm:$0xff]   ;;  %v13014_v61 = vld [vmem:[%s17052_s8 + $0x7f0] ss:$48 sps:$4 sm:$0xff]  }
0x1c34   :  { %7349 = vmatpush2.bf16.msra.mxu0 %v12954_v33  ;;  %7418 = vmatmul.mubr.bf16.vlgmr.msra.gmra.mxu1 %v15964_v55  ;;  %v13017_v33 = vld [vmem:[%s17052_s8 + $0x4f0] ss:$48 sps:$4 sm:$0xff]  }
0x1c35   :  { %7439 = vmatpush1.bf16.msra.mxu1 %v12957_v30  ;;  %7350 = vmatprep.subr.bf16.mxu0 %v12962_v62  ;;  %v13022_v30 = vld [vmem:[%s17052_s8 + $0x794] ss:$48 sps:$4 sm:$0xff]  }
0x1c36   :  { %7440 = vmatprep.subr.bf16.mxu1 %v12965_v48  ;;  %7427 = vmatprep.mubr.bf16.mxu1 %v13821_v40  ;;  %v13025_v62 = vld [vmem:[%s17052_s8 + $0x494] ss:$48 sps:$4 sm:$0xff]   ;;  %v13020_v48 = vld [vmem:[%s17052_s8 + $0x790] ss:$48 sps:$4 sm:$0xff]  }
0x1c38   :  { %7351 = vmatpush2.bf16.msra.mxu0 %v12960_v2  ;;  %v13023_v2 = vld [vmem:[%s17052_s8 + $0x490] ss:$48 sps:$4 sm:$0xff]  }
0x1c39   :  { %7441 = vmatpush1.bf16.msra.mxu1 %v12963_v31  ;;  %7352 = vmatprep.subr.bf16.mxu0 %v12968_v45  ;;  %v13028_v31 = vld [vmem:[%s17052_s8 + $0x734] ss:$48 sps:$4 sm:$0xff]  }
0x1c3a   :  { %7442 = vmatprep.subr.bf16.mxu1 %v12971_v5  ;;  %v13031_v45 = vld [vmem:[%s17052_s8 + $0x434] ss:$48 sps:$4 sm:$0xff]   ;;  %v13026_v5 = vld [vmem:[%s17052_s8 + $0x730] ss:$48 sps:$4 sm:$0xff]  }
0x1c3c   :  { %7353 = vmatpush2.bf16.msra.mxu0 %v12966_v3  ;;  %7428 = vmatmul.mubr.bf16.gmra.mxu1 %v15999_v24  ;;  %v13029_v3 = vld [vmem:[%s17052_s8 + $0x430] ss:$48 sps:$4 sm:$0xff]  }
0x1c3d   :  { %7443 = vmatpush1.bf16.msra.mxu1 %v12969_v38  ;;  %7470 = vmatprep.mubr.bf16.mxu1 %v15962_v23  ;;  %v13034_v38 = vld [vmem:[%s17052_s8 + $0x6d4] ss:$48 sps:$4 sm:$0xff]  }
0x1c3e   :  { %7354 = vmatprep.subr.bf16.mxu0 %v12974_v35  ;;  %7444 = vmatprep.subr.bf16.mxu1 %v12977_v34  ;;  %v13037_v35 = vld [vmem:[%s17052_s8 + $0x3d4] ss:$48 sps:$4 sm:$0xff]   ;;  %v13032_v34 = vld [vmem:[%s17052_s8 + $0x6d0] ss:$48 sps:$4 sm:$0xff]  }
0x1c40   :  { %7355 = vmatpush2.bf16.msra.mxu0 %v12972_v21  ;;  %v13035_v21 = vld [vmem:[%s17052_s8 + $0x3d0] ss:$48 sps:$4 sm:$0xff]  }
0x1c41   :  { %7445 = vmatpush1.bf16.msra.mxu1 %v12975_v18  ;;  %7356 = vmatprep.subr.bf16.mxu0 %v12980_v22  ;;  %v13040_v18 = vld [vmem:[%s17052_s8 + $0x674] ss:$48 sps:$4 sm:$0xff]  }
0x1c42   :  { %7446 = vmatprep.subr.bf16.mxu1 %v12983_v47  ;;  %v13043_v22 = vld [vmem:[%s17052_s8 + $0x374] ss:$48 sps:$4 sm:$0xff]   ;;  %v13038_v47 = vld [vmem:[%s17052_s8 + $0x670] ss:$48 sps:$4 sm:$0xff]  }
0x1c44   :  { %7357 = vmatpush2.bf16.msra.mxu0 %v12978_v1  ;;  %v13041_v1 = vld [vmem:[%s17052_s8 + $0x370] ss:$48 sps:$4 sm:$0xff]  }
0x1c45   :  { %7447 = vmatpush1.bf16.msra.mxu1 %v12981_v36  ;;  %7358 = vmatprep.subr.bf16.mxu0 %v12986_v39  ;;  %v13046_v36 = vld [vmem:[%s17052_s8 + $0x614] ss:$48 sps:$4 sm:$0xff]  }
0x1c46   :  { %7448 = vmatprep.subr.bf16.mxu1 %v12989_v29  ;;  %v13049_v39 = vld [vmem:[%s17052_s8 + $0x314] ss:$48 sps:$4 sm:$0xff]   ;;  %v13044_v29 = vld [vmem:[%s17052_s8 + $0x610] ss:$48 sps:$4 sm:$0xff]  }
0x1c48   :  { %7359 = vmatpush2.bf16.msra.mxu0 %v12984_v15  ;;  %v13047_v15 = vld [vmem:[%s17052_s8 + $0x310] ss:$48 sps:$4 sm:$0xff]  }
0x1c49   :  { %7449 = vmatpush1.bf16.msra.mxu1 %v12987_v53  ;;  %7360 = vmatprep.subr.bf16.mxu0 %v12992_v60  ;;  %v13052_v53 = vld [vmem:[%s17052_s8 + $0x2bc] ss:$48 sps:$4 sm:$0xff]  }
0x1c4a   :  { %7450 = vmatprep.subr.bf16.mxu1 %v12995_v58  ;;  %v13055_v60 = vld [vmem:[%s17052_s8 + $0x8bc] ss:$48 sps:$4 sm:$0xff]   ;;  %v13050_v58 = vld [vmem:[%s17052_s8 + $0x2b8] ss:$48 sps:$4 sm:$0xff]  }
0x1c4c   :  { %7361 = vmatpush2.bf16.msra.mxu0 %v12990_v51  ;;  %v13053_v51 = vld [vmem:[%s17052_s8 + $0x8b8] ss:$48 sps:$4 sm:$0xff]  }
0x1c4d   :  { %7451 = vmatpush1.bf16.msra.mxu1 %v12993_v54  ;;  %7362 = vmatprep.subr.bf16.mxu0 %v12998_v50  ;;  %v13058_v54 = vld [vmem:[%s17052_s8 + $0x25c] ss:$48 sps:$4 sm:$0xff]  }
0x1c4e   :  { %7452 = vmatprep.subr.bf16.mxu1 %v13001_v59  ;;  %v13061_v50 = vld [vmem:[%s17052_s8 + $0x85c] ss:$48 sps:$4 sm:$0xff]   ;;  %v13056_v59 = vld [vmem:[%s17052_s8 + $0x258] ss:$48 sps:$4 sm:$0xff]  }
0x1c50   :  { %7363 = vmatpush2.bf16.msra.mxu0 %v12996_v37  ;;  %v13059_v37 = vld [vmem:[%s17052_s8 + $0x858] ss:$48 sps:$4 sm:$0xff]  }
0x1c51   :  { %7453 = vmatpush1.bf16.msra.mxu1 %v12999_v52  ;;  %7491 = vmatprep.subr.bf16.mxu0 %v13004_v17  ;;  %v13064_v52 = vld [vmem:[%s17052_s8 + $0x1fc] ss:$48 sps:$4 sm:$0xff]  }
0x1c52   :  { %7454 = vmatprep.subr.bf16.mxu1 %v13007_v25  ;;  %v13067_v17 = vld [vmem:[%s17052_s8 + $0x7fc] ss:$48 sps:$4 sm:$0xff]   ;;  %v13062_v25 = vld [vmem:[%s17052_s8 + $0x1f8] ss:$48 sps:$4 sm:$0xff]  }
0x1c53   :  { %7365 = vmatmul.mubr.bf16.vlgmr.msra.gmra.mxu0 %v15969_v16 }
0x1c54   :  { %7374 = vmatprep.mubr.bf16.mxu0 %v15983_v26  ;;  %7492 = vmatpush1.bf16.msra.mxu0 %v13002_v11  ;;  %v13065_v11 = vld [vmem:[%s17052_s8 + $0x7f8] ss:$48 sps:$4 sm:$0xff]  }
0x1c55   :  { %7455 = vmatpush2.bf16.msra.mxu1 %v13005_v43  ;;  %7493 = vmatprep.subr.bf16.mxu0 %v13010_v4  ;;  %v13070_v43 = vld [vmem:[%s17052_s8 + $0x19c] ss:$48 sps:$4 sm:$0xff]  }
0x1c56   :  { %7456 = vmatprep.subr.bf16.mxu1 %v13013_v32  ;;  %v13073_v4 = vld [vmem:[%s17052_s8 + $0x79c] ss:$48 sps:$4 sm:$0xff]   ;;  %v13068_v32 = vld [vmem:[%s17052_s8 + $0x198] ss:$48 sps:$4 sm:$0xff]  }
0x1c58   :  { %7494 = vmatpush1.bf16.msra.mxu0 %v13008_v19  ;;  %v13071_v19 = vld [vmem:[%s17052_s8 + $0x798] ss:$48 sps:$4 sm:$0xff]  }
0x1c59   :  { %7457 = vmatpush2.bf16.msra.mxu1 %v13011_v7  ;;  %7495 = vmatprep.subr.bf16.mxu0 %v13016_v41  ;;  %v13076_v7 = vld [vmem:[%s17052_s8 + $0x13c] ss:$48 sps:$4 sm:$0xff]  }
0x1c5a   :  { %7458 = vmatprep.subr.bf16.mxu1 %v13019_v28  ;;  %v13079_v41 = vld [vmem:[%s17052_s8 + $0x73c] ss:$48 sps:$4 sm:$0xff]   ;;  %v13074_v28 = vld [vmem:[%s17052_s8 + $0x138] ss:$48 sps:$4 sm:$0xff]  }
0x1c5b   :  { %7375 = vmatmul.mubr.bf16.gmra.mxu0 %v16004_v49 }
0x1c5c   :  { %7496 = vmatpush1.bf16.msra.mxu0 %v13014_v61  ;;  %7523 = vmatprep.mubr.bf16.mxu0 %v13821_v40  ;;  %v13077_v61 = vld [vmem:[%s17052_s8 + $0x738] ss:$48 sps:$4 sm:$0xff]  }
0x1c5d   :  { %7459 = vmatpush2.bf16.msra.mxu1 %v13017_v33  ;;  %7497 = vmatprep.subr.bf16.mxu0 %v13022_v30  ;;  %v13082_v33 = vld [vmem:[%s17052_s8 + $0xdc] ss:$48 sps:$4 sm:$0xff]  }
0x1c5e   :  { %7460 = vmatprep.subr.bf16.mxu1 %v13025_v62  ;;  %v13085_v30 = vld [vmem:[%s17052_s8 + $0x6dc] ss:$48 sps:$4 sm:$0xff]   ;;  %v13080_v62 = vld [vmem:[%s17052_s8 + $0xd8] ss:$48 sps:$4 sm:$0xff]  }
0x1c60   :  { %7498 = vmatpush1.bf16.msra.mxu0 %v13020_v48  ;;  %v13083_v48 = vld [vmem:[%s17052_s8 + $0x6d8] ss:$48 sps:$4 sm:$0xff]  }
0x1c61   :  { %7461 = vmatpush2.bf16.msra.mxu1 %v13023_v2  ;;  %7499 = vmatprep.subr.bf16.mxu0 %v13028_v31  ;;  %v13088_v2 = vld [vmem:[%s17052_s8 + $0x7c] ss:$48 sps:$4 sm:$0xff]  }
0x1c62   :  { %7462 = vmatprep.subr.bf16.mxu1 %v13031_v45  ;;  %v13091_v31 = vld [vmem:[%s17052_s8 + $0x67c] ss:$48 sps:$4 sm:$0xff]   ;;  %v13086_v45 = vld [vmem:[%s17052_s8 + $0x78] ss:$48 sps:$4 sm:$0xff]  }
0x1c64   :  { %7500 = vmatpush1.bf16.msra.mxu0 %v13026_v5  ;;  %v13089_v5 = vld [vmem:[%s17052_s8 + $0x678] ss:$48 sps:$4 sm:$0xff]  }
0x1c65   :  { %7463 = vmatpush2.bf16.msra.mxu1 %v13029_v3  ;;  %7501 = vmatprep.subr.bf16.mxu0 %v13034_v38  ;;  %v13094_v3 = vld [vmem:[%s17052_s8 + $0x1c] ss:$48 sps:$4 sm:$0xff]  }
0x1c66   :  { %7464 = vmatprep.subr.bf16.mxu1 %v13037_v35  ;;  %v13097_v38 = vld [vmem:[%s17052_s8 + $0x61c] ss:$48 sps:$4 sm:$0xff]   ;;  %v13092_v35 = vld [vmem:[%s17052_s8 + $0x18] ss:$48 sps:$4 sm:$0xff]  }
0x1c68   :  { %7502 = vmatpush1.bf16.msra.mxu0 %v13032_v34  ;;  %v13095_v34 = vld [vmem:[%s17052_s8 + $0x618] ss:$48 sps:$4 sm:$0xff]  }
0x1c69   :  { %7465 = vmatpush2.bf16.msra.mxu1 %v13035_v21  ;;  %7503 = vmatprep.subr.bf16.mxu0 %v13040_v18  ;;  %v13100_v21 = vld [vmem:[%s17052_s8 + $0x5bc] ss:$48 sps:$4 sm:$0xff]   ;;  %v13103_v18 = vld [vmem:[%s17052_s8 + $0x2c4] ss:$48 sps:$4 sm:$0xff]  }
0x1c6a   :  { %7466 = vmatprep.subr.bf16.mxu1 %v13043_v22  ;;  %v13098_v22 = vld [vmem:[%s17052_s8 + $0x5b8] ss:$48 sps:$4 sm:$0xff]  }
0x1c6c   :  { %7504 = vmatpush1.bf16.msra.mxu0 %v13038_v47  ;;  %v13101_v47 = vld [vmem:[%s17052_s8 + $0x2c0] ss:$48 sps:$4 sm:$0xff]  }
0x1c6d   :  { %7467 = vmatpush2.bf16.msra.mxu1 %v13041_v1  ;;  %7505 = vmatprep.subr.bf16.mxu0 %v13046_v36  ;;  %v13106_v1 = vld [vmem:[%s17052_s8 + $0x55c] ss:$48 sps:$4 sm:$0xff]   ;;  %v13109_v36 = vld [vmem:[%s17052_s8 + $0x264] ss:$48 sps:$4 sm:$0xff]  }
0x1c6e   :  { %7468 = vmatprep.subr.bf16.mxu1 %v13049_v39  ;;  %v13104_v39 = vld [vmem:[%s17052_s8 + $0x558] ss:$48 sps:$4 sm:$0xff]  }
0x1c70   :  { %7506 = vmatpush1.bf16.msra.mxu0 %v13044_v29  ;;  %v13107_v29 = vld [vmem:[%s17052_s8 + $0x260] ss:$48 sps:$4 sm:$0xff]  }
0x1c71   :  { %7469 = vmatpush2.bf16.msra.mxu1 %v13047_v15  ;;  %7544 = vmatprep.subr.bf16.mxu0 %v13052_v53  ;;  %v13112_v15 = vld [vmem:[%s17052_s8 + $0x4fc] ss:$48 sps:$4 sm:$0xff]   ;;  %v13115_v53 = vld [vmem:[%s17052_s8 + $0x204] ss:$48 sps:$4 sm:$0xff]  }
0x1c72   :  { %7597 = vmatprep.subr.bf16.mxu1 %v13055_v60  ;;  %v13110_v60 = vld [vmem:[%s17052_s8 + $0x4f8] ss:$48 sps:$4 sm:$0xff]  }
0x1c73   :  { %7524 = vmatmul.mubr.bf16.vlgmr.msra.gmra.mxu0 %v15964_v55 }
0x1c74   :  { %7471 = vmatmul.mubr.bf16.vlgmr.msra.gmra.mxu1 %v15969_v16  ;;  %7545 = vmatpush1.bf16.msra.mxu0 %v13050_v58  ;;  %v13113_v58 = vld [vmem:[%s17052_s8 + $0x200] ss:$48 sps:$4 sm:$0xff]  }
0x1c75   :  { %7480 = vmatprep.mubr.bf16.mxu1 %v15983_v26  ;;  %7598 = vmatpush1.bf16.msra.mxu1 %v13053_v51  ;;  %v13118_v51 = vld [vmem:[%s17052_s8 + $0x49c] ss:$48 sps:$4 sm:$0xff]  }
0x1c76   :  { %7546 = vmatprep.subr.bf16.mxu0 %v13058_v54  ;;  %7599 = vmatprep.subr.bf16.mxu1 %v13061_v50  ;;  %v13121_v54 = vld [vmem:[%s17052_s8 + $0x1a4] ss:$48 sps:$4 sm:$0xff]   ;;  %v13116_v50 = vld [vmem:[%s17052_s8 + $0x498] ss:$48 sps:$4 sm:$0xff]  }
0x1c77   :  { %7533 = vmatprep.mubr.bf16.mxu0 %v13821_v40 }
0x1c78   :  { %7547 = vmatpush1.bf16.msra.mxu0 %v13056_v59  ;;  %v13119_v59 = vld [vmem:[%s17052_s8 + $0x1a0] ss:$48 sps:$4 sm:$0xff]  }
0x1c79   :  { %7600 = vmatpush1.bf16.msra.mxu1 %v13059_v37  ;;  %7548 = vmatprep.subr.bf16.mxu0 %v13064_v52  ;;  %v13124_v37 = vld [vmem:[%s17052_s8 + $0x43c] ss:$48 sps:$4 sm:$0xff]   ;;  %v13127_v52 = vld [vmem:[%s17052_s8 + $0x144] ss:$48 sps:$4 sm:$0xff]  }
0x1c7a   :  { %7601 = vmatprep.subr.bf16.mxu1 %v13067_v17  ;;  %v13122_v17 = vld [vmem:[%s17052_s8 + $0x438] ss:$48 sps:$4 sm:$0xff]  }
0x1c7b   :  { %7534 = vmatmul.mubr.bf16.gmra.mxu0 %v15999_v24 }
0x1c7c   :  { %7481 = vmatmul.mubr.bf16.gmra.mxu1 %v16004_v49  ;;  %7549 = vmatpush1.bf16.msra.mxu0 %v13062_v25  ;;  %v13125_v25 = vld [vmem:[%s17052_s8 + $0x140] ss:$48 sps:$4 sm:$0xff]  }
0x1c7d   :  { %7576 = vmatprep.mubr.bf16.mxu0 %v15962_v23  ;;  %7602 = vmatpush1.bf16.msra.mxu1 %v13065_v11  ;;  %v13130_v11 = vld [vmem:[%s17052_s8 + $0x3dc] ss:$48 sps:$4 sm:$0xff]  }
0x1c7e   :  { %7550 = vmatprep.subr.bf16.mxu0 %v13070_v43  ;;  %7603 = vmatprep.subr.bf16.mxu1 %v13073_v4  ;;  %v13133_v43 = vld [vmem:[%s17052_s8 + $0xe4] ss:$48 sps:$4 sm:$0xff]   ;;  %v13128_v4 = vld [vmem:[%s17052_s8 + $0x3d8] ss:$48 sps:$4 sm:$0xff]  }
0x1c7f   :  { %7629 = vmatprep.mubr.bf16.mxu1 %v13821_v40 }
0x1c80   :  { %7551 = vmatpush1.bf16.msra.mxu0 %v13068_v32  ;;  %v13131_v32 = vld [vmem:[%s17052_s8 + $0xe0] ss:$48 sps:$4 sm:$0xff]  }
0x1c81   :  { %7604 = vmatpush1.bf16.msra.mxu1 %v13071_v19  ;;  %7552 = vmatprep.subr.bf16.mxu0 %v13076_v7  ;;  %v13136_v19 = vld [vmem:[%s17052_s8 + $0x37c] ss:$48 sps:$4 sm:$0xff]   ;;  %v13139_v7 = vld [vmem:[%s17052_s8 + $0x84] ss:$48 sps:$4 sm:$0xff]  }
0x1c82   :  { %7605 = vmatprep.subr.bf16.mxu1 %v13079_v41  ;;  %v13134_v41 = vld [vmem:[%s17052_s8 + $0x378] ss:$48 sps:$4 sm:$0xff]  }
0x1c84   :  { %7553 = vmatpush1.bf16.msra.mxu0 %v13074_v28  ;;  %v13137_v28 = vld [vmem:[%s17052_s8 + $0x80] ss:$48 sps:$4 sm:$0xff]  }
0x1c85   :  { %7606 = vmatpush1.bf16.msra.mxu1 %v13077_v61  ;;  %7554 = vmatprep.subr.bf16.mxu0 %v13082_v33  ;;  %v13142_v61 = vld [vmem:[%s17052_s8 + $0x31c] ss:$48 sps:$4 sm:$0xff]   ;;  %v13145_v33 = vld [vmem:[%s17052_s8 + $0x24] ss:$48 sps:$4 sm:$0xff]  }
0x1c86   :  { %7607 = vmatprep.subr.bf16.mxu1 %v13085_v30  ;;  %v13140_v30 = vld [vmem:[%s17052_s8 + $0x318] ss:$48 sps:$4 sm:$0xff]  }
0x1c88   :  { %7555 = vmatpush1.bf16.msra.mxu0 %v13080_v62  ;;  %v13143_v62 = vld [vmem:[%s17052_s8 + $0x20] ss:$48 sps:$4 sm:$0xff]  }
0x1c89   :  { %7608 = vmatpush1.bf16.msra.mxu1 %v13083_v48  ;;  %7556 = vmatprep.subr.bf16.mxu0 %v13088_v2  ;;  %v13148_v48 = vld [vmem:[%s17052_s8 + $0x8c4] ss:$48 sps:$4 sm:$0xff]  }
0x1c8a   :  { %7609 = vmatprep.subr.bf16.mxu1 %v13091_v31  ;;  %v13151_v2 = vld [vmem:[%s17052_s8 + $0x5c4] ss:$48 sps:$4 sm:$0xff]   ;;  %v13146_v31 = vld [vmem:[%s17052_s8 + $0x8c0] ss:$48 sps:$4 sm:$0xff]  }
0x1c8c   :  { %7557 = vmatpush1.bf16.msra.mxu0 %v13086_v45  ;;  %v13149_v45 = vld [vmem:[%s17052_s8 + $0x5c0] ss:$48 sps:$4 sm:$0xff]  }
0x1c8d   :  { %7610 = vmatpush1.bf16.msra.mxu1 %v13089_v5  ;;  %7558 = vmatprep.subr.bf16.mxu0 %v13094_v3  ;;  %v13154_v5 = vld [vmem:[%s17052_s8 + $0x864] ss:$48 sps:$4 sm:$0xff]  }
0x1c8e   :  { %7611 = vmatprep.subr.bf16.mxu1 %v13097_v38  ;;  %v13157_v3 = vld [vmem:[%s17052_s8 + $0x564] ss:$48 sps:$4 sm:$0xff]   ;;  %v13152_v38 = vld [vmem:[%s17052_s8 + $0x860] ss:$48 sps:$4 sm:$0xff]  }
0x1c90   :  { %7559 = vmatpush1.bf16.msra.mxu0 %v13092_v35  ;;  %v13155_v35 = vld [vmem:[%s17052_s8 + $0x560] ss:$48 sps:$4 sm:$0xff]  }
0x1c91   :  { %7612 = vmatpush1.bf16.msra.mxu1 %v13095_v34  ;;  %7560 = vmatprep.subr.bf16.mxu0 %v13100_v21  ;;  %v13160_v34 = vld [vmem:[%s17052_s8 + $0x804] ss:$48 sps:$4 sm:$0xff]  }
0x1c92   :  { %7650 = vmatprep.subr.bf16.mxu1 %v13103_v18  ;;  %v13163_v21 = vld [vmem:[%s17052_s8 + $0x504] ss:$48 sps:$4 sm:$0xff]   ;;  %v13158_v18 = vld [vmem:[%s17052_s8 + $0x800] ss:$48 sps:$4 sm:$0xff]  }
0x1c94   :  { %7561 = vmatpush2.bf16.msra.mxu0 %v13098_v22  ;;  %7630 = vmatmul.mubr.bf16.vlgmr.msra.gmra.mxu1 %v15964_v55  ;;  %v13161_v22 = vld [vmem:[%s17052_s8 + $0x500] ss:$48 sps:$4 sm:$0xff]  }
0x1c95   :  { %7651 = vmatpush1.bf16.msra.mxu1 %v13101_v47  ;;  %7562 = vmatprep.subr.bf16.mxu0 %v13106_v1  ;;  %v13166_v47 = vld [vmem:[%s17052_s8 + $0x7a4] ss:$48 sps:$4 sm:$0xff]  }
0x1c96   :  { %7652 = vmatprep.subr.bf16.mxu1 %v13109_v36  ;;  %7639 = vmatprep.mubr.bf16.mxu1 %v13821_v40  ;;  %v13169_v1 = vld [vmem:[%s17052_s8 + $0x4a4] ss:$48 sps:$4 sm:$0xff]   ;;  %v13164_v36 = vld [vmem:[%s17052_s8 + $0x7a0] ss:$48 sps:$4 sm:$0xff]  }
0x1c98   :  { %7563 = vmatpush2.bf16.msra.mxu0 %v13104_v39  ;;  %v13167_v39 = vld [vmem:[%s17052_s8 + $0x4a0] ss:$48 sps:$4 sm:$0xff]  }
0x1c99   :  { %7653 = vmatpush1.bf16.msra.mxu1 %v13107_v29  ;;  %7564 = vmatprep.subr.bf16.mxu0 %v13112_v15  ;;  %v13172_v29 = vld [vmem:[%s17052_s8 + $0x744] ss:$48 sps:$4 sm:$0xff]  }
0x1c9a   :  { %7654 = vmatprep.subr.bf16.mxu1 %v13115_v53  ;;  %v13175_v15 = vld [vmem:[%s17052_s8 + $0x444] ss:$48 sps:$4 sm:$0xff]   ;;  %v13170_v53 = vld [vmem:[%s17052_s8 + $0x740] ss:$48 sps:$4 sm:$0xff]  }
0x1c9c   :  { %7565 = vmatpush2.bf16.msra.mxu0 %v13110_v60  ;;  %7640 = vmatmul.mubr.bf16.gmra.mxu1 %v15999_v24  ;;  %v13173_v60 = vld [vmem:[%s17052_s8 + $0x440] ss:$48 sps:$4 sm:$0xff]  }
0x1c9d   :  { %7655 = vmatpush1.bf16.msra.mxu1 %v13113_v58  ;;  %7682 = vmatprep.mubr.bf16.mxu1 %v15962_v23  ;;  %v13178_v58 = vld [vmem:[%s17052_s8 + $0x6e4] ss:$48 sps:$4 sm:$0xff]  }
0x1c9e   :  { %7566 = vmatprep.subr.bf16.mxu0 %v13118_v51  ;;  %7656 = vmatprep.subr.bf16.mxu1 %v13121_v54  ;;  %v13181_v51 = vld [vmem:[%s17052_s8 + $0x3e4] ss:$48 sps:$4 sm:$0xff]   ;;  %v13176_v54 = vld [vmem:[%s17052_s8 + $0x6e0] ss:$48 sps:$4 sm:$0xff]  }
0x1ca0   :  { %7567 = vmatpush2.bf16.msra.mxu0 %v13116_v50  ;;  %v13179_v50 = vld [vmem:[%s17052_s8 + $0x3e0] ss:$48 sps:$4 sm:$0xff]  }
0x1ca1   :  { %7657 = vmatpush1.bf16.msra.mxu1 %v13119_v59  ;;  %7568 = vmatprep.subr.bf16.mxu0 %v13124_v37  ;;  %v13184_v59 = vld [vmem:[%s17052_s8 + $0x684] ss:$48 sps:$4 sm:$0xff]  }
0x1ca2   :  { %7658 = vmatprep.subr.bf16.mxu1 %v13127_v52  ;;  %v13187_v37 = vld [vmem:[%s17052_s8 + $0x384] ss:$48 sps:$4 sm:$0xff]   ;;  %v13182_v52 = vld [vmem:[%s17052_s8 + $0x680] ss:$48 sps:$4 sm:$0xff]  }
0x1ca4   :  { %7569 = vmatpush2.bf16.msra.mxu0 %v13122_v17  ;;  %v13185_v17 = vld [vmem:[%s17052_s8 + $0x380] ss:$48 sps:$4 sm:$0xff]  }
0x1ca5   :  { %7659 = vmatpush1.bf16.msra.mxu1 %v13125_v25  ;;  %7570 = vmatprep.subr.bf16.mxu0 %v13130_v11  ;;  %v13190_v25 = vld [vmem:[%s17052_s8 + $0x624] ss:$48 sps:$4 sm:$0xff]  }
0x1ca6   :  { %7660 = vmatprep.subr.bf16.mxu1 %v13133_v43  ;;  %v13193_v11 = vld [vmem:[%s17052_s8 + $0x324] ss:$48 sps:$4 sm:$0xff]   ;;  %v13188_v43 = vld [vmem:[%s17052_s8 + $0x620] ss:$48 sps:$4 sm:$0xff]  }
0x1ca8   :  { %7571 = vmatpush2.bf16.msra.mxu0 %v13128_v4  ;;  %v13191_v4 = vld [vmem:[%s17052_s8 + $0x320] ss:$48 sps:$4 sm:$0xff]  }
0x1ca9   :  { %7661 = vmatpush1.bf16.msra.mxu1 %v13131_v32  ;;  %7572 = vmatprep.subr.bf16.mxu0 %v13136_v19  ;;  %v13196_v32 = vld [vmem:[%s17052_s8 + $0x2cc] ss:$48 sps:$4 sm:$0xff]  }
0x1caa   :  { %7662 = vmatprep.subr.bf16.mxu1 %v13139_v7  ;;  %v13199_v19 = vld [vmem:[%s17052_s8 + $0x8cc] ss:$48 sps:$4 sm:$0xff]   ;;  %v13194_v7 = vld [vmem:[%s17052_s8 + $0x2c8] ss:$48 sps:$4 sm:$0xff]  }
0x1cac   :  { %7573 = vmatpush2.bf16.msra.mxu0 %v13134_v41  ;;  %v13197_v41 = vld [vmem:[%s17052_s8 + $0x8c8] ss:$48 sps:$4 sm:$0xff]  }
0x1cad   :  { %7663 = vmatpush1.bf16.msra.mxu1 %v13137_v28  ;;  %7574 = vmatprep.subr.bf16.mxu0 %v13142_v61  ;;  %v13202_v28 = vld [vmem:[%s17052_s8 + $0x26c] ss:$48 sps:$4 sm:$0xff]  }
0x1cae   :  { %7664 = vmatprep.subr.bf16.mxu1 %v13145_v33  ;;  %v13205_v61 = vld [vmem:[%s17052_s8 + $0x86c] ss:$48 sps:$4 sm:$0xff]   ;;  %v13200_v33 = vld [vmem:[%s17052_s8 + $0x268] ss:$48 sps:$4 sm:$0xff]  }
0x1cb0   :  { %7575 = vmatpush2.bf16.msra.mxu0 %v13140_v30  ;;  %v13203_v30 = vld [vmem:[%s17052_s8 + $0x868] ss:$48 sps:$4 sm:$0xff]  }
0x1cb1   :  { %7665 = vmatpush1.bf16.msra.mxu1 %v13143_v62  ;;  %7703 = vmatprep.subr.bf16.mxu0 %v13148_v48  ;;  %v13208_v62 = vld [vmem:[%s17052_s8 + $0x20c] ss:$48 sps:$4 sm:$0xff]  }
0x1cb2   :  { %7666 = vmatprep.subr.bf16.mxu1 %v13151_v2  ;;  %v13211_v48 = vld [vmem:[%s17052_s8 + $0x80c] ss:$48 sps:$4 sm:$0xff]   ;;  %v13206_v2 = vld [vmem:[%s17052_s8 + $0x208] ss:$48 sps:$4 sm:$0xff]  }
0x1cb3   :  { %7577 = vmatmul.mubr.bf16.vlgmr.msra.gmra.mxu0 %v15969_v16 }
0x1cb4   :  { %7586 = vmatprep.mubr.bf16.mxu0 %v15983_v26  ;;  %7704 = vmatpush1.bf16.msra.mxu0 %v13146_v31  ;;  %v13209_v31 = vld [vmem:[%s17052_s8 + $0x808] ss:$48 sps:$4 sm:$0xff]  }
0x1cb5   :  { %7667 = vmatpush2.bf16.msra.mxu1 %v13149_v45  ;;  %7705 = vmatprep.subr.bf16.mxu0 %v13154_v5  ;;  %v13214_v45 = vld [vmem:[%s17052_s8 + $0x1ac] ss:$48 sps:$4 sm:$0xff]  }
0x1cb6   :  { %7668 = vmatprep.subr.bf16.mxu1 %v13157_v3  ;;  %v13217_v5 = vld [vmem:[%s17052_s8 + $0x7ac] ss:$48 sps:$4 sm:$0xff]   ;;  %v13212_v3 = vld [vmem:[%s17052_s8 + $0x1a8] ss:$48 sps:$4 sm:$0xff]  }
0x1cb8   :  { %7706 = vmatpush1.bf16.msra.mxu0 %v13152_v38  ;;  %v13215_v38 = vld [vmem:[%s17052_s8 + $0x7a8] ss:$48 sps:$4 sm:$0xff]  }
0x1cb9   :  { %7669 = vmatpush2.bf16.msra.mxu1 %v13155_v35  ;;  %7707 = vmatprep.subr.bf16.mxu0 %v13160_v34  ;;  %v13220_v35 = vld [vmem:[%s17052_s8 + $0x14c] ss:$48 sps:$4 sm:$0xff]  }
0x1cba   :  { %7670 = vmatprep.subr.bf16.mxu1 %v13163_v21  ;;  %v13223_v34 = vld [vmem:[%s17052_s8 + $0x74c] ss:$48 sps:$4 sm:$0xff]  }
0x1cbb   :  { %7587 = vmatmul.mubr.bf16.gmra.mxu0 %v16004_v49 }
0x1cbc   :  { %7708 = vmatpush1.bf16.msra.mxu0 %v13158_v18  ;;  %7735 = vmatprep.mubr.bf16.mxu0 %v13821_v40  ;;  %v13221_v18 = vld [vmem:[%s17052_s8 + $0x748] ss:$48 sps:$4 sm:$0xff]  }
0x1cbd   :  { %7671 = vmatpush2.bf16.msra.mxu1 %v13161_v22  ;;  %7709 = vmatprep.subr.bf16.mxu0 %v13166_v47  ;;  %v13226_v22 = vld [vmem:[%s17052_s8 + $0xec] ss:$48 sps:$4 sm:$0xff]  }
0x1cbe   :  { %7672 = vmatprep.subr.bf16.mxu1 %v13169_v1  ;;  %v13229_v47 = vld [vmem:[%s17052_s8 + $0x6ec] ss:$48 sps:$4 sm:$0xff]  }
0x1cc0   :  { %7710 = vmatpush1.bf16.msra.mxu0 %v13164_v36  ;;  %v13224_v36 = vld [vmem:[%s17052_s8 + $0xe8] ss:$48 sps:$4 sm:$0xff]  }
0x1cc1   :  { %7673 = vmatpush2.bf16.msra.mxu1 %v13167_v39  ;;  %7711 = vmatprep.subr.bf16.mxu0 %v13172_v29  ;;  %v13227_v39 = vld [vmem:[%s17052_s8 + $0x6e8] ss:$48 sps:$4 sm:$0xff]   ;;  %v13232_v29 = vld [vmem:[%s17052_s8 + $0x8c] ss:$48 sps:$4 sm:$0xff]  }
0x1cc2   :  { %7674 = vmatprep.subr.bf16.mxu1 %v13175_v15 }
0x1cc4   :  { %7712 = vmatpush1.bf16.msra.mxu0 %v13170_v53  ;;  %v13235_v53 = vld [vmem:[%s17052_s8 + $0x68c] ss:$48 sps:$4 sm:$0xff]  }
0x1cc5   :  { %7675 = vmatpush2.bf16.msra.mxu1 %v13173_v60  ;;  %7713 = vmatprep.subr.bf16.mxu0 %v13178_v58  ;;  %v13230_v58 = vld [vmem:[%s17052_s8 + $0x88] ss:$48 sps:$4 sm:$0xff]  }
0x1cc6   :  { %7676 = vmatprep.subr.bf16.mxu1 %v13181_v51  ;;  %v13233_v51 = vld [vmem:[%s17052_s8 + $0x688] ss:$48 sps:$4 sm:$0xff]  }
0x1cc8   :  { %7714 = vmatpush1.bf16.msra.mxu0 %v13176_v54  ;;  %v13238_v54 = vld [vmem:[%s17052_s8 + $0x2c] ss:$48 sps:$4 sm:$0xff]  }
0x1cc9   :  { %7677 = vmatpush2.bf16.msra.mxu1 %v13179_v50  ;;  %7715 = vmatprep.subr.bf16.mxu0 %v13184_v59  ;;  %v13241_v59 = vld [vmem:[%s17052_s8 + $0x62c] ss:$48 sps:$4 sm:$0xff]  }
0x1cca   :  { %7678 = vmatprep.subr.bf16.mxu1 %v13187_v37  ;;  %v16681_v37 = vld [vmem:[%s17053_s9] sm:$0xff] }
0x1ccc   :  { %7716 = vmatpush1.bf16.msra.mxu0 %v13182_v52 }
0x1ccd   :  { %7679 = vmatpush2.bf16.msra.mxu1 %v13185_v17  ;;  %7717 = vmatprep.subr.bf16.mxu0 %v13190_v25  ;;  %v13236_v17 = vld [vmem:[%s17052_s8 + $0x28] ss:$48 sps:$4 sm:$0xff]   ;;  %v16688_v25 = vrot.slane %v16681_v37, %v14183_v9 }
0x1cce   :  { %7680 = vmatprep.subr.bf16.mxu1 %v13193_v11  ;;  %v13239_v11 = vld [vmem:[%s17052_s8 + $0x628] ss:$48 sps:$4 sm:$0xff]  }
0x1cd0   :  { %7718 = vmatpush1.bf16.msra.mxu0 %v13188_v43  ;;  %v13244_v43 = vld [vmem:[%s17052_s8 + $0x5cc] ss:$48 sps:$4 sm:$0xff]  }
0x1cd1   :  { %7681 = vmatpush2.bf16.msra.mxu1 %v13191_v4  ;;  %7756 = vmatprep.subr.bf16.mxu0 %v13196_v32  ;;  %v13247_v32 = vld [vmem:[#allocation2 + $0xac] ss:$12 sps:$4 sm:$0xff]  }
0x1cd2   :  { %7809 = vmatprep.subr.bf16.mxu1 %v13199_v19 }
0x1cd3   :  { %7736 = vmatmul.mubr.bf16.vlgmr.msra.gmra.mxu0 %v15964_v55  ;;  %v16659_v15 = vpop.f32.mrf.mxu0 }
0x1cd4   :  { %7683 = vmatmul.mubr.bf16.vlgmr.msra.gmra.mxu1 %v15969_v16  ;;  %7757 = vmatpush1.bf16.msra.mxu0 %v13194_v7  ;;  %v16636_v21 = vpop.f32.mrf.mxu1  ;;  %v13242_v7 = vld [vmem:[%s17052_s8 + $0x5c8] ss:$48 sps:$4 sm:$0xff]  }
0x1cd5   :  { %7692 = vmatprep.mubr.bf16.mxu1 %v15983_v26  ;;  %7810 = vmatpush1.bf16.msra.mxu1 %v13197_v41  ;;  %v7315_v50 = vpop.f32.mrf.mxu0 }
0x1cd6   :  { %7758 = vmatprep.subr.bf16.mxu0 %v13202_v28  ;;  %7811 = vmatprep.subr.bf16.mxu1 %v13205_v61  ;;  %v7262_v1 = vpop.f32.mrf.mxu1  ;;  %v13245_v28 = vld [vmem:[#allocation2 + $0xa8] ss:$12 sps:$4 sm:$0xff]   ;;  %v13250_v61 = vld [vmem:[%s17052_s8 + $0x56c] ss:$48 sps:$4 sm:$0xff]  }
0x1cd7   :  { %7745 = vmatprep.mubr.bf16.mxu0 %v13821_v40  ;;  %v16696_v4 = vpop.f32.mrf.mxu0  ;;  %v7263_v41 = vadd.f32 %v7262_v1, %v16688_v25  ;;  %v13271_v1 = vld [vmem:[#allocation2 + $0x4c] ss:$12 sps:$4 sm:$0xff]  }
0x1cd8   :  { %7759 = vmatpush1.bf16.msra.mxu0 %v13200_v33  ;;  %v16664_v60 = vpop.f32.mrf.mxu1 }
0x1cd9   :  { %7812 = vmatpush1.bf16.msra.mxu1 %v13203_v30  ;;  %7760 = vmatprep.subr.bf16.mxu0 %v13208_v62  ;;  %v7319_v33 = vpop.f32.mrf.mxu0  ;;  %v13253_v30 = vld [vmem:[#allocation2 + $0x94] ss:$12 sps:$4 sm:$0xff]  }
0x1cda   :  { %7813 = vmatprep.subr.bf16.mxu1 %v13211_v48  ;;  %v7266_v52 = vpop.f32.mrf.mxu1  ;;  %v13248_v48 = vld [vmem:[%s17052_s8 + $0x568] ss:$48 sps:$4 sm:$0xff]  }
0x1cdb   :  { %7746 = vmatmul.mubr.bf16.gmra.mxu0 %v15999_v24  ;;  %v7267_v19 = vadd.f32 %v7266_v52, %v16688_v25  ;;  %v13283_v52 = vld [vmem:[#allocation2 + $0x1c] ss:$12 sps:$4 sm:$0xff]  }
0x1cdc   :  { %7693 = vmatmul.mubr.bf16.gmra.mxu1 %v16004_v49  ;;  %7761 = vmatpush1.bf16.msra.mxu0 %v13206_v2  ;;  %v7316_v2 = vadd.f32 %v7315_v50, %v7263_v41  ;;  %v13275_v50 = vld [vmem:[#allocation2 + $0x30] ss:$12 sps:$4 sm:$0xff]   ;;  %v13284_v41 = vld [vmem:[%s17052_s8 + $0x328] ss:$48 sps:$4 sm:$0xff]  }
0x1cdd   :  { %7788 = vmatprep.mubr.bf16.mxu0 %v15962_v23  ;;  %7814 = vmatpush1.bf16.msra.mxu1 %v13209_v31  ;;  %v13218_v23 = vld [vmem:[%s17052_s8 + $0x148] ss:$48 sps:$4 sm:$0xff]   ;;  %v7320_v62 = vadd.f32 %v7319_v33, %v7267_v19  ;;  %v13251_v31 = vld [vmem:[#allocation2 + $0x90] ss:$12 sps:$4 sm:$0xff]   ;;  %v13287_v33 = vld [vmem:[#allocation2] ss:$12 sps:$4 sm:$0xff]  }
0x1cde   :  { %7762 = vmatprep.subr.bf16.mxu0 %v13214_v45  ;;  %7815 = vmatprep.subr.bf16.mxu1 %v13217_v5  ;;  %v13256_v45 = vld [vmem:[%s17052_s8 + $0x50c] ss:$48 sps:$4 sm:$0xff]  }
0x1cdf   :  { %7841 = vmatprep.mubr.bf16.mxu1 %v13821_v40  ;;  %v13259_v5 = vld [vmem:[#allocation2 + $0x7c] ss:$12 sps:$4 sm:$0xff]  }
0x1ce0   :  { %7763 = vmatpush1.bf16.msra.mxu0 %v13212_v3  ;;  %v7875_v3 = vmax.f32 %v7320_v62, 0.0  ;;  %v13286_v19 = vld [vmem:[%s17052_s8 + $0x32c] ss:$48 sps:$4 sm:$0xff]  }
0x1ce1   :  { %7816 = vmatpush1.bf16.msra.mxu1 %v13215_v38  ;;  %7764 = vmatprep.subr.bf16.mxu0 %v13220_v35  ;;  %v7863_v38 = vmax.f32 %v7316_v2, 0.0  ;;  %v13257_v35 = vld [vmem:[#allocation2 + $0x78] ss:$12 sps:$4 sm:$0xff]  }
0x1ce2   :  { %7817 = vmatprep.subr.bf16.mxu1 %v13223_v34  ;;  %v13262_v34 = vld [vmem:[%s17052_s8 + $0x4ac] ss:$48 sps:$4 sm:$0xff]  }
0x1ce3   :  { %v13295_v62 = vld [vmem:[#allocation2 + $0x16c] ss:$12 sps:$4 sm:$0xff]  }
0x1ce4   :  { %7765 = vmatpush1.bf16.msra.mxu0 %v13218_v23  ;;  %v13265_v23 = vld [vmem:[#allocation2 + $0x64] ss:$12 sps:$4 sm:$0xff]  }
0x1ce5   :  { %7818 = vmatpush1.bf16.msra.mxu1 %v13221_v18  ;;  %7766 = vmatprep.subr.bf16.mxu0 %v13226_v22  ;;  %v16720_v18 = vpack.c.bf16 %v7875_v3, %v7863_v38  ;;  %v13263_v22 = vld [vmem:[#allocation2 + $0x60] ss:$12 sps:$4 sm:$0xff]  }
0x1ce6   :  { %7819 = vmatprep.subr.bf16.mxu1 %v13229_v47  ;;  %v13268_v47 = vld [vmem:[%s17052_s8 + $0x44c] ss:$48 sps:$4 sm:$0xff]   ;;  %v13298_v3 = vld [vmem:[#allocation2 + $0x214] ss:$12 sps:$4 sm:$0xff]  }
0x1ce7   :  { %v13301_v38 = vld [vmem:[#allocation2 + $0x154] ss:$12 sps:$4 sm:$0xff]  }
0x1ce8   :  { %7767 = vmatpush1.bf16.msra.mxu0 %v13224_v36  ;;  %v16733_v36 = vpop.f32.mrf.mxu1 }
0x1ce9   :  { %7820 = vmatpush1.bf16.msra.mxu1 %v13227_v39  ;;  %7768 = vmatprep.subr.bf16.mxu0 %v13232_v29  ;;  %v13269_v39 = vld [vmem:[#allocation2 + $0x48] ss:$12 sps:$4 sm:$0xff]   ;;  %v13274_v29 = vld [vmem:[%s17052_s8 + $0x3ec] ss:$48 sps:$4 sm:$0xff]  }
0x1cea   :  { %7821 = vmatprep.subr.bf16.mxu1 %v13235_v53  ;;  %v13277_v53 = vld [vmem:[#allocation2 + $0x34] ss:$12 sps:$4 sm:$0xff]  }
0x1cec   :  { %7769 = vmatpush1.bf16.msra.mxu0 %v13230_v58  ;;  %v13272_v58 = vld [vmem:[%s17052_s8 + $0x3e8] ss:$48 sps:$4 sm:$0xff]  }
0x1ced   :  { %7822 = vmatpush1.bf16.msra.mxu1 %v13233_v51  ;;  %7770 = vmatprep.subr.bf16.mxu0 %v13238_v54  ;;  %v16741_v51 = vpop.f32.mrf.mxu0  ;;  %v16743_v54 = vpop.f32.mrf.mxu1 }
0x1cee   :  { %7823 = vmatprep.subr.bf16.mxu1 %v13241_v59  ;;  %v13280_v59 = vld [vmem:[%s17052_s8 + $0x38c] ss:$48 sps:$4 sm:$0xff]  }
0x1cf0   :  { %7771 = vmatpush1.bf16.msra.mxu0 %v13236_v17  ;;  %v13278_v17 = vld [vmem:[%s17052_s8 + $0x388] ss:$48 sps:$4 sm:$0xff]  }
0x1cf1   :  { %7824 = vmatpush1.bf16.msra.mxu1 %v13239_v11  ;;  %7772 = vmatprep.subr.bf16.mxu0 %v13244_v43  ;;  %v16751_v11 = vpop.f32.mrf.mxu0  ;;  %v16753_v43 = vpop.f32.mrf.mxu1 }
0x1cf2   :  { %9871 = vmatprep.subr.bf16.mxu1 %v13247_v32  ;;  %v13281_v32 = vld [vmem:[#allocation2 + $0x18] ss:$12 sps:$4 sm:$0xff]  }
0x1cf4   :  { %7773 = vmatpush2.bf16.msra.mxu0 %v13242_v7  ;;  %7842 = vmatmul.mubr.bf16.vlgmr.msra.gmra.mxu1 %v15964_v55  ;;  %v13254_v55 = vld [vmem:[%s17052_s8 + $0x508] ss:$48 sps:$4 sm:$0xff]   ;;  %v13289_v7 = vld [vmem:[#allocation2 + $0x4] ss:$12 sps:$4 sm:$0xff]  }
0x1cf5   :  { %9872 = vmatpush1.bf16.msra.mxu1 %v13245_v28  ;;  %7774 = vmatprep.subr.bf16.mxu0 %v13250_v61  ;;  %v16761_v28 = vpop.f32.mrf.mxu0  ;;  %v16763_v61 = vpop.f32.mrf.mxu1 }
0x1cf6   :  { %9873 = vmatprep.subr.bf16.mxu1 %v13253_v30  ;;  %7851 = vmatprep.mubr.bf16.mxu1 %v13821_v40  ;;  %v13260_v40 = vld [vmem:[%s17052_s8 + $0x4a8] ss:$48 sps:$4 sm:$0xff]  }
0x1cf7   :  { %v13292_v30 = vld [vmem:[#allocation2 + $0x22c] ss:$12 sps:$4 sm:$0xff]   ;;  %v16766_v2 = vpop.f32.mrf.mxu1 }
0x1cf8   :  { %7775 = vmatpush2.bf16.msra.mxu0 %v13248_v48  ;;  %v17057_v48 = vsub.s32 3, %v14177_v6 }
0x1cf9   :  { %9874 = vmatpush1.bf16.msra.mxu1 %v13251_v31  ;;  %7776 = vmatprep.subr.bf16.mxu0 %v13256_v45  ;;  %v13290_v31 = vld [vmem:[#allocation2 + $0x228] ss:$12 sps:$4 sm:$0xff]   ;;  %v16768_v45 = vpop.f32.mrf.mxu0 }
0x1cfa   :  { %9875 = vmatprep.subr.bf16.mxu1 %v13259_v5  ;;  %v13293_v5 = vld [vmem:[#allocation2 + $0x168] ss:$12 sps:$4 sm:$0xff]  }
0x1cfc   :  { %7777 = vmatpush2.bf16.msra.mxu0 %v13254_v55  ;;  %7852 = vmatmul.mubr.bf16.gmra.mxu1 %v15999_v24  ;;  %v13266_v24 = vld [vmem:[%s17052_s8 + $0x448] ss:$48 sps:$4 sm:$0xff]   ;;  %v16773_v55 = vrot.slane %v16681_v37, %v17057_v48 }
0x1cfd   :  { %9876 = vmatpush1.bf16.msra.mxu1 %v13257_v35  ;;  %9903 = vmatprep.mubr.bf16.mxu1 %v16720_v18  ;;  %v7421_v35 = vpop.f32.mrf.mxu1 }
0x1cfe   :  { %7778 = vmatprep.subr.bf16.mxu0 %v13262_v34  ;;  %9877 = vmatprep.subr.bf16.mxu1 %v13265_v23  ;;  %v13296_v23 = vld [vmem:[#allocation2 + $0x210] ss:$12 sps:$4 sm:$0xff]  }
0x1d00   :  { %7779 = vmatpush2.bf16.msra.mxu0 %v13260_v40 }
0x1d01   :  { %9878 = vmatpush1.bf16.msra.mxu1 %v13263_v22  ;;  %7780 = vmatprep.subr.bf16.mxu0 %v13268_v47  ;;  %v13299_v22 = vld [vmem:[#allocation2 + $0x150] ss:$12 sps:$4 sm:$0xff]  }
0x1d02   :  { %9879 = vmatprep.subr.bf16.mxu1 %v13271_v1  ;;  %v13304_v47 = vld [vmem:[#allocation2 + $0x1fc] ss:$12 sps:$4 sm:$0xff]  }
0x1d04   :  { %7781 = vmatpush2.bf16.msra.mxu0 %v13266_v24  ;;  %v13307_v24 = vld [vmem:[#allocation2 + $0x13c] ss:$12 sps:$4 sm:$0xff]  }
0x1d05   :  { %9880 = vmatpush1.bf16.msra.mxu1 %v13269_v39  ;;  %7782 = vmatprep.subr.bf16.mxu0 %v13274_v29  ;;  %v16780_v39 = vpop.f32.mrf.mxu1 }
0x1d06   :  { %9881 = vmatprep.subr.bf16.mxu1 %v13277_v53  ;;  %v13302_v53 = vld [vmem:[#allocation2 + $0x1f8] ss:$12 sps:$4 sm:$0xff]  }
0x1d08   :  { %7783 = vmatpush2.bf16.msra.mxu0 %v13272_v58  ;;  %v13310_v58 = vld [vmem:[#allocation2 + $0x1e4] ss:$12 sps:$4 sm:$0xff]  }
0x1d09   :  { %9882 = vmatpush1.bf16.msra.mxu1 %v13275_v50  ;;  %7784 = vmatprep.subr.bf16.mxu0 %v13280_v59 }
0x1d0a   :  { %9883 = vmatprep.subr.bf16.mxu1 %v13283_v52  ;;  %v13313_v52 = vld [vmem:[#allocation2 + $0x124] ss:$12 sps:$4 sm:$0xff]  }
0x1d0c   :  { %7785 = vmatpush2.bf16.msra.mxu0 %v13278_v17  ;;  %v7425_v17 = vpop.f32.mrf.mxu1 }
0x1d0d   :  { %9884 = vmatpush1.bf16.msra.mxu1 %v13281_v32  ;;  %7786 = vmatprep.subr.bf16.mxu0 %v13286_v19  ;;  %v13308_v19 = vld [vmem:[#allocation2 + $0x1e0] ss:$12 sps:$4 sm:$0xff]  }
0x1d0e   :  { %9885 = vmatprep.subr.bf16.mxu1 %v13289_v7  ;;  %v13311_v7 = vld [vmem:[#allocation2 + $0x120] ss:$12 sps:$4 sm:$0xff]  }
0x1d10   :  { %7787 = vmatpush2.bf16.msra.mxu0 %v13284_v41  ;;  %v13316_v41 = vld [vmem:[#allocation2 + $0x1cc] ss:$12 sps:$4 sm:$0xff]  }
0x1d11   :  { %9886 = vmatpush1.bf16.msra.mxu1 %v13287_v33  ;;  %9924 = vmatprep.subr.bf16.mxu0 %v13292_v30 }
0x1d12   :  { %9887 = vmatprep.subr.bf16.mxu1 %v13295_v62  ;;  %v13319_v62 = vld [vmem:[#allocation2 + $0x10c] ss:$12 sps:$4 sm:$0xff]  }
0x1d13   :  { %v16775_v34 = vpop.f32.mrf.mxu0  ;;  %7789 = vmatmul.mubr.bf16.vlgmr.msra.gmra.mxu0 %v15969_v16 }
0x1d14   :  { %7798 = vmatprep.mubr.bf16.mxu0 %v15983_v26  ;;  %9925 = vmatpush1.bf16.msra.mxu0 %v13290_v31  ;;  %v13305_v26 = vld [vmem:[#allocation2 + $0x138] ss:$12 sps:$4 sm:$0xff]  }
0x1d15   :  { %v7368_v40 = vpop.f32.mrf.mxu0  ;;  %9888 = vmatpush2.bf16.msra.mxu1 %v13293_v5  ;;  %9926 = vmatprep.subr.bf16.mxu0 %v13298_v3  ;;  %v13314_v5 = vld [vmem:[#allocation2 + $0x1c8] ss:$12 sps:$4 sm:$0xff]  }
0x1d16   :  { %v7369_v1 = vadd.f32 %v7368_v40, %v16773_v55  ;;  %9889 = vmatprep.subr.bf16.mxu1 %v13301_v38  ;;  %v13317_v3 = vld [vmem:[#allocation2 + $0x108] ss:$12 sps:$4 sm:$0xff]  }
0x1d17   :  { %v16782_v29 = vpop.f32.mrf.mxu0  ;;  %v13322_v38 = vld [vmem:[#allocation2 + $0x1b4] ss:$12 sps:$4 sm:$0xff]  }
0x1d18   :  { %9927 = vmatpush1.bf16.msra.mxu0 %v13296_v23  ;;  %v7422_v50 = vadd.f32 %v7421_v35, %v7369_v1  ;;  %v5729_v35 = vrot.slane %v16681_v37, %v14192_v12  ;;  %v13320_v23 = vld [vmem:[#allocation2 + $0x1b0] ss:$12 sps:$4 sm:$0xff]  }
0x1d19   :  { %v7372_v16 = vpop.f32.mrf.mxu0  ;;  %9890 = vmatpush2.bf16.msra.mxu1 %v13299_v22  ;;  %9928 = vmatprep.subr.bf16.mxu0 %v13304_v47  ;;  %v13323_v22 = vld [vmem:[#allocation2 + $0xf0] ss:$12 sps:$4 sm:$0xff]  }
0x1d1a   :  { %v7373_v59 = vadd.f32 %v7372_v16, %v16773_v55  ;;  %9891 = vmatprep.subr.bf16.mxu1 %v13307_v24  ;;  %v7865_v33 = vmax.f32 %v7422_v50, 0.0  ;;  %v13328_v47 = vld [vmem:[#allocation2 + $0x19c] ss:$12 sps:$4 sm:$0xff]   ;;  %v7265_v1 = vadd.f32 %v16664_v60, %v5729_v35  ;;  %v16794_v24 = vpop.f32.mrf.mxu1  ;;  %v7277_v16 = vadd.f32 %v16763_v61, %v16688_v25  ;;  %v13334_v60 = vld [vmem:[#allocation2 + $0x184] ss:$12 sps:$4 sm:$0xff]  }
0x1d1b   :  { %7799 = vmatmul.mubr.bf16.gmra.mxu0 %v16004_v49  ;;  %v13325_v49 = vld [vmem:[#allocation2 + $0xf4] ss:$12 sps:$4 sm:$0xff]   ;;  %v16791_v40 = vpop.f32.mrf.mxu0  ;;  %v7273_v50 = vadd.f32 %v16743_v54, %v16688_v25 }
0x1d1c   :  { %v7426_v32 = vadd.f32 %v7425_v17, %v7373_v59  ;;  %9929 = vmatpush1.bf16.msra.mxu0 %v13302_v53  ;;  %v13331_v53 = vld [vmem:[#allocation2 + $0xdc] ss:$12 sps:$4 sm:$0xff]   ;;  %v7318_v17 = vadd.f32 %v16696_v4, %v7265_v1  ;;  %v7330_v61 = vadd.f32 %v16768_v45, %v7277_v16  ;;  %v7275_v4 = vadd.f32 %v16753_v43, %v5729_v35  ;;  %v13349_v16 = vld [vmem:[#allocation2 + $0x394] ss:$12 sps:$4 sm:$0xff]  }
0x1d1d   :  { %9892 = vmatpush2.bf16.msra.mxu1 %v13305_v26  ;;  %9930 = vmatprep.subr.bf16.mxu0 %v13310_v58  ;;  %v7261_v26 = vadd.f32 %v16636_v21, %v5729_v35  ;;  %v13326_v58 = vld [vmem:[#allocation2 + $0x198] ss:$12 sps:$4 sm:$0xff]   ;;  %v16801_v59 = vpop.f32.mrf.mxu0  ;;  %v7326_v25 = vadd.f32 %v16751_v11, %v7273_v50  ;;  %v13338_v11 = vld [vmem:[#allocation2 + $0x2e8] ss:$12 sps:$4 sm:$0xff]  }
0x1d1e   :  { %v7877_v30 = vmax.f32 %v7426_v32, 0.0  ;;  %9893 = vmatprep.subr.bf16.mxu1 %v13313_v52  ;;  %v13329_v52 = vld [vmem:[#allocation2 + $0xd8] ss:$12 sps:$4 sm:$0xff]   ;;  %v16804_v32 = vpop.f32.mrf.mxu1  ;;  %v7899_v45 = vmax.f32 %v7330_v61, 0.0  ;;  %v7328_v43 = vadd.f32 %v16761_v28, %v7275_v4  ;;  %v13344_v28 = vld [vmem:[#allocation2 + $0x2d0] ss:$12 sps:$4 sm:$0xff]  }
0x1d1f   :  { %v7314_v21 = vadd.f32 %v16659_v15, %v7261_v26  ;;  %v16809_v54 = vpop.f32.mrf.mxu0  ;;  %v5748_v15 = vsub.s32 5, %v14177_v6  ;;  %v13358_v4 = vld [vmem:[#allocation2 + $0x2a4] ss:$12 sps:$4 sm:$0xff]  }
0x1d20   :  { %9931 = vmatpush1.bf16.msra.mxu0 %v13308_v19  ;;  %v16786_v31 = vpack.c.bf16 %v7877_v30, %v7865_v33  ;;  %v13337_v19 = vld [vmem:[#allocation2 + $0xc4] ss:$12 sps:$4 sm:$0xff]   ;;  %v13340_v33 = vld [vmem:[#allocation2 + $0x2ec] ss:$12 sps:$4 sm:$0xff]   ;;  %v7874_v30 = vmax.f32 %v7318_v17, 0.0 }
0x1d21   :  { %9894 = vmatpush2.bf16.msra.mxu1 %v13311_v7  ;;  %9932 = vmatprep.subr.bf16.mxu0 %v13316_v41  ;;  %v13332_v7 = vld [vmem:[#allocation2 + $0x180] ss:$12 sps:$4 sm:$0xff]   ;;  %v13352_v17 = vld [vmem:[#allocation2 + $0x2bc] ss:$12 sps:$4 sm:$0xff]  }
0x1d22   :  { %9956 = vmatprep.mubr.bf16.mxu0 %v16786_v31  ;;  %9895 = vmatprep.subr.bf16.mxu1 %v13319_v62  ;;  %v13335_v41 = vld [vmem:[#allocation2 + $0xc0] ss:$12 sps:$4 sm:$0xff]   ;;  %v16812_v62 = vpop.f32.mrf.mxu1 }
0x1d24   :  { %9933 = vmatpush1.bf16.msra.mxu0 %v13314_v5  ;;  %v13343_v5 = vld [vmem:[#allocation2 + $0x3ac] ss:$12 sps:$4 sm:$0xff]   ;;  %v16821_v1 = vpop.f32.mrf.mxu1 }
0x1d25   :  { %9896 = vmatpush2.bf16.msra.mxu1 %v13317_v3  ;;  %9934 = vmatprep.subr.bf16.mxu0 %v13322_v38  ;;  %v7862_v3 = vmax.f32 %v7314_v21, 0.0  ;;  %v7271_v38 = vadd.f32 %v16733_v36, %v5729_v35  ;;  %v16828_v35 = vrot.slane %v16681_v37, %v5748_v15  ;;  %v13355_v21 = vld [vmem:[#allocation2 + $0x37c] ss:$12 sps:$4 sm:$0xff]   ;;  %v13361_v15 = vld [vmem:[#allocation2 + $0x364] ss:$12 sps:$4 sm:$0xff]  }
0x1d26   :  { %9897 = vmatprep.subr.bf16.mxu1 %v13325_v49  ;;  %v7887_v49 = vmax.f32 %v7326_v25, 0.0 }
0x1d28   :  { %9935 = vmatpush1.bf16.msra.mxu0 %v13320_v23  ;;  %v16816_v23 = vpop.f32.mrf.mxu0  ;;  %v16825_v36 = vpack.c.bf16 %v7899_v45, %v7887_v49  ;;  %v13356_v49 = vld [vmem:[#allocation2 + $0x2a0] ss:$12 sps:$4 sm:$0xff]  }
0x1d29   :  { %9898 = vmatpush2.bf16.msra.mxu1 %v13323_v22  ;;  %9936 = vmatprep.subr.bf16.mxu0 %v13328_v47  ;;  %v13341_v22 = vld [vmem:[#allocation2 + $0x3a8] ss:$12 sps:$4 sm:$0xff]   ;;  %v16818_v47 = vpack.c.bf16 %v7874_v30, %v7862_v3  ;;  %v13353_v30 = vld [vmem:[#allocation2 + $0x378] ss:$12 sps:$4 sm:$0xff]  }
0x1d2a   :  { %9899 = vmatprep.subr.bf16.mxu1 %v13331_v53  ;;  %v13346_v53 = vld [vmem:[#allocation2 + $0x2d4] ss:$12 sps:$4 sm:$0xff]  }
0x1d2c   :  { %9937 = vmatpush1.bf16.msra.mxu0 %v13326_v58  ;;  %v7324_v58 = vadd.f32 %v16741_v51, %v7271_v38 }
0x1d2d   :  { %9900 = vmatpush2.bf16.msra.mxu1 %v13329_v52  ;;  %9938 = vmatprep.subr.bf16.mxu0 %v13334_v60  ;;  %v13347_v60 = vld [vmem:[#allocation2 + $0x390] ss:$12 sps:$4 sm:$0xff]  }
0x1d2e   :  { %9901 = vmatprep.subr.bf16.mxu1 %v13337_v19  ;;  %v7898_v19 = vmax.f32 %v7328_v43, 0.0  ;;  %v7886_v51 = vmax.f32 %v7324_v58, 0.0  ;;  %v13359_v43 = vld [vmem:[#allocation2 + $0x360] ss:$12 sps:$4 sm:$0xff]  }
0x1d30   :  { %9939 = vmatpush1.bf16.msra.mxu0 %v13332_v7 }
0x1d31   :  { %9902 = vmatpush2.bf16.msra.mxu1 %v13335_v41  ;;  %9940 = vmatprep.subr.bf16.mxu0 %v13340_v33  ;;  %v13350_v33 = vld [vmem:[#allocation2 + $0x2b8] ss:$12 sps:$4 sm:$0xff]  }
0x1d32   :  { %9977 = vmatprep.subr.bf16.mxu1 %v13343_v5  ;;  %v16840_v5 = vpack.c.bf16 %v7898_v19, %v7886_v51  ;;  %v13370_v19 = vld [vmem:[#allocation2 + $0x274] ss:$12 sps:$4 sm:$0xff]  }
0x1d33   :  { %v16823_v26 = vpop.f32.mrf.mxu0 }
0x1d34   :  { %v16831_v50 = vpop.f32.mrf.mxu1  ;;  %9904 = vmatmul.mubr.bf16.vlgmr.msra.gmra.mxu1 %v16818_v47  ;;  %9941 = vmatpush2.bf16.msra.mxu0 %v13338_v11 }
0x1d35   :  { %v7527_v52 = vpop.f32.mrf.mxu0  ;;  %9913 = vmatprep.mubr.bf16.mxu1 %v16825_v36  ;;  %9978 = vmatpush1.bf16.msra.mxu1 %v13341_v22 }
0x1d36   :  { %v7474_v61 = vpop.f32.mrf.mxu1  ;;  %9942 = vmatprep.subr.bf16.mxu0 %v13346_v53  ;;  %9979 = vmatprep.subr.bf16.mxu1 %v13349_v16  ;;  %v13364_v53 = vld [vmem:[#allocation2 + $0x28c] ss:$12 sps:$4 sm:$0xff]  }
0x1d37   :  { %v7475_v7 = vadd.f32 %v7474_v61, %v16828_v35  ;;  %v16836_v25 = vpop.f32.mrf.mxu0  ;;  %v13367_v16 = vld [vmem:[#allocation2 + $0x34c] ss:$12 sps:$4 sm:$0xff]   ;;  %v13373_v61 = vld [vmem:[#allocation2 + $0x334] ss:$12 sps:$4 sm:$0xff]  }
0x1d38   :  { %v16838_v41 = vpop.f32.mrf.mxu1  ;;  %9943 = vmatpush2.bf16.msra.mxu0 %v13344_v28 }
0x1d39   :  { %9980 = vmatpush1.bf16.msra.mxu1 %v13347_v60  ;;  %9944 = vmatprep.subr.bf16.mxu0 %v13352_v17  ;;  %v7528_v3 = vadd.f32 %v7527_v52, %v7475_v7  ;;  %v7531_v11 = vpop.f32.mrf.mxu0  ;;  %v13362_v60 = vld [vmem:[#allocation2 + $0x288] ss:$12 sps:$4 sm:$0xff]   ;;  %v13368_v7 = vld [vmem:[#allocation2 + $0x270] ss:$12 sps:$4 sm:$0xff]  }
0x1d3a   :  { %v7478_v45 = vpop.f32.mrf.mxu1  ;;  %9981 = vmatprep.subr.bf16.mxu1 %v13355_v21  ;;  %v13365_v17 = vld [vmem:[#allocation2 + $0x348] ss:$12 sps:$4 sm:$0xff]   ;;  %v5737_v21 = vrot.slane %v16681_v37, %v14186_v10 }
0x1d3b   :  { %v7479_v38 = vadd.f32 %v7478_v45, %v16828_v35  ;;  %v7867_v58 = vmax.f32 %v7528_v3, 0.0  ;;  %v13379_v45 = vld [vmem:[#allocation2 + $0x31c] ss:$12 sps:$4 sm:$0xff]   ;;  %v7379_v3 = vadd.f32 %v16801_v59, %v16773_v55  ;;  %v13388_v59 = vld [vmem:[#allocation2 + $0x52c] ss:$12 sps:$4 sm:$0xff]  }
0x1d3c   :  { %9914 = vmatmul.mubr.bf16.gmra.mxu1 %v16840_v5  ;;  %9945 = vmatpush2.bf16.msra.mxu0 %v13350_v33  ;;  %v7371_v51 = vadd.f32 %v16782_v29, %v5737_v21  ;;  %v13371_v33 = vld [vmem:[#allocation2 + $0x330] ss:$12 sps:$4 sm:$0xff]   ;;  %v13377_v29 = vld [vmem:[#allocation2 + $0x318] ss:$12 sps:$4 sm:$0xff]  }
0x1d3d   :  { %v7532_v22 = vadd.f32 %v7531_v11, %v7479_v38  ;;  %9982 = vmatpush1.bf16.msra.mxu1 %v13353_v30  ;;  %9946 = vmatprep.subr.bf16.mxu0 %v13358_v4  ;;  %v13376_v30 = vld [vmem:[#allocation2 + $0x25c] ss:$12 sps:$4 sm:$0xff]   ;;  %v7383_v4 = vadd.f32 %v16816_v23, %v16773_v55  ;;  %v13374_v38 = vld [vmem:[#allocation2 + $0x258] ss:$12 sps:$4 sm:$0xff]   ;;  %v7381_v55 = vadd.f32 %v16809_v54, %v5737_v21 }
0x1d3e   :  { %9983 = vmatprep.subr.bf16.mxu1 %v13361_v15  ;;  %v7367_v15 = vadd.f32 %v16775_v34, %v5737_v21  ;;  %v7424_v11 = vadd.f32 %v16780_v39, %v7371_v51  ;;  %v13380_v34 = vld [vmem:[#allocation2 + $0x240] ss:$12 sps:$4 sm:$0xff]   ;;  %v13389_v54 = vld [vmem:[#allocation2 + $0x468] ss:$12 sps:$4 sm:$0xff]  }
0x1d3f   :  { %v7879_v28 = vmax.f32 %v7532_v22, 0.0  ;;  %v7436_v22 = vadd.f32 %v16821_v1, %v7383_v4  ;;  %v13383_v39 = vld [vmem:[#allocation2 + $0x300] ss:$12 sps:$4 sm:$0xff]   ;;  %v7377_v1 = vadd.f32 %v16791_v40, %v5737_v21  ;;  %v13392_v40 = vld [vmem:[#allocation2 + $0x510] ss:$12 sps:$4 sm:$0xff]  }
0x1d40   :  { %9947 = vmatpush2.bf16.msra.mxu0 %v13356_v49  ;;  %v13382_v49 = vld [vmem:[#allocation2 + $0x244] ss:$12 sps:$4 sm:$0xff]   ;;  %v7420_v23 = vadd.f32 %v16766_v2, %v7367_v15  ;;  %v13386_v2 = vld [vmem:[#allocation2 + $0x528] ss:$12 sps:$4 sm:$0xff]   ;;  %v16869_v15 = vpop.f32.mrf.mxu1 }
0x1d41   :  { %9984 = vmatpush1.bf16.msra.mxu1 %v13359_v43  ;;  %9948 = vmatprep.subr.bf16.mxu0 %v13364_v53  ;;  %v16844_v52 = vpack.c.bf16 %v7879_v28, %v7867_v58  ;;  %v13385_v43 = vld [vmem:[#allocation2 + $0x304] ss:$12 sps:$4 sm:$0xff]   ;;  %v7432_v53 = vadd.f32 %v16804_v32, %v7379_v3  ;;  %v7901_v58 = vmax.f32 %v7436_v22, 0.0  ;;  %v13391_v28 = vld [vmem:[#allocation2 + $0x46c] ss:$12 sps:$4 sm:$0xff]   ;;  %v7434_v32 = vadd.f32 %v16812_v62, %v7381_v55 }
0x1d42   :  { %9985 = vmatprep.subr.bf16.mxu1 %v13367_v16  ;;  %v7876_v16 = vmax.f32 %v7424_v11, 0.0  ;;  %v13397_v51 = vld [vmem:[#allocation2 + $0x454] ss:$12 sps:$4 sm:$0xff]   ;;  %v13395_v62 = vld [vmem:[#allocation2 + $0x450] ss:$12 sps:$4 sm:$0xff]  }
0x1d43   :  { %10009 = vmatprep.mubr.bf16.mxu1 %v16844_v52  ;;  %v7900_v21 = vmax.f32 %v7434_v32, 0.0  ;;  %v13403_v4 = vld [vmem:[#allocation2 + $0x43c] ss:$12 sps:$4 sm:$0xff]   ;;  %v13398_v3 = vld [vmem:[#allocation2 + $0x4f8] ss:$12 sps:$4 sm:$0xff]  }
0x1d44   :  { %9949 = vmatpush2.bf16.msra.mxu0 %v13362_v60  ;;  %v7864_v60 = vmax.f32 %v7420_v23, 0.0  ;;  %v13406_v11 = vld [vmem:[#allocation2 + $0x4e4] ss:$12 sps:$4 sm:$0xff]   ;;  %v13404_v22 = vld [vmem:[#allocation2 + $0x4e0] ss:$12 sps:$4 sm:$0xff]  }
0x1d45   :  { %9986 = vmatpush1.bf16.msra.mxu1 %v13365_v17  ;;  %9950 = vmatprep.subr.bf16.mxu0 %v13370_v19  ;;  %v7889_v17 = vmax.f32 %v7432_v53, 0.0  ;;  %v13412_v23 = vld [vmem:[#allocation2 + $0x4cc] ss:$12 sps:$4 sm:$0xff]   ;;  %v16874_v53 = vpop.f32.mrf.mxu0  ;;  %v13419_v32 = vld [vmem:[#allocation2 + $0x3f0] ss:$12 sps:$4 sm:$0xff]  }
0x1d46   :  { %9987 = vmatprep.subr.bf16.mxu1 %v13373_v61  ;;  %v16861_v19 = vpack.c.bf16 %v7876_v16, %v7864_v60  ;;  %v13394_v61 = vld [vmem:[#allocation2 + $0x514] ss:$12 sps:$4 sm:$0xff]   ;;  %v5744_v16 = vsub.s32 4, %v14177_v6 }
0x1d47   :  { %v13421_v60 = vld [vmem:[#allocation2 + $0x3f4] ss:$12 sps:$4 sm:$0xff]  }
0x1d48   :  { %9951 = vmatpush2.bf16.msra.mxu0 %v13368_v7  ;;  %v16864_v7 = vpack.c.bf16 %v7901_v58, %v7889_v17  ;;  %v13418_v58 = vld [vmem:[#allocation2 + $0x4b4] ss:$12 sps:$4 sm:$0xff]  }
0x1d49   :  { %9988 = vmatpush1.bf16.msra.mxu1 %v13371_v33  ;;  %9952 = vmatprep.subr.bf16.mxu0 %v13376_v30  ;;  %v7430_v33 = vadd.f32 %v16794_v24, %v7377_v1  ;;  %v13400_v30 = vld [vmem:[#allocation2 + $0x4fc] ss:$12 sps:$4 sm:$0xff]   ;;  %v13401_v24 = vld [vmem:[#allocation2 + $0x438] ss:$12 sps:$4 sm:$0xff]   ;;  %v5745_v1 = vrot.slane %v16681_v37, %v5744_v16 }
0x1d4a   :  { %9989 = vmatprep.subr.bf16.mxu1 %v13379_v45  ;;  %v13439_v16 = vld [vmem:[#allocation2 + $0x6ac] ss:$12 sps:$4 sm:$0xff]  }
0x1d4b   :  { %v7888_v45 = vmax.f32 %v7430_v33, 0.0  ;;  %v13427_v33 = vld [vmem:[#allocation2 + $0x3dc] ss:$12 sps:$4 sm:$0xff]  }
0x1d4c   :  { %9953 = vmatpush2.bf16.msra.mxu0 %v13374_v38 }
0x1d4d   :  { %9990 = vmatpush1.bf16.msra.mxu1 %v13377_v29  ;;  %9954 = vmatprep.subr.bf16.mxu0 %v13382_v49  ;;  %v16871_v38 = vpack.c.bf16 %v7900_v21, %v7888_v45  ;;  %v13409_v29 = vld [vmem:[#allocation2 + $0x424] ss:$12 sps:$4 sm:$0xff]   ;;  %v7484_v49 = vpop.f32.mrf.mxu1  ;;  %v7473_v21 = vadd.f32 %v16831_v50, %v5745_v1 }
0x1d4e   :  { %9991 = vmatprep.subr.bf16.mxu1 %v13385_v43  ;;  %v13407_v43 = vld [vmem:[#allocation2 + $0x420] ss:$12 sps:$4 sm:$0xff]   ;;  %v13430_v45 = vld [vmem:[#allocation2 + $0x484] ss:$12 sps:$4 sm:$0xff]  }
0x1d4f   :  { %v7486_v55 = vpop.f32.mrf.mxu1 }
0x1d50   :  { %9955 = vmatpush2.bf16.msra.mxu0 %v13380_v34  ;;  %v13415_v34 = vld [vmem:[#allocation2 + $0x40c] ss:$12 sps:$4 sm:$0xff]  }
0x1d51   :  { %9992 = vmatpush1.bf16.msra.mxu1 %v13383_v39  ;;  %10030 = vmatprep.subr.bf16.mxu0 %v13388_v59  ;;  %v13410_v39 = vld [vmem:[#allocation2 + $0x4c8] ss:$12 sps:$4 sm:$0xff]   ;;  %v7488_v17 = vpop.f32.mrf.mxu1 }
0x1d52   :  { %9993 = vmatprep.subr.bf16.mxu1 %v13391_v28  ;;  %v13413_v59 = vld [vmem:[#allocation2 + $0x408] ss:$12 sps:$4 sm:$0xff]   ;;  %v7537_v28 = vpop.f32.mrf.mxu0 }
0x1d53   :  { %9957 = vmatmul.mubr.bf16.vlgmr.msra.gmra.mxu0 %v16861_v19 }
0x1d54   :  { %9966 = vmatprep.mubr.bf16.mxu0 %v16864_v7  ;;  %10031 = vmatpush1.bf16.msra.mxu0 %v13386_v2  ;;  %v13416_v2 = vld [vmem:[#allocation2 + $0x4b0] ss:$12 sps:$4 sm:$0xff]   ;;  %v16884_v50 = vpop.f32.mrf.mxu1 }
0x1d55   :  { %9994 = vmatpush2.bf16.msra.mxu1 %v13389_v54  ;;  %10032 = vmatprep.subr.bf16.mxu0 %v13394_v61  ;;  %v13424_v54 = vld [vmem:[#allocation2 + $0x49c] ss:$12 sps:$4 sm:$0xff]   ;;  %v7477_v61 = vadd.f32 %v16838_v41, %v5745_v1  ;;  %v13433_v41 = vld [vmem:[#allocation2 + $0x3c4] ss:$12 sps:$4 sm:$0xff]  }
0x1d56   :  { %9995 = vmatprep.subr.bf16.mxu1 %v13397_v51  ;;  %v7539_v51 = vpop.f32.mrf.mxu0 }
0x1d58   :  { %10033 = vmatpush1.bf16.msra.mxu0 %v13392_v40  ;;  %v7489_v40 = vadd.f32 %v7488_v17, %v16828_v35  ;;  %v13437_v17 = vld [vmem:[#allocation2 + $0x6a8] ss:$12 sps:$4 sm:$0xff]  }
0x1d59   :  { %9996 = vmatpush2.bf16.msra.mxu1 %v13395_v62  ;;  %10034 = vmatprep.subr.bf16.mxu0 %v13400_v30  ;;  %v13422_v62 = vld [vmem:[#allocation2 + $0x498] ss:$12 sps:$4 sm:$0xff]   ;;  %v7485_v30 = vadd.f32 %v7484_v49, %v16828_v35  ;;  %v13431_v35 = vld [vmem:[#allocation2 + $0x3c0] ss:$12 sps:$4 sm:$0xff]  }
0x1d5a   :  { %9997 = vmatprep.subr.bf16.mxu1 %v13403_v4  ;;  %v13425_v4 = vld [vmem:[#allocation2 + $0x3d8] ss:$12 sps:$4 sm:$0xff]  }
0x1d5b   :  { %9967 = vmatmul.mubr.bf16.gmra.mxu0 %v16871_v38  ;;  %v13436_v49 = vld [vmem:[#allocation2 + $0x5ec] ss:$12 sps:$4 sm:$0xff]  }
0x1d5c   :  { %10035 = vmatpush1.bf16.msra.mxu0 %v13398_v3  ;;  %v7530_v3 = vadd.f32 %v16836_v25, %v7477_v61  ;;  %v5756_v25 = vsub.s32 7, %v14177_v6  ;;  %v13445_v61 = vld [vmem:[#allocation2 + $0x694] ss:$12 sps:$4 sm:$0xff]  }
0x1d5d   :  { %9998 = vmatpush2.bf16.msra.mxu1 %v13401_v24  ;;  %10036 = vmatprep.subr.bf16.mxu0 %v13406_v11  ;;  %v7541_v24 = vpop.f32.mrf.mxu0 }
0x1d5e   :  { %9999 = vmatprep.subr.bf16.mxu1 %v13409_v29  ;;  %v7542_v11 = vadd.f32 %v7541_v24, %v7489_v40  ;;  %v7526_v29 = vadd.f32 %v16823_v26, %v7473_v21  ;;  %v13434_v26 = vld [vmem:[#allocation2 + $0x5e8] ss:$12 sps:$4 sm:$0xff]  }
0x1d60   :  { %10037 = vmatpush1.bf16.msra.mxu0 %v13404_v22  ;;  %v13428_v22 = vld [vmem:[#allocation2 + $0x480] ss:$12 sps:$4 sm:$0xff]  }
0x1d61   :  { %10000 = vmatpush2.bf16.msra.mxu1 %v13407_v43  ;;  %10038 = vmatprep.subr.bf16.mxu0 %v13412_v23  ;;  %v7538_v43 = vadd.f32 %v7537_v28, %v7485_v30  ;;  %v7878_v23 = vmax.f32 %v7530_v3, 0.0  ;;  %v7633_v28 = vpop.f32.mrf.mxu1  ;;  %v13448_v30 = vld [vmem:[#allocation2 + $0x5bc] ss:$12 sps:$4 sm:$0xff]  }
0x1d62   :  { %10001 = vmatprep.subr.bf16.mxu1 %v13415_v34  ;;  %v7487_v34 = vadd.f32 %v7486_v55, %v5745_v1  ;;  %v16891_v55 = vrot.slane %v16681_v37, %v5756_v25  ;;  %v13451_v3 = vld [vmem:[#allocation2 + $0x67c] ss:$12 sps:$4 sm:$0xff]  }
0x1d63   :  { %v16899_v21 = vpop.f32.mrf.mxu1 }
0x1d64   :  { %10039 = vmatpush1.bf16.msra.mxu0 %v13410_v39  ;;  %v7903_v39 = vmax.f32 %v7542_v11, 0.0 }
0x1d65   :  { %10002 = vmatpush2.bf16.msra.mxu1 %v13413_v59  ;;  %10040 = vmatprep.subr.bf16.mxu0 %v13418_v58  ;;  %v7866_v59 = vmax.f32 %v7526_v29, 0.0  ;;  %v7483_v58 = vadd.f32 %v16869_v15, %v5745_v1  ;;  %v13440_v1 = vld [vmem:[#allocation2 + $0x5d0] ss:$12 sps:$4 sm:$0xff]   ;;  %v7637_v11 = vpop.f32.mrf.mxu1 }
0x1d66   :  { %10003 = vmatprep.subr.bf16.mxu1 %v13421_v60  ;;  %v7891_v60 = vmax.f32 %v7538_v43, 0.0  ;;  %v13454_v43 = vld [vmem:[#allocation2 + $0x5a4] ss:$12 sps:$4 sm:$0xff]  }
0x1d67   :  { %v7536_v15 = vadd.f32 %v16874_v53, %v7483_v58 }
0x1d68   :  { %10041 = vmatpush1.bf16.msra.mxu0 %v13416_v2  ;;  %v16888_v2 = vpack.c.bf16 %v7878_v23, %v7866_v59  ;;  %v16895_v40 = vpack.c.bf16 %v7903_v39, %v7891_v60  ;;  %v13452_v39 = vld [vmem:[#allocation2 + $0x5a0] ss:$12 sps:$4 sm:$0xff]   ;;  %v16909_v59 = vpop.f32.mrf.mxu1 }
0x1d69   :  { %10004 = vmatpush2.bf16.msra.mxu1 %v13419_v32  ;;  %10042 = vmatprep.subr.bf16.mxu0 %v13424_v54  ;;  %v7540_v32 = vadd.f32 %v7539_v51, %v7487_v34  ;;  %v13442_v54 = vld [vmem:[#allocation2 + $0x5d4] ss:$12 sps:$4 sm:$0xff]   ;;  %v13443_v51 = vld [vmem:[#allocation2 + $0x690] ss:$12 sps:$4 sm:$0xff]   ;;  %v7890_v53 = vmax.f32 %v7536_v15, 0.0 }
0x1d6a   :  { %10005 = vmatprep.subr.bf16.mxu1 %v13427_v33  ;;  %v13457_v34 = vld [vmem:[#allocation2 + $0x664] ss:$12 sps:$4 sm:$0xff]   ;;  %v13460_v60 = vld [vmem:[#allocation2 + $0x58c] ss:$12 sps:$4 sm:$0xff]  }
0x1d6c   :  { %10043 = vmatpush1.bf16.msra.mxu0 %v13422_v62 }
0x1d6d   :  { %10006 = vmatpush2.bf16.msra.mxu1 %v13425_v4  ;;  %10044 = vmatprep.subr.bf16.mxu0 %v13430_v45  ;;  %v7902_v4 = vmax.f32 %v7540_v32, 0.0  ;;  %v13463_v32 = vld [vmem:[#allocation2 + $0x64c] ss:$12 sps:$4 sm:$0xff]  }
0x1d6e   :  { %10007 = vmatprep.subr.bf16.mxu1 %v13433_v41  ;;  %v13446_v41 = vld [vmem:[#allocation2 + $0x5b8] ss:$12 sps:$4 sm:$0xff]  }
0x1d70   :  { %10045 = vmatpush1.bf16.msra.mxu0 %v13428_v22  ;;  %v13449_v22 = vld [vmem:[#allocation2 + $0x678] ss:$12 sps:$4 sm:$0xff]  }
0x1d71   :  { %10008 = vmatpush2.bf16.msra.mxu1 %v13431_v35  ;;  %10046 = vmatprep.subr.bf16.mxu0 %v13436_v49  ;;  %v16903_v35 = vpack.c.bf16 %v7902_v4, %v7890_v53  ;;  %v13469_v4 = vld [vmem:[#allocation2 + $0x634] ss:$12 sps:$4 sm:$0xff]   ;;  %v13464_v53 = vld [vmem:[#allocation2 + $0x570] ss:$12 sps:$4 sm:$0xff]  }
0x1d72   :  { %10083 = vmatprep.subr.bf16.mxu1 %v13439_v16 }
0x1d73   :  { %v16893_v33 = vpop.f32.mrf.mxu0 }
0x1d74   :  { %10010 = vmatmul.mubr.bf16.vlgmr.msra.gmra.mxu1 %v16888_v2  ;;  %10047 = vmatpush2.bf16.msra.mxu0 %v13434_v26  ;;  %v13455_v26 = vld [vmem:[#allocation2 + $0x660] ss:$12 sps:$4 sm:$0xff]  }
0x1d75   :  { %v7580_v62 = vpop.f32.mrf.mxu0  ;;  %10019 = vmatprep.mubr.bf16.mxu1 %v16895_v40  ;;  %10084 = vmatpush1.bf16.msra.mxu1 %v13437_v17 }
0x1d76   :  { %v7581_v45 = vadd.f32 %v7580_v62, %v16891_v55  ;;  %10048 = vmatprep.subr.bf16.mxu0 %v13442_v54  ;;  %10085 = vmatprep.subr.bf16.mxu1 %v13445_v61  ;;  %v5752_v54 = vsub.s32 6, %v14177_v6  ;;  %v7643_v62 = vpop.f32.mrf.mxu1 }
0x1d77   :  { %v7582_v24 = vpop.f32.mrf.mxu0 }
0x1d78   :  { %10049 = vmatpush2.bf16.msra.mxu0 %v13440_v1  ;;  %v7634_v49 = vadd.f32 %v7633_v28, %v7581_v45  ;;  %v13458_v1 = vld [vmem:[#allocation2 + $0x588] ss:$12 sps:$4 sm:$0xff]   ;;  %v5753_v45 = vrot.slane %v16681_v37, %v5752_v54  ;;  %v13476_v54 = vld [vmem:[#allocation2 + $0x540] ss:$12 sps:$4 sm:$0xff]  }
0x1d79   :  { %v7584_v29 = vpop.f32.mrf.mxu0  ;;  %10086 = vmatpush1.bf16.msra.mxu1 %v13443_v51  ;;  %10050 = vmatprep.subr.bf16.mxu0 %v13448_v30  ;;  %v13461_v51 = vld [vmem:[#allocation2 + $0x648] ss:$12 sps:$4 sm:$0xff]  }
0x1d7a   :  { %v7585_v23 = vadd.f32 %v7584_v29, %v16891_v55  ;;  %10087 = vmatprep.subr.bf16.mxu1 %v13451_v3  ;;  %v7869_v17 = vmax.f32 %v7634_v49, 0.0  ;;  %v13466_v30 = vld [vmem:[#allocation2 + $0x574] ss:$12 sps:$4 sm:$0xff]   ;;  %v13467_v29 = vld [vmem:[#allocation2 + $0x630] ss:$12 sps:$4 sm:$0xff]  }
0x1d7b   :  { %v16906_v16 = vpop.f32.mrf.mxu0  ;;  %v13475_v49 = vld [vmem:[#allocation2 + $0x61c] ss:$12 sps:$4 sm:$0xff]  }
0x1d7c   :  { %v7638_v25 = vadd.f32 %v7637_v11, %v7585_v23  ;;  %10020 = vmatmul.mubr.bf16.gmra.mxu1 %v16903_v35  ;;  %10051 = vmatpush2.bf16.msra.mxu0 %v13446_v41  ;;  %v7645_v41 = vpop.f32.mrf.mxu1  ;;  %v7583_v11 = vadd.f32 %v7582_v24, %v5753_v45  ;;  %v7579_v23 = vadd.f32 %v16893_v33, %v5753_v45  ;;  %v13473_v24 = vld [vmem:[#allocation2 + $0x618] ss:$12 sps:$4 sm:$0xff]  }
0x1d7d   :  { %v7590_v58 = vpop.f32.mrf.mxu0  ;;  %10088 = vmatpush1.bf16.msra.mxu1 %v13449_v22  ;;  %10052 = vmatprep.subr.bf16.mxu0 %v13454_v43  ;;  %v13472_v22 = vld [vmem:[#allocation2 + $0x55c] ss:$12 sps:$4 sm:$0xff]  }
0x1d7e   :  { %v7881_v28 = vmax.f32 %v7638_v25, 0.0  ;;  %10089 = vmatprep.subr.bf16.mxu1 %v13457_v34  ;;  %v7591_v34 = vadd.f32 %v7590_v58, %v16891_v55  ;;  %v13470_v25 = vld [vmem:[#allocation2 + $0x558] ss:$12 sps:$4 sm:$0xff]   ;;  %v7647_v37 = vpop.f32.mrf.mxu1 }
0x1d7f   :  { %v7592_v61 = vpop.f32.mrf.mxu0  ;;  %v13496_v58 = vld [vmem:[#allocation2 + $0x82c] ss:$12 sps:$4 sm:$0xff]  }
0x1d80   :  { %10053 = vmatpush2.bf16.msra.mxu0 %v13452_v39  ;;  %v16912_v15 = vpack.c.bf16 %v7881_v28, %v7869_v17  ;;  %v7636_v39 = vadd.f32 %v16899_v21, %v7583_v11  ;;  %v13481_v17 = vld [vmem:[#allocation2 + $0x604] ss:$12 sps:$4 sm:$0xff]   ;;  %v7632_v28 = vadd.f32 %v16884_v50, %v7579_v23  ;;  %v13484_v21 = vld [vmem:[#allocation2 + $0x76c] ss:$12 sps:$4 sm:$0xff]  }
0x1d81   :  { %10090 = vmatpush1.bf16.msra.mxu1 %v13455_v26  ;;  %10054 = vmatprep.subr.bf16.mxu0 %v13460_v60  ;;  %v7594_v3 = vpop.f32.mrf.mxu0  ;;  %v13478_v26 = vld [vmem:[#allocation2 + $0x544] ss:$12 sps:$4 sm:$0xff]  }
0x1d82   :  { %10062 = vmatprep.mubr.bf16.mxu0 %v16912_v15  ;;  %10091 = vmatprep.subr.bf16.mxu1 %v13463_v32  ;;  %v7595_v43 = vadd.f32 %v7594_v3, %v16891_v55  ;;  %v7644_v32 = vadd.f32 %v7643_v62, %v7591_v34  ;;  %v7880_v33 = vmax.f32 %v7636_v39, 0.0  ;;  %v13479_v55 = vld [vmem:[#allocation2 + $0x600] ss:$12 sps:$4 sm:$0xff]   ;;  %v13482_v62 = vld [vmem:[#allocation2 + $0x768] ss:$12 sps:$4 sm:$0xff]  }
0x1d83   :  { %v13500_v23 = vld [vmem:[#allocation2 + $0x810] ss:$12 sps:$4 sm:$0xff]  }
0x1d84   :  { %10055 = vmatpush2.bf16.msra.mxu0 %v13458_v1  ;;  %v7648_v60 = vadd.f32 %v7647_v37, %v7595_v43  ;;  %v7593_v1 = vadd.f32 %v7592_v61, %v5753_v45  ;;  %v7893_v3 = vmax.f32 %v7644_v32, 0.0  ;;  %v13502_v61 = vld [vmem:[#allocation2 + $0x814] ss:$12 sps:$4 sm:$0xff]   ;;  %v13485_v37 = vld [vmem:[#allocation2 + $0x750] ss:$12 sps:$4 sm:$0xff]  }
0x1d85   :  { %10092 = vmatpush1.bf16.msra.mxu1 %v13461_v51  ;;  %10056 = vmatprep.subr.bf16.mxu0 %v13466_v30  ;;  %v7868_v30 = vmax.f32 %v7632_v28, 0.0  ;;  %v13487_v43 = vld [vmem:[#allocation2 + $0x754] ss:$12 sps:$4 sm:$0xff]   ;;  %v13506_v32 = vld [vmem:[#allocation2 + $0x7f8] ss:$12 sps:$4 sm:$0xff]  }
0x1d86   :  { %10093 = vmatprep.subr.bf16.mxu1 %v13469_v4  ;;  %v7905_v51 = vmax.f32 %v7648_v60, 0.0  ;;  %v7589_v4 = vadd.f32 %v16906_v16, %v5753_v45  ;;  %v7646_v50 = vadd.f32 %v7645_v41, %v7593_v1  ;;  %v13514_v1 = vld [vmem:[#allocation2 + $0x7e4] ss:$12 sps:$4 sm:$0xff]  }
0x1d87   :  { %v16922_v11 = vpack.c.bf16 %v7880_v33, %v7868_v30  ;;  %v13488_v33 = vld [vmem:[#allocation2 + $0x738] ss:$12 sps:$4 sm:$0xff]  }
0x1d88   :  { %10057 = vmatpush2.bf16.msra.mxu0 %v13464_v53  ;;  %v13494_v53 = vld [vmem:[#allocation2 + $0x828] ss:$12 sps:$4 sm:$0xff]   ;;  %v7642_v16 = vadd.f32 %v16909_v59, %v7589_v4  ;;  %v7904_v34 = vmax.f32 %v7646_v50, 0.0  ;;  %v13491_v50 = vld [vmem:[#allocation2 + $0x720] ss:$12 sps:$4 sm:$0xff]  }
0x1d89   :  { %10094 = vmatpush1.bf16.msra.mxu1 %v13467_v29  ;;  %10058 = vmatprep.subr.bf16.mxu0 %v13472_v22  ;;  %v16927_v29 = vld [vmem:[%s17053_s9 + $0x8] sm:$0xf]  ;;  %v16929_v22 = vpack.c.bf16 %v7905_v51, %v7893_v3  ;;  %v13493_v51 = vld [vmem:[#allocation2 + $0x724] ss:$12 sps:$4 sm:$0xff]   ;;  %v13512_v3 = vld [vmem:[#allocation2 + $0x7e0] ss:$12 sps:$4 sm:$0xff]  }
0x1d8a   :  { %10095 = vmatprep.subr.bf16.mxu1 %v13475_v49  ;;  %v16937_v41 = vrot.slane %v16927_v29, %v14183_v9  ;;  %v13508_v59 = vld [vmem:[#allocation2 + $0x7fc] ss:$12 sps:$4 sm:$0xff]  }
0x1d8c   :  { %10059 = vmatpush2.bf16.msra.mxu0 %v13470_v25 }
0x1d8d   :  { %10096 = vmatpush1.bf16.msra.mxu1 %v13473_v24  ;;  %10060 = vmatprep.subr.bf16.mxu0 %v13478_v26  ;;  %v13490_v24 = vld [vmem:[#allocation2 + $0x73c] ss:$12 sps:$4 sm:$0xff]   ;;  %v7892_v26 = vmax.f32 %v7642_v16, 0.0  ;;  %v13499_v16 = vld [vmem:[#allocation2 + $0x70c] ss:$12 sps:$4 sm:$0xff]  }
0x1d8e   :  { %10097 = vmatprep.subr.bf16.mxu1 %v13481_v17 }
0x1d90   :  { %10061 = vmatpush2.bf16.msra.mxu0 %v13476_v54  ;;  %v16945_v54 = vpack.c.bf16 %v7904_v34, %v7892_v26 }
0x1d91   :  { %10098 = vmatpush1.bf16.msra.mxu1 %v13479_v55  ;;  %10136 = vmatprep.subr.bf16.mxu0 %v13496_v58 }
0x1d92   :  { %10099 = vmatprep.subr.bf16.mxu1 %v13484_v21 }
0x1d93   :  { %v16932_v45 = vpop.f32.mrf.mxu0  ;;  %10063 = vmatmul.mubr.bf16.vlgmr.msra.gmra.mxu0 %v16922_v11 }
0x1d94   :  { %v16939_v49 = vpop.f32.mrf.mxu1  ;;  %10072 = vmatprep.mubr.bf16.mxu0 %v16929_v22  ;;  %10137 = vmatpush1.bf16.msra.mxu0 %v13494_v53 }
0x1d95   :  { %v7739_v25 = vpop.f32.mrf.mxu0  ;;  %10100 = vmatpush2.bf16.msra.mxu1 %v13482_v62  ;;  %10138 = vmatprep.subr.bf16.mxu0 %v13502_v61  ;;  %v13520_v62 = vld [vmem:[#allocation2 + $0x7cc] ss:$12 sps:$4 sm:$0xff]  }
0x1d96   :  { %v7686_v39 = vpop.f32.mrf.mxu1  ;;  %10101 = vmatprep.subr.bf16.mxu1 %v13487_v43 }
0x1d97   :  { %v7687_v60 = vadd.f32 %v7686_v39, %v16937_v41  ;;  %v16943_v17 = vpop.f32.mrf.mxu0  ;;  %v13497_v39 = vld [vmem:[#allocation2 + $0x708] ss:$12 sps:$4 sm:$0xff]  }
0x1d98   :  { %v7688_v28 = vpop.f32.mrf.mxu1  ;;  %10139 = vmatpush1.bf16.msra.mxu0 %v13500_v23 }
0x1d99   :  { %10102 = vmatpush2.bf16.msra.mxu1 %v13485_v37  ;;  %10140 = vmatprep.subr.bf16.mxu0 %v13508_v59  ;;  %v7743_v55 = vpop.f32.mrf.mxu0  ;;  %v7740_v21 = vadd.f32 %v7739_v25, %v7687_v60  ;;  %v13518_v37 = vld [vmem:[#allocation2 + $0x7c8] ss:$12 sps:$4 sm:$0xff]  }
0x1d9a   :  { %v7690_v58 = vpop.f32.mrf.mxu1  ;;  %10103 = vmatprep.subr.bf16.mxu1 %v13490_v24  ;;  %v13525_v24 = vld [vmem:[#allocation2 + $0x7b4] ss:$12 sps:$4 sm:$0xff]  }
0x1d9b   :  { %v7691_v30 = vadd.f32 %v7690_v58, %v16937_v41  ;;  %10073 = vmatmul.mubr.bf16.gmra.mxu0 %v16945_v54  ;;  %v16951_v61 = vpop.f32.mrf.mxu0  ;;  %v7871_v23 = vmax.f32 %v7740_v21, 0.0  ;;  %v13505_v60 = vld [vmem:[#allocation2 + $0x6f4] ss:$12 sps:$4 sm:$0xff]   ;;  %v13530_v58 = vld [vmem:[#allocation2 + $0x79c] ss:$12 sps:$4 sm:$0xff]  }
0x1d9c   :  { %v16949_v4 = vpop.f32.mrf.mxu1  ;;  %10141 = vmatpush1.bf16.msra.mxu0 %v13506_v32  ;;  %v5761_v32 = vrot.slane %v16927_v29, %v14192_v12 }
0x1d9d   :  { %v7744_v53 = vadd.f32 %v7743_v55, %v7691_v30  ;;  %10104 = vmatpush2.bf16.msra.mxu1 %v13488_v33  ;;  %10142 = vmatprep.subr.bf16.mxu0 %v13514_v1  ;;  %v7749_v26 = vpop.f32.mrf.mxu0  ;;  %v13523_v1 = vld [vmem:[#allocation2 + $0x7b0] ss:$12 sps:$4 sm:$0xff]  }
0x1d9e   :  { %v7696_v43 = vpop.f32.mrf.mxu1  ;;  %10105 = vmatprep.subr.bf16.mxu1 %v13493_v51  ;;  %v13503_v55 = vld [vmem:[#allocation2 + $0x6f0] ss:$12 sps:$4 sm:$0xff]   ;;  %v7689_v51 = vadd.f32 %v7688_v28, %v5761_v32 }
0x1d9f   :  { %v7883_v34 = vmax.f32 %v7744_v53, 0.0  ;;  %v7751_v21 = vpop.f32.mrf.mxu0  ;;  %v13511_v30 = vld [vmem:[#allocation2 + $0x6dc] ss:$12 sps:$4 sm:$0xff]   ;;  %v7685_v53 = vadd.f32 %v16939_v49, %v5761_v32  ;;  %v13517_v28 = vld [vmem:[#allocation2 + $0x6c4] ss:$12 sps:$4 sm:$0xff]  }
0x1da0   :  { %v7698_v25 = vpop.f32.mrf.mxu1  ;;  %10143 = vmatpush1.bf16.msra.mxu0 %v13512_v3  ;;  %v13515_v49 = vld [vmem:[#allocation2 + $0x6c0] ss:$12 sps:$4 sm:$0xff]  }
0x1da1   :  { %10106 = vmatpush2.bf16.msra.mxu1 %v13491_v50  ;;  %v16953_v59 = vpack.c.bf16 %v7883_v34, %v7871_v23  ;;  %10144 = vmatprep.subr.bf16.mxu0 %v13520_v62  ;;  %v13528_v50 = vld [vmem:[#allocation2 + $0x798] ss:$12 sps:$4 sm:$0xff]   ;;  %v7697_v62 = vadd.f32 %v7696_v43, %v16937_v41  ;;  %v7742_v34 = vadd.f32 %v16943_v17, %v7689_v51  ;;  %v13538_v51 = vld [vmem:[#allocation2 + $0x8e8] ss:$12 sps:$4 sm:$0xff]  }
0x1da2   :  { %10107 = vmatprep.subr.bf16.mxu1 %v13499_v16  ;;  %v7700_v33 = vpop.f32.mrf.mxu1  ;;  %v13509_v16 = vld [vmem:[#allocation2 + $0x6d8] ss:$12 sps:$4 sm:$0xff]   ;;  %v7699_v43 = vadd.f32 %v7698_v25, %v5761_v32  ;;  %v7695_v17 = vadd.f32 %v16949_v4, %v5761_v32  ;;  %v13543_v4 = vld [vmem:[#allocation2 + $0x8d0] ss:$12 sps:$4 sm:$0xff]  }
0x1da3   :  { %10115 = vmatprep.mubr.bf16.mxu1 %v16953_v59  ;;  %v7701_v3 = vadd.f32 %v7700_v33, %v16937_v41  ;;  %v13535_v23 = vld [vmem:[#allocation2 + $0x784] ss:$12 sps:$4 sm:$0xff]   ;;  %v7750_v33 = vadd.f32 %v7749_v26, %v7697_v62  ;;  %v7882_v41 = vmax.f32 %v7742_v34, 0.0 }
0x1da4   :  { %10145 = vmatpush1.bf16.msra.mxu0 %v13518_v37  ;;  %v7753_v37 = vpop.f32.mrf.mxu0  ;;  %v7752_v26 = vadd.f32 %v7751_v21, %v7699_v43  ;;  %v7748_v25 = vadd.f32 %v16951_v61, %v7695_v17  ;;  %v13527_v32 = vld [vmem:[#allocation2 + $0x98] ss:$12 sps:$4 sm:$0xff]   ;;  %v13565_v43 = vld [vmem:[#allocation2 + $0x874] ss:$12 sps:$4 sm:$0xff]  }
0x1da5   :  { %10108 = vmatpush2.bf16.msra.mxu1 %v13497_v39  ;;  %10146 = vmatprep.subr.bf16.mxu0 %v13525_v24  ;;  %v7754_v39 = vadd.f32 %v7753_v37, %v7701_v3  ;;  %v7738_v24 = vadd.f32 %v16932_v45, %v7685_v53  ;;  %v13522_v45 = vld [vmem:[#allocation2 + $0xb0] ss:$12 sps:$4 sm:$0xff]   ;;  %v13526_v53 = vld [vmem:[#allocation2 + $0x158] ss:$12 sps:$4 sm:$0xff]   ;;  %v13532_v37 = vld [vmem:[#allocation2 + $0x80] ss:$12 sps:$4 sm:$0xff]  }
0x1da6   :  { %10109 = vmatprep.subr.bf16.mxu1 %v13505_v60  ;;  %v13533_v60 = vld [vmem:[#allocation2 + $0x780] ss:$12 sps:$4 sm:$0xff]   ;;  %v7894_v21 = vmax.f32 %v7748_v25, 0.0  ;;  %v13548_v34 = vld [vmem:[#allocation2 + $0x8b8] ss:$12 sps:$4 sm:$0xff]  }
0x1da7   :  { %v7870_v48 = vmax.f32 %v7738_v24, 0.0  ;;  %v13553_v24 = vld [vmem:[#allocation2 + $0x8a0] ss:$12 sps:$4 sm:$0xff]   ;;  %v13547_v17 = vld [vmem:[#allocation2 + $0x38] ss:$12 sps:$4 sm:$0xff]  }
0x1da8   :  { %10147 = vmatpush1.bf16.msra.mxu0 %v13523_v1  ;;  %v13540_v1 = vld [vmem:[#allocation2 + $0x8ec] ss:$12 sps:$4 sm:$0xff]  }
0x1da9   :  { %10110 = vmatpush2.bf16.msra.mxu1 %v13503_v55  ;;  %10148 = vmatprep.subr.bf16.mxu0 %v13530_v58  ;;  %v13521_v55 = vld [vmem:[#allocation2 + $0x170] ss:$12 sps:$4 sm:$0xff]   ;;  %v7907_v58 = vmax.f32 %v7754_v39, 0.0  ;;  %v16964_v3 = vpack.c.bf16 %v7882_v41, %v7870_v48  ;;  %v13531_v48 = vld [vmem:[#allocation2 + $0x140] ss:$12 sps:$4 sm:$0xff]  }
0x1daa   :  { %10111 = vmatprep.subr.bf16.mxu1 %v13511_v30  ;;  %v7895_v30 = vmax.f32 %v7750_v33, 0.0  ;;  %v13555_v39 = vld [vmem:[#allocation2 + $0x8a4] ss:$12 sps:$4 sm:$0xff]   ;;  %v13560_v33 = vld [vmem:[#allocation2 + $0x88c] ss:$12 sps:$4 sm:$0xff]  }
0x1dab   :  { %v13542_v41 = vld [vmem:[#allocation2 + $0x50] ss:$12 sps:$4 sm:$0xff]  }
0x1dac   :  { %10149 = vmatpush1.bf16.msra.mxu0 %v13528_v50  ;;  %v13545_v50 = vld [vmem:[#allocation2 + $0x8d4] ss:$12 sps:$4 sm:$0xff]   ;;  %v16966_v62 = vpack.c.bf16 %v7907_v58, %v7895_v30  ;;  %v13563_v58 = vld [vmem:[#allocation2 + $0x870] ss:$12 sps:$4 sm:$0xff]  }
0x1dad   :  { %10112 = vmatpush2.bf16.msra.mxu1 %v13509_v16  ;;  %10150 = vmatprep.subr.bf16.mxu0 %v13535_v23  ;;  %v13550_v16 = vld [vmem:[#allocation2 + $0x8bc] ss:$12 sps:$4 sm:$0xff]   ;;  %v7906_v23 = vmax.f32 %v7752_v26, 0.0  ;;  %v13552_v26 = vld [vmem:[#allocation2 + $0x20] ss:$12 sps:$4 sm:$0xff]  }
0x1dae   :  { %10113 = vmatprep.subr.bf16.mxu1 %v13517_v28  ;;  %v13536_v28 = vld [vmem:[#allocation2 + $0x128] ss:$12 sps:$4 sm:$0xff]  }
0x1daf   :  { %v16971_v61 = vpack.c.bf16 %v7906_v23, %v7894_v21  ;;  %v13561_v23 = vld [vmem:[#allocation2 + $0x470] ss:$12 sps:$4 sm:$0xff]  }
0x1db0   :  { %10151 = vmatpush1.bf16.msra.mxu0 %v13533_v60  ;;  %v13537_v60 = vld [vmem:[#allocation2 + $0x68] ss:$12 sps:$4 sm:$0xff]   ;;  %v13562_v21 = vld [vmem:[#allocation2 + $0x3b0] ss:$12 sps:$4 sm:$0xff]  }
0x1db1   :  { %10114 = vmatpush2.bf16.msra.mxu1 %v13515_v49  ;;  %10152 = vmatprep.subr.bf16.mxu0 %v13540_v1  ;;  %v13541_v49 = vld [vmem:[#allocation2 + $0x110] ss:$12 sps:$4 sm:$0xff]   ;;  %v13558_v1 = vld [vmem:[#allocation2 + $0x888] ss:$12 sps:$4 sm:$0xff]  }
0x1db2   :  { %11912 = vmatprep.subr.bf16.mxu1 %v13521_v55  ;;  %v13546_v55 = vld [vmem:[#allocation2 + $0xf8] ss:$12 sps:$4 sm:$0xff]  }
0x1db4   :  { %10116 = vmatmul.mubr.bf16.vlgmr.msra.gmra.mxu1 %v16964_v3  ;;  %10153 = vmatpush2.bf16.msra.mxu0 %v13538_v51  ;;  %v13570_v51 = vld [vmem:[#allocation2 + $0x85c] ss:$12 sps:$4 sm:$0xff]   ;;  %v7843_v30 = vpop.f32.mrf.mxu1 }
0x1db5   :  { %10125 = vmatprep.mubr.bf16.mxu1 %v16966_v62  ;;  %11913 = vmatpush3.bf16.msra.mxu1 %v13522_v45  ;;  %v13568_v45 = vld [vmem:[#allocation2 + $0x858] ss:$12 sps:$4 sm:$0xff]  }
0x1db6   :  { %11914 = vmatprep.subr.bf16.mxu1 %v13526_v53  ;;  %10154 = vmatprep.subr.bf16.mxu0 %v13545_v50  ;;  %v13575_v53 = vld [vmem:[#allocation2 + $0x844] ss:$12 sps:$4 sm:$0xff]   ;;  %v13556_v50 = vld [vmem:[#allocation2 + $0xc8] ss:$12 sps:$4 sm:$0xff]   ;;  %v7845_v25 = vpop.f32.mrf.mxu1 }
0x1db8   :  { %10155 = vmatpush2.bf16.msra.mxu0 %v13543_v4  ;;  %v13573_v4 = vld [vmem:[#allocation2 + $0x840] ss:$12 sps:$4 sm:$0xff]  }
0x1db9   :  { %11915 = vmatpush3.bf16.msra.mxu1 %v13527_v32  ;;  %10156 = vmatprep.subr.bf16.mxu0 %v13550_v16  ;;  %v13557_v32 = vld [vmem:[#allocation2 + $0x8] ss:$12 sps:$4 sm:$0xff]   ;;  %v13578_v16 = vld [vmem:[#allocation2 + $0x2f0] ss:$12 sps:$4 sm:$0xff]  }
0x1dba   :  { %11916 = vmatprep.subr.bf16.mxu1 %v13531_v48  ;;  %v7847_v48 = vpop.f32.mrf.mxu1 }
0x1dbc   :  { %10126 = vmatmul.mubr.bf16.gmra.mxu1 %v16971_v61  ;;  %10157 = vmatpush2.bf16.msra.mxu0 %v13548_v34  ;;  %v17073_v34 = vsub.s32 3, %v14177_v6 }
0x1dbd   :  { %11917 = vmatpush3.bf16.msra.mxu1 %v13532_v37  ;;  %10221 = vmatprep.mubr.bf16.mxu1 %v16720_v18  ;;  %v13551_v18 = vld [vmem:[#allocation2 + $0xe0] ss:$12 sps:$4 sm:$0xff]  }
0x1dbe   :  { %11918 = vmatprep.subr.bf16.mxu1 %v13536_v28  ;;  %10158 = vmatprep.subr.bf16.mxu0 %v13555_v39  ;;  %v5773_v37 = vrot.slane %v16927_v29, %v17073_v34  ;;  %v13566_v28 = vld [vmem:[#allocation2 + $0x458] ss:$12 sps:$4 sm:$0xff]   ;;  %v7849_v39 = vpop.f32.mrf.mxu1 }
0x1dc0   :  { %10159 = vmatpush2.bf16.msra.mxu0 %v13553_v24  ;;  %v5769_v24 = vrot.slane %v16927_v29, %v14186_v10 }
0x1dc1   :  { %11919 = vmatpush3.bf16.msra.mxu1 %v13537_v60  ;;  %10160 = vmatprep.subr.bf16.mxu0 %v13560_v33 }
0x1dc2   :  { %11920 = vmatprep.subr.bf16.mxu1 %v13541_v49  ;;  %v13567_v49 = vld [vmem:[#allocation2 + $0x398] ss:$12 sps:$4 sm:$0xff]  }
0x1dc4   :  { %10161 = vmatpush2.bf16.msra.mxu0 %v13558_v1 }
0x1dc5   :  { %11921 = vmatpush3.bf16.msra.mxu1 %v13542_v41  ;;  %10162 = vmatprep.subr.bf16.mxu0 %v13565_v43  ;;  %v13571_v41 = vld [vmem:[#allocation2 + $0x440] ss:$12 sps:$4 sm:$0xff]   ;;  %v7853_v43 = vpop.f32.mrf.mxu1 }
0x1dc6   :  { %11922 = vmatprep.subr.bf16.mxu1 %v13546_v55 }
0x1dc8   :  { %10163 = vmatpush2.bf16.msra.mxu0 %v13563_v58 }
0x1dc9   :  { %11923 = vmatpush3.bf16.msra.mxu1 %v13547_v17  ;;  %10164 = vmatprep.subr.bf16.mxu0 %v13570_v51  ;;  %v13572_v51 = vld [vmem:[#allocation2 + $0x380] ss:$12 sps:$4 sm:$0xff]  }
0x1dca   :  { %11924 = vmatprep.subr.bf16.mxu1 %v13551_v18 }
0x1dcc   :  { %10165 = vmatpush2.bf16.msra.mxu0 %v13568_v45 }
0x1dcd   :  { %11925 = vmatpush3.bf16.msra.mxu1 %v13552_v26  ;;  %10166 = vmatprep.subr.bf16.mxu0 %v13575_v53  ;;  %v7855_v26 = vpop.f32.mrf.mxu1 }
0x1dce   :  { %11926 = vmatprep.subr.bf16.mxu1 %v13556_v50 }
0x1dd0   :  { %10167 = vmatpush2.bf16.msra.mxu0 %v13573_v4 }
0x1dd1   :  { %11927 = vmatpush3.bf16.msra.mxu1 %v13557_v32  ;;  %11940 = vmatprep.subr.bf16.mxu0 %v13578_v16  ;;  %v13577_v16 = vld [vmem:[#allocation2 + $0x368] ss:$12 sps:$4 sm:$0xff]  }
0x1dd2   :  { %11968 = vmatprep.subr.bf16.mxu1 %v13561_v23 }
0x1dd3   :  { %v7790_v60 = vpop.f32.mrf.mxu0 }
0x1dd4   :  { %10222 = vmatmul.mubr.bf16.vlgmr.msra.gmra.mxu1 %v16818_v47  ;;  %v7791_v6 = vadd.f32 %v7790_v60, %v5769_v24  ;;  %v13576_v47 = vld [vmem:[#allocation2 + $0x428] ss:$12 sps:$4 sm:$0xff]  }
0x1dd5   :  { %v7792_v33 = vpop.f32.mrf.mxu0  ;;  %10229 = vmatprep.mubr.bf16.mxu1 %v16825_v36  ;;  %11969 = vmatpush3.bf16.msra.mxu1 %v13562_v21 }
0x1dd6   :  { %v7793_v1 = vadd.f32 %v7792_v33, %v5773_v37  ;;  %11970 = vmatprep.subr.bf16.mxu1 %v13566_v28  ;;  %v7844_v53 = vadd.f32 %v7843_v30, %v7791_v6 }
0x1dd7   :  { %v7794_v55 = vpop.f32.mrf.mxu0 }
0x1dd8   :  { %v7795_v58 = vadd.f32 %v7794_v55, %v5769_v24  ;;  %v7846_v18 = vadd.f32 %v7845_v25, %v7793_v1  ;;  %v13580_v25 = vld [vmem:[#allocation2 + $0x410] ss:$12 sps:$4 sm:$0xff]   ;;  %v7872_v28 = vmax.f32 %v7844_v53, 0.0  ;;  %v13586_v53 = vld [vmem:[#allocation2 + $0x2c0] ss:$12 sps:$4 sm:$0xff]  }
0x1dd9   :  { %v7796_v17 = vpop.f32.mrf.mxu0  ;;  %11971 = vmatpush3.bf16.msra.mxu1 %v13567_v49 }
0x1dda   :  { %v7848_v29 = vadd.f32 %v7847_v48, %v7795_v58  ;;  %v7797_v45 = vadd.f32 %v7796_v17, %v5773_v37  ;;  %11972 = vmatprep.subr.bf16.mxu1 %v13571_v41  ;;  %v7873_v23 = vmax.f32 %v7846_v18, 0.0  ;;  %v7857_v48 = vpop.f32.mrf.mxu1  ;;  %v13581_v41 = vld [vmem:[#allocation2 + $0x350] ss:$12 sps:$4 sm:$0xff]   ;;  %v13584_v17 = vld [vmem:[#allocation2 + $0x3f8] ss:$12 sps:$4 sm:$0xff]  }
0x1ddb   :  { %v7800_v36 = vpop.f32.mrf.mxu0 }
0x1ddc   :  { %v7850_v50 = vadd.f32 %v7849_v39, %v7797_v45  ;;  %10230 = vmatmul.mubr.bf16.gmra.mxu1 %v16840_v5  ;;  %v7884_v4 = vmax.f32 %v7848_v29, 0.0  ;;  %v7801_v60 = vadd.f32 %v7800_v36, %v5769_v24  ;;  %v13579_v39 = vld [vmem:[#allocation2 + $0x230] ss:$12 sps:$4 sm:$0xff]   ;;  %v13583_v29 = vld [vmem:[#allocation2 + $0x218] ss:$12 sps:$4 sm:$0xff]  }
0x1ddd   :  { %v7802_v32 = vpop.f32.mrf.mxu0  ;;  %11973 = vmatpush3.bf16.msra.mxu1 %v13572_v51  ;;  %10319 = vmatprep.mubr.bf16.mxu1 %v16844_v52  ;;  %v13582_v52 = vld [vmem:[#allocation2 + $0x2d8] ss:$12 sps:$4 sm:$0xff]   ;;  %v7859_v51 = vpop.f32.mrf.mxu1 }
0x1dde   :  { %v7885_v21 = vmax.f32 %v7850_v50, 0.0  ;;  %v7803_v34 = vadd.f32 %v7802_v32, %v5773_v37  ;;  %11974 = vmatprep.subr.bf16.mxu1 %v13576_v47  ;;  %v16986_v5 = vpack.c.bf16 %v7884_v4, %v7872_v28  ;;  %v7854_v18 = vadd.f32 %v7853_v43, %v7801_v60  ;;  %v13585_v47 = vld [vmem:[#allocation2 + $0x338] ss:$12 sps:$4 sm:$0xff]   ;;  %v13587_v32 = vld [vmem:[#allocation2 + $0x200] ss:$12 sps:$4 sm:$0xff]  }
0x1ddf   :  { %v7804_v33 = vpop.f32.mrf.mxu0  ;;  %v13596_v28 = vld [vmem:[#allocation2 + $0x770] ss:$12 sps:$4 sm:$0xff]  }
0x1de0   :  { %v7805_v30 = vadd.f32 %v7804_v33, %v5769_v24  ;;  %v16984_v49 = vpack.c.bf16 %v7885_v21, %v7873_v23  ;;  %v7856_v6 = vadd.f32 %v7855_v26, %v7803_v34  ;;  %v7896_v50 = vmax.f32 %v7854_v18, 0.0  ;;  %v13590_v23 = vld [vmem:[#allocation2 + $0x2a8] ss:$12 sps:$4 sm:$0xff]   ;;  %v13595_v60 = vld [vmem:[#allocation2 + $0x1d0] ss:$12 sps:$4 sm:$0xff]  }
0x1de1   :  { %v7806_v1 = vpop.f32.mrf.mxu0  ;;  %11975 = vmatpush3.bf16.msra.mxu1 %v13577_v16  ;;  %v13589_v16 = vld [vmem:[#allocation2 + $0x320] ss:$12 sps:$4 sm:$0xff]   ;;  %v13592_v21 = vld [vmem:[#allocation2 + $0x3c8] ss:$12 sps:$4 sm:$0xff]   ;;  %v13597_v33 = vld [vmem:[#allocation2 + $0x6b0] ss:$12 sps:$4 sm:$0xff]  }
0x1de2   :  { %v7858_v55 = vadd.f32 %v7857_v48, %v7805_v30  ;;  %v7807_v58 = vadd.f32 %v7806_v1, %v5773_v37  ;;  %10168 = vmatprep.mubr.bf16.mxu0 %v16984_v49  ;;  %11976 = vmatprep.subr.bf16.mxu1 %v13580_v25  ;;  %v7897_v36 = vmax.f32 %v7856_v6, 0.0  ;;  %v13588_v37 = vld [vmem:[#allocation2 + $0x3e0] ss:$12 sps:$4 sm:$0xff]   ;;  %v13591_v34 = vld [vmem:[#allocation2 + $0x1e8] ss:$12 sps:$4 sm:$0xff]  }
0x1de3   :  { %10169 = vmatmul.mubr.bf16.vlgmr.msra.gmra.mxu0 %v16986_v5  ;;  %v13593_v25 = vld [vmem:[#allocation2 + $0x308] ss:$12 sps:$4 sm:$0xff]   ;;  %v13594_v48 = vld [vmem:[#allocation2 + $0x290] ss:$12 sps:$4 sm:$0xff]   ;;  %v13598_v30 = vld [vmem:[#allocation2 + $0x278] ss:$12 sps:$4 sm:$0xff]  }
0x1de4   :  { %v7860_v24 = vadd.f32 %v7859_v51, %v7807_v58  ;;  %11941 = vmatpush3.bf16.msra.mxu0 %v13579_v39  ;;  %v7908_v45 = vmax.f32 %v7858_v55, 0.0  ;;  %v13600_v39 = vld [vmem:[#allocation2 + $0x758] ss:$12 sps:$4 sm:$0xff]   ;;  %v13603_v6 = vld [vmem:[#allocation2 + $0x1a0] ss:$12 sps:$4 sm:$0xff]  }
0x1de5   :  { %11977 = vmatpush3.bf16.msra.mxu1 %v13581_v41  ;;  %11942 = vmatprep.subr.bf16.mxu0 %v13582_v52  ;;  %v13599_v1 = vld [vmem:[#allocation2 + $0x1b8] ss:$12 sps:$4 sm:$0xff]   ;;  %v13602_v41 = vld [vmem:[#allocation2 + $0x260] ss:$12 sps:$4 sm:$0xff]   ;;  %v13606_v58 = vld [vmem:[#allocation2 + $0x248] ss:$12 sps:$4 sm:$0xff]  }
0x1de6   :  { %v7909_v26 = vmax.f32 %v7860_v24, 0.0  ;;  %11978 = vmatprep.subr.bf16.mxu1 %v13584_v17  ;;  %v16992_v43 = vpack.c.bf16 %v7908_v45, %v7896_v50  ;;  %v13604_v52 = vld [vmem:[#allocation2 + $0x740] ss:$12 sps:$4 sm:$0xff]   ;;  %v13608_v17 = vld [vmem:[#allocation2 + $0x728] ss:$12 sps:$4 sm:$0xff]  }
0x1de7   :  { %v13605_v55 = vld [vmem:[#allocation2 + $0x680] ss:$12 sps:$4 sm:$0xff]   ;;  %v13610_v51 = vld [vmem:[#allocation2 + $0x5f0] ss:$12 sps:$4 sm:$0xff]   ;;  %v13614_v45 = vld [vmem:[#allocation2 + $0x5d8] ss:$12 sps:$4 sm:$0xff]  }
0x1de8   :  { %11943 = vmatpush3.bf16.msra.mxu0 %v13583_v29  ;;  %v16990_v4 = vpack.c.bf16 %v7909_v26, %v7897_v36  ;;  %v13612_v18 = vld [vmem:[#allocation2 + $0x710] ss:$12 sps:$4 sm:$0xff]   ;;  %v13620_v36 = vld [vmem:[#allocation2 + $0x6e0] ss:$12 sps:$4 sm:$0xff]   ;;  %v13622_v50 = vld [vmem:[#allocation2 + $0x5a8] ss:$12 sps:$4 sm:$0xff]  }
0x1de9   :  { %11979 = vmatpush3.bf16.msra.mxu1 %v13585_v47  ;;  %11944 = vmatprep.subr.bf16.mxu0 %v13586_v53  ;;  %v13611_v24 = vld [vmem:[#allocation2 + $0x530] ss:$12 sps:$4 sm:$0xff]   ;;  %v13616_v47 = vld [vmem:[#allocation2 + $0x6f8] ss:$12 sps:$4 sm:$0xff]   ;;  %v13618_v53 = vld [vmem:[#allocation2 + $0x5c0] ss:$12 sps:$4 sm:$0xff]  }
0x1dea   :  { %10178 = vmatprep.mubr.bf16.mxu0 %v16990_v4  ;;  %11980 = vmatprep.subr.bf16.mxu1 %v13588_v37  ;;  %v13613_v29 = vld [vmem:[#allocation2 + $0x650] ss:$12 sps:$4 sm:$0xff]   ;;  %v13619_v26 = vld [vmem:[#allocation2 + $0x500] ss:$12 sps:$4 sm:$0xff]  }
0x1deb   :  { %10179 = vmatmul.mubr.bf16.gmra.mxu0 %v16992_v43  ;;  %v13621_v37 = vld [vmem:[#allocation2 + $0x620] ss:$12 sps:$4 sm:$0xff]  }
0x1dec   :  { %11945 = vmatpush3.bf16.msra.mxu0 %v13587_v32  ;;  %10270 = vmatprep.mubr.bf16.mxu0 %v16786_v31  ;;  %v13601_v31 = vld [vmem:[#allocation2 + $0x698] ss:$12 sps:$4 sm:$0xff]   ;;  %v13624_v32 = vld [vmem:[#allocation2 + $0x6c8] ss:$12 sps:$4 sm:$0xff]  }
0x1ded   :  { %11981 = vmatpush3.bf16.msra.mxu1 %v13589_v16  ;;  %11946 = vmatprep.subr.bf16.mxu0 %v13590_v23  ;;  %v13626_v16 = vld [vmem:[#allocation2 + $0x590] ss:$12 sps:$4 sm:$0xff]  }
0x1dee   :  { %11982 = vmatprep.subr.bf16.mxu1 %v13592_v21  ;;  %v13627_v23 = vld [vmem:[#allocation2 + $0x4d0] ss:$12 sps:$4 sm:$0xff]   ;;  %v13628_v21 = vld [vmem:[#allocation2 + $0x578] ss:$12 sps:$4 sm:$0xff]  }
0x1df0   :  { %11947 = vmatpush3.bf16.msra.mxu0 %v13591_v34  ;;  %v13629_v34 = vld [vmem:[#allocation2 + $0x4b8] ss:$12 sps:$4 sm:$0xff]  }
0x1df1   :  { %11983 = vmatpush3.bf16.msra.mxu1 %v13593_v25  ;;  %11948 = vmatprep.subr.bf16.mxu0 %v13594_v48  ;;  %v13632_v25 = vld [vmem:[#allocation2 + $0x548] ss:$12 sps:$4 sm:$0xff]  }
0x1df2   :  { %12024 = vmatprep.subr.bf16.mxu1 %v13596_v28  ;;  %v13633_v48 = vld [vmem:[#allocation2 + $0x488] ss:$12 sps:$4 sm:$0xff]   ;;  %v13634_v28 = vld [vmem:[#allocation2 + $0x8f0] ss:$12 sps:$4 sm:$0xff]  }
0x1df4   :  { %11949 = vmatpush3.bf16.msra.mxu0 %v13595_v60  ;;  %10320 = vmatmul.mubr.bf16.vlgmr.msra.gmra.mxu1 %v16888_v2  ;;  %v13607_v2 = vld [vmem:[#allocation2 + $0x188] ss:$12 sps:$4 sm:$0xff]   ;;  %v13635_v60 = vld [vmem:[#allocation2 + $0x830] ss:$12 sps:$4 sm:$0xff]  }
0x1df5   :  { %10327 = vmatprep.mubr.bf16.mxu1 %v16895_v40  ;;  %12025 = vmatpush3.bf16.msra.mxu1 %v13597_v33  ;;  %v13609_v40 = vld [vmem:[#allocation2 + $0x668] ss:$12 sps:$4 sm:$0xff]   ;;  %v13636_v33 = vld [vmem:[#allocation2 + $0x8d8] ss:$12 sps:$4 sm:$0xff]  }
0x1df6   :  { %11950 = vmatprep.subr.bf16.mxu0 %v13598_v30  ;;  %12026 = vmatprep.subr.bf16.mxu1 %v13600_v39  ;;  %v13639_v30 = vld [vmem:[#allocation2 + $0x800] ss:$12 sps:$4 sm:$0xff]   ;;  %v13640_v39 = vld [vmem:[#allocation2 + $0x8a8] ss:$12 sps:$4 sm:$0xff]  }
0x1df8   :  { %11951 = vmatpush3.bf16.msra.mxu0 %v13599_v1  ;;  %v13642_v1 = vld [vmem:[#allocation2 + $0x890] ss:$12 sps:$4 sm:$0xff]  }
0x1df9   :  { %12027 = vmatpush3.bf16.msra.mxu1 %v13601_v31  ;;  %11952 = vmatprep.subr.bf16.mxu0 %v13602_v41  ;;  %v13645_v31 = vld [vmem:[#allocation2 + $0x7b8] ss:$12 sps:$4 sm:$0xff]   ;;  %v13646_v41 = vld [vmem:[#allocation2 + $0x860] ss:$12 sps:$4 sm:$0xff]  }
0x1dfa   :  { %12028 = vmatprep.subr.bf16.mxu1 %v13604_v52  ;;  %v13647_v52 = vld [vmem:[#allocation2 + $0x7a0] ss:$12 sps:$4 sm:$0xff]  }
0x1dfc   :  { %11953 = vmatpush3.bf16.msra.mxu0 %v13603_v6  ;;  %10328 = vmatmul.mubr.bf16.gmra.mxu1 %v16903_v35  ;;  %v13615_v35 = vld [vmem:[#allocation2 + $0x518] ss:$12 sps:$4 sm:$0xff]   ;;  %v13648_v6 = vld [vmem:[#allocation2 + $0x848] ss:$12 sps:$4 sm:$0xff]  }
0x1dfd   :  { %12029 = vmatpush3.bf16.msra.mxu1 %v13605_v55  ;;  %10417 = vmatprep.mubr.bf16.mxu1 %v16953_v59  ;;  %v13617_v59 = vld [vmem:[#allocation2 + $0x638] ss:$12 sps:$4 sm:$0xff]  }
0x1dfe   :  { %11954 = vmatprep.subr.bf16.mxu0 %v13606_v58  ;;  %12030 = vmatprep.subr.bf16.mxu1 %v13608_v17 }
0x1e00   :  { %11955 = vmatpush3.bf16.msra.mxu0 %v13607_v2 }
0x1e01   :  { %12031 = vmatpush3.bf16.msra.mxu1 %v13609_v40  ;;  %11996 = vmatprep.subr.bf16.mxu0 %v13610_v51 }
0x1e02   :  { %12032 = vmatprep.subr.bf16.mxu1 %v13612_v18 }
0x1e03   :  { %10271 = vmatmul.mubr.bf16.vlgmr.msra.gmra.mxu0 %v16861_v19  ;;  %v13623_v19 = vld [vmem:[#allocation2 + $0x4e8] ss:$12 sps:$4 sm:$0xff]  }
0x1e04   :  { %10278 = vmatprep.mubr.bf16.mxu0 %v16864_v7  ;;  %11997 = vmatpush3.bf16.msra.mxu0 %v13611_v24  ;;  %v13625_v7 = vld [vmem:[#allocation2 + $0x608] ss:$12 sps:$4 sm:$0xff]  }
0x1e05   :  { %12033 = vmatpush3.bf16.msra.mxu1 %v13613_v29  ;;  %11998 = vmatprep.subr.bf16.mxu0 %v13614_v45 }
0x1e06   :  { %12034 = vmatprep.subr.bf16.mxu1 %v13616_v47 }
0x1e08   :  { %11999 = vmatpush3.bf16.msra.mxu0 %v13615_v35 }
0x1e09   :  { %12035 = vmatpush3.bf16.msra.mxu1 %v13617_v59  ;;  %12000 = vmatprep.subr.bf16.mxu0 %v13618_v53 }
0x1e0a   :  { %12036 = vmatprep.subr.bf16.mxu1 %v13620_v36 }
0x1e0b   :  { %10279 = vmatmul.mubr.bf16.gmra.mxu0 %v16871_v38  ;;  %v13630_v38 = vld [vmem:[#allocation2 + $0x560] ss:$12 sps:$4 sm:$0xff]  }
0x1e0c   :  { %12001 = vmatpush3.bf16.msra.mxu0 %v13619_v26  ;;  %10368 = vmatprep.mubr.bf16.mxu0 %v16912_v15  ;;  %v13631_v15 = vld [vmem:[#allocation2 + $0x4a0] ss:$12 sps:$4 sm:$0xff]  }
0x1e0d   :  { %12037 = vmatpush3.bf16.msra.mxu1 %v13621_v37  ;;  %12002 = vmatprep.subr.bf16.mxu0 %v13622_v50 }
0x1e0e   :  { %12038 = vmatprep.subr.bf16.mxu1 %v13624_v32 }
0x1e10   :  { %12003 = vmatpush3.bf16.msra.mxu0 %v13623_v19 }
0x1e11   :  { %12039 = vmatpush3.bf16.msra.mxu1 %v13625_v7  ;;  %12004 = vmatprep.subr.bf16.mxu0 %v13626_v16 }
0x1e13   :  { %v9958_v40 = vpop.f32.mrf.mxu0 }
0x1e14   :  { %12005 = vmatpush3.bf16.msra.mxu0 %v13627_v23  ;;  %10418 = vmatmul.mubr.bf16.vlgmr.msra.gmra.mxu1 %v16964_v3  ;;  %v13637_v3 = vld [vmem:[#allocation2 + $0x818] ss:$12 sps:$4 sm:$0xff]  }
0x1e15   :  { %10425 = vmatprep.mubr.bf16.mxu1 %v16966_v62  ;;  %12006 = vmatprep.subr.bf16.mxu0 %v13628_v21  ;;  %v13638_v62 = vld [vmem:[#allocation2 + $0x8c0] ss:$12 sps:$4 sm:$0xff]   ;;  %v9960_v18 = vpop.f32.mrf.mxu0 }
0x1e17   :  { %v9962_v29 = vpop.f32.mrf.mxu0 }
0x1e18   :  { %12007 = vmatpush3.bf16.msra.mxu0 %v13629_v34 }
0x1e19   :  { %12008 = vmatprep.subr.bf16.mxu0 %v13630_v38  ;;  %v9964_v47 = vpop.f32.mrf.mxu0  ;;  %v17020_v38 = vld [vmem:[%s17055_s11] sm:$0x7]  ;;  %s13825_s11 = smov [#allocation5]  }
0x1e1a   :  { %17074 = vst [vmem:[#allocation13_spill] sm:$0xff] %v17020_v38  ;;  %s10512_s4 = sshll.u32 %s13825_s11, 4  ;;  %s10513_s4 = int_to_ptr.vmem [resolvable:$true] %s10512_s4 }
0x1e1b   :  { %v9968_v59 = vpop.f32.mrf.mxu0  ;;  %s13794_s16 = scalar_lea.vmem %s10513_s4, 1536  ;;  %p13799_p6 = scmp.lt.s32.totalorder %s10513_s4, %s10513_s4 }
0x1e1c   :  { %12009 = vmatpush3.bf16.msra.mxu0 %v13631_v15  ;;  %10426 = vmatmul.mubr.bf16.gmra.mxu1 %v16971_v61  ;;  %v13641_v61 = vld [vmem:[#allocation2 + $0x7e8] ss:$12 sps:$4 sm:$0xff]   ;;  %p13795_p5 = scmp.ne.s32.totalorder %s10513_s4, %s13794_s16  ;;  %p13800_p7 = scmp.lt.s32.totalorder %s13794_s16, %s13794_s16 }
0x1e1d   :  { %12010 = vmatprep.subr.bf16.mxu0 %v13632_v25 }
0x1e1e   :  { %p13801_p8 = por %p13800_p7, %p13799_p6 }
0x1e20   :  { %12011 = vmatpush3.bf16.msra.mxu0 %v13633_v48  ;;  %v8323_v48 = vrot.slane %v17020_v38, %v14192_v12  ;;  %p13802_p9 = pnand %p13801_p8, %p13795_p5 }
0x1e21   :  { %12052 = vmatprep.subr.bf16.mxu0 %v13634_v28  ;;  %v8327_v28 = vrot.slane %v17020_v38, %v14183_v9 }
0x1e23   :  { %10369 = vmatmul.mubr.bf16.vlgmr.msra.gmra.mxu0 %v16922_v11  ;;  %v13643_v11 = vld [vmem:[#allocation2 + $0x7d0] ss:$12 sps:$4 sm:$0xff]  }
0x1e24   :  { %10376 = vmatprep.mubr.bf16.mxu0 %v16929_v22  ;;  %12053 = vmatpush3.bf16.msra.mxu0 %v13635_v60  ;;  %v13644_v22 = vld [vmem:[#allocation2 + $0x878] ss:$12 sps:$4 sm:$0xff]  }
0x1e25   :  { %12054 = vmatprep.subr.bf16.mxu0 %v13636_v33 }
0x1e28   :  { %12055 = vmatpush3.bf16.msra.mxu0 %v13637_v3 }
0x1e29   :  { %12056 = vmatprep.subr.bf16.mxu0 %v13638_v62 }
0x1e2b   :  { %10377 = vmatmul.mubr.bf16.gmra.mxu0 %v16945_v54  ;;  %v13649_v54 = vld [vmem:[#allocation2 + $0x788] ss:$12 sps:$4 sm:$0xff]  }
0x1e2c   :  { %12057 = vmatpush3.bf16.msra.mxu0 %v13639_v30  ;;  %10466 = vmatprep.mubr.bf16.mxu0 %v16984_v49  ;;  %v9905_v49 = vpop.f32.mrf.mxu1 }
0x1e2d   :  { %12058 = vmatprep.subr.bf16.mxu0 %v13640_v39  ;;  %v9906_v3 = vadd.f32 %v9905_v49, %v8323_v48 }
0x1e2e   :  { %v9907_v55 = vpop.f32.mrf.mxu1 }
0x1e2f   :  { %v9908_v62 = vadd.f32 %v9907_v55, %v8327_v28  ;;  %v9959_v30 = vadd.f32 %v9958_v40, %v9906_v3 }
0x1e30   :  { %12059 = vmatpush3.bf16.msra.mxu0 %v13641_v61  ;;  %v9909_v58 = vpop.f32.mrf.mxu1 }
0x1e31   :  { %12060 = vmatprep.subr.bf16.mxu0 %v13642_v1  ;;  %v9910_v1 = vadd.f32 %v9909_v58, %v8323_v48 }
0x1e32   :  { %v9911_v17 = vpop.f32.mrf.mxu1 }
0x1e34   :  { %12061 = vmatpush3.bf16.msra.mxu0 %v13643_v11  ;;  %v9915_v2 = vpop.f32.mrf.mxu1  ;;  %v9961_v11 = vadd.f32 %v9960_v18, %v9908_v62 }
0x1e35   :  { %12062 = vmatprep.subr.bf16.mxu0 %v13644_v22 }
0x1e36   :  { %v9917_v51 = vpop.f32.mrf.mxu1 }
0x1e37   :  { %v9918_v38 = vadd.f32 %v9917_v51, %v8327_v28 }
0x1e38   :  { %12063 = vmatpush3.bf16.msra.mxu0 %v13645_v31  ;;  %v9919_v24 = vpop.f32.mrf.mxu1  ;;  %v9912_v31 = vadd.f32 %v9911_v17, %v8327_v28 }
0x1e39   :  { %12064 = vmatprep.subr.bf16.mxu0 %v13646_v41  ;;  %v9963_v41 = vadd.f32 %v9962_v29, %v9910_v1  ;;  %v9920_v18 = vadd.f32 %v9919_v24, %v8323_v48 }
0x1e3a   :  { %v9921_v45 = vpop.f32.mrf.mxu1  ;;  %v9965_v42 = vadd.f32 %v9964_v47, %v9912_v31 }
0x1e3c   :  { %12065 = vmatpush3.bf16.msra.mxu0 %v13647_v52  ;;  %v10011_v35 = vpop.f32.mrf.mxu1 }
0x1e3d   :  { %12066 = vmatprep.subr.bf16.mxu0 %v13648_v6  ;;  %v10012_v22 = vadd.f32 %v10011_v35, %v9959_v30 }
0x1e3e   :  { %v10013_v53 = vpop.f32.mrf.mxu1 }
0x1e3f   :  { %v10014_v52 = vadd.f32 %v10013_v53, %v9961_v11 }
0x1e40   :  { %12067 = vmatpush3.bf16.msra.mxu0 %v13649_v54  ;;  %v10015_v36 = vpop.f32.mrf.mxu1  ;;  %v9916_v54 = vadd.f32 %v9915_v2, %v8323_v48 }
0x1e41   :  { %v10016_v44 = vadd.f32 %v10015_v36, %v9963_v41  ;;  %v9922_v36 = vadd.f32 %v9921_v45, %v8327_v28 }
0x1e42   :  { %v10017_v26 = vpop.f32.mrf.mxu1  ;;  %v9969_v49 = vadd.f32 %v9968_v59, %v9916_v54 }
0x1e43   :  { %10467 = vmatmul.mubr.bf16.vlgmr.msra.gmra.mxu0 %v16986_v5  ;;  %v9970_v5 = vpop.f32.mrf.mxu0  ;;  %v10018_v40 = vadd.f32 %v10017_v26, %v9965_v42 }
0x1e44   :  { %10474 = vmatprep.mubr.bf16.mxu0 %v16990_v4  ;;  %v10021_v37 = vpop.f32.mrf.mxu1  ;;  %v9971_v35 = vadd.f32 %v9970_v5, %v9918_v38 }
0x1e45   :  { %v9972_v4 = vpop.f32.mrf.mxu0  ;;  %v10022_v17 = vadd.f32 %v10021_v37, %v9969_v49 }
0x1e46   :  { %v10023_v32 = vpop.f32.mrf.mxu1 }
0x1e48   :  { %v10025_v7 = vpop.f32.mrf.mxu1 }
0x1e4a   :  { %v17015_v23 = vpop.f32.mrf.mxu1 }
0x1e4b   :  { %10475 = vmatmul.mubr.bf16.gmra.mxu0 %v16992_v43  ;;  %v9974_v43 = vpop.f32.mrf.mxu0 }
0x1e4c   :  { %v9975_v42 = vadd.f32 %v9974_v43, %v9922_v36 }
0x1e4e   :  { %v10028_v45 = vadd.f32 %v17015_v23, %v9975_v42 }
0x1e53   :  { %v10064_v50 = vpop.f32.mrf.mxu0 }
0x1e54   :  { %v10065_v6 = vadd.f32 %v10064_v50, %v10012_v22 }
0x1e55   :  { %v10066_v19 = vpop.f32.mrf.mxu0 }
0x1e56   :  { %v10067_v9 = vadd.f32 %v10066_v19, %v10014_v52  ;;  %v9973_v19 = vadd.f32 %v9972_v4, %v9920_v18 }
0x1e57   :  { %v10068_v16 = vpop.f32.mrf.mxu0 }
0x1e58   :  { %v10069_v3 = vadd.f32 %v10068_v16, %v10016_v44  ;;  %v10026_v24 = vadd.f32 %v10025_v7, %v9973_v19 }
0x1e59   :  { %v10070_v21 = vpop.f32.mrf.mxu0 }
0x1e5a   :  { %v10071_v50 = vadd.f32 %v10070_v21, %v10018_v40 }
0x1e5b   :  { %v10074_v15 = vpop.f32.mrf.mxu0 }
0x1e5c   :  { %v10075_v59 = vadd.f32 %v10074_v15, %v10022_v17 }
0x1e5d   :  { %v10076_v60 = vpop.f32.mrf.mxu0 }
0x1e5f   :  { %v10078_v39 = vpop.f32.mrf.mxu0 }
0x1e61   :  { %v10080_v56 = vpop.f32.mrf.mxu0 }
0x1e62   :  { %v10081_v7 = vadd.f32 %v10080_v56, %v10028_v45 }
0x1e74   :  { %v10117_v34 = vpop.f32.mrf.mxu1 }
0x1e75   :  { %v10118_v14 = vadd.f32 %v10117_v34, %v10065_v6  ;;  %v10024_v34 = vadd.f32 %v10023_v32, %v9971_v35  ;;  %v10079_v32 = vadd.f32 %v10078_v39, %v10026_v24 }
0x1e76   :  { %v10119_v25 = vpop.f32.mrf.mxu1 }
0x1e77   :  { %v10120_v10 = vadd.f32 %v10119_v25, %v10067_v9  ;;  %v10077_v37 = vadd.f32 %v10076_v60, %v10024_v34 }
0x1e78   :  { %v10121_v33 = vpop.f32.mrf.mxu1 }
0x1e79   :  { %v10122_v2 = vadd.f32 %v10121_v33, %v10069_v3 }
0x1e7a   :  { %v10123_v61 = vpop.f32.mrf.mxu1 }
0x1e7b   :  { %v10124_v30 = vadd.f32 %v10123_v61, %v10071_v50 }
0x1e7c   :  { %v10127_v12 = vpop.f32.mrf.mxu1 }
0x1e7d   :  { %v10128_v16 = vadd.f32 %v10127_v12, %v10075_v59  ;;  %v17076_v59 = vld [vmem:[#allocation13_spill] sm:$0xff] }
0x1e7e   :  { %v10129_v29 = vpop.f32.mrf.mxu1 }
0x1e7f   :  { %v10130_v21 = vadd.f32 %v10129_v29, %v10077_v37 }
0x1e80   :  { %v10131_v5 = vpop.f32.mrf.mxu1 }
0x1e81   :  { %v10132_v25 = vadd.f32 %v10131_v5, %v10079_v32 }
0x1e82   :  { %v10133_v15 = vpop.f32.mrf.mxu1 }
0x1e94   :  { %v11928_v56 = vpop.f32.mrf.mxu1 }
0x1e96   :  { %v11929_v11 = vpop.f32.mrf.mxu1 }
0x1e98   :  { %v11931_v22 = vpop.f32.mrf.mxu1 }
0x1ea3   :  { %v10170_v55 = vpop.f32.mrf.mxu0 }
0x1ea4   :  { %v10171_v58 = vadd.f32 %v10170_v55, %v10118_v14 }
0x1ea5   :  { %v10172_v53 = vpop.f32.mrf.mxu0 }
0x1ea6   :  { %v10483_v62 = vadd.f32 %v10171_v58, %v15667_v57  ;;  %v10173_v47 = vadd.f32 %v10172_v53, %v10120_v10 }
0x1ea7   :  { %v10174_v51 = vpop.f32.mrf.mxu0 }
0x1ea8   :  { %10495 = vst [vmem:[#allocation5] sm:$0xff] %v10483_v62  ;;  %v10484_v44 = vadd.f32 %v10173_v47, %v15660_v8  ;;  %v10175_v14 = vadd.f32 %v10174_v51, %v10122_v2  ;;  %v17075_v51 = vld [vmem:[#allocation8_spill] sm:$0xff] }
0x1ea9   :  { %v10176_v26 = vpop.f32.mrf.mxu0 }
0x1eaa   :  { %10496 = vst [vmem:[#allocation5 + $0x8] sm:$0xff] %v10484_v44  ;;  %v10486_v57 = vadd.f32 %v10175_v14, %v15674_v20  ;;  %v10177_v10 = vadd.f32 %v10176_v26, %v10124_v30  ;;  %v10134_v20 = vadd.f32 %v10133_v15, %v10081_v7  ;;  %v8331_v30 = vrot.slane %v17076_v59, %v17075_v51 }
0x1eab   :  { %v10180_v4 = vpop.f32.mrf.mxu0  ;;  %v11930_v44 = vadd.f32 %v11929_v11, %v11928_v56 }
0x1eac   :  { %10498 = vst [vmem:[#allocation5 + $0x18] sm:$0xff] %v10486_v57  ;;  %v10487_v38 = vadd.f32 %v10177_v10, %v15676_v63  ;;  %v10181_v8 = vadd.f32 %v10180_v4, %v10128_v16 }
0x1ead   :  { %v10182_v43 = vpop.f32.mrf.mxu0  ;;  %v10224_v26 = vadd.f32 %v11930_v44, %v8331_v30 }
0x1eae   :  { %10499 = vst [vmem:[#allocation5 + $0x20] sm:$0xff] %v10487_v38  ;;  %v10489_v48 = vadd.f32 %v10181_v8, %v15687_v27  ;;  %v10183_v28 = vadd.f32 %v10182_v43, %v10130_v21  ;;  %v11932_v27 = vpop.f32.mrf.mxu1 }
0x1eaf   :  { %v10184_v60 = vpop.f32.mrf.mxu0  ;;  %v11933_v42 = vadd.f32 %v11932_v27, %v11931_v22 }
0x1eb0   :  { %10501 = vst [vmem:[#allocation5 + $0x30] sm:$0xff] %v10489_v48  ;;  %v10490_v23 = vadd.f32 %v10183_v28, %v15682_v13  ;;  %v10185_v33 = vadd.f32 %v10184_v60, %v10132_v25  ;;  %v11934_v31 = vpop.f32.mrf.mxu1 }
0x1eb1   :  { %v10186_v39 = vpop.f32.mrf.mxu0  ;;  %v10227_v57 = vadd.f32 %v11933_v42, %v8331_v30  ;;  %v17079_v42 = vld [vmem:[#allocation11_spill] sm:$0xff] }
0x1eb2   :  { %10502 = vst [vmem:[#allocation5 + $0x38] sm:$0xff] %v10490_v23  ;;  %v10492_v61 = vadd.f32 %v10185_v33, %v15707_v46  ;;  %v10187_v63 = vadd.f32 %v10186_v39, %v10134_v20  ;;  %v11935_v52 = vpop.f32.mrf.mxu1 }
0x1eb3   :  { %v11936_v4 = vadd.f32 %v11935_v52, %v11934_v31 }
0x1eb4   :  { %10504 = vst [vmem:[#allocation5 + $0x48] sm:$0xff] %v10492_v61  ;;  %v10493_v1 = vadd.f32 %v10187_v63, %v15712_v0  ;;  %v11937_v54 = vpop.f32.mrf.mxu1 }
0x1eb5   :  { %v10232_v60 = vadd.f32 %v11936_v4, %v8331_v30 }
0x1eb6   :  { %10505 = vst [vmem:[#allocation5 + $0x50] sm:$0xff] %v10493_v1  ;;  %v11938_v12 = vpop.f32.mrf.mxu1 }
0x1eb7   :  { %v11939_v43 = vadd.f32 %v11938_v12, %v11937_v54 }
0x1eb8   :  { %v11984_v9 = vpop.f32.mrf.mxu1 }
0x1eb9   :  { %v10235_v1 = vadd.f32 %v11939_v43, %v8331_v30 }
0x1eba   :  { %v11985_v55 = vpop.f32.mrf.mxu1 }
0x1ebb   :  { %v11986_v32 = vadd.f32 %v11985_v55, %v11984_v9 }
0x1ebc   :  { %v11987_v40 = vpop.f32.mrf.mxu1 }
0x1ebe   :  { %v11988_v58 = vpop.f32.mrf.mxu1 }
0x1ebf   :  { %v11989_v7 = vadd.f32 %v11988_v58, %v11987_v40 }
0x1ec0   :  { %v11990_v18 = vpop.f32.mrf.mxu1 }
0x1ec2   :  { %v11991_v29 = vpop.f32.mrf.mxu1 }
0x1ec3   :  { %v11956_v41 = vpop.f32.mrf.mxu0  ;;  %v11992_v27 = vadd.f32 %v11991_v29, %v11990_v18 }
0x1ec4   :  { %v11993_v50 = vpop.f32.mrf.mxu1 }
0x1ec5   :  { %v11957_v6 = vpop.f32.mrf.mxu0 }
0x1ec6   :  { %v11994_v62 = vpop.f32.mrf.mxu1  ;;  %v11958_v14 = vadd.f32 %v11957_v6, %v11956_v41 }
0x1ec7   :  { %v11959_v13 = vpop.f32.mrf.mxu0 }
0x1ec8   :  { %v10273_v16 = vadd.f32 %v11958_v14, %v10224_v26 }
0x1ec9   :  { %v11960_v49 = vpop.f32.mrf.mxu0 }
0x1eca   :  { %v11961_v37 = vadd.f32 %v11960_v49, %v11959_v13  ;;  %v10322_v15 = vadd.f32 %v11986_v32, %v10273_v16  ;;  %v11995_v49 = vadd.f32 %v11994_v62, %v11993_v50  ;;  %v17080_v16 = vld [vmem:[#allocation12_spill] sm:$0xff] }
0x1ecb   :  { %v11962_v46 = vpop.f32.mrf.mxu0 }
0x1ecc   :  { %v10276_v38 = vadd.f32 %v11961_v37, %v10227_v57 }
0x1ecd   :  { %v11963_v3 = vpop.f32.mrf.mxu0 }
0x1ece   :  { %v11964_v8 = vadd.f32 %v11963_v3, %v11962_v46  ;;  %v10325_v23 = vadd.f32 %v11989_v7, %v10276_v38 }
0x1ecf   :  { %v11965_v0 = vpop.f32.mrf.mxu0 }
0x1ed0   :  { %v10281_v39 = vadd.f32 %v11964_v8, %v10232_v60 }
0x1ed1   :  { %v11966_v35 = vpop.f32.mrf.mxu0 }
0x1ed2   :  { %v11967_v61 = vadd.f32 %v11966_v35, %v11965_v0  ;;  %v10330_v12 = vadd.f32 %v11992_v27, %v10281_v39  ;;  %v17077_v0 = vld [vmem:[#allocation9_spill] sm:$0xff] }
0x1ed4   :  { %v12040_v47 = vpop.f32.mrf.mxu1  ;;  %v10284_v13 = vadd.f32 %v11967_v61, %v10235_v1 }
0x1ed6   :  { %v12041_v19 = vpop.f32.mrf.mxu1  ;;  %v10333_v18 = vadd.f32 %v11995_v49, %v10284_v13 }
0x1ed7   :  { %v12042_v63 = vadd.f32 %v12041_v19, %v12040_v47 }
0x1ed8   :  { %v12043_v24 = vpop.f32.mrf.mxu1 }
0x1eda   :  { %v12044_v10 = vpop.f32.mrf.mxu1 }
0x1edb   :  { %v12045_v6 = vadd.f32 %v12044_v10, %v12043_v24 }
0x1edc   :  { %v12046_v25 = vpop.f32.mrf.mxu1 }
0x1ede   :  { %v12047_v56 = vpop.f32.mrf.mxu1 }
0x1ee0   :  { %v12049_v55 = vpop.f32.mrf.mxu1 }
0x1ee2   :  { %v12050_v47 = vpop.f32.mrf.mxu1 }
0x1ee3   :  { %v12012_v17 = vpop.f32.mrf.mxu0  ;;  %v12051_v30 = vadd.f32 %v12050_v47, %v12049_v55 }
0x1ee5   :  { %v12013_v53 = vpop.f32.mrf.mxu0 }
0x1ee6   :  { %v12014_v21 = vadd.f32 %v12013_v53, %v12012_v17 }
0x1ee7   :  { %v12015_v2 = vpop.f32.mrf.mxu0 }
0x1ee8   :  { %v10371_v20 = vadd.f32 %v12014_v21, %v10322_v15 }
0x1ee9   :  { %v12016_v36 = vpop.f32.mrf.mxu0 }
0x1eea   :  { %v12017_v48 = vadd.f32 %v12016_v36, %v12015_v2  ;;  %v10420_v41 = vadd.f32 %v12042_v63, %v10371_v20  ;;  %v12048_v2 = vadd.f32 %v12047_v56, %v12046_v25 }
0x1eeb   :  { %v12018_v34 = vpop.f32.mrf.mxu0 }
0x1eec   :  { %v10374_v11 = vadd.f32 %v12017_v48, %v10325_v23 }
0x1eed   :  { %v12019_v5 = vpop.f32.mrf.mxu0 }
0x1eee   :  { %v12020_v31 = vadd.f32 %v12019_v5, %v12018_v34  ;;  %v10423_v46 = vadd.f32 %v12045_v6, %v10374_v11  ;;  %v17078_v34 = vld [vmem:[#allocation10_spill] sm:$0xff] }
0x1eef   :  { %v12021_v45 = vpop.f32.mrf.mxu0 }
0x1ef0   :  { %v10379_v3 = vadd.f32 %v12020_v31, %v10330_v12 }
0x1ef1   :  { %v12022_v28 = vpop.f32.mrf.mxu0 }
0x1ef2   :  { %v12023_v58 = vadd.f32 %v12022_v28, %v12021_v45  ;;  %v10428_v59 = vadd.f32 %v12048_v2, %v10379_v3 }
0x1ef4   :  { %v10382_v19 = vadd.f32 %v12023_v58, %v10333_v18 }
0x1ef6   :  { %v10431_v5 = vadd.f32 %v12051_v30, %v10382_v19 }
0x1f03   :  { %v12068_v33 = vpop.f32.mrf.mxu0 }
0x1f05   :  { %v12069_v22 = vpop.f32.mrf.mxu0 }
0x1f06   :  { %v12070_v52 = vadd.f32 %v12069_v22, %v12068_v33 }
0x1f07   :  { %v12071_v54 = vpop.f32.mrf.mxu0 }
0x1f08   :  { %v10469_v9 = vadd.f32 %v12070_v52, %v10420_v41 }
0x1f09   :  { %v12072_v40 = vpop.f32.mrf.mxu0 }
0x1f0a   :  { %v10485_v35 = vadd.f32 %v10469_v9, %v17077_v0  ;;  %v12073_v17 = vadd.f32 %v12072_v40, %v12071_v54 }
0x1f0b   :  { %v12074_v53 = vpop.f32.mrf.mxu0 }
0x1f0c   :  { %10497 = vst [vmem:[#allocation5 + $0x10] sm:$0xff] %v10485_v35  ;;  %v10472_v29 = vadd.f32 %v12073_v17, %v10423_v46 }
0x1f0d   :  { %v12075_v36 = vpop.f32.mrf.mxu0 }
0x1f0e   :  { %v10488_v51 = vadd.f32 %v10472_v29, %v17078_v34  ;;  %v12076_v50 = vadd.f32 %v12075_v36, %v12074_v53 }
0x1f0f   :  { %v12077_v62 = vpop.f32.mrf.mxu0 }
0x1f10   :  { %10500 = vst [vmem:[#allocation5 + $0x28] sm:$0xff] %v10488_v51  ;;  %v10477_v44 = vadd.f32 %v12076_v50, %v10428_v59 }
0x1f11   :  { %v12078_v14 = vpop.f32.mrf.mxu0 }
0x1f12   :  { %v10491_v24 = vadd.f32 %v10477_v44, %v17079_v42  ;;  %v12079_v26 = vadd.f32 %v12078_v14, %v12077_v62 }
0x1f14   :  { %10503 = vst [vmem:[#allocation5 + $0x40] sm:$0xff] %v10491_v24  ;;  %v10480_v37 = vadd.f32 %v12079_v26, %v10431_v5 }
0x1f16   :  { %v10494_v57 = vadd.f32 %v10480_v37, %v17080_v16 }
0x1f18   :  { %10506 = vst [vmem:[#allocation5 + $0x58] sm:$0xff] %v10494_v57 }
0x1f19   :  { %13805 = shalt.err (!%p13802_p9)
}
0x1f1a   :  { %s13826_s0 = smov 384   ;;  %s13827_s17 = smov 24  }
0x1f1b   :  { %10518 = dma.vmem_to_hbm [thread:$0]  %s10513_s4, 1536, %s17056_s12, [#allocation4], %s13826_s0, %s13826_s0, %s13827_s17  }
0x1f1c   :  { %13816 = dma.done.wait [#allocation4], 1536  }
0x1f1d   :  { %13817 = vsyncadd [#allocation4], 4294965760 }
0x1f1e   :  { %10522 = vsyncpa [#allocation3], 1 }
0x1f1f   :  { %10523 = vsyncpa [#allocation4], 1 }

</bundles_post_ra>
